<compile_context>
chip_gen: v5e
topology: v5e:2x2
jax: 0.10.0
libtpu: 0.0.40
codegen_flags: <defaults>
</compile_context>

<pallas_src>
import numpy as np
import jax
import jax.numpy as jnp
from jax.experimental import pallas as pl
from jax.experimental.pallas import tpu as pltpu

# ---------------- config (small, consistent with the module) ----------------
DIM = 32           # dim
H = W = 8          # input_resolution
DEPTH = 2          # depth (block 0: shift=0, block 1: shift=window//2)
NUM_HEADS = 4
WINDOW = 4         # window_size  (min(H,W)=8 > 4, so no clamping)
MLP_RATIO = 4.0
B = 2

N = WINDOW * WINDOW                 # tokens per window
NW = (H // WINDOW) * (W // WINDOW)  # windows per image
L = H * W                           # tokens per image (== NW * N)
HEAD_DIM = DIM // NUM_HEADS
SCALE = HEAD_DIM ** -0.5
HIDDEN = int(DIM * MLP_RATIO)
EPS = 1e-5                          # nn.LayerNorm default
NEG = -1.0e9                        # finite "masked" value (safe with max-sub)


# ------------------------------ small helpers --------------------------------
def _layer_norm(x, g, b):
    mu = jnp.mean(x, axis=-1, keepdims=True)
    var = jnp.mean(jnp.square(x - mu), axis=-1, keepdims=True)
    return (x - mu) * jax.lax.rsqrt(var + EPS) * g + b


def _erf(z):
    # Abramowitz & Stegun 7.1.26 (|err| < 1.5e-7) — avoids relying on an
    # erf lowering inside Mosaic; exact enough vs. the erf-based reference.
    a1, a2, a3, a4, a5 = 0.254829592, -0.284496736, 1.421413741, -1.453152027, 1.061405429
    p = 0.3275911
    az = jnp.abs(z)
    t = 1.0 / (1.0 + p * az)
    poly = ((((a5 * t + a4) * t + a3) * t + a2) * t + a1) * t
    y = 1.0 - poly * jnp.exp(-az * az)
    return jnp.where(z >= 0, y, -y)


def _gelu(x):  # exact-GELU semantics (nn.GELU default)
    return 0.5 * x * (1.0 + _erf(x * 0.7071067811865476))


# ------------------------------ Pallas kernel --------------------------------
def basic_layer_kernel(x_ref, bias_ref,
                       wqkv_ref, bqkv_ref, wproj_ref, bproj_ref,
                       ln1g_ref, ln1b_ref, ln2g_ref, ln2b_ref,
                       wfc1_ref, bfc1_ref, wfc2_ref, bfc2_ref,
                       o_ref):
    x = x_ref[0]                                   # (M, C), block-0 window layout

    for blk in range(DEPTH):                       # fused blocks, VMEM-resident
        # ---- LN1 + windowed multi-head attention + residual ----
        hn = _layer_norm(x, ln1g_ref[blk], ln1b_ref[blk])
        acc = None                                 # per-head projected outputs
        for hh in range(NUM_HEADS):
            iq = (blk * 3 + 0) * NUM_HEADS + hh
            ik = (blk * 3 + 1) * NUM_HEADS + hh
            iv = (blk * 3 + 2) * NUM_HEADS + hh
            q = jnp.dot(hn, wqkv_ref[iq], preferred_element_type=jnp.float32) + bqkv_ref[iq]
            k = jnp.dot(hn, wqkv_ref[ik], preferred_element_type=jnp.float32) + bqkv_ref[ik]
            v = jnp.dot(hn, wqkv_ref[iv], preferred_element_type=jnp.float32) + bqkv_ref[iv]
            # whole-image 2D scores: (M, hd) x (M, hd)^T -> (M, M)
            s = jax.lax.dot_general(q, k, (((1,), (1,)), ((), ())),
                                    preferred_element_type=jnp.float32)
            s = s + bias_ref[blk * NUM_HEADS + hh]     # rel-pos bias + all masks
            s = s - jnp.max(s, axis=-1, keepdims=True)
            p = jnp.exp(s)
            p = p * pl.reciprocal(jnp.sum(p, axis=-1, keepdims=True), approx=True)
            o = jnp.dot(p, v, preferred_element_type=jnp.float32)       # (M, hd)
            contrib = jnp.dot(o, wproj_ref[blk * NUM_HEADS + hh],
                              preferred_element_type=jnp.float32)       # (M, C)
            acc = contrib if acc is None else acc + contrib
        x = x + acc + bproj_ref[blk]

        # ---- LN2 + MLP(GELU exact) + residual ----
        h2 = _layer_norm(x, ln2g_ref[blk], ln2b_ref[blk])
        m = jnp.dot(h2, wfc1_ref[blk], preferred_element_type=jnp.float32) + bfc1_ref[blk]
        m = _gelu(m)
        m = jnp.dot(m, wfc2_ref[blk], preferred_element_type=jnp.float32) + bfc2_ref[blk]
        x = x + m

    o_ref[0] = x


# ----------------------- wrapper (layout hoisted to JAX) ---------------------
def to_window_layout(x):
    b = x.shape[0]
    x = x.reshape(b, H // WINDOW, WINDOW, W // WINDOW, WINDOW, DIM)
    x = x.transpose(0, 1, 3, 2, 4, 5)
    return x.reshape(b, L, DIM)


def from_window_layout(x):
    b = x.shape[0]
    x = x.reshape(b, H // WINDOW, W // WINDOW, WINDOW, WINDOW, DIM)
    x = x.transpose(0, 1, 3, 2, 4, 5)
    return x.reshape(b, L, DIM)


def basic_layer_pallas(x, biasmask, sp, collapse_batch):
    bsz = x.shape[0]
    xw = to_window_layout(x)                       # raster -> block-0 window layout
    if collapse_batch:
        steps, m = 1, bsz * L                      # single-TC chips: M = B*L rows
    else:
        steps, m = bsz, L                          # v7x: one image per TensorCore
    xw = xw.reshape(steps, m, DIM)

    def full(shape):
        nd = len(shape)
        return pl.BlockSpec(shape, lambda b, _nd=nd: (0,) * _nd)

    call = pl.pallas_call(
        basic_layer_kernel,
        out_shape=jax.ShapeDtypeStruct((steps, m, DIM), jnp.float32),
        grid=(steps,),
        in_specs=[
            pl.BlockSpec((1, m, DIM), lambda b: (b, 0, 0)),     # activations
            full((DEPTH * NUM_HEADS, m, m)),                    # fused bias+mask
            full((DEPTH * 3 * NUM_HEADS, DIM, HEAD_DIM)),       # per-head w_{q,k,v}
            full((DEPTH * 3 * NUM_HEADS, 1, HEAD_DIM)),         # per-head b_{q,k,v}
            full((DEPTH * NUM_HEADS, HEAD_DIM, DIM)),           # per-head w_proj
            full((DEPTH, 1, DIM)),                              # b_proj
            full((DEPTH, 1, DIM)),                              # ln1 gamma
            full((DEPTH, 1, DIM)),                              # ln1 beta
            full((DEPTH, 1, DIM)),                              # ln2 gamma
            full((DEPTH, 1, DIM)),                              # ln2 beta
            full((DEPTH, DIM, HIDDEN)),                         # w_fc1
            full((DEPTH, 1, HIDDEN)),                           # b_fc1
            full((DEPTH, HIDDEN, DIM)),                         # w_fc2
            full((DEPTH, 1, DIM)),                              # b_fc2
        ],
        out_specs=pl.BlockSpec((1, m, DIM), lambda b: (b, 0, 0)),
        compiler_params=pltpu.CompilerParams(dimension_semantics=("parallel",)),
    )
    out = call(xw, biasmask,
               sp["w_qkv"], sp["b_qkv"], sp["w_proj"], sp["b_proj"],
               sp["ln1_g"], sp["ln1_b"], sp["ln2_g"], sp["ln2_b"],
               sp["w_fc1"], sp["b_fc1"], sp["w_fc2"], sp["b_fc2"])
    return from_window_layout(out.reshape(bsz, L, DIM))


def _should_collapse_batch():
    # v5e / v6e have a single TensorCore: serial grid steps only add overhead,
    # so process all B*L tokens in one step.  Otherwise (e.g. v7x, 2 TCs) keep
    # grid=(B,) parallel so both cores get an image.
    try:
        kind = jax.devices()[0].device_kind.lower()
    except Exception:
        return False
    return ("v5" in kind) or ("v6" in kind)


# ------------------------- host-side constant builders -----------------------
def window_partition_np(x, ws):
    b, h, w, c = x.shape
    x = x.reshape(b, h // ws, ws, w // ws, ws, c)
    return np.ascontiguousarray(x.transpose(0, 1, 3, 2, 4, 5)).reshape(-1, ws, ws, c)


def compute_attn_mask(shift):
    """(NW, N, N) additive mask; zeros when shift == 0 (matches the reference)."""
    if shift == 0:
        return np.zeros((NW, N, N), np.float32)
    img_mask = np.zeros((1, H, W, 1), np.float32)
    cnt = 0
    for hs in (slice(0, -WINDOW), slice(-WINDOW, -shift), slice(-shift, None)):
        for ws_ in (slice(0, -WINDOW), slice(-WINDOW, -shift), slice(-shift, None)):
            img_mask[:, hs, ws_, :] = cnt
            cnt += 1
    mw = window_partition_np(img_mask, WINDOW).reshape(-1, N)
    am = mw[:, None, :] - mw[:, :, None]
    return np.where(am != 0, -100.0, 0.0).astype(np.float32)


def compute_rel_pos_index():
    coords_h = np.arange(WINDOW)
    coords_w = np.arange(WINDOW)
    coords = np.stack(np.meshgrid(coords_h, coords_w, indexing="ij"))
    coords_flatten = coords.reshape(2, -1)
    rel = coords_flatten[:, :, None] - coords_flatten[:, None, :]
    rel = rel.transpose(1, 2, 0).copy()
    rel[:, :, 0] += WINDOW - 1
    rel[:, :, 1] += WINDOW - 1
    rel[:, :, 0] *= 2 * WINDOW - 1
    return rel.sum(-1)


def make_layout_perm(shift):
    """(L, L) 0/1 matrix: window-layout token i <- raster token, where the
    layout is window_partition(roll(x, (-shift, -shift)))."""
    perm = np.zeros((L, L), np.float32)
    idx = 0
    for wr in range(H // WINDOW):
        for wc in range(W // WINDOW):
            for i in range(WINDOW):
                for j in range(WINDOW):
                    r = (wr * WINDOW + i + shift) % H
                    c = (wc * WINDOW + j + shift) % W
                    perm[idx, r * W + c] = 1.0
                    idx += 1
    return perm


def build_bias_layout0(shifts, rel_biases):
    """(DEPTH*HEADS, L, L) fused bias+mask tables, expressed in BLOCK-0 window
    layout (the shifted layout of block 1 is folded in by permuting the table:
    B1' = R^T @ B1 @ R with R = perm1 @ perm0^T)."""
    perm0 = make_layout_perm(0)
    tables = []
    for b, s in enumerate(shifts):
        rel = np.asarray(rel_biases[b], np.float32)          # (HEADS, N, N)
        shift_mask = compute_attn_mask(s)                    # (NW, N, N)
        full = np.full((NUM_HEADS, L, L), NEG, np.float32)   # off-window -> masked
        for w in range(NW):
            sl = slice(w * N, (w + 1) * N)
            full[:, sl, sl] = rel + shift_mask[w][None]
        if s != 0:
            permb = make_layout_perm(s)
            R = permb @ perm0.T                              # layout0 -> layout_b
            full = np.einsum("ia,hij,jb->hab", R, full, R)   # R^T @ full @ R
        tables.append(full)
    return np.stack(tables).reshape(DEPTH * NUM_HEADS, L, L).astype(np.float32)


def expand_for_batch(bias, bsz):
    """(DEPTH*HEADS, L, L) -> (DEPTH*HEADS, bsz*L, bsz*L) block-diagonal."""
    dh, l_, _ = bias.shape
    out = np.full((dh, bsz * l_, bsz * l_), NEG, np.float32)
    for i in range(bsz):
        out[:, i * l_:(i + 1) * l_, i * l_:(i + 1) * l_] = bias
    return out


def init_block_params(key):
    ks = jax.random.split(key, 9)

    def lin_w(k, fin, fout):
        return jax.random.normal(k, (fin, fout), jnp.float32) * 0.02

    def lin_b(k, fout):
        return jax.random.normal(k, (1, fout), jnp.float32) * 0.02

    table = jax.random.normal(ks[0], ((2 * WINDOW - 1) ** 2, NUM_HEADS),
                              jnp.float32) * 0.02
    rel_idx = compute_rel_pos_index()
    rel_bias = table[rel_idx.reshape(-1)].reshape(N, N, NUM_HEADS).transpose(2, 0, 1)

    w_qkv = lin_w(ks[1], DIM, 3 * DIM)
    b_qkv = lin_b(ks[2], 3 * DIM)
    # fold the attention scale into the Q columns (no in-kernel q*scale)
    w_qkv = w_qkv.at[:, :DIM].multiply(SCALE)
    b_qkv = b_qkv.at[:, :DIM].multiply(SCALE)

    return {
        "rel_bias": rel_bias,                       # (heads, N, N)
        "w_qkv": w_qkv, "b_qkv": b_qkv,
        "w_proj": lin_w(ks[3], DIM, DIM), "b_proj": lin_b(ks[4], DIM),
        "ln1_g": jnp.ones((1, DIM), jnp.float32), "ln1_b": jnp.zeros((1, DIM), jnp.float32),
        "ln2_g": jnp.ones((1, DIM), jnp.float32), "ln2_b": jnp.zeros((1, DIM), jnp.float32),
        "w_fc1": lin_w(ks[5], DIM, HIDDEN), "b_fc1": lin_b(ks[6], HIDDEN),
        "w_fc2": lin_w(ks[7], HIDDEN, DIM), "b_fc2": lin_b(ks[8], DIM),
    }


def stack_split_params(block_params):
    """Stack per-block params; pre-split w_qkv/b_qkv/w_proj per head."""
    wqkv, bqkv, wproj = [], [], []
    for p in block_params:
        w = p["w_qkv"].reshape(DIM, 3, NUM_HEADS, HEAD_DIM).transpose(1, 2, 0, 3)
        b = p["b_qkv"].reshape(1, 3, NUM_HEADS, HEAD_DIM).transpose(1, 2, 0, 3)
        wqkv.append(w)
        bqkv.append(b)
        wproj.append(p["w_proj"].reshape(NUM_HEADS, HEAD_DIM, DIM))
    sp = {
        "w_qkv": jnp.stack(wqkv).reshape(DEPTH * 3 * NUM_HEADS, DIM, HEAD_DIM),
        "b_qkv": jnp.stack(bqkv).reshape(DEPTH * 3 * NUM_HEADS, 1, HEAD_DIM),
        "w_proj": jnp.stack(wproj).reshape(DEPTH * NUM_HEADS, HEAD_DIM, DIM),
    }
    for k in ["b_proj", "ln1_g", "ln1_b", "ln2_g", "ln2_b",
              "w_fc1", "b_fc1", "w_fc2", "b_fc2"]:
        sp[k] = jnp.stack([p[k] for p in block_params])
    return sp


# ------------------------- pure-JAX reference (checking) ---------------------
def window_partition_jnp(x, ws):
    b, h, w, c = x.shape
    x = x.reshape(b, h // ws, ws, w // ws, ws, c)
    return x.transpose(0, 1, 3, 2, 4, 5).reshape(-1, ws, ws, c)


def window_reverse_jnp(windows, ws, h, w):
    b = windows.shape[0] // (h * w // ws // ws)
    x = windows.reshape(b, h // ws, w // ws, ws, ws, -1)
    return x.transpose(0, 1, 3, 2, 4, 5).reshape(b, h, w, -1)


def ref_block(x, p, shift, mask):
    bsz, L_, c = x.shape
    shortcut = x
    hn = _layer_norm(x, p["ln1_g"][0], p["ln1_b"][0])
    hn = hn.reshape(bsz, H, W, c)
    if shift > 0:
        hn = jnp.roll(hn, (-shift, -shift), axis=(1, 2))
    hw = window_partition_jnp(hn, WINDOW).reshape(-1, N, c)
    bn = hw.shape[0]
    qkv = hw @ p["w_qkv"] + p["b_qkv"][0]          # scale already folded into q cols
    qkv = qkv.reshape(bn, N, 3, NUM_HEADS, HEAD_DIM).transpose(2, 0, 3, 1, 4)
    q, k, v = qkv[0], qkv[1], qkv[2]
    attn = jnp.einsum("bhqd,bhkd->bhqk", q, k)
    attn = attn + p["rel_bias"][None]
    attn = attn.reshape(bsz, NW, NUM_HEADS, N, N) + mask[None, :, None]
    attn = jax.nn.softmax(attn.reshape(bn, NUM_HEADS, N, N), axis=-1)
    out = jnp.einsum("bhqk,bhkd->bhqd", attn, v).transpose(0, 2, 1, 3).reshape(bn, N, c)
    out = out @ p["w_proj"] + p["b_proj"][0]
    out = window_reverse_jnp(out.reshape(-1, WINDOW, WINDOW, c), WINDOW, H, W)
    if shift > 0:
        out = jnp.roll(out, (shift, shift), axis=(1, 2))
    x = shortcut + out.reshape(bsz, L_, c)
    h2 = _layer_norm(x, p["ln2_g"][0], p["ln2_b"][0])
    m = h2 @ p["w_fc1"] + p["b_fc1"][0]
    m = jax.nn.gelu(m, approximate=False)
    m = m @ p["w_fc2"] + p["b_fc2"][0]
    return x + m


# ----------------------------------- main -------------------------------------
if __name__ == "__main__":
    key = jax.random.PRNGKey(0)
    kx, kp = jax.random.split(key)
    x = jax.random.normal(kx, (B, H * W, DIM), jnp.float32)        # (B, L, C)

    block_params = [init_block_params(k) for k in jax.random.split(kp, DEPTH)]
    shifts = [0 if i % 2 == 0 else WINDOW // 2 for i in range(DEPTH)]

    collapse = _should_collapse_batch()
    bias_l0 = build_bias_layout0(shifts,
                                 [np.asarray(p["rel_bias"]) for p in block_params])
    biasmask = jnp.asarray(expand_for_batch(bias_l0, B) if collapse else bias_l0)
    sp = stack_split_params(block_params)

    fwd = jax.jit(lambda inp: basic_layer_pallas(inp, biasmask, sp, collapse))
    out = jax.block_until_ready(fwd(x))

    # pure-JAX reference (mirrors the PyTorch BasicLayer forward, eval mode)
    ref = x
    for i, p in enumerate(block_params):
        ref = ref_block(ref, p, shifts[i], jnp.asarray(compute_attn_mask(shifts[i])))
    ref = jax.block_until_ready(ref)

    assert out.shape == (B, H * W, DIM)
    assert bool(jnp.all(jnp.isfinite(out)))
    err = float(jnp.max(jnp.abs(out - ref)))
    assert err < 5e-2, f"kernel/reference mismatch: max abs diff = {err}"
    print("KERNEL_OK")
</pallas_src>

<mosaic_0001>
module attributes {stable_mosaic.version = 11 : i64} {
  func.func @basic_layer_kernel(%arg0: i32, %arg1: memref<1x64x32xf32, #tpu.memory_space<vmem>>, %arg2: memref<8x64x64xf32, #tpu.memory_space<vmem>>, %arg3: memref<24x32x8xf32, #tpu.memory_space<vmem>>, %arg4: memref<24x1x8xf32, #tpu.memory_space<vmem>>, %arg5: memref<8x8x32xf32, #tpu.memory_space<vmem>>, %arg6: memref<2x1x32xf32, #tpu.memory_space<vmem>>, %arg7: memref<2x1x32xf32, #tpu.memory_space<vmem>>, %arg8: memref<2x1x32xf32, #tpu.memory_space<vmem>>, %arg9: memref<2x1x32xf32, #tpu.memory_space<vmem>>, %arg10: memref<2x1x32xf32, #tpu.memory_space<vmem>>, %arg11: memref<2x32x128xf32, #tpu.memory_space<vmem>>, %arg12: memref<2x1x128xf32, #tpu.memory_space<vmem>>, %arg13: memref<2x128x32xf32, #tpu.memory_space<vmem>>, %arg14: memref<2x1x32xf32, #tpu.memory_space<vmem>>, %arg15: memref<1x64x32xf32, #tpu.memory_space<vmem>>) attributes {dimension_semantics = [#tpu.dimension_semantics<parallel>], iteration_bounds = array<i64: 2>, scalar_prefetch = 0 : i64, scratch_operands = 0 : i64, tpu.core_type = #tpu.core_type<tc>, window_params = [{transform_indices = @transform_0, window_bounds = array<i64: 1, 64, 32>}, {pipeline_mode = #tpu.pipeline_mode<synchronous>, transform_indices = @transform_1, window_bounds = array<i64: 8, 64, 64>}, {pipeline_mode = #tpu.pipeline_mode<synchronous>, transform_indices = @transform_2, window_bounds = array<i64: 24, 32, 8>}, {pipeline_mode = #tpu.pipeline_mode<synchronous>, transform_indices = @transform_3, window_bounds = array<i64: 24, 1, 8>}, {pipeline_mode = #tpu.pipeline_mode<synchronous>, transform_indices = @transform_4, window_bounds = array<i64: 8, 8, 32>}, {pipeline_mode = #tpu.pipeline_mode<synchronous>, transform_indices = @transform_5, window_bounds = array<i64: 2, 1, 32>}, {pipeline_mode = #tpu.pipeline_mode<synchronous>, transform_indices = @transform_6, window_bounds = array<i64: 2, 1, 32>}, {pipeline_mode = #tpu.pipeline_mode<synchronous>, transform_indices = @transform_7, window_bounds = array<i64: 2, 1, 32>}, {pipeline_mode = #tpu.pipeline_mode<synchronous>, transform_indices = @transform_8, window_bounds = array<i64: 2, 1, 32>}, {pipeline_mode = #tpu.pipeline_mode<synchronous>, transform_indices = @transform_9, window_bounds = array<i64: 2, 1, 32>}, {pipeline_mode = #tpu.pipeline_mode<synchronous>, transform_indices = @transform_10, window_bounds = array<i64: 2, 32, 128>}, {pipeline_mode = #tpu.pipeline_mode<synchronous>, transform_indices = @transform_11, window_bounds = array<i64: 2, 1, 128>}, {pipeline_mode = #tpu.pipeline_mode<synchronous>, transform_indices = @transform_12, window_bounds = array<i64: 2, 128, 32>}, {pipeline_mode = #tpu.pipeline_mode<synchronous>, transform_indices = @transform_13, window_bounds = array<i64: 2, 1, 32>}, {transform_indices = @transform_14, window_bounds = array<i64: 1, 64, 32>}]} {
    %c0 = arith.constant 0 : index
    %c0_0 = arith.constant 0 : index
    %c0_1 = arith.constant 0 : index
    %0 = vector.load %arg1[%c0, %c0_0, %c0_1] : memref<1x64x32xf32, #tpu.memory_space<vmem>>, vector<1x64x32xf32>
    %1 = vector.shape_cast %0 : vector<1x64x32xf32> to vector<64x32xf32>
    %c0_2 = arith.constant 0 : index
    %c0_3 = arith.constant 0 : index
    %c0_4 = arith.constant 0 : index
    %2 = vector.load %arg7[%c0_2, %c0_3, %c0_4] : memref<2x1x32xf32, #tpu.memory_space<vmem>>, vector<1x1x32xf32>
    %3 = vector.shape_cast %2 : vector<1x1x32xf32> to vector<1x32xf32>
    %c0_5 = arith.constant 0 : index
    %c0_6 = arith.constant 0 : index
    %c0_7 = arith.constant 0 : index
    %4 = vector.load %arg8[%c0_5, %c0_6, %c0_7] : memref<2x1x32xf32, #tpu.memory_space<vmem>>, vector<1x1x32xf32>
    %5 = vector.shape_cast %4 : vector<1x1x32xf32> to vector<1x32xf32>
    %cst = arith.constant dense<0.000000e+00> : vector<64xf32>
    %6 = vector.multi_reduction <add>, %1, %cst [1] : vector<64x32xf32> to vector<64xf32>
    %7 = vector.shape_cast %6 : vector<64xf32> to vector<64x1xf32>
    %cst_8 = arith.constant 3.200000e+01 : f32
    %8 = vector.broadcast %cst_8 : f32 to vector<64x1xf32>
    %9 = arith.divf %7, %8 : vector<64x1xf32>
    %10 = vector.broadcast %9 : vector<64x1xf32> to vector<64x32xf32>
    %11 = arith.subf %1, %10 : vector<64x32xf32>
    %12 = arith.mulf %11, %11 : vector<64x32xf32>
    %cst_9 = arith.constant dense<0.000000e+00> : vector<64xf32>
    %13 = vector.multi_reduction <add>, %12, %cst_9 [1] : vector<64x32xf32> to vector<64xf32>
    %14 = vector.shape_cast %13 : vector<64xf32> to vector<64x1xf32>
    %cst_10 = arith.constant 3.200000e+01 : f32
    %15 = vector.broadcast %cst_10 : f32 to vector<64x1xf32>
    %16 = arith.divf %14, %15 : vector<64x1xf32>
    %17 = vector.broadcast %9 : vector<64x1xf32> to vector<64x32xf32>
    %18 = arith.subf %1, %17 : vector<64x32xf32>
    %cst_11 = arith.constant 9.99999974E-6 : f32
    %19 = vector.broadcast %cst_11 : f32 to vector<64x1xf32>
    %20 = arith.addf %16, %19 : vector<64x1xf32>
    %21 = math.rsqrt %20 : vector<64x1xf32>
    %22 = vector.broadcast %21 : vector<64x1xf32> to vector<64x32xf32>
    %23 = arith.mulf %18, %22 : vector<64x32xf32>
    %24 = vector.broadcast %3 : vector<1x32xf32> to vector<64x32xf32>
    %25 = arith.mulf %23, %24 : vector<64x32xf32>
    %26 = vector.broadcast %5 : vector<1x32xf32> to vector<64x32xf32>
    %27 = arith.addf %25, %26 : vector<64x32xf32>
    %c0_12 = arith.constant 0 : index
    %c0_13 = arith.constant 0 : index
    %c0_14 = arith.constant 0 : index
    %28 = vector.load %arg3[%c0_12, %c0_13, %c0_14] : memref<24x32x8xf32, #tpu.memory_space<vmem>>, vector<1x32x8xf32>
    %29 = vector.shape_cast %28 : vector<1x32x8xf32> to vector<32x8xf32>
    %cst_15 = arith.constant dense<0.000000e+00> : vector<64x8xf32>
    %30 = tpu.matmul %27, %29, %cst_15 {dimension_numbers = #tpu.dot_dimension_numbers<[1], [0], [0], [1], [0, 0, 1, 1], [], []>} : vector<64x32xf32>, vector<32x8xf32>, vector<64x8xf32> -> vector<64x8xf32>
    %c0_16 = arith.constant 0 : index
    %c0_17 = arith.constant 0 : index
    %c0_18 = arith.constant 0 : index
    %31 = vector.load %arg4[%c0_16, %c0_17, %c0_18] : memref<24x1x8xf32, #tpu.memory_space<vmem>>, vector<1x1x8xf32>
    %32 = vector.shape_cast %31 : vector<1x1x8xf32> to vector<1x8xf32>
    %33 = vector.broadcast %32 : vector<1x8xf32> to vector<64x8xf32>
    %34 = arith.addf %30, %33 : vector<64x8xf32>
    %c4 = arith.constant 4 : index
    %c0_19 = arith.constant 0 : index
    %c0_20 = arith.constant 0 : index
    %35 = vector.load %arg3[%c4, %c0_19, %c0_20] : memref<24x32x8xf32, #tpu.memory_space<vmem>>, vector<1x32x8xf32>
    %36 = vector.shape_cast %35 : vector<1x32x8xf32> to vector<32x8xf32>
    %cst_21 = arith.constant dense<0.000000e+00> : vector<64x8xf32>
    %37 = tpu.matmul %27, %36, %cst_21 {dimension_numbers = #tpu.dot_dimension_numbers<[1], [0], [0], [1], [0, 0, 1, 1], [], []>} : vector<64x32xf32>, vector<32x8xf32>, vector<64x8xf32> -> vector<64x8xf32>
    %c4_22 = arith.constant 4 : index
    %c0_23 = arith.constant 0 : index
    %c0_24 = arith.constant 0 : index
    %38 = vector.load %arg4[%c4_22, %c0_23, %c0_24] : memref<24x1x8xf32, #tpu.memory_space<vmem>>, vector<1x1x8xf32>
    %39 = vector.shape_cast %38 : vector<1x1x8xf32> to vector<1x8xf32>
    %40 = vector.broadcast %39 : vector<1x8xf32> to vector<64x8xf32>
    %41 = arith.addf %37, %40 : vector<64x8xf32>
    %c8 = arith.constant 8 : index
    %c0_25 = arith.constant 0 : index
    %c0_26 = arith.constant 0 : index
    %42 = vector.load %arg3[%c8, %c0_25, %c0_26] : memref<24x32x8xf32, #tpu.memory_space<vmem>>, vector<1x32x8xf32>
    %43 = vector.shape_cast %42 : vector<1x32x8xf32> to vector<32x8xf32>
    %cst_27 = arith.constant dense<0.000000e+00> : vector<64x8xf32>
    %44 = tpu.matmul %27, %43, %cst_27 {dimension_numbers = #tpu.dot_dimension_numbers<[1], [0], [0], [1], [0, 0, 1, 1], [], []>} : vector<64x32xf32>, vector<32x8xf32>, vector<64x8xf32> -> vector<64x8xf32>
    %c8_28 = arith.constant 8 : index
    %c0_29 = arith.constant 0 : index
    %c0_30 = arith.constant 0 : index
    %45 = vector.load %arg4[%c8_28, %c0_29, %c0_30] : memref<24x1x8xf32, #tpu.memory_space<vmem>>, vector<1x1x8xf32>
    %46 = vector.shape_cast %45 : vector<1x1x8xf32> to vector<1x8xf32>
    %47 = vector.broadcast %46 : vector<1x8xf32> to vector<64x8xf32>
    %48 = arith.addf %44, %47 : vector<64x8xf32>
    %cst_31 = arith.constant dense<0.000000e+00> : vector<64x64xf32>
    %49 = tpu.matmul %34, %41, %cst_31 {dimension_numbers = #tpu.dot_dimension_numbers<[1], [1], [0], [0], [0, 0, 1, 0], [], []>} : vector<64x8xf32>, vector<64x8xf32>, vector<64x64xf32> -> vector<64x64xf32>
    %c0_32 = arith.constant 0 : index
    %c0_33 = arith.constant 0 : index
    %c0_34 = arith.constant 0 : index
    %50 = vector.load %arg2[%c0_32, %c0_33, %c0_34] : memref<8x64x64xf32, #tpu.memory_space<vmem>>, vector<1x64x64xf32>
    %51 = vector.shape_cast %50 : vector<1x64x64xf32> to vector<64x64xf32>
    %52 = arith.addf %49, %51 : vector<64x64xf32>
    %cst_35 = arith.constant dense<0xFF800000> : vector<64xf32>
    %53 = vector.multi_reduction <maximumf>, %52, %cst_35 [1] : vector<64x64xf32> to vector<64xf32>
    %54 = vector.shape_cast %53 : vector<64xf32> to vector<64x1xf32>
    %55 = vector.broadcast %54 : vector<64x1xf32> to vector<64x64xf32>
    %56 = arith.subf %52, %55 : vector<64x64xf32>
    %57 = math.exp %56 : vector<64x64xf32>
    %cst_36 = arith.constant dense<0.000000e+00> : vector<64xf32>
    %58 = vector.multi_reduction <add>, %57, %cst_36 [1] : vector<64x64xf32> to vector<64xf32>
    %59 = vector.shape_cast %58 : vector<64xf32> to vector<64x1xf32>
    %60 = tpu.reciprocal %59 {approx = true} : vector<64x1xf32> -> vector<64x1xf32>
    %61 = vector.broadcast %60 : vector<64x1xf32> to vector<64x64xf32>
    %62 = arith.mulf %57, %61 : vector<64x64xf32>
    %cst_37 = arith.constant dense<0.000000e+00> : vector<64x8xf32>
    %63 = tpu.matmul %62, %48, %cst_37 {dimension_numbers = #tpu.dot_dimension_numbers<[1], [0], [0], [1], [0, 0, 1, 1], [], []>} : vector<64x64xf32>, vector<64x8xf32>, vector<64x8xf32> -> vector<64x8xf32>
    %c0_38 = arith.constant 0 : index
    %c0_39 = arith.constant 0 : index
    %c0_40 = arith.constant 0 : index
    %64 = vector.load %arg5[%c0_38, %c0_39, %c0_40] : memref<8x8x32xf32, #tpu.memory_space<vmem>>, vector<1x8x32xf32>
    %65 = vector.shape_cast %64 : vector<1x8x32xf32> to vector<8x32xf32>
    %cst_41 = arith.constant dense<0.000000e+00> : vector<64x32xf32>
    %66 = tpu.matmul %63, %65, %cst_41 {dimension_numbers = #tpu.dot_dimension_numbers<[1], [0], [0], [1], [0, 0, 1, 1], [], []>} : vector<64x8xf32>, vector<8x32xf32>, vector<64x32xf32> -> vector<64x32xf32>
    %c1 = arith.constant 1 : index
    %c0_42 = arith.constant 0 : index
    %c0_43 = arith.constant 0 : index
    %67 = vector.load %arg3[%c1, %c0_42, %c0_43] : memref<24x32x8xf32, #tpu.memory_space<vmem>>, vector<1x32x8xf32>
    %68 = vector.shape_cast %67 : vector<1x32x8xf32> to vector<32x8xf32>
    %cst_44 = arith.constant dense<0.000000e+00> : vector<64x8xf32>
    %69 = tpu.matmul %27, %68, %cst_44 {dimension_numbers = #tpu.dot_dimension_numbers<[1], [0], [0], [1], [0, 0, 1, 1], [], []>} : vector<64x32xf32>, vector<32x8xf32>, vector<64x8xf32> -> vector<64x8xf32>
    %c1_45 = arith.constant 1 : index
    %c0_46 = arith.constant 0 : index
    %c0_47 = arith.constant 0 : index
    %70 = vector.load %arg4[%c1_45, %c0_46, %c0_47] : memref<24x1x8xf32, #tpu.memory_space<vmem>>, vector<1x1x8xf32>
    %71 = vector.shape_cast %70 : vector<1x1x8xf32> to vector<1x8xf32>
    %72 = vector.broadcast %71 : vector<1x8xf32> to vector<64x8xf32>
    %73 = arith.addf %69, %72 : vector<64x8xf32>
    %c5 = arith.constant 5 : index
    %c0_48 = arith.constant 0 : index
    %c0_49 = arith.constant 0 : index
    %74 = vector.load %arg3[%c5, %c0_48, %c0_49] : memref<24x32x8xf32, #tpu.memory_space<vmem>>, vector<1x32x8xf32>
    %75 = vector.shape_cast %74 : vector<1x32x8xf32> to vector<32x8xf32>
    %cst_50 = arith.constant dense<0.000000e+00> : vector<64x8xf32>
    %76 = tpu.matmul %27, %75, %cst_50 {dimension_numbers = #tpu.dot_dimension_numbers<[1], [0], [0], [1], [0, 0, 1, 1], [], []>} : vector<64x32xf32>, vector<32x8xf32>, vector<64x8xf32> -> vector<64x8xf32>
    %c5_51 = arith.constant 5 : index
    %c0_52 = arith.constant 0 : index
    %c0_53 = arith.constant 0 : index
    %77 = vector.load %arg4[%c5_51, %c0_52, %c0_53] : memref<24x1x8xf32, #tpu.memory_space<vmem>>, vector<1x1x8xf32>
    %78 = vector.shape_cast %77 : vector<1x1x8xf32> to vector<1x8xf32>
    %79 = vector.broadcast %78 : vector<1x8xf32> to vector<64x8xf32>
    %80 = arith.addf %76, %79 : vector<64x8xf32>
    %c9 = arith.constant 9 : index
    %c0_54 = arith.constant 0 : index
    %c0_55 = arith.constant 0 : index
    %81 = vector.load %arg3[%c9, %c0_54, %c0_55] : memref<24x32x8xf32, #tpu.memory_space<vmem>>, vector<1x32x8xf32>
    %82 = vector.shape_cast %81 : vector<1x32x8xf32> to vector<32x8xf32>
    %cst_56 = arith.constant dense<0.000000e+00> : vector<64x8xf32>
    %83 = tpu.matmul %27, %82, %cst_56 {dimension_numbers = #tpu.dot_dimension_numbers<[1], [0], [0], [1], [0, 0, 1, 1], [], []>} : vector<64x32xf32>, vector<32x8xf32>, vector<64x8xf32> -> vector<64x8xf32>
    %c9_57 = arith.constant 9 : index
    %c0_58 = arith.constant 0 : index
    %c0_59 = arith.constant 0 : index
    %84 = vector.load %arg4[%c9_57, %c0_58, %c0_59] : memref<24x1x8xf32, #tpu.memory_space<vmem>>, vector<1x1x8xf32>
    %85 = vector.shape_cast %84 : vector<1x1x8xf32> to vector<1x8xf32>
    %86 = vector.broadcast %85 : vector<1x8xf32> to vector<64x8xf32>
    %87 = arith.addf %83, %86 : vector<64x8xf32>
    %cst_60 = arith.constant dense<0.000000e+00> : vector<64x64xf32>
    %88 = tpu.matmul %73, %80, %cst_60 {dimension_numbers = #tpu.dot_dimension_numbers<[1], [1], [0], [0], [0, 0, 1, 0], [], []>} : vector<64x8xf32>, vector<64x8xf32>, vector<64x64xf32> -> vector<64x64xf32>
    %c1_61 = arith.constant 1 : index
    %c0_62 = arith.constant 0 : index
    %c0_63 = arith.constant 0 : index
    %89 = vector.load %arg2[%c1_61, %c0_62, %c0_63] : memref<8x64x64xf32, #tpu.memory_space<vmem>>, vector<1x64x64xf32>
    %90 = vector.shape_cast %89 : vector<1x64x64xf32> to vector<64x64xf32>
    %91 = arith.addf %88, %90 : vector<64x64xf32>
    %cst_64 = arith.constant dense<0xFF800000> : vector<64xf32>
    %92 = vector.multi_reduction <maximumf>, %91, %cst_64 [1] : vector<64x64xf32> to vector<64xf32>
    %93 = vector.shape_cast %92 : vector<64xf32> to vector<64x1xf32>
    %94 = vector.broadcast %93 : vector<64x1xf32> to vector<64x64xf32>
    %95 = arith.subf %91, %94 : vector<64x64xf32>
    %96 = math.exp %95 : vector<64x64xf32>
    %cst_65 = arith.constant dense<0.000000e+00> : vector<64xf32>
    %97 = vector.multi_reduction <add>, %96, %cst_65 [1] : vector<64x64xf32> to vector<64xf32>
    %98 = vector.shape_cast %97 : vector<64xf32> to vector<64x1xf32>
    %99 = tpu.reciprocal %98 {approx = true} : vector<64x1xf32> -> vector<64x1xf32>
    %100 = vector.broadcast %99 : vector<64x1xf32> to vector<64x64xf32>
    %101 = arith.mulf %96, %100 : vector<64x64xf32>
    %cst_66 = arith.constant dense<0.000000e+00> : vector<64x8xf32>
    %102 = tpu.matmul %101, %87, %cst_66 {dimension_numbers = #tpu.dot_dimension_numbers<[1], [0], [0], [1], [0, 0, 1, 1], [], []>} : vector<64x64xf32>, vector<64x8xf32>, vector<64x8xf32> -> vector<64x8xf32>
    %c1_67 = arith.constant 1 : index
    %c0_68 = arith.constant 0 : index
    %c0_69 = arith.constant 0 : index
    %103 = vector.load %arg5[%c1_67, %c0_68, %c0_69] : memref<8x8x32xf32, #tpu.memory_space<vmem>>, vector<1x8x32xf32>
    %104 = vector.shape_cast %103 : vector<1x8x32xf32> to vector<8x32xf32>
    %cst_70 = arith.constant dense<0.000000e+00> : vector<64x32xf32>
    %105 = tpu.matmul %102, %104, %cst_70 {dimension_numbers = #tpu.dot_dimension_numbers<[1], [0], [0], [1], [0, 0, 1, 1], [], []>} : vector<64x8xf32>, vector<8x32xf32>, vector<64x32xf32> -> vector<64x32xf32>
    %106 = arith.addf %66, %105 : vector<64x32xf32>
    %c2 = arith.constant 2 : index
    %c0_71 = arith.constant 0 : index
    %c0_72 = arith.constant 0 : index
    %107 = vector.load %arg3[%c2, %c0_71, %c0_72] : memref<24x32x8xf32, #tpu.memory_space<vmem>>, vector<1x32x8xf32>
    %108 = vector.shape_cast %107 : vector<1x32x8xf32> to vector<32x8xf32>
    %cst_73 = arith.constant dense<0.000000e+00> : vector<64x8xf32>
    %109 = tpu.matmul %27, %108, %cst_73 {dimension_numbers = #tpu.dot_dimension_numbers<[1], [0], [0], [1], [0, 0, 1, 1], [], []>} : vector<64x32xf32>, vector<32x8xf32>, vector<64x8xf32> -> vector<64x8xf32>
    %c2_74 = arith.constant 2 : index
    %c0_75 = arith.constant 0 : index
    %c0_76 = arith.constant 0 : index
    %110 = vector.load %arg4[%c2_74, %c0_75, %c0_76] : memref<24x1x8xf32, #tpu.memory_space<vmem>>, vector<1x1x8xf32>
    %111 = vector.shape_cast %110 : vector<1x1x8xf32> to vector<1x8xf32>
    %112 = vector.broadcast %111 : vector<1x8xf32> to vector<64x8xf32>
    %113 = arith.addf %109, %112 : vector<64x8xf32>
    %c6 = arith.constant 6 : index
    %c0_77 = arith.constant 0 : index
    %c0_78 = arith.constant 0 : index
    %114 = vector.load %arg3[%c6, %c0_77, %c0_78] : memref<24x32x8xf32, #tpu.memory_space<vmem>>, vector<1x32x8xf32>
    %115 = vector.shape_cast %114 : vector<1x32x8xf32> to vector<32x8xf32>
    %cst_79 = arith.constant dense<0.000000e+00> : vector<64x8xf32>
    %116 = tpu.matmul %27, %115, %cst_79 {dimension_numbers = #tpu.dot_dimension_numbers<[1], [0], [0], [1], [0, 0, 1, 1], [], []>} : vector<64x32xf32>, vector<32x8xf32>, vector<64x8xf32> -> vector<64x8xf32>
    %c6_80 = arith.constant 6 : index
    %c0_81 = arith.constant 0 : index
    %c0_82 = arith.constant 0 : index
    %117 = vector.load %arg4[%c6_80, %c0_81, %c0_82] : memref<24x1x8xf32, #tpu.memory_space<vmem>>, vector<1x1x8xf32>
    %118 = vector.shape_cast %117 : vector<1x1x8xf32> to vector<1x8xf32>
    %119 = vector.broadcast %118 : vector<1x8xf32> to vector<64x8xf32>
    %120 = arith.addf %116, %119 : vector<64x8xf32>
    %c10 = arith.constant 10 : index
    %c0_83 = arith.constant 0 : index
    %c0_84 = arith.constant 0 : index
    %121 = vector.load %arg3[%c10, %c0_83, %c0_84] : memref<24x32x8xf32, #tpu.memory_space<vmem>>, vector<1x32x8xf32>
    %122 = vector.shape_cast %121 : vector<1x32x8xf32> to vector<32x8xf32>
    %cst_85 = arith.constant dense<0.000000e+00> : vector<64x8xf32>
    %123 = tpu.matmul %27, %122, %cst_85 {dimension_numbers = #tpu.dot_dimension_numbers<[1], [0], [0], [1], [0, 0, 1, 1], [], []>} : vector<64x32xf32>, vector<32x8xf32>, vector<64x8xf32> -> vector<64x8xf32>
    %c10_86 = arith.constant 10 : index
    %c0_87 = arith.constant 0 : index
    %c0_88 = arith.constant 0 : index
    %124 = vector.load %arg4[%c10_86, %c0_87, %c0_88] : memref<24x1x8xf32, #tpu.memory_space<vmem>>, vector<1x1x8xf32>
    %125 = vector.shape_cast %124 : vector<1x1x8xf32> to vector<1x8xf32>
    %126 = vector.broadcast %125 : vector<1x8xf32> to vector<64x8xf32>
    %127 = arith.addf %123, %126 : vector<64x8xf32>
    %cst_89 = arith.constant dense<0.000000e+00> : vector<64x64xf32>
    %128 = tpu.matmul %113, %120, %cst_89 {dimension_numbers = #tpu.dot_dimension_numbers<[1], [1], [0], [0], [0, 0, 1, 0], [], []>} : vector<64x8xf32>, vector<64x8xf32>, vector<64x64xf32> -> vector<64x64xf32>
    %c2_90 = arith.constant 2 : index
    %c0_91 = arith.constant 0 : index
    %c0_92 = arith.constant 0 : index
    %129 = vector.load %arg2[%c2_90, %c0_91, %c0_92] : memref<8x64x64xf32, #tpu.memory_space<vmem>>, vector<1x64x64xf32>
    %130 = vector.shape_cast %129 : vector<1x64x64xf32> to vector<64x64xf32>
    %131 = arith.addf %128, %130 : vector<64x64xf32>
    %cst_93 = arith.constant dense<0xFF800000> : vector<64xf32>
    %132 = vector.multi_reduction <maximumf>, %131, %cst_93 [1] : vector<64x64xf32> to vector<64xf32>
    %133 = vector.shape_cast %132 : vector<64xf32> to vector<64x1xf32>
    %134 = vector.broadcast %133 : vector<64x1xf32> to vector<64x64xf32>
    %135 = arith.subf %131, %134 : vector<64x64xf32>
    %136 = math.exp %135 : vector<64x64xf32>
    %cst_94 = arith.constant dense<0.000000e+00> : vector<64xf32>
    %137 = vector.multi_reduction <add>, %136, %cst_94 [1] : vector<64x64xf32> to vector<64xf32>
    %138 = vector.shape_cast %137 : vector<64xf32> to vector<64x1xf32>
    %139 = tpu.reciprocal %138 {approx = true} : vector<64x1xf32> -> vector<64x1xf32>
    %140 = vector.broadcast %139 : vector<64x1xf32> to vector<64x64xf32>
    %141 = arith.mulf %136, %140 : vector<64x64xf32>
    %cst_95 = arith.constant dense<0.000000e+00> : vector<64x8xf32>
    %142 = tpu.matmul %141, %127, %cst_95 {dimension_numbers = #tpu.dot_dimension_numbers<[1], [0], [0], [1], [0, 0, 1, 1], [], []>} : vector<64x64xf32>, vector<64x8xf32>, vector<64x8xf32> -> vector<64x8xf32>
    %c2_96 = arith.constant 2 : index
    %c0_97 = arith.constant 0 : index
    %c0_98 = arith.constant 0 : index
    %143 = vector.load %arg5[%c2_96, %c0_97, %c0_98] : memref<8x8x32xf32, #tpu.memory_space<vmem>>, vector<1x8x32xf32>
    %144 = vector.shape_cast %143 : vector<1x8x32xf32> to vector<8x32xf32>
    %cst_99 = arith.constant dense<0.000000e+00> : vector<64x32xf32>
    %145 = tpu.matmul %142, %144, %cst_99 {dimension_numbers = #tpu.dot_dimension_numbers<[1], [0], [0], [1], [0, 0, 1, 1], [], []>} : vector<64x8xf32>, vector<8x32xf32>, vector<64x32xf32> -> vector<64x32xf32>
    %146 = arith.addf %106, %145 : vector<64x32xf32>
    %c3 = arith.constant 3 : index
    %c0_100 = arith.constant 0 : index
    %c0_101 = arith.constant 0 : index
    %147 = vector.load %arg3[%c3, %c0_100, %c0_101] : memref<24x32x8xf32, #tpu.memory_space<vmem>>, vector<1x32x8xf32>
    %148 = vector.shape_cast %147 : vector<1x32x8xf32> to vector<32x8xf32>
    %cst_102 = arith.constant dense<0.000000e+00> : vector<64x8xf32>
    %149 = tpu.matmul %27, %148, %cst_102 {dimension_numbers = #tpu.dot_dimension_numbers<[1], [0], [0], [1], [0, 0, 1, 1], [], []>} : vector<64x32xf32>, vector<32x8xf32>, vector<64x8xf32> -> vector<64x8xf32>
    %c3_103 = arith.constant 3 : index
    %c0_104 = arith.constant 0 : index
    %c0_105 = arith.constant 0 : index
    %150 = vector.load %arg4[%c3_103, %c0_104, %c0_105] : memref<24x1x8xf32, #tpu.memory_space<vmem>>, vector<1x1x8xf32>
    %151 = vector.shape_cast %150 : vector<1x1x8xf32> to vector<1x8xf32>
    %152 = vector.broadcast %151 : vector<1x8xf32> to vector<64x8xf32>
    %153 = arith.addf %149, %152 : vector<64x8xf32>
    %c7 = arith.constant 7 : index
    %c0_106 = arith.constant 0 : index
    %c0_107 = arith.constant 0 : index
    %154 = vector.load %arg3[%c7, %c0_106, %c0_107] : memref<24x32x8xf32, #tpu.memory_space<vmem>>, vector<1x32x8xf32>
    %155 = vector.shape_cast %154 : vector<1x32x8xf32> to vector<32x8xf32>
    %cst_108 = arith.constant dense<0.000000e+00> : vector<64x8xf32>
    %156 = tpu.matmul %27, %155, %cst_108 {dimension_numbers = #tpu.dot_dimension_numbers<[1], [0], [0], [1], [0, 0, 1, 1], [], []>} : vector<64x32xf32>, vector<32x8xf32>, vector<64x8xf32> -> vector<64x8xf32>
    %c7_109 = arith.constant 7 : index
    %c0_110 = arith.constant 0 : index
    %c0_111 = arith.constant 0 : index
    %157 = vector.load %arg4[%c7_109, %c0_110, %c0_111] : memref<24x1x8xf32, #tpu.memory_space<vmem>>, vector<1x1x8xf32>
    %158 = vector.shape_cast %157 : vector<1x1x8xf32> to vector<1x8xf32>
    %159 = vector.broadcast %158 : vector<1x8xf32> to vector<64x8xf32>
    %160 = arith.addf %156, %159 : vector<64x8xf32>
    %c11 = arith.constant 11 : index
    %c0_112 = arith.constant 0 : index
    %c0_113 = arith.constant 0 : index
    %161 = vector.load %arg3[%c11, %c0_112, %c0_113] : memref<24x32x8xf32, #tpu.memory_space<vmem>>, vector<1x32x8xf32>
    %162 = vector.shape_cast %161 : vector<1x32x8xf32> to vector<32x8xf32>
    %cst_114 = arith.constant dense<0.000000e+00> : vector<64x8xf32>
    %163 = tpu.matmul %27, %162, %cst_114 {dimension_numbers = #tpu.dot_dimension_numbers<[1], [0], [0], [1], [0, 0, 1, 1], [], []>} : vector<64x32xf32>, vector<32x8xf32>, vector<64x8xf32> -> vector<64x8xf32>
    %c11_115 = arith.constant 11 : index
    %c0_116 = arith.constant 0 : index
    %c0_117 = arith.constant 0 : index
    %164 = vector.load %arg4[%c11_115, %c0_116, %c0_117] : memref<24x1x8xf32, #tpu.memory_space<vmem>>, vector<1x1x8xf32>
    %165 = vector.shape_cast %164 : vector<1x1x8xf32> to vector<1x8xf32>
    %166 = vector.broadcast %165 : vector<1x8xf32> to vector<64x8xf32>
    %167 = arith.addf %163, %166 : vector<64x8xf32>
    %cst_118 = arith.constant dense<0.000000e+00> : vector<64x64xf32>
    %168 = tpu.matmul %153, %160, %cst_118 {dimension_numbers = #tpu.dot_dimension_numbers<[1], [1], [0], [0], [0, 0, 1, 0], [], []>} : vector<64x8xf32>, vector<64x8xf32>, vector<64x64xf32> -> vector<64x64xf32>
    %c3_119 = arith.constant 3 : index
    %c0_120 = arith.constant 0 : index
    %c0_121 = arith.constant 0 : index
    %169 = vector.load %arg2[%c3_119, %c0_120, %c0_121] : memref<8x64x64xf32, #tpu.memory_space<vmem>>, vector<1x64x64xf32>
    %170 = vector.shape_cast %169 : vector<1x64x64xf32> to vector<64x64xf32>
    %171 = arith.addf %168, %170 : vector<64x64xf32>
    %cst_122 = arith.constant dense<0xFF800000> : vector<64xf32>
    %172 = vector.multi_reduction <maximumf>, %171, %cst_122 [1] : vector<64x64xf32> to vector<64xf32>
    %173 = vector.shape_cast %172 : vector<64xf32> to vector<64x1xf32>
    %174 = vector.broadcast %173 : vector<64x1xf32> to vector<64x64xf32>
    %175 = arith.subf %171, %174 : vector<64x64xf32>
    %176 = math.exp %175 : vector<64x64xf32>
    %cst_123 = arith.constant dense<0.000000e+00> : vector<64xf32>
    %177 = vector.multi_reduction <add>, %176, %cst_123 [1] : vector<64x64xf32> to vector<64xf32>
    %178 = vector.shape_cast %177 : vector<64xf32> to vector<64x1xf32>
    %179 = tpu.reciprocal %178 {approx = true} : vector<64x1xf32> -> vector<64x1xf32>
    %180 = vector.broadcast %179 : vector<64x1xf32> to vector<64x64xf32>
    %181 = arith.mulf %176, %180 : vector<64x64xf32>
    %cst_124 = arith.constant dense<0.000000e+00> : vector<64x8xf32>
    %182 = tpu.matmul %181, %167, %cst_124 {dimension_numbers = #tpu.dot_dimension_numbers<[1], [0], [0], [1], [0, 0, 1, 1], [], []>} : vector<64x64xf32>, vector<64x8xf32>, vector<64x8xf32> -> vector<64x8xf32>
    %c3_125 = arith.constant 3 : index
    %c0_126 = arith.constant 0 : index
    %c0_127 = arith.constant 0 : index
    %183 = vector.load %arg5[%c3_125, %c0_126, %c0_127] : memref<8x8x32xf32, #tpu.memory_space<vmem>>, vector<1x8x32xf32>
    %184 = vector.shape_cast %183 : vector<1x8x32xf32> to vector<8x32xf32>
    %cst_128 = arith.constant dense<0.000000e+00> : vector<64x32xf32>
    %185 = tpu.matmul %182, %184, %cst_128 {dimension_numbers = #tpu.dot_dimension_numbers<[1], [0], [0], [1], [0, 0, 1, 1], [], []>} : vector<64x8xf32>, vector<8x32xf32>, vector<64x32xf32> -> vector<64x32xf32>
    %186 = arith.addf %146, %185 : vector<64x32xf32>
    %187 = arith.addf %1, %186 : vector<64x32xf32>
    %c0_129 = arith.constant 0 : index
    %c0_130 = arith.constant 0 : index
    %c0_131 = arith.constant 0 : index
    %188 = vector.load %arg6[%c0_129, %c0_130, %c0_131] : memref<2x1x32xf32, #tpu.memory_space<vmem>>, vector<1x1x32xf32>
    %189 = vector.shape_cast %188 : vector<1x1x32xf32> to vector<1x32xf32>
    %190 = vector.broadcast %189 : vector<1x32xf32> to vector<64x32xf32>
    %191 = arith.addf %187, %190 : vector<64x32xf32>
    %c0_132 = arith.constant 0 : index
    %c0_133 = arith.constant 0 : index
    %c0_134 = arith.constant 0 : index
    %192 = vector.load %arg9[%c0_132, %c0_133, %c0_134] : memref<2x1x32xf32, #tpu.memory_space<vmem>>, vector<1x1x32xf32>
    %193 = vector.shape_cast %192 : vector<1x1x32xf32> to vector<1x32xf32>
    %c0_135 = arith.constant 0 : index
    %c0_136 = arith.constant 0 : index
    %c0_137 = arith.constant 0 : index
    %194 = vector.load %arg10[%c0_135, %c0_136, %c0_137] : memref<2x1x32xf32, #tpu.memory_space<vmem>>, vector<1x1x32xf32>
    %195 = vector.shape_cast %194 : vector<1x1x32xf32> to vector<1x32xf32>
    %cst_138 = arith.constant dense<0.000000e+00> : vector<64xf32>
    %196 = vector.multi_reduction <add>, %191, %cst_138 [1] : vector<64x32xf32> to vector<64xf32>
    %197 = vector.shape_cast %196 : vector<64xf32> to vector<64x1xf32>
    %cst_139 = arith.constant 3.200000e+01 : f32
    %198 = vector.broadcast %cst_139 : f32 to vector<64x1xf32>
    %199 = arith.divf %197, %198 : vector<64x1xf32>
    %200 = vector.broadcast %199 : vector<64x1xf32> to vector<64x32xf32>
    %201 = arith.subf %191, %200 : vector<64x32xf32>
    %202 = arith.mulf %201, %201 : vector<64x32xf32>
    %cst_140 = arith.constant dense<0.000000e+00> : vector<64xf32>
    %203 = vector.multi_reduction <add>, %202, %cst_140 [1] : vector<64x32xf32> to vector<64xf32>
    %204 = vector.shape_cast %203 : vector<64xf32> to vector<64x1xf32>
    %cst_141 = arith.constant 3.200000e+01 : f32
    %205 = vector.broadcast %cst_141 : f32 to vector<64x1xf32>
    %206 = arith.divf %204, %205 : vector<64x1xf32>
    %207 = vector.broadcast %199 : vector<64x1xf32> to vector<64x32xf32>
    %208 = arith.subf %191, %207 : vector<64x32xf32>
    %cst_142 = arith.constant 9.99999974E-6 : f32
    %209 = vector.broadcast %cst_142 : f32 to vector<64x1xf32>
    %210 = arith.addf %206, %209 : vector<64x1xf32>
    %211 = math.rsqrt %210 : vector<64x1xf32>
    %212 = vector.broadcast %211 : vector<64x1xf32> to vector<64x32xf32>
    %213 = arith.mulf %208, %212 : vector<64x32xf32>
    %214 = vector.broadcast %193 : vector<1x32xf32> to vector<64x32xf32>
    %215 = arith.mulf %213, %214 : vector<64x32xf32>
    %216 = vector.broadcast %195 : vector<1x32xf32> to vector<64x32xf32>
    %217 = arith.addf %215, %216 : vector<64x32xf32>
    %c0_143 = arith.constant 0 : index
    %c0_144 = arith.constant 0 : index
    %c0_145 = arith.constant 0 : index
    %218 = vector.load %arg11[%c0_143, %c0_144, %c0_145] : memref<2x32x128xf32, #tpu.memory_space<vmem>>, vector<1x32x128xf32>
    %219 = vector.shape_cast %218 : vector<1x32x128xf32> to vector<32x128xf32>
    %cst_146 = arith.constant dense<0.000000e+00> : vector<64x128xf32>
    %220 = tpu.matmul %217, %219, %cst_146 {dimension_numbers = #tpu.dot_dimension_numbers<[1], [0], [0], [1], [0, 0, 1, 1], [], []>} : vector<64x32xf32>, vector<32x128xf32>, vector<64x128xf32> -> vector<64x128xf32>
    %c0_147 = arith.constant 0 : index
    %c0_148 = arith.constant 0 : index
    %c0_149 = arith.constant 0 : index
    %221 = vector.load %arg12[%c0_147, %c0_148, %c0_149] : memref<2x1x128xf32, #tpu.memory_space<vmem>>, vector<1x1x128xf32>
    %222 = vector.shape_cast %221 : vector<1x1x128xf32> to vector<1x128xf32>
    %223 = vector.broadcast %222 : vector<1x128xf32> to vector<64x128xf32>
    %224 = arith.addf %220, %223 : vector<64x128xf32>
    %cst_150 = arith.constant 5.000000e-01 : f32
    %225 = vector.broadcast %cst_150 : f32 to vector<64x128xf32>
    %226 = arith.mulf %225, %224 : vector<64x128xf32>
    %cst_151 = arith.constant 0.707106769 : f32
    %227 = vector.broadcast %cst_151 : f32 to vector<64x128xf32>
    %228 = arith.mulf %224, %227 : vector<64x128xf32>
    %229 = math.absf %228 : vector<64x128xf32>
    %cst_152 = arith.constant 0.327591091 : f32
    %230 = vector.broadcast %cst_152 : f32 to vector<64x128xf32>
    %231 = arith.mulf %230, %229 : vector<64x128xf32>
    %cst_153 = arith.constant 1.000000e+00 : f32
    %232 = vector.broadcast %cst_153 : f32 to vector<64x128xf32>
    %233 = arith.addf %232, %231 : vector<64x128xf32>
    %cst_154 = arith.constant 1.000000e+00 : f32
    %234 = vector.broadcast %cst_154 : f32 to vector<64x128xf32>
    %235 = arith.divf %234, %233 : vector<64x128xf32>
    %cst_155 = arith.constant 1.06140542 : f32
    %236 = vector.broadcast %cst_155 : f32 to vector<64x128xf32>
    %237 = arith.mulf %236, %235 : vector<64x128xf32>
    %cst_156 = arith.constant -1.45315206 : f32
    %238 = vector.broadcast %cst_156 : f32 to vector<64x128xf32>
    %239 = arith.addf %237, %238 : vector<64x128xf32>
    %240 = arith.mulf %239, %235 : vector<64x128xf32>
    %cst_157 = arith.constant 1.42141378 : f32
    %241 = vector.broadcast %cst_157 : f32 to vector<64x128xf32>
    %242 = arith.addf %240, %241 : vector<64x128xf32>
    %243 = arith.mulf %242, %235 : vector<64x128xf32>
    %cst_158 = arith.constant -0.284496725 : f32
    %244 = vector.broadcast %cst_158 : f32 to vector<64x128xf32>
    %245 = arith.addf %243, %244 : vector<64x128xf32>
    %246 = arith.mulf %245, %235 : vector<64x128xf32>
    %cst_159 = arith.constant 0.254829586 : f32
    %247 = vector.broadcast %cst_159 : f32 to vector<64x128xf32>
    %248 = arith.addf %246, %247 : vector<64x128xf32>
    %249 = arith.mulf %248, %235 : vector<64x128xf32>
    %cst_160 = arith.constant 0.000000e+00 : f32
    %250 = vector.broadcast %cst_160 : f32 to vector<64x128xf32>
    %251 = arith.subf %250, %229 : vector<64x128xf32>
    %252 = arith.mulf %251, %229 : vector<64x128xf32>
    %253 = math.exp %252 : vector<64x128xf32>
    %254 = arith.mulf %249, %253 : vector<64x128xf32>
    %cst_161 = arith.constant 1.000000e+00 : f32
    %255 = vector.broadcast %cst_161 : f32 to vector<64x128xf32>
    %256 = arith.subf %255, %254 : vector<64x128xf32>
    %cst_162 = arith.constant 0.000000e+00 : f32
    %257 = vector.broadcast %cst_162 : f32 to vector<64x128xf32>
    %258 = arith.cmpf oge, %228, %257 : vector<64x128xf32>
    %cst_163 = arith.constant 0.000000e+00 : f32
    %259 = vector.broadcast %cst_163 : f32 to vector<64x128xf32>
    %260 = arith.subf %259, %256 : vector<64x128xf32>
    %261 = arith.select %258, %256, %260 : vector<64x128xi1>, vector<64x128xf32>
    %cst_164 = arith.constant 1.000000e+00 : f32
    %262 = vector.broadcast %cst_164 : f32 to vector<64x128xf32>
    %263 = arith.addf %262, %261 : vector<64x128xf32>
    %264 = arith.mulf %226, %263 : vector<64x128xf32>
    %c0_165 = arith.constant 0 : index
    %c0_166 = arith.constant 0 : index
    %c0_167 = arith.constant 0 : index
    %265 = vector.load %arg13[%c0_165, %c0_166, %c0_167] : memref<2x128x32xf32, #tpu.memory_space<vmem>>, vector<1x128x32xf32>
    %266 = vector.shape_cast %265 : vector<1x128x32xf32> to vector<128x32xf32>
    %cst_168 = arith.constant dense<0.000000e+00> : vector<64x32xf32>
    %267 = tpu.matmul %264, %266, %cst_168 {dimension_numbers = #tpu.dot_dimension_numbers<[1], [0], [0], [1], [0, 0, 1, 1], [], []>} : vector<64x128xf32>, vector<128x32xf32>, vector<64x32xf32> -> vector<64x32xf32>
    %c0_169 = arith.constant 0 : index
    %c0_170 = arith.constant 0 : index
    %c0_171 = arith.constant 0 : index
    %268 = vector.load %arg14[%c0_169, %c0_170, %c0_171] : memref<2x1x32xf32, #tpu.memory_space<vmem>>, vector<1x1x32xf32>
    %269 = vector.shape_cast %268 : vector<1x1x32xf32> to vector<1x32xf32>
    %270 = vector.broadcast %269 : vector<1x32xf32> to vector<64x32xf32>
    %271 = arith.addf %267, %270 : vector<64x32xf32>
    %272 = arith.addf %191, %271 : vector<64x32xf32>
    %c1_172 = arith.constant 1 : index
    %c0_173 = arith.constant 0 : index
    %c0_174 = arith.constant 0 : index
    %273 = vector.load %arg7[%c1_172, %c0_173, %c0_174] : memref<2x1x32xf32, #tpu.memory_space<vmem>>, vector<1x1x32xf32>
    %274 = vector.shape_cast %273 : vector<1x1x32xf32> to vector<1x32xf32>
    %c1_175 = arith.constant 1 : index
    %c0_176 = arith.constant 0 : index
    %c0_177 = arith.constant 0 : index
    %275 = vector.load %arg8[%c1_175, %c0_176, %c0_177] : memref<2x1x32xf32, #tpu.memory_space<vmem>>, vector<1x1x32xf32>
    %276 = vector.shape_cast %275 : vector<1x1x32xf32> to vector<1x32xf32>
    %cst_178 = arith.constant dense<0.000000e+00> : vector<64xf32>
    %277 = vector.multi_reduction <add>, %272, %cst_178 [1] : vector<64x32xf32> to vector<64xf32>
    %278 = vector.shape_cast %277 : vector<64xf32> to vector<64x1xf32>
    %cst_179 = arith.constant 3.200000e+01 : f32
    %279 = vector.broadcast %cst_179 : f32 to vector<64x1xf32>
    %280 = arith.divf %278, %279 : vector<64x1xf32>
    %281 = vector.broadcast %280 : vector<64x1xf32> to vector<64x32xf32>
    %282 = arith.subf %272, %281 : vector<64x32xf32>
    %283 = arith.mulf %282, %282 : vector<64x32xf32>
    %cst_180 = arith.constant dense<0.000000e+00> : vector<64xf32>
    %284 = vector.multi_reduction <add>, %283, %cst_180 [1] : vector<64x32xf32> to vector<64xf32>
    %285 = vector.shape_cast %284 : vector<64xf32> to vector<64x1xf32>
    %cst_181 = arith.constant 3.200000e+01 : f32
    %286 = vector.broadcast %cst_181 : f32 to vector<64x1xf32>
    %287 = arith.divf %285, %286 : vector<64x1xf32>
    %288 = vector.broadcast %280 : vector<64x1xf32> to vector<64x32xf32>
    %289 = arith.subf %272, %288 : vector<64x32xf32>
    %cst_182 = arith.constant 9.99999974E-6 : f32
    %290 = vector.broadcast %cst_182 : f32 to vector<64x1xf32>
    %291 = arith.addf %287, %290 : vector<64x1xf32>
    %292 = math.rsqrt %291 : vector<64x1xf32>
    %293 = vector.broadcast %292 : vector<64x1xf32> to vector<64x32xf32>
    %294 = arith.mulf %289, %293 : vector<64x32xf32>
    %295 = vector.broadcast %274 : vector<1x32xf32> to vector<64x32xf32>
    %296 = arith.mulf %294, %295 : vector<64x32xf32>
    %297 = vector.broadcast %276 : vector<1x32xf32> to vector<64x32xf32>
    %298 = arith.addf %296, %297 : vector<64x32xf32>
    %c12 = arith.constant 12 : index
    %c0_183 = arith.constant 0 : index
    %c0_184 = arith.constant 0 : index
    %299 = vector.load %arg3[%c12, %c0_183, %c0_184] : memref<24x32x8xf32, #tpu.memory_space<vmem>>, vector<1x32x8xf32>
    %300 = vector.shape_cast %299 : vector<1x32x8xf32> to vector<32x8xf32>
    %cst_185 = arith.constant dense<0.000000e+00> : vector<64x8xf32>
    %301 = tpu.matmul %298, %300, %cst_185 {dimension_numbers = #tpu.dot_dimension_numbers<[1], [0], [0], [1], [0, 0, 1, 1], [], []>} : vector<64x32xf32>, vector<32x8xf32>, vector<64x8xf32> -> vector<64x8xf32>
    %c12_186 = arith.constant 12 : index
    %c0_187 = arith.constant 0 : index
    %c0_188 = arith.constant 0 : index
    %302 = vector.load %arg4[%c12_186, %c0_187, %c0_188] : memref<24x1x8xf32, #tpu.memory_space<vmem>>, vector<1x1x8xf32>
    %303 = vector.shape_cast %302 : vector<1x1x8xf32> to vector<1x8xf32>
    %304 = vector.broadcast %303 : vector<1x8xf32> to vector<64x8xf32>
    %305 = arith.addf %301, %304 : vector<64x8xf32>
    %c16 = arith.constant 16 : index
    %c0_189 = arith.constant 0 : index
    %c0_190 = arith.constant 0 : index
    %306 = vector.load %arg3[%c16, %c0_189, %c0_190] : memref<24x32x8xf32, #tpu.memory_space<vmem>>, vector<1x32x8xf32>
    %307 = vector.shape_cast %306 : vector<1x32x8xf32> to vector<32x8xf32>
    %cst_191 = arith.constant dense<0.000000e+00> : vector<64x8xf32>
    %308 = tpu.matmul %298, %307, %cst_191 {dimension_numbers = #tpu.dot_dimension_numbers<[1], [0], [0], [1], [0, 0, 1, 1], [], []>} : vector<64x32xf32>, vector<32x8xf32>, vector<64x8xf32> -> vector<64x8xf32>
    %c16_192 = arith.constant 16 : index
    %c0_193 = arith.constant 0 : index
    %c0_194 = arith.constant 0 : index
    %309 = vector.load %arg4[%c16_192, %c0_193, %c0_194] : memref<24x1x8xf32, #tpu.memory_space<vmem>>, vector<1x1x8xf32>
    %310 = vector.shape_cast %309 : vector<1x1x8xf32> to vector<1x8xf32>
    %311 = vector.broadcast %310 : vector<1x8xf32> to vector<64x8xf32>
    %312 = arith.addf %308, %311 : vector<64x8xf32>
    %c20 = arith.constant 20 : index
    %c0_195 = arith.constant 0 : index
    %c0_196 = arith.constant 0 : index
    %313 = vector.load %arg3[%c20, %c0_195, %c0_196] : memref<24x32x8xf32, #tpu.memory_space<vmem>>, vector<1x32x8xf32>
    %314 = vector.shape_cast %313 : vector<1x32x8xf32> to vector<32x8xf32>
    %cst_197 = arith.constant dense<0.000000e+00> : vector<64x8xf32>
    %315 = tpu.matmul %298, %314, %cst_197 {dimension_numbers = #tpu.dot_dimension_numbers<[1], [0], [0], [1], [0, 0, 1, 1], [], []>} : vector<64x32xf32>, vector<32x8xf32>, vector<64x8xf32> -> vector<64x8xf32>
    %c20_198 = arith.constant 20 : index
    %c0_199 = arith.constant 0 : index
    %c0_200 = arith.constant 0 : index
    %316 = vector.load %arg4[%c20_198, %c0_199, %c0_200] : memref<24x1x8xf32, #tpu.memory_space<vmem>>, vector<1x1x8xf32>
    %317 = vector.shape_cast %316 : vector<1x1x8xf32> to vector<1x8xf32>
    %318 = vector.broadcast %317 : vector<1x8xf32> to vector<64x8xf32>
    %319 = arith.addf %315, %318 : vector<64x8xf32>
    %cst_201 = arith.constant dense<0.000000e+00> : vector<64x64xf32>
    %320 = tpu.matmul %305, %312, %cst_201 {dimension_numbers = #tpu.dot_dimension_numbers<[1], [1], [0], [0], [0, 0, 1, 0], [], []>} : vector<64x8xf32>, vector<64x8xf32>, vector<64x64xf32> -> vector<64x64xf32>
    %c4_202 = arith.constant 4 : index
    %c0_203 = arith.constant 0 : index
    %c0_204 = arith.constant 0 : index
    %321 = vector.load %arg2[%c4_202, %c0_203, %c0_204] : memref<8x64x64xf32, #tpu.memory_space<vmem>>, vector<1x64x64xf32>
    %322 = vector.shape_cast %321 : vector<1x64x64xf32> to vector<64x64xf32>
    %323 = arith.addf %320, %322 : vector<64x64xf32>
    %cst_205 = arith.constant dense<0xFF800000> : vector<64xf32>
    %324 = vector.multi_reduction <maximumf>, %323, %cst_205 [1] : vector<64x64xf32> to vector<64xf32>
    %325 = vector.shape_cast %324 : vector<64xf32> to vector<64x1xf32>
    %326 = vector.broadcast %325 : vector<64x1xf32> to vector<64x64xf32>
    %327 = arith.subf %323, %326 : vector<64x64xf32>
    %328 = math.exp %327 : vector<64x64xf32>
    %cst_206 = arith.constant dense<0.000000e+00> : vector<64xf32>
    %329 = vector.multi_reduction <add>, %328, %cst_206 [1] : vector<64x64xf32> to vector<64xf32>
    %330 = vector.shape_cast %329 : vector<64xf32> to vector<64x1xf32>
    %331 = tpu.reciprocal %330 {approx = true} : vector<64x1xf32> -> vector<64x1xf32>
    %332 = vector.broadcast %331 : vector<64x1xf32> to vector<64x64xf32>
    %333 = arith.mulf %328, %332 : vector<64x64xf32>
    %cst_207 = arith.constant dense<0.000000e+00> : vector<64x8xf32>
    %334 = tpu.matmul %333, %319, %cst_207 {dimension_numbers = #tpu.dot_dimension_numbers<[1], [0], [0], [1], [0, 0, 1, 1], [], []>} : vector<64x64xf32>, vector<64x8xf32>, vector<64x8xf32> -> vector<64x8xf32>
    %c4_208 = arith.constant 4 : index
    %c0_209 = arith.constant 0 : index
    %c0_210 = arith.constant 0 : index
    %335 = vector.load %arg5[%c4_208, %c0_209, %c0_210] : memref<8x8x32xf32, #tpu.memory_space<vmem>>, vector<1x8x32xf32>
    %336 = vector.shape_cast %335 : vector<1x8x32xf32> to vector<8x32xf32>
    %cst_211 = arith.constant dense<0.000000e+00> : vector<64x32xf32>
    %337 = tpu.matmul %334, %336, %cst_211 {dimension_numbers = #tpu.dot_dimension_numbers<[1], [0], [0], [1], [0, 0, 1, 1], [], []>} : vector<64x8xf32>, vector<8x32xf32>, vector<64x32xf32> -> vector<64x32xf32>
    %c13 = arith.constant 13 : index
    %c0_212 = arith.constant 0 : index
    %c0_213 = arith.constant 0 : index
    %338 = vector.load %arg3[%c13, %c0_212, %c0_213] : memref<24x32x8xf32, #tpu.memory_space<vmem>>, vector<1x32x8xf32>
    %339 = vector.shape_cast %338 : vector<1x32x8xf32> to vector<32x8xf32>
    %cst_214 = arith.constant dense<0.000000e+00> : vector<64x8xf32>
    %340 = tpu.matmul %298, %339, %cst_214 {dimension_numbers = #tpu.dot_dimension_numbers<[1], [0], [0], [1], [0, 0, 1, 1], [], []>} : vector<64x32xf32>, vector<32x8xf32>, vector<64x8xf32> -> vector<64x8xf32>
    %c13_215 = arith.constant 13 : index
    %c0_216 = arith.constant 0 : index
    %c0_217 = arith.constant 0 : index
    %341 = vector.load %arg4[%c13_215, %c0_216, %c0_217] : memref<24x1x8xf32, #tpu.memory_space<vmem>>, vector<1x1x8xf32>
    %342 = vector.shape_cast %341 : vector<1x1x8xf32> to vector<1x8xf32>
    %343 = vector.broadcast %342 : vector<1x8xf32> to vector<64x8xf32>
    %344 = arith.addf %340, %343 : vector<64x8xf32>
    %c17 = arith.constant 17 : index
    %c0_218 = arith.constant 0 : index
    %c0_219 = arith.constant 0 : index
    %345 = vector.load %arg3[%c17, %c0_218, %c0_219] : memref<24x32x8xf32, #tpu.memory_space<vmem>>, vector<1x32x8xf32>
    %346 = vector.shape_cast %345 : vector<1x32x8xf32> to vector<32x8xf32>
    %cst_220 = arith.constant dense<0.000000e+00> : vector<64x8xf32>
    %347 = tpu.matmul %298, %346, %cst_220 {dimension_numbers = #tpu.dot_dimension_numbers<[1], [0], [0], [1], [0, 0, 1, 1], [], []>} : vector<64x32xf32>, vector<32x8xf32>, vector<64x8xf32> -> vector<64x8xf32>
    %c17_221 = arith.constant 17 : index
    %c0_222 = arith.constant 0 : index
    %c0_223 = arith.constant 0 : index
    %348 = vector.load %arg4[%c17_221, %c0_222, %c0_223] : memref<24x1x8xf32, #tpu.memory_space<vmem>>, vector<1x1x8xf32>
    %349 = vector.shape_cast %348 : vector<1x1x8xf32> to vector<1x8xf32>
    %350 = vector.broadcast %349 : vector<1x8xf32> to vector<64x8xf32>
    %351 = arith.addf %347, %350 : vector<64x8xf32>
    %c21 = arith.constant 21 : index
    %c0_224 = arith.constant 0 : index
    %c0_225 = arith.constant 0 : index
    %352 = vector.load %arg3[%c21, %c0_224, %c0_225] : memref<24x32x8xf32, #tpu.memory_space<vmem>>, vector<1x32x8xf32>
    %353 = vector.shape_cast %352 : vector<1x32x8xf32> to vector<32x8xf32>
    %cst_226 = arith.constant dense<0.000000e+00> : vector<64x8xf32>
    %354 = tpu.matmul %298, %353, %cst_226 {dimension_numbers = #tpu.dot_dimension_numbers<[1], [0], [0], [1], [0, 0, 1, 1], [], []>} : vector<64x32xf32>, vector<32x8xf32>, vector<64x8xf32> -> vector<64x8xf32>
    %c21_227 = arith.constant 21 : index
    %c0_228 = arith.constant 0 : index
    %c0_229 = arith.constant 0 : index
    %355 = vector.load %arg4[%c21_227, %c0_228, %c0_229] : memref<24x1x8xf32, #tpu.memory_space<vmem>>, vector<1x1x8xf32>
    %356 = vector.shape_cast %355 : vector<1x1x8xf32> to vector<1x8xf32>
    %357 = vector.broadcast %356 : vector<1x8xf32> to vector<64x8xf32>
    %358 = arith.addf %354, %357 : vector<64x8xf32>
    %cst_230 = arith.constant dense<0.000000e+00> : vector<64x64xf32>
    %359 = tpu.matmul %344, %351, %cst_230 {dimension_numbers = #tpu.dot_dimension_numbers<[1], [1], [0], [0], [0, 0, 1, 0], [], []>} : vector<64x8xf32>, vector<64x8xf32>, vector<64x64xf32> -> vector<64x64xf32>
    %c5_231 = arith.constant 5 : index
    %c0_232 = arith.constant 0 : index
    %c0_233 = arith.constant 0 : index
    %360 = vector.load %arg2[%c5_231, %c0_232, %c0_233] : memref<8x64x64xf32, #tpu.memory_space<vmem>>, vector<1x64x64xf32>
    %361 = vector.shape_cast %360 : vector<1x64x64xf32> to vector<64x64xf32>
    %362 = arith.addf %359, %361 : vector<64x64xf32>
    %cst_234 = arith.constant dense<0xFF800000> : vector<64xf32>
    %363 = vector.multi_reduction <maximumf>, %362, %cst_234 [1] : vector<64x64xf32> to vector<64xf32>
    %364 = vector.shape_cast %363 : vector<64xf32> to vector<64x1xf32>
    %365 = vector.broadcast %364 : vector<64x1xf32> to vector<64x64xf32>
    %366 = arith.subf %362, %365 : vector<64x64xf32>
    %367 = math.exp %366 : vector<64x64xf32>
    %cst_235 = arith.constant dense<0.000000e+00> : vector<64xf32>
    %368 = vector.multi_reduction <add>, %367, %cst_235 [1] : vector<64x64xf32> to vector<64xf32>
    %369 = vector.shape_cast %368 : vector<64xf32> to vector<64x1xf32>
    %370 = tpu.reciprocal %369 {approx = true} : vector<64x1xf32> -> vector<64x1xf32>
    %371 = vector.broadcast %370 : vector<64x1xf32> to vector<64x64xf32>
    %372 = arith.mulf %367, %371 : vector<64x64xf32>
    %cst_236 = arith.constant dense<0.000000e+00> : vector<64x8xf32>
    %373 = tpu.matmul %372, %358, %cst_236 {dimension_numbers = #tpu.dot_dimension_numbers<[1], [0], [0], [1], [0, 0, 1, 1], [], []>} : vector<64x64xf32>, vector<64x8xf32>, vector<64x8xf32> -> vector<64x8xf32>
    %c5_237 = arith.constant 5 : index
    %c0_238 = arith.constant 0 : index
    %c0_239 = arith.constant 0 : index
    %374 = vector.load %arg5[%c5_237, %c0_238, %c0_239] : memref<8x8x32xf32, #tpu.memory_space<vmem>>, vector<1x8x32xf32>
    %375 = vector.shape_cast %374 : vector<1x8x32xf32> to vector<8x32xf32>
    %cst_240 = arith.constant dense<0.000000e+00> : vector<64x32xf32>
    %376 = tpu.matmul %373, %375, %cst_240 {dimension_numbers = #tpu.dot_dimension_numbers<[1], [0], [0], [1], [0, 0, 1, 1], [], []>} : vector<64x8xf32>, vector<8x32xf32>, vector<64x32xf32> -> vector<64x32xf32>
    %377 = arith.addf %337, %376 : vector<64x32xf32>
    %c14 = arith.constant 14 : index
    %c0_241 = arith.constant 0 : index
    %c0_242 = arith.constant 0 : index
    %378 = vector.load %arg3[%c14, %c0_241, %c0_242] : memref<24x32x8xf32, #tpu.memory_space<vmem>>, vector<1x32x8xf32>
    %379 = vector.shape_cast %378 : vector<1x32x8xf32> to vector<32x8xf32>
    %cst_243 = arith.constant dense<0.000000e+00> : vector<64x8xf32>
    %380 = tpu.matmul %298, %379, %cst_243 {dimension_numbers = #tpu.dot_dimension_numbers<[1], [0], [0], [1], [0, 0, 1, 1], [], []>} : vector<64x32xf32>, vector<32x8xf32>, vector<64x8xf32> -> vector<64x8xf32>
    %c14_244 = arith.constant 14 : index
    %c0_245 = arith.constant 0 : index
    %c0_246 = arith.constant 0 : index
    %381 = vector.load %arg4[%c14_244, %c0_245, %c0_246] : memref<24x1x8xf32, #tpu.memory_space<vmem>>, vector<1x1x8xf32>
    %382 = vector.shape_cast %381 : vector<1x1x8xf32> to vector<1x8xf32>
    %383 = vector.broadcast %382 : vector<1x8xf32> to vector<64x8xf32>
    %384 = arith.addf %380, %383 : vector<64x8xf32>
    %c18 = arith.constant 18 : index
    %c0_247 = arith.constant 0 : index
    %c0_248 = arith.constant 0 : index
    %385 = vector.load %arg3[%c18, %c0_247, %c0_248] : memref<24x32x8xf32, #tpu.memory_space<vmem>>, vector<1x32x8xf32>
    %386 = vector.shape_cast %385 : vector<1x32x8xf32> to vector<32x8xf32>
    %cst_249 = arith.constant dense<0.000000e+00> : vector<64x8xf32>
    %387 = tpu.matmul %298, %386, %cst_249 {dimension_numbers = #tpu.dot_dimension_numbers<[1], [0], [0], [1], [0, 0, 1, 1], [], []>} : vector<64x32xf32>, vector<32x8xf32>, vector<64x8xf32> -> vector<64x8xf32>
    %c18_250 = arith.constant 18 : index
    %c0_251 = arith.constant 0 : index
    %c0_252 = arith.constant 0 : index
    %388 = vector.load %arg4[%c18_250, %c0_251, %c0_252] : memref<24x1x8xf32, #tpu.memory_space<vmem>>, vector<1x1x8xf32>
    %389 = vector.shape_cast %388 : vector<1x1x8xf32> to vector<1x8xf32>
    %390 = vector.broadcast %389 : vector<1x8xf32> to vector<64x8xf32>
    %391 = arith.addf %387, %390 : vector<64x8xf32>
    %c22 = arith.constant 22 : index
    %c0_253 = arith.constant 0 : index
    %c0_254 = arith.constant 0 : index
    %392 = vector.load %arg3[%c22, %c0_253, %c0_254] : memref<24x32x8xf32, #tpu.memory_space<vmem>>, vector<1x32x8xf32>
    %393 = vector.shape_cast %392 : vector<1x32x8xf32> to vector<32x8xf32>
    %cst_255 = arith.constant dense<0.000000e+00> : vector<64x8xf32>
    %394 = tpu.matmul %298, %393, %cst_255 {dimension_numbers = #tpu.dot_dimension_numbers<[1], [0], [0], [1], [0, 0, 1, 1], [], []>} : vector<64x32xf32>, vector<32x8xf32>, vector<64x8xf32> -> vector<64x8xf32>
    %c22_256 = arith.constant 22 : index
    %c0_257 = arith.constant 0 : index
    %c0_258 = arith.constant 0 : index
    %395 = vector.load %arg4[%c22_256, %c0_257, %c0_258] : memref<24x1x8xf32, #tpu.memory_space<vmem>>, vector<1x1x8xf32>
    %396 = vector.shape_cast %395 : vector<1x1x8xf32> to vector<1x8xf32>
    %397 = vector.broadcast %396 : vector<1x8xf32> to vector<64x8xf32>
    %398 = arith.addf %394, %397 : vector<64x8xf32>
    %cst_259 = arith.constant dense<0.000000e+00> : vector<64x64xf32>
    %399 = tpu.matmul %384, %391, %cst_259 {dimension_numbers = #tpu.dot_dimension_numbers<[1], [1], [0], [0], [0, 0, 1, 0], [], []>} : vector<64x8xf32>, vector<64x8xf32>, vector<64x64xf32> -> vector<64x64xf32>
    %c6_260 = arith.constant 6 : index
    %c0_261 = arith.constant 0 : index
    %c0_262 = arith.constant 0 : index
    %400 = vector.load %arg2[%c6_260, %c0_261, %c0_262] : memref<8x64x64xf32, #tpu.memory_space<vmem>>, vector<1x64x64xf32>
    %401 = vector.shape_cast %400 : vector<1x64x64xf32> to vector<64x64xf32>
    %402 = arith.addf %399, %401 : vector<64x64xf32>
    %cst_263 = arith.constant dense<0xFF800000> : vector<64xf32>
    %403 = vector.multi_reduction <maximumf>, %402, %cst_263 [1] : vector<64x64xf32> to vector<64xf32>
    %404 = vector.shape_cast %403 : vector<64xf32> to vector<64x1xf32>
    %405 = vector.broadcast %404 : vector<64x1xf32> to vector<64x64xf32>
    %406 = arith.subf %402, %405 : vector<64x64xf32>
    %407 = math.exp %406 : vector<64x64xf32>
    %cst_264 = arith.constant dense<0.000000e+00> : vector<64xf32>
    %408 = vector.multi_reduction <add>, %407, %cst_264 [1] : vector<64x64xf32> to vector<64xf32>
    %409 = vector.shape_cast %408 : vector<64xf32> to vector<64x1xf32>
    %410 = tpu.reciprocal %409 {approx = true} : vector<64x1xf32> -> vector<64x1xf32>
    %411 = vector.broadcast %410 : vector<64x1xf32> to vector<64x64xf32>
    %412 = arith.mulf %407, %411 : vector<64x64xf32>
    %cst_265 = arith.constant dense<0.000000e+00> : vector<64x8xf32>
    %413 = tpu.matmul %412, %398, %cst_265 {dimension_numbers = #tpu.dot_dimension_numbers<[1], [0], [0], [1], [0, 0, 1, 1], [], []>} : vector<64x64xf32>, vector<64x8xf32>, vector<64x8xf32> -> vector<64x8xf32>
    %c6_266 = arith.constant 6 : index
    %c0_267 = arith.constant 0 : index
    %c0_268 = arith.constant 0 : index
    %414 = vector.load %arg5[%c6_266, %c0_267, %c0_268] : memref<8x8x32xf32, #tpu.memory_space<vmem>>, vector<1x8x32xf32>
    %415 = vector.shape_cast %414 : vector<1x8x32xf32> to vector<8x32xf32>
    %cst_269 = arith.constant dense<0.000000e+00> : vector<64x32xf32>
    %416 = tpu.matmul %413, %415, %cst_269 {dimension_numbers = #tpu.dot_dimension_numbers<[1], [0], [0], [1], [0, 0, 1, 1], [], []>} : vector<64x8xf32>, vector<8x32xf32>, vector<64x32xf32> -> vector<64x32xf32>
    %417 = arith.addf %377, %416 : vector<64x32xf32>
    %c15 = arith.constant 15 : index
    %c0_270 = arith.constant 0 : index
    %c0_271 = arith.constant 0 : index
    %418 = vector.load %arg3[%c15, %c0_270, %c0_271] : memref<24x32x8xf32, #tpu.memory_space<vmem>>, vector<1x32x8xf32>
    %419 = vector.shape_cast %418 : vector<1x32x8xf32> to vector<32x8xf32>
    %cst_272 = arith.constant dense<0.000000e+00> : vector<64x8xf32>
    %420 = tpu.matmul %298, %419, %cst_272 {dimension_numbers = #tpu.dot_dimension_numbers<[1], [0], [0], [1], [0, 0, 1, 1], [], []>} : vector<64x32xf32>, vector<32x8xf32>, vector<64x8xf32> -> vector<64x8xf32>
    %c15_273 = arith.constant 15 : index
    %c0_274 = arith.constant 0 : index
    %c0_275 = arith.constant 0 : index
    %421 = vector.load %arg4[%c15_273, %c0_274, %c0_275] : memref<24x1x8xf32, #tpu.memory_space<vmem>>, vector<1x1x8xf32>
    %422 = vector.shape_cast %421 : vector<1x1x8xf32> to vector<1x8xf32>
    %423 = vector.broadcast %422 : vector<1x8xf32> to vector<64x8xf32>
    %424 = arith.addf %420, %423 : vector<64x8xf32>
    %c19 = arith.constant 19 : index
    %c0_276 = arith.constant 0 : index
    %c0_277 = arith.constant 0 : index
    %425 = vector.load %arg3[%c19, %c0_276, %c0_277] : memref<24x32x8xf32, #tpu.memory_space<vmem>>, vector<1x32x8xf32>
    %426 = vector.shape_cast %425 : vector<1x32x8xf32> to vector<32x8xf32>
    %cst_278 = arith.constant dense<0.000000e+00> : vector<64x8xf32>
    %427 = tpu.matmul %298, %426, %cst_278 {dimension_numbers = #tpu.dot_dimension_numbers<[1], [0], [0], [1], [0, 0, 1, 1], [], []>} : vector<64x32xf32>, vector<32x8xf32>, vector<64x8xf32> -> vector<64x8xf32>
    %c19_279 = arith.constant 19 : index
    %c0_280 = arith.constant 0 : index
    %c0_281 = arith.constant 0 : index
    %428 = vector.load %arg4[%c19_279, %c0_280, %c0_281] : memref<24x1x8xf32, #tpu.memory_space<vmem>>, vector<1x1x8xf32>
    %429 = vector.shape_cast %428 : vector<1x1x8xf32> to vector<1x8xf32>
    %430 = vector.broadcast %429 : vector<1x8xf32> to vector<64x8xf32>
    %431 = arith.addf %427, %430 : vector<64x8xf32>
    %c23 = arith.constant 23 : index
    %c0_282 = arith.constant 0 : index
    %c0_283 = arith.constant 0 : index
    %432 = vector.load %arg3[%c23, %c0_282, %c0_283] : memref<24x32x8xf32, #tpu.memory_space<vmem>>, vector<1x32x8xf32>
    %433 = vector.shape_cast %432 : vector<1x32x8xf32> to vector<32x8xf32>
    %cst_284 = arith.constant dense<0.000000e+00> : vector<64x8xf32>
    %434 = tpu.matmul %298, %433, %cst_284 {dimension_numbers = #tpu.dot_dimension_numbers<[1], [0], [0], [1], [0, 0, 1, 1], [], []>} : vector<64x32xf32>, vector<32x8xf32>, vector<64x8xf32> -> vector<64x8xf32>
    %c23_285 = arith.constant 23 : index
    %c0_286 = arith.constant 0 : index
    %c0_287 = arith.constant 0 : index
    %435 = vector.load %arg4[%c23_285, %c0_286, %c0_287] : memref<24x1x8xf32, #tpu.memory_space<vmem>>, vector<1x1x8xf32>
    %436 = vector.shape_cast %435 : vector<1x1x8xf32> to vector<1x8xf32>
    %437 = vector.broadcast %436 : vector<1x8xf32> to vector<64x8xf32>
    %438 = arith.addf %434, %437 : vector<64x8xf32>
    %cst_288 = arith.constant dense<0.000000e+00> : vector<64x64xf32>
    %439 = tpu.matmul %424, %431, %cst_288 {dimension_numbers = #tpu.dot_dimension_numbers<[1], [1], [0], [0], [0, 0, 1, 0], [], []>} : vector<64x8xf32>, vector<64x8xf32>, vector<64x64xf32> -> vector<64x64xf32>
    %c7_289 = arith.constant 7 : index
    %c0_290 = arith.constant 0 : index
    %c0_291 = arith.constant 0 : index
    %440 = vector.load %arg2[%c7_289, %c0_290, %c0_291] : memref<8x64x64xf32, #tpu.memory_space<vmem>>, vector<1x64x64xf32>
    %441 = vector.shape_cast %440 : vector<1x64x64xf32> to vector<64x64xf32>
    %442 = arith.addf %439, %441 : vector<64x64xf32>
    %cst_292 = arith.constant dense<0xFF800000> : vector<64xf32>
    %443 = vector.multi_reduction <maximumf>, %442, %cst_292 [1] : vector<64x64xf32> to vector<64xf32>
    %444 = vector.shape_cast %443 : vector<64xf32> to vector<64x1xf32>
    %445 = vector.broadcast %444 : vector<64x1xf32> to vector<64x64xf32>
    %446 = arith.subf %442, %445 : vector<64x64xf32>
    %447 = math.exp %446 : vector<64x64xf32>
    %cst_293 = arith.constant dense<0.000000e+00> : vector<64xf32>
    %448 = vector.multi_reduction <add>, %447, %cst_293 [1] : vector<64x64xf32> to vector<64xf32>
    %449 = vector.shape_cast %448 : vector<64xf32> to vector<64x1xf32>
    %450 = tpu.reciprocal %449 {approx = true} : vector<64x1xf32> -> vector<64x1xf32>
    %451 = vector.broadcast %450 : vector<64x1xf32> to vector<64x64xf32>
    %452 = arith.mulf %447, %451 : vector<64x64xf32>
    %cst_294 = arith.constant dense<0.000000e+00> : vector<64x8xf32>
    %453 = tpu.matmul %452, %438, %cst_294 {dimension_numbers = #tpu.dot_dimension_numbers<[1], [0], [0], [1], [0, 0, 1, 1], [], []>} : vector<64x64xf32>, vector<64x8xf32>, vector<64x8xf32> -> vector<64x8xf32>
    %c7_295 = arith.constant 7 : index
    %c0_296 = arith.constant 0 : index
    %c0_297 = arith.constant 0 : index
    %454 = vector.load %arg5[%c7_295, %c0_296, %c0_297] : memref<8x8x32xf32, #tpu.memory_space<vmem>>, vector<1x8x32xf32>
    %455 = vector.shape_cast %454 : vector<1x8x32xf32> to vector<8x32xf32>
    %cst_298 = arith.constant dense<0.000000e+00> : vector<64x32xf32>
    %456 = tpu.matmul %453, %455, %cst_298 {dimension_numbers = #tpu.dot_dimension_numbers<[1], [0], [0], [1], [0, 0, 1, 1], [], []>} : vector<64x8xf32>, vector<8x32xf32>, vector<64x32xf32> -> vector<64x32xf32>
    %457 = arith.addf %417, %456 : vector<64x32xf32>
    %458 = arith.addf %272, %457 : vector<64x32xf32>
    %c1_299 = arith.constant 1 : index
    %c0_300 = arith.constant 0 : index
    %c0_301 = arith.constant 0 : index
    %459 = vector.load %arg6[%c1_299, %c0_300, %c0_301] : memref<2x1x32xf32, #tpu.memory_space<vmem>>, vector<1x1x32xf32>
    %460 = vector.shape_cast %459 : vector<1x1x32xf32> to vector<1x32xf32>
    %461 = vector.broadcast %460 : vector<1x32xf32> to vector<64x32xf32>
    %462 = arith.addf %458, %461 : vector<64x32xf32>
    %c1_302 = arith.constant 1 : index
    %c0_303 = arith.constant 0 : index
    %c0_304 = arith.constant 0 : index
    %463 = vector.load %arg9[%c1_302, %c0_303, %c0_304] : memref<2x1x32xf32, #tpu.memory_space<vmem>>, vector<1x1x32xf32>
    %464 = vector.shape_cast %463 : vector<1x1x32xf32> to vector<1x32xf32>
    %c1_305 = arith.constant 1 : index
    %c0_306 = arith.constant 0 : index
    %c0_307 = arith.constant 0 : index
    %465 = vector.load %arg10[%c1_305, %c0_306, %c0_307] : memref<2x1x32xf32, #tpu.memory_space<vmem>>, vector<1x1x32xf32>
    %466 = vector.shape_cast %465 : vector<1x1x32xf32> to vector<1x32xf32>
    %cst_308 = arith.constant dense<0.000000e+00> : vector<64xf32>
    %467 = vector.multi_reduction <add>, %462, %cst_308 [1] : vector<64x32xf32> to vector<64xf32>
    %468 = vector.shape_cast %467 : vector<64xf32> to vector<64x1xf32>
    %cst_309 = arith.constant 3.200000e+01 : f32
    %469 = vector.broadcast %cst_309 : f32 to vector<64x1xf32>
    %470 = arith.divf %468, %469 : vector<64x1xf32>
    %471 = vector.broadcast %470 : vector<64x1xf32> to vector<64x32xf32>
    %472 = arith.subf %462, %471 : vector<64x32xf32>
    %473 = arith.mulf %472, %472 : vector<64x32xf32>
    %cst_310 = arith.constant dense<0.000000e+00> : vector<64xf32>
    %474 = vector.multi_reduction <add>, %473, %cst_310 [1] : vector<64x32xf32> to vector<64xf32>
    %475 = vector.shape_cast %474 : vector<64xf32> to vector<64x1xf32>
    %cst_311 = arith.constant 3.200000e+01 : f32
    %476 = vector.broadcast %cst_311 : f32 to vector<64x1xf32>
    %477 = arith.divf %475, %476 : vector<64x1xf32>
    %478 = vector.broadcast %470 : vector<64x1xf32> to vector<64x32xf32>
    %479 = arith.subf %462, %478 : vector<64x32xf32>
    %cst_312 = arith.constant 9.99999974E-6 : f32
    %480 = vector.broadcast %cst_312 : f32 to vector<64x1xf32>
    %481 = arith.addf %477, %480 : vector<64x1xf32>
    %482 = math.rsqrt %481 : vector<64x1xf32>
    %483 = vector.broadcast %482 : vector<64x1xf32> to vector<64x32xf32>
    %484 = arith.mulf %479, %483 : vector<64x32xf32>
    %485 = vector.broadcast %464 : vector<1x32xf32> to vector<64x32xf32>
    %486 = arith.mulf %484, %485 : vector<64x32xf32>
    %487 = vector.broadcast %466 : vector<1x32xf32> to vector<64x32xf32>
    %488 = arith.addf %486, %487 : vector<64x32xf32>
    %c1_313 = arith.constant 1 : index
    %c0_314 = arith.constant 0 : index
    %c0_315 = arith.constant 0 : index
    %489 = vector.load %arg11[%c1_313, %c0_314, %c0_315] : memref<2x32x128xf32, #tpu.memory_space<vmem>>, vector<1x32x128xf32>
    %490 = vector.shape_cast %489 : vector<1x32x128xf32> to vector<32x128xf32>
    %cst_316 = arith.constant dense<0.000000e+00> : vector<64x128xf32>
    %491 = tpu.matmul %488, %490, %cst_316 {dimension_numbers = #tpu.dot_dimension_numbers<[1], [0], [0], [1], [0, 0, 1, 1], [], []>} : vector<64x32xf32>, vector<32x128xf32>, vector<64x128xf32> -> vector<64x128xf32>
    %c1_317 = arith.constant 1 : index
    %c0_318 = arith.constant 0 : index
    %c0_319 = arith.constant 0 : index
    %492 = vector.load %arg12[%c1_317, %c0_318, %c0_319] : memref<2x1x128xf32, #tpu.memory_space<vmem>>, vector<1x1x128xf32>
    %493 = vector.shape_cast %492 : vector<1x1x128xf32> to vector<1x128xf32>
    %494 = vector.broadcast %493 : vector<1x128xf32> to vector<64x128xf32>
    %495 = arith.addf %491, %494 : vector<64x128xf32>
    %cst_320 = arith.constant 5.000000e-01 : f32
    %496 = vector.broadcast %cst_320 : f32 to vector<64x128xf32>
    %497 = arith.mulf %496, %495 : vector<64x128xf32>
    %cst_321 = arith.constant 0.707106769 : f32
    %498 = vector.broadcast %cst_321 : f32 to vector<64x128xf32>
    %499 = arith.mulf %495, %498 : vector<64x128xf32>
    %500 = math.absf %499 : vector<64x128xf32>
    %cst_322 = arith.constant 0.327591091 : f32
    %501 = vector.broadcast %cst_322 : f32 to vector<64x128xf32>
    %502 = arith.mulf %501, %500 : vector<64x128xf32>
    %cst_323 = arith.constant 1.000000e+00 : f32
    %503 = vector.broadcast %cst_323 : f32 to vector<64x128xf32>
    %504 = arith.addf %503, %502 : vector<64x128xf32>
    %cst_324 = arith.constant 1.000000e+00 : f32
    %505 = vector.broadcast %cst_324 : f32 to vector<64x128xf32>
    %506 = arith.divf %505, %504 : vector<64x128xf32>
    %cst_325 = arith.constant 1.06140542 : f32
    %507 = vector.broadcast %cst_325 : f32 to vector<64x128xf32>
    %508 = arith.mulf %507, %506 : vector<64x128xf32>
    %cst_326 = arith.constant -1.45315206 : f32
    %509 = vector.broadcast %cst_326 : f32 to vector<64x128xf32>
    %510 = arith.addf %508, %509 : vector<64x128xf32>
    %511 = arith.mulf %510, %506 : vector<64x128xf32>
    %cst_327 = arith.constant 1.42141378 : f32
    %512 = vector.broadcast %cst_327 : f32 to vector<64x128xf32>
    %513 = arith.addf %511, %512 : vector<64x128xf32>
    %514 = arith.mulf %513, %506 : vector<64x128xf32>
    %cst_328 = arith.constant -0.284496725 : f32
    %515 = vector.broadcast %cst_328 : f32 to vector<64x128xf32>
    %516 = arith.addf %514, %515 : vector<64x128xf32>
    %517 = arith.mulf %516, %506 : vector<64x128xf32>
    %cst_329 = arith.constant 0.254829586 : f32
    %518 = vector.broadcast %cst_329 : f32 to vector<64x128xf32>
    %519 = arith.addf %517, %518 : vector<64x128xf32>
    %520 = arith.mulf %519, %506 : vector<64x128xf32>
    %cst_330 = arith.constant 0.000000e+00 : f32
    %521 = vector.broadcast %cst_330 : f32 to vector<64x128xf32>
    %522 = arith.subf %521, %500 : vector<64x128xf32>
    %523 = arith.mulf %522, %500 : vector<64x128xf32>
    %524 = math.exp %523 : vector<64x128xf32>
    %525 = arith.mulf %520, %524 : vector<64x128xf32>
    %cst_331 = arith.constant 1.000000e+00 : f32
    %526 = vector.broadcast %cst_331 : f32 to vector<64x128xf32>
    %527 = arith.subf %526, %525 : vector<64x128xf32>
    %cst_332 = arith.constant 0.000000e+00 : f32
    %528 = vector.broadcast %cst_332 : f32 to vector<64x128xf32>
    %529 = arith.cmpf oge, %499, %528 : vector<64x128xf32>
    %cst_333 = arith.constant 0.000000e+00 : f32
    %530 = vector.broadcast %cst_333 : f32 to vector<64x128xf32>
    %531 = arith.subf %530, %527 : vector<64x128xf32>
    %532 = arith.select %529, %527, %531 : vector<64x128xi1>, vector<64x128xf32>
    %cst_334 = arith.constant 1.000000e+00 : f32
    %533 = vector.broadcast %cst_334 : f32 to vector<64x128xf32>
    %534 = arith.addf %533, %532 : vector<64x128xf32>
    %535 = arith.mulf %497, %534 : vector<64x128xf32>
    %c1_335 = arith.constant 1 : index
    %c0_336 = arith.constant 0 : index
    %c0_337 = arith.constant 0 : index
    %536 = vector.load %arg13[%c1_335, %c0_336, %c0_337] : memref<2x128x32xf32, #tpu.memory_space<vmem>>, vector<1x128x32xf32>
    %537 = vector.shape_cast %536 : vector<1x128x32xf32> to vector<128x32xf32>
    %cst_338 = arith.constant dense<0.000000e+00> : vector<64x32xf32>
    %538 = tpu.matmul %535, %537, %cst_338 {dimension_numbers = #tpu.dot_dimension_numbers<[1], [0], [0], [1], [0, 0, 1, 1], [], []>} : vector<64x128xf32>, vector<128x32xf32>, vector<64x32xf32> -> vector<64x32xf32>
    %c1_339 = arith.constant 1 : index
    %c0_340 = arith.constant 0 : index
    %c0_341 = arith.constant 0 : index
    %539 = vector.load %arg14[%c1_339, %c0_340, %c0_341] : memref<2x1x32xf32, #tpu.memory_space<vmem>>, vector<1x1x32xf32>
    %540 = vector.shape_cast %539 : vector<1x1x32xf32> to vector<1x32xf32>
    %541 = vector.broadcast %540 : vector<1x32xf32> to vector<64x32xf32>
    %542 = arith.addf %538, %541 : vector<64x32xf32>
    %543 = arith.addf %462, %542 : vector<64x32xf32>
    %c0_342 = arith.constant 0 : index
    %c0_343 = arith.constant 0 : index
    %c0_344 = arith.constant 0 : index
    %544 = vector.load %arg15[%c0_342, %c0_343, %c0_344] : memref<1x64x32xf32, #tpu.memory_space<vmem>>, vector<1x64x32xf32>
    %545 = vector.shape_cast %544 : vector<1x64x32xf32> to vector<64x32xf32>
    %546 = vector.shape_cast %543 : vector<64x32xf32> to vector<1x64x32xf32>
    tpu.vector_store %arg15[%c0_342, %c0_343, %c0_344], %546 {strides = array<i32>} : memref<1x64x32xf32, #tpu.memory_space<vmem>>, vector<1x64x32xf32>,
    return
  }
  func.func @transform_0(%arg0: i32) -> (i32, i32, i32) {
    %c0_i32 = arith.constant 0 : i32
    %c0_i32_0 = arith.constant 0 : i32
    %c0_i32_1 = arith.constant 0 : i32
    return %arg0, %c0_i32, %c0_i32_0 : i32, i32, i32
  }
  func.func @transform_1(%arg0: i32) -> (i32, i32, i32) {
    %c0_i32 = arith.constant 0 : i32
    %c0_i32_0 = arith.constant 0 : i32
    %c0_i32_1 = arith.constant 0 : i32
    %c0_i32_2 = arith.constant 0 : i32
    return %c0_i32, %c0_i32_0, %c0_i32_1 : i32, i32, i32
  }
  func.func @transform_2(%arg0: i32) -> (i32, i32, i32) {
    %c0_i32 = arith.constant 0 : i32
    %c0_i32_0 = arith.constant 0 : i32
    %c0_i32_1 = arith.constant 0 : i32
    %c0_i32_2 = arith.constant 0 : i32
    return %c0_i32, %c0_i32_0, %c0_i32_1 : i32, i32, i32
  }
  func.func @transform_3(%arg0: i32) -> (i32, i32, i32) {
    %c0_i32 = arith.constant 0 : i32
    %c0_i32_0 = arith.constant 0 : i32
    %c0_i32_1 = arith.constant 0 : i32
    %c0_i32_2 = arith.constant 0 : i32
    return %c0_i32, %c0_i32_0, %c0_i32_1 : i32, i32, i32
  }
  func.func @transform_4(%arg0: i32) -> (i32, i32, i32) {
    %c0_i32 = arith.constant 0 : i32
    %c0_i32_0 = arith.constant 0 : i32
    %c0_i32_1 = arith.constant 0 : i32
    %c0_i32_2 = arith.constant 0 : i32
    return %c0_i32, %c0_i32_0, %c0_i32_1 : i32, i32, i32
  }
  func.func @transform_5(%arg0: i32) -> (i32, i32, i32) {
    %c0_i32 = arith.constant 0 : i32
    %c0_i32_0 = arith.constant 0 : i32
    %c0_i32_1 = arith.constant 0 : i32
    %c0_i32_2 = arith.constant 0 : i32
    return %c0_i32, %c0_i32_0, %c0_i32_1 : i32, i32, i32
  }
  func.func @transform_6(%arg0: i32) -> (i32, i32, i32) {
    %c0_i32 = arith.constant 0 : i32
    %c0_i32_0 = arith.constant 0 : i32
    %c0_i32_1 = arith.constant 0 : i32
    %c0_i32_2 = arith.constant 0 : i32
    return %c0_i32, %c0_i32_0, %c0_i32_1 : i32, i32, i32
  }
  func.func @transform_7(%arg0: i32) -> (i32, i32, i32) {
    %c0_i32 = arith.constant 0 : i32
    %c0_i32_0 = arith.constant 0 : i32
    %c0_i32_1 = arith.constant 0 : i32
    %c0_i32_2 = arith.constant 0 : i32
    return %c0_i32, %c0_i32_0, %c0_i32_1 : i32, i32, i32
  }
  func.func @transform_8(%arg0: i32) -> (i32, i32, i32) {
    %c0_i32 = arith.constant 0 : i32
    %c0_i32_0 = arith.constant 0 : i32
    %c0_i32_1 = arith.constant 0 : i32
    %c0_i32_2 = arith.constant 0 : i32
    return %c0_i32, %c0_i32_0, %c0_i32_1 : i32, i32, i32
  }
  func.func @transform_9(%arg0: i32) -> (i32, i32, i32) {
    %c0_i32 = arith.constant 0 : i32
    %c0_i32_0 = arith.constant 0 : i32
    %c0_i32_1 = arith.constant 0 : i32
    %c0_i32_2 = arith.constant 0 : i32
    return %c0_i32, %c0_i32_0, %c0_i32_1 : i32, i32, i32
  }
  func.func @transform_10(%arg0: i32) -> (i32, i32, i32) {
    %c0_i32 = arith.constant 0 : i32
    %c0_i32_0 = arith.constant 0 : i32
    %c0_i32_1 = arith.constant 0 : i32
    %c0_i32_2 = arith.constant 0 : i32
    return %c0_i32, %c0_i32_0, %c0_i32_1 : i32, i32, i32
  }
  func.func @transform_11(%arg0: i32) -> (i32, i32, i32) {
    %c0_i32 = arith.constant 0 : i32
    %c0_i32_0 = arith.constant 0 : i32
    %c0_i32_1 = arith.constant 0 : i32
    %c0_i32_2 = arith.constant 0 : i32
    return %c0_i32, %c0_i32_0, %c0_i32_1 : i32, i32, i32
  }
  func.func @transform_12(%arg0: i32) -> (i32, i32, i32) {
    %c0_i32 = arith.constant 0 : i32
    %c0_i32_0 = arith.constant 0 : i32
    %c0_i32_1 = arith.constant 0 : i32
    %c0_i32_2 = arith.constant 0 : i32
    return %c0_i32, %c0_i32_0, %c0_i32_1 : i32, i32, i32
  }
  func.func @transform_13(%arg0: i32) -> (i32, i32, i32) {
    %c0_i32 = arith.constant 0 : i32
    %c0_i32_0 = arith.constant 0 : i32
    %c0_i32_1 = arith.constant 0 : i32
    %c0_i32_2 = arith.constant 0 : i32
    return %c0_i32, %c0_i32_0, %c0_i32_1 : i32, i32, i32
  }
  func.func @transform_14(%arg0: i32) -> (i32, i32, i32) {
    %c0_i32 = arith.constant 0 : i32
    %c0_i32_0 = arith.constant 0 : i32
    %c0_i32_1 = arith.constant 0 : i32
    return %arg0, %c0_i32, %c0_i32_0 : i32, i32, i32
  }
}

</mosaic_0001>

<bundles_post_ra>
// kernel: _lambda_.1
= control target key start
LH: loop header
LB: loop body
LE: loop exit
PB: predicated region body
PF: predicated region fallthrough
CT: control target
= control target key end

     0   :  { %19 = vsyncpa [#allocation3], 0  ;;  %s9768_s0 = inlined_call_operand.vmem [shape: f32[2,64,32], index: 0, kind: input, shape index: {}]   ;;  %s9769_s1 = inlined_call_operand.hbm [shape: f32[8,64,64], index: 1, kind: input, shape index: {}]   ;;  %s9770_s2 = inlined_call_operand.hbm [shape: f32[24,32,8], index: 2, kind: input, shape index: {}]   ;;  %s9771_s3 = inlined_call_operand.vmem [shape: f32[24,1,8], index: 3, kind: input, shape index: {}]   ;;  %s9772_s4 = inlined_call_operand.vmem [shape: f32[8,8,32], index: 4, kind: input, shape index: {}]   ;;  %s9773_s5 = inlined_call_operand.vmem [shape: f32[2,1,32], index: 5, kind: input, shape index: {}]   ;;  %s9774_s6 = inlined_call_operand.vmem [shape: f32[2,1,32], index: 6, kind: input, shape index: {}, may-alias: {6,8}]   ;;  %s9775_s7 = inlined_call_operand.vmem [shape: f32[2,1,32], index: 7, kind: input, shape index: {}, may-alias: {7,9}]   ;;  %s9776_s8 = inlined_call_operand.vmem [shape: f32[2,1,32], index: 8, kind: input, shape index: {}, may-alias: {6,8}]   ;;  %s9777_s9 = inlined_call_operand.vmem [shape: f32[2,1,32], index: 9, kind: input, shape index: {}, may-alias: {7,9}]   ;;  %s9778_s10 = inlined_call_operand.vmem [shape: f32[2,32,128], index: 10, kind: input, shape index: {}]   ;;  %s9779_s11 = inlined_call_operand.vmem [shape: f32[2,1,128], index: 11, kind: input, shape index: {}]   ;;  %s9780_s12 = inlined_call_operand.vmem [shape: f32[2,128,32], index: 12, kind: input, shape index: {}]   ;;  %s9781_s13 = inlined_call_operand.vmem [shape: f32[2,1,32], index: 13, kind: input, shape index: {}]   ;;  %s9782_s14 = inlined_call_operand.vmem [shape: f32[2,64,32], index: 14, kind: output, shape index: {}]  }
   0x1   :  { %20 = vsyncpa [#allocation5], 0  ;;  %s7392_s29 = smov 0  }
   0x2 LB: > { %s367_s16 = sshll.u32 %s9769_s1, 4  ;;  %s6222_s17 = sadd.s32 4294967295, %s7310_s29   ;;  %s7310_s29 = sphi %s7392_s29, %s26_s29   ;;  %s368_s16 = int_to_ptr.hbm [resolvable:$true] %s367_s16 }
   0x3   : > { %p6224_p0 = scmp.ge.s32.totalorder %s7310_s29, 1  ;;  %p356_p1 = scmp.lt.s32.totalorder %s7310_s29, 3 }
   0x4   : > { %p6787_p2 = scmp.eq.s32.totalorder %s6222_s17, 0  ;;  %s7312_s19 = smov [#allocation2]  }
   0x5   : > { %p7403_p3 = pnand %p6224_p0, %p356_p1  ;;  %s369_s20 = sshll.u32 %s7312_s19, 4  ;;  %s370_s20 = int_to_ptr.vmem [resolvable:$true] %s369_s20 }
   0x6   : > { %s381_s23 = sshll.u32 %s9770_s2, 4  ;;  %s7313_s24 = smov [#allocation4]   ;;  %s382_s23 = int_to_ptr.hbm [resolvable:$true] %s381_s23 }
   0x7   : > { %p6780_p4 = pneg %p7403_p3  ;;  %s383_s25 = sshll.u32 %s7313_s24, 4  ;;  %s384_s25 = int_to_ptr.vmem [resolvable:$true] %s383_s25 }
   0x8   : > { %s7314_s26 = smov 128   ;;  %s7315_s27 = smov 8  }
   0x9   : > { %p6781_p5 = pnand %p6787_p2, %p6780_p4  ;;  %440 = sbr.rel (%p7403_p3) target bundleno = 7137 (0x1be1), region = 76 }
   0xb   : > { %6783 = dma.hbm_to_vmem [thread:$0]  (!%p6781_p5), %s368_s16, 8192, %s370_s20, [#allocation3], %s7314_s26, %s7314_s26, %s7315_s27  }
   0xc   : > { %6786 = dma.hbm_to_vmem [thread:$0]  (!%p6781_p5), %s382_s23, 12288, %s384_s25, [#allocation5], %s7314_s26, %s7314_s26, %s7315_s27  }
   0xe   : > { %7301 = dma.done.wait (%p6787_p2), [#allocation3], 8192  }
   0xf   : > { %7303 = vsyncadd (%p6787_p2), [#allocation3], 4294959104 }
  0x10   : > { %7305 = dma.done.wait (%p6787_p2), [#allocation5], 12288  }
  0x11   : > { %7307 = vsyncadd (%p6787_p2), [#allocation5], 4294955008  ;;  %p492_p6 = scmp.lt.s32.totalorder %s6222_s17, 1  ;;  %vm512_vm0 = vcmask 261120   ;;  %v7316_v14 = vmov 32.0   ;;  %v721_v58 = vld [vmem:[#allocation4 + $0x18] sm:$0xff] }
  0x12   : > { %6842 = vrcp.f32 %v7316_v14  ;;  %6760 = vmatpush.msra.mxu1 %v721_v58  ;;  %762 = vmatpush.msra.mxu0 %v721_v58  ;;  %v720_v59 = vld [vmem:[#allocation4 + $0x10] sm:$0xff]  ;;  %v719_v60 = vld [vmem:[#allocation4 + $0x8] sm:$0xff]  ;;  %v718_v61 = vld [vmem:[#allocation4] sm:$0xff] }
  0x13   : > { %s9797_s17 = smov (!%p492_p6, %s6222_s17), 1  ;;  %v795_v62 = vld [vmem:[#allocation4 + $0x98] sm:$0xff] }
  0x14   : > { %s6758_s28 = sshll.u32 %s9797_s17, 6  ;;  %6761 = vmatpush.msra.mxu1 %v720_v59  ;;  %763 = vmatpush.msra.mxu0 %v720_v59  ;;  %v846_v63 = vld [vmem:[#allocation4 + $0x118] sm:$0xff] }
  0x15   : > { %s7427_s16 = scalar_lea.vmem %s9768_s0, %s6758_s28  ;;  %864 = vmatpush.msra.mxu2 %v846_v63  ;;  %s501_s25 = scalar_lea.vmem %s9782_s14, %s6758_s28 }
  0x16   : > { %v509_v0 = vld [vmem:[%s7427_s16 + $0x38] sm:$0xff]  ;;  %v503_v2 = vld [vmem:[%s7427_s16 + $0x8] sm:$0xff]  ;;  %v506_v6 = vld [vmem:[%s7427_s16 + $0x20] sm:$0xff]  ;;  %6762 = vmatpush.msra.mxu1 %v719_v60  ;;  %764 = vmatpush.msra.mxu0 %v719_v60 }
  0x17   : > { %v505_v1 = vld [vmem:[%s7427_s16 + $0x18] sm:$0xff]  ;;  %v534_v3 = vsel %vm512_vm0, %v509_v0, 0.0  ;;  %v516_v5 = vsel %vm512_vm0, %v503_v2, 0.0  ;;  %v502_v7 = vld [vmem:[%s7427_s16] sm:$0xff]  ;;  %v504_v8 = vld [vmem:[%s7427_s16 + $0x10] sm:$0xff]  ;;  %v525_v9 = vsel %vm512_vm0, %v506_v6, 0.0 }
  0x18   : > { %v522_v4 = vsel %vm512_vm0, %v505_v1, 0.0  ;;  %535 = vadd.xlane.f32.xlu0 %v534_v3  ;;  %517 = vadd.xlane.f32.xlu1 %v516_v5  ;;  %v513_v10 = vsel %vm512_vm0, %v502_v7, 0.0  ;;  %v519_v11 = vsel %vm512_vm0, %v504_v8, 0.0  ;;  %v507_v12 = vld [vmem:[%s7427_s16 + $0x28] sm:$0xff]  ;;  %v6843_v15 = vpop.eup %6842  ;;  %v7461_v38 = vld [vmem:[%s7427_s16 + $0x30] sm:$0xff] }
  0x19   : > { %523 = vadd.xlane.f32.xlu2 %v522_v4  ;;  %v528_v13 = vsel %vm512_vm0, %v507_v12, 0.0  ;;  %v538_v16 = vmul.f32 32.0, %v6843_v15  ;;  %vm542_vm1 = vweird.f32 %v6843_v15  ;;  %v531_v42 = vsel %vm512_vm0, %v7461_v38, 0.0  ;;  %6763 = vmatpush.msra.mxu1 %v718_v61 }
  0x1a   : > { %765 = vmatpush.msra.mxu0 %v718_v61 }
  0x1b   : > { %v539_v17 = vsub.f32 1.0, %v538_v16  ;;  %813 = vmatpush.msrb.mxu1 %v795_v62 }
  0x1d   : > { %v540_v18 = vmul.f32 %v6843_v15, %v539_v17 }
  0x1f   : > { %v541_v19 = vadd.f32 %v6843_v15, %v540_v18 }
  0x20   : > { %514 = vadd.xlane.f32.xlu0 %v513_v10  ;;  %520 = vadd.xlane.f32.xlu1 %v519_v11  ;;  %v792_v10 = vld [vmem:[#allocation4 + $0x80] sm:$0xff] }
  0x21   : > { %526 = vadd.xlane.f32.xlu2 %v525_v9  ;;  %v7443_v20 = vsel %vm542_vm1, %v6843_v15, %v541_v19  ;;  %v843_v11 = vld [vmem:[#allocation4 + $0x100] sm:$0xff] }
  0x28   : > { %529 = vadd.xlane.f32.xlu1 %v528_v13 }
  0x8b   : > { %v536_v21 = vpop.xlane.xlu0 %535  ;;  %v518_v24 = vpop.xlane.xlu1 %517 }
  0x8c   : > { %v524_v22 = vpop.xlane.xlu2 %523  ;;  %v551_v23 = vmul.f32 %v7443_v20, %v536_v21  ;;  %v545_v25 = vmul.f32 %v7443_v20, %v518_v24 }
  0x8d   : > { %v547_v34 = vmul.f32 %v7443_v20, %v524_v22 }
  0x8e   : > { %v7447_v26 = vsub.f32 %v509_v0, %v551_v23  ;;  %v7449_v27 = vsub.f32 %v503_v2, %v545_v25  ;;  %v845_v2 = vld [vmem:[#allocation4 + $0x110] sm:$0xff] }
  0x8f   : > { %v7470_v43 = vsub.f32 %v505_v1, %v547_v34  ;;  %v794_v1 = vld [vmem:[#allocation4 + $0x90] sm:$0xff]  ;;  %865 = vmatpush.msra.mxu2 %v845_v2 }
  0x90   : > { %v567_v28 = vmul.f32 %v7447_v26, %v7447_v26  ;;  %v561_v29 = vmul.f32 %v7449_v27, %v7449_v27  ;;  %814 = vmatpush.msrb.mxu1 %v794_v1 }
  0x91   : > { %v563_v50 = vmul.f32 %v7470_v43, %v7470_v43 }
  0x92   : > { %v589_v30 = vsel %vm512_vm0, %v567_v28, 0.0  ;;  %v571_v32 = vsel %vm512_vm0, %v561_v29, 0.0 }
  0x93   : > { %590 = vadd.xlane.f32.xlu0 %v589_v30  ;;  %v515_v33 = vpop.xlane.xlu0 %514  ;;  %572 = vadd.xlane.f32.xlu1 %v571_v32  ;;  %v521_v37 = vpop.xlane.xlu1 %520  ;;  %v577_v54 = vsel %vm512_vm0, %v563_v50, 0.0  ;;  %v7524_v50 = vld [vmem:[%s9775_s7] ss:$0 sm:$0xff] }
  0x94   : > { %v527_v31 = vpop.xlane.xlu2 %526  ;;  %v544_v36 = vmul.f32 %v7443_v20, %v515_v33  ;;  %v546_v39 = vmul.f32 %v7443_v20, %v521_v37 }
  0x95   : > { %v548_v35 = vmul.f32 %v7443_v20, %v527_v31 }
  0x96   : > { %v7466_v41 = vsub.f32 %v502_v7, %v544_v36  ;;  %v7474_v45 = vsub.f32 %v504_v8, %v546_v39  ;;  %v844_v7 = vld [vmem:[#allocation4 + $0x108] sm:$0xff] }
  0x97   : > { %v7464_v40 = vsub.f32 %v506_v6, %v548_v35  ;;  %v793_v6 = vld [vmem:[#allocation4 + $0x88] sm:$0xff]  ;;  %866 = vmatpush.msra.mxu2 %v844_v7 }
  0x98   : > { %v560_v46 = vmul.f32 %v7466_v41, %v7466_v41  ;;  %v562_v51 = vmul.f32 %v7474_v45, %v7474_v45  ;;  %815 = vmatpush.msrb.mxu1 %v793_v6 }
  0x99   : > { %v564_v44 = vmul.f32 %v7464_v40, %v7464_v40  ;;  %867 = vmatpush.msra.mxu2 %v843_v11 }
  0x9a   : > { %v568_v48 = vsel %vm512_vm0, %v560_v46, 0.0  ;;  %v574_v55 = vsel %vm512_vm0, %v562_v51, 0.0  ;;  %816 = vmatpush.msrb.mxu1 %v792_v10 }
  0x9b   : > { %v580_v47 = vsel %vm512_vm0, %v564_v44, 0.0  ;;  %532 = vadd.xlane.f32.xlu0 %v531_v42  ;;  %569 = vadd.xlane.f32.xlu2 %v568_v48  ;;  %v530_v49 = vpop.xlane.xlu1 %529 }
  0x9c   : > { %581 = vadd.xlane.f32.xlu1 %v580_v47  ;;  %v549_v52 = vmul.f32 %v7443_v20, %v530_v49  ;;  %v7518_v47 = vld [vmem:[%s9774_s6] ss:$0 sm:$0xff] }
  0x9e   : > { %v7485_v53 = vsub.f32 %v507_v12, %v549_v52 }
  0xa0   : > { %v565_v56 = vmul.f32 %v7485_v53, %v7485_v53 }
  0xa2   : > { %v583_v57 = vsel %vm512_vm0, %v565_v56, 0.0 }
  0xa3   : > { %578 = vadd.xlane.f32.xlu0 %v577_v54  ;;  %575 = vadd.xlane.f32.xlu2 %v574_v55 }
  0xab   : > { %584 = vadd.xlane.f32.xlu2 %v583_v57 }
 0x106   : > { %v591_v0 = vpop.xlane.xlu0 %590  ;;  %v573_v3 = vpop.xlane.xlu1 %572 }
 0x107   : > { %v599_v4 = vmul.f32 %v591_v0, %v7443_v20  ;;  %v593_v5 = vmul.f32 %v573_v3, %v7443_v20 }
 0x109   : > { %v607_v8 = vadd.f32 1e-05, %v599_v4  ;;  %v7494_v9 = vadd.f32 1e-05, %v593_v5 }
 0x10b   : > { %6844 = vrsqrt.f32 %v607_v8  ;;  %vm684_vm3 = vweird.f32 %v607_v8  ;;  %vm624_vm7 = vweird.f32 %v7494_v9 }
 0x10c   : > { %6846 = vrsqrt.f32 %v7494_v9 }
 0x10e   : > { %v570_v12 = vpop.xlane.xlu2 %569  ;;  %v533_v13 = vpop.xlane.xlu0 %532 }
 0x10f   : > { %v592_v14 = vmul.f32 %v570_v12, %v7443_v20  ;;  %v550_v15 = vmul.f32 %v7443_v20, %v533_v13  ;;  %v582_v25 = vpop.xlane.xlu1 %581 }
 0x110   : > { %v596_v37 = vmul.f32 %v582_v25, %v7443_v20 }
 0x111   : > { %v6845_v16 = vpop.eup %6844  ;;  %v600_v17 = vadd.f32 1e-05, %v592_v14  ;;  %v7500_v18 = vsub.f32 %v7461_v38, %v550_v15 }
 0x112   : > { %v7502_v19 = vpop.eup %6846  ;;  %v679_v21 = vmul.f32 %v6845_v16, %v607_v8  ;;  %vm685_vm2 = vweird.f32 %v6845_v16  ;;  %v7527_v52 = vadd.f32 1e-05, %v596_v37 }
 0x113   : > { %v619_v22 = vmul.f32 %v7502_v19, %v7494_v9  ;;  %6848 = vrsqrt.f32 %v600_v17  ;;  %v566_v24 = vmul.f32 %v7500_v18, %v7500_v18  ;;  %vm686_vm4 = vmor %vm684_vm3, %vm685_vm2  ;;  %vm614_vm5 = vweird.f32 %v600_v17 }
 0x114   : > { %v680_v23 = vmul.f32 %v6845_v16, %v679_v21  ;;  %vm625_vm8 = vweird.f32 %v7502_v19  ;;  %vm654_vm2 = vweird.f32 %v7527_v52 }
 0x115   : > { %v620_v28 = vmul.f32 %v7502_v19, %v619_v22  ;;  %v586_v31 = vsel %vm512_vm0, %v566_v24, 0.0  ;;  %vm626_vm10 = vmor %vm624_vm7, %vm625_vm8 }
 0x116   : > { %v681_v29 = vmul.f32 0.5, %v680_v23  ;;  %v576_v30 = vpop.xlane.xlu2 %575  ;;  %v579_v32 = vpop.xlane.xlu0 %578  ;;  %587 = vadd.xlane.f32.xlu0 %v586_v31 }
 0x117   : > { %v594_v33 = vmul.f32 %v576_v30, %v7443_v20  ;;  %v595_v34 = vmul.f32 %v579_v32, %v7443_v20  ;;  %v621_v42 = vmul.f32 0.5, %v620_v28 }
 0x118   : > { %v682_v35 = vsub.f32 1.5, %v681_v29 }
 0x119   : > { %v6849_v36 = vpop.eup %6848  ;;  %v602_v38 = vadd.f32 1e-05, %v594_v33  ;;  %v7513_v39 = vadd.f32 1e-05, %v595_v34  ;;  %v622_v54 = vsub.f32 1.5, %v621_v42 }
 0x11a   : > { %v683_v44 = vmul.f32 %v6845_v16, %v682_v35  ;;  %v609_v46 = vmul.f32 %v6849_v36, %v600_v17  ;;  %vm615_vm6 = vweird.f32 %v6849_v36 }
 0x11b   : > { %6850 = vrsqrt.f32 %v602_v38  ;;  %vm616_vm9 = vmor %vm614_vm5, %vm615_vm6  ;;  %v623_v62 = vmul.f32 %v7502_v19, %v622_v54  ;;  %vm634_vm11 = vweird.f32 %v602_v38  ;;  %vm644_vm14 = vweird.f32 %v7513_v39 }
 0x11c   : > { %v687_v48 = vsel %vm686_vm4, %v6845_v16, %v683_v44  ;;  %v610_v49 = vmul.f32 %v6849_v36, %v609_v46  ;;  %6852 = vrsqrt.f32 %v7513_v39 }
 0x11d   : > { %v695_v51 = vmul.f32 %v687_v48, %v7447_v26  ;;  %6854 = vrsqrt.f32 %v7527_v52  ;;  %v627_v6 = vsel %vm626_vm10, %v7502_v19, %v623_v62  ;;  %v1198_v62 = vld [vmem:[#allocation4 + $0xa0] sm:$0xff] }
 0x11e   : > { %v611_v55 = vmul.f32 0.5, %v610_v49  ;;  %v585_v56 = vpop.xlane.xlu2 %584  ;;  %v689_v12 = vmul.f32 %v627_v6, %v7449_v27 }
 0x11f   : > { %v706_v57 = vmul.f32 %v7518_v47, %v695_v51  ;;  %v597_v26 = vmul.f32 %v585_v56, %v7443_v20  ;;  %v1201_v56 = vld [vmem:[#allocation4 + $0xb8] sm:$0xff] }
 0x120   : > { %v612_v58 = vsub.f32 1.5, %v611_v55  ;;  %v700_v27 = vmul.f32 %v7518_v47, %v689_v12  ;;  %v1150_v55 = vld [vmem:[#allocation4 + $0x38] sm:$0xff]  ;;  %1219 = vmatpush.msrb.mxu2 %v1201_v56 }
 0x121   : > { %v6851_v59 = vpop.eup %6850  ;;  %v7533_v60 = vadd.f32 %v7524_v50, %v706_v57  ;;  %v605_v5 = vadd.f32 1e-05, %v597_v26  ;;  %v1149_v57 = vld [vmem:[#allocation4 + $0x30] sm:$0xff]  ;;  %v1199_v26 = vld [vmem:[#allocation4 + $0xa8] sm:$0xff] }
 0x122   : > { %v6853_v61 = vpop.eup %6852  ;;  %v613_v63 = vmul.f32 %v6849_v36, %v612_v58  ;;  %v629_v0 = vmul.f32 %v6851_v59, %v602_v38  ;;  %vm635_vm12 = vweird.f32 %v6851_v59  ;;  %v7558_v22 = vadd.f32 %v7524_v50, %v700_v27  ;;  %v1200_v58 = vld [vmem:[#allocation4 + $0xb0] sm:$0xff] }
 0x123   : > { %v639_v1 = vmul.f32 %v6853_v61, %v7513_v39  ;;  %6242 = vmatmul.msk.f32.vlgmr.msra.gmra.mxu1 %vm512_vm0, %v7533_v60  ;;  %v6855_v9 = vpop.eup %6854  ;;  %6856 = vrsqrt.f32 %v605_v5  ;;  %vm636_vm13 = vmor %vm634_vm11, %vm635_vm12  ;;  %vm645_vm15 = vweird.f32 %v6853_v61  ;;  %vm664_vm5 = vweird.f32 %v605_v5  ;;  %1220 = vmatpush.msrb.mxu2 %v1200_v58 }
 0x124   : > { %v617_v2 = vsel %vm616_vm9, %v6849_v36, %v613_v63  ;;  %v630_v3 = vmul.f32 %v6851_v59, %v629_v0  ;;  %v649_v14 = vmul.f32 %v6855_v9, %v7527_v52  ;;  %vm646_vm1 = vmor %vm644_vm14, %vm645_vm15  ;;  %vm655_vm3 = vweird.f32 %v6855_v9  ;;  %1168 = vmatpush.msra.mxu1 %v1150_v55 }
 0x125   : > { %v688_v4 = vmul.f32 %v617_v2, %v7466_v41  ;;  %v640_v8 = vmul.f32 %v6853_v61, %v639_v1  ;;  %vm656_vm4 = vmor %vm654_vm2, %vm655_vm3  ;;  %1221 = vmatpush.msrb.mxu2 %v1199_v26  ;;  %vm901_vm11 = vcmask 64512   ;;  %vm991_vm12 = vcmask 523264  }
 0x126   : > { %v631_v7 = vmul.f32 0.5, %v630_v3  ;;  %v650_v16 = vmul.f32 %v6855_v9, %v649_v14  ;;  %1169 = vmatpush.msra.mxu1 %v1149_v57 }
 0x127   : > { %v699_v10 = vmul.f32 %v7518_v47, %v688_v4  ;;  %v641_v15 = vmul.f32 0.5, %v640_v8  ;;  %1222 = vmatpush.msrb.mxu2 %v1198_v62 }
 0x128   : > { %v632_v11 = vsub.f32 1.5, %v631_v7  ;;  %v651_v24 = vmul.f32 0.5, %v650_v16 }
 0x129   : > { %v7546_v13 = vadd.f32 %v7524_v50, %v699_v10  ;;  %v642_v19 = vsub.f32 1.5, %v641_v15  ;;  %v6857_v21 = vpop.eup %6856 }
 0x12a   : > { %v633_v41 = vmul.f32 %v6851_v59, %v632_v11  ;;  %v659_v28 = vmul.f32 %v6857_v21, %v605_v5  ;;  %v652_v30 = vsub.f32 1.5, %v651_v24  ;;  %vm665_vm6 = vweird.f32 %v6857_v21 }
 0x12b   : > { %6235 = vmatmul.msk.f32.vlgmr.msra.gmra.mxu0 %vm512_vm0, %v7546_v13  ;;  %6244 = vmatmul.msk.f32.vlgmr.msrb.gmra.mxu1 %vm512_vm0, %v7546_v13  ;;  %v643_v25 = vmul.f32 %v6853_v61, %v642_v19  ;;  %vm666_vm7 = vmor %vm664_vm5, %vm665_vm6 }
 0x12c   : > { %6253 = vmatmul.msk.f32.vlgmr.msra.gmra.mxu2 %vm512_vm0, %v7546_v13  ;;  %v637_v17 = vsel %vm636_vm13, %v6851_v59, %v633_v41  ;;  %v660_v32 = vmul.f32 %v6857_v21, %v659_v28  ;;  %v653_v34 = vmul.f32 %v6855_v9, %v652_v30  ;;  %v1148_v59 = vld [vmem:[#allocation4 + $0x28] sm:$0xff] }
 0x12d   : > { %v690_v23 = vmul.f32 %v637_v17, %v7474_v45  ;;  %v647_v31 = vsel %vm646_vm1, %v6853_v61, %v643_v25  ;;  %v1147_v61 = vld [vmem:[#allocation4 + $0x20] sm:$0xff]  ;;  %1170 = vmatpush.msra.mxu1 %v1148_v59 }
 0x12e   : > { %v691_v33 = vmul.f32 %v647_v31, %v7470_v43  ;;  %v661_v35 = vmul.f32 0.5, %v660_v32  ;;  %v657_v37 = vsel %vm656_vm4, %v6855_v9, %v653_v34 }
 0x12f   : > { %v701_v29 = vmul.f32 %v7518_v47, %v690_v23  ;;  %v692_v43 = vmul.f32 %v657_v37, %v7464_v40  ;;  %1171 = vmatpush.msra.mxu1 %v1147_v61 }
 0x130   : > { %v702_v36 = vmul.f32 %v7518_v47, %v691_v33  ;;  %v662_v38 = vsub.f32 1.5, %v661_v35 }
 0x131   : > { %v7570_v45 = vadd.f32 %v7524_v50, %v701_v29  ;;  %v703_v44 = vmul.f32 %v7518_v47, %v692_v43 }
 0x132   : > { %v7582_v39 = vadd.f32 %v7524_v50, %v702_v36  ;;  %v663_v42 = vmul.f32 %v6857_v21, %v662_v38 }
 0x133   : > { %6236 = vmatmul.msk.f32.gmra.mxu0 %vm512_vm0, %v7558_v22  ;;  %6245 = vmatmul.msk.f32.gmra.mxu1 %vm512_vm0, %v7558_v22  ;;  %v7592_v48 = vadd.f32 %v7524_v50, %v703_v44 }
 0x134   : > { %6254 = vmatmul.msk.f32.gmra.mxu2 %vm512_vm0, %v7558_v22  ;;  %v667_v46 = vsel %vm666_vm7, %v6857_v21, %v663_v42  ;;  %v6807_v21 = vld [vmem:[%s9771_s3 + $0x4] ss:$0 sm:$0xff]  ;;  %v6808_v42 = vld [vmem:[%s9771_s3 + $0x8] ss:$0 sm:$0xff] }
 0x135   : > { %v693_v40 = vmul.f32 %v667_v46, %v7485_v53  ;;  %v6806_v46 = vld [vmem:[%s9771_s3] ss:$0 sm:$0xff] }
 0x137   : > { %v704_v49 = vmul.f32 %v7518_v47, %v693_v40 }
 0x139   : > { %v7603_v51 = vadd.f32 %v7524_v50, %v704_v49 }
 0x13b   : > { %6237 = vmatmul.msk.f32.gmra.mxu0 %vm512_vm0, %v7570_v45  ;;  %6246 = vmatmul.msk.f32.gmra.mxu1 %vm512_vm0, %v7570_v45 }
 0x13c   : > { %6255 = vmatmul.msk.f32.gmra.mxu2 %vm512_vm0, %v7570_v45 }
 0x143   : > { %6238 = vmatmul.msk.f32.gmra.mxu0 %vm512_vm0, %v7582_v39  ;;  %6247 = vmatmul.msk.f32.gmra.mxu1 %vm512_vm0, %v7582_v39 }
 0x144   : > { %6256 = vmatmul.msk.f32.gmra.mxu2 %vm512_vm0, %v7582_v39 }
 0x14b   : > { %6239 = vmatmul.msk.f32.gmra.mxu0 %vm512_vm0, %v7592_v48  ;;  %6248 = vmatmul.msk.f32.gmra.mxu1 %vm512_vm0, %v7592_v48 }
 0x14c   : > { %6257 = vmatmul.msk.f32.gmra.mxu2 %vm512_vm0, %v7592_v48 }
 0x153   : > { %6240 = vmatmul.msk.f32.gmra.mxu0 %vm512_vm0, %v7603_v51  ;;  %6249 = vmatmul.msk.f32.gmra.mxu1 %vm512_vm0, %v7603_v51 }
 0x154   : > { %6258 = vmatmul.msk.f32.gmra.mxu2 %vm512_vm0, %v7603_v51 }
 0x189   : > { %v588_v53 = vpop.xlane.xlu0 %587 }
 0x18a   : > { %v598_v52 = vmul.f32 %v588_v53, %v7443_v20 }
 0x18c   : > { %v606_v54 = vadd.f32 1e-05, %v598_v52 }
 0x18e   : > { %6858 = vrsqrt.f32 %v606_v54  ;;  %vm674_vm9 = vweird.f32 %v606_v54 }
 0x194   : > { %v6859_v63 = vpop.eup %6858 }
 0x195   : > { %v669_v0 = vmul.f32 %v6859_v63, %v606_v54  ;;  %vm675_vm8 = vweird.f32 %v6859_v63 }
 0x196   : > { %vm676_vm10 = vmor %vm674_vm9, %vm675_vm8 }
 0x197   : > { %v670_v1 = vmul.f32 %v6859_v63, %v669_v0  ;;  %v1251_v0 = vld [vmem:[#allocation4 + $0x130] sm:$0xff] }
 0x199   : > { %v671_v2 = vmul.f32 0.5, %v670_v1 }
 0x19b   : > { %v672_v3 = vsub.f32 1.5, %v671_v2 }
 0x19d   : > { %v673_v4 = vmul.f32 %v6859_v63, %v672_v3 }
 0x19f   : > { %v677_v5 = vsel %vm676_vm10, %v6859_v63, %v673_v4  ;;  %v1252_v63 = vld [vmem:[#allocation4 + $0x138] sm:$0xff]  ;;  %v1250_v4 = vld [vmem:[#allocation4 + $0x128] sm:$0xff] }
 0x1a0   : > { %v694_v6 = vmul.f32 %v677_v5, %v7500_v18  ;;  %v7649_v18 = vpop.f32.mrf.mxu1  ;;  %v1249_v5 = vld [vmem:[#allocation4 + $0x120] sm:$0xff] }
 0x1a2   : > { %v705_v7 = vmul.f32 %v7518_v47, %v694_v6 }
 0x1a4   : > { %v7615_v8 = vadd.f32 %v7524_v50, %v705_v7 }
 0x1a6   : > { %6241 = vmatmul.msk.f32.gmra.mxu0 %vm512_vm0, %v7615_v8  ;;  %6250 = vmatmul.msk.f32.gmra.mxu1 %vm512_vm0, %v7615_v8 }
 0x1a7   : > { %6259 = vmatmul.msk.f32.gmra.mxu2 %vm512_vm0, %v7615_v8 }
 0x1a8   : > { %v818_v47 = vpop.f32.mrf.mxu1  ;;  %v767_v28 = vpop.f32.mrf.mxu0 }
 0x1a9   : > { %v819_v44 = vadd.f32 %v6807_v21, %v818_v47  ;;  %v768_v53 = vadd.f32 %v6806_v46, %v767_v28 }
 0x1ae   : > { %6251 = vmatmul.msk.f32.gmra.mxu1 %vm512_vm0, %v7533_v60 }
 0x1af   : > { %6260 = vmatmul.msk.f32.gmra.mxu2 %vm512_vm0, %v7533_v60  ;;  %v7661_v50 = vpop.f32.mrf.mxu2 }
 0x1b0   : > { %v821_v9 = vpop.f32.mrf.mxu1  ;;  %v770_v32 = vpop.f32.mrf.mxu0  ;;  %v870_v3 = vadd.f32 %v6808_v42, %v7661_v50  ;;  %v6810_v50 = vld [vmem:[%s9771_s3 + $0x5] ss:$0 sm:$0xff] }
 0x1b1   : > { %v822_v43 = vadd.f32 %v6807_v21, %v821_v9  ;;  %v771_v26 = vadd.f32 %v6806_v46, %v770_v32 }
 0x1b6   : > { %6286 = vmatmul.msk.f32.vlgmr.msra.gmra.mxu1 %vm512_vm0, %v7546_v13 }
 0x1b7   : > { %6295 = vmatmul.msk.f32.vlgmr.msrb.gmra.mxu2 %vm512_vm0, %v7546_v13  ;;  %v7663_v10 = vpop.f32.mrf.mxu2 }
 0x1b8   : > { %v824_v11 = vpop.f32.mrf.mxu1  ;;  %v773_v37 = vpop.f32.mrf.mxu0  ;;  %v873_v1 = vadd.f32 %v6808_v42, %v7663_v10 }
 0x1b9   : > { %v825_v36 = vadd.f32 %v6807_v21, %v824_v11  ;;  %v774_v52 = vadd.f32 %v6806_v46, %v773_v37 }
 0x1be   : > { %6287 = vmatmul.msk.f32.gmra.mxu1 %vm512_vm0, %v7558_v22 }
 0x1bf   : > { %6296 = vmatmul.msk.f32.gmra.mxu2 %vm512_vm0, %v7558_v22  ;;  %v875_v12 = vpop.f32.mrf.mxu2 }
 0x1c0   : > { %v827_v14 = vpop.f32.mrf.mxu1  ;;  %v776_v54 = vpop.f32.mrf.mxu0  ;;  %v876_v62 = vadd.f32 %v6808_v42, %v875_v12 }
 0x1c1   : > { %v828_v35 = vadd.f32 %v6807_v21, %v827_v14  ;;  %v777_v61 = vadd.f32 %v6806_v46, %v776_v54  ;;  %v898_v54 = vld [vmem:[#allocation2 + $0x28] sm:$0xff] }
 0x1c6   : > { %6288 = vmatmul.msk.f32.gmra.mxu1 %vm512_vm0, %v7570_v45 }
 0x1c7   : > { %6297 = vmatmul.msk.f32.gmra.mxu2 %vm512_vm0, %v7570_v45  ;;  %v878_v41 = vpop.f32.mrf.mxu2 }
 0x1c8   : > { %v830_v15 = vpop.f32.mrf.mxu1  ;;  %v879_v58 = vadd.f32 %v6808_v42, %v878_v41  ;;  %v779_v2 = vpop.f32.mrf.mxu0 }
 0x1c9   : > { %v831_v33 = vadd.f32 %v6807_v21, %v830_v15  ;;  %v780_v7 = vadd.f32 %v6806_v46, %v779_v2  ;;  %v789_v15 = vadd.f32 %v6806_v46, %v7649_v18 }
 0x1ce   : > { %6289 = vmatmul.msk.f32.gmra.mxu1 %vm512_vm0, %v7582_v39 }
 0x1cf   : > { %6298 = vmatmul.msk.f32.gmra.mxu2 %vm512_vm0, %v7582_v39  ;;  %v881_v27 = vpop.f32.mrf.mxu2 }
 0x1d0   : > { %v833_v16 = vpop.f32.mrf.mxu1  ;;  %v882_v57 = vadd.f32 %v6808_v42, %v881_v27  ;;  %v782_v47 = vpop.f32.mrf.mxu0 }
 0x1d1   : > { %v834_v31 = vadd.f32 %v6807_v21, %v833_v16  ;;  %v783_v11 = vadd.f32 %v6806_v46, %v782_v47 }
 0x1d6   : > { %6290 = vmatmul.msk.f32.gmra.mxu1 %vm512_vm0, %v7592_v48 }
 0x1d7   : > { %6299 = vmatmul.msk.f32.gmra.mxu2 %vm512_vm0, %v7592_v48  ;;  %v884_v17 = vpop.f32.mrf.mxu2 }
 0x1d8   : > { %v885_v56 = vadd.f32 %v6808_v42, %v884_v17 }
 0x1de   : > { %6291 = vmatmul.msk.f32.gmra.mxu1 %vm512_vm0, %v7603_v51 }
 0x1df   : > { %6300 = vmatmul.msk.f32.gmra.mxu2 %vm512_vm0, %v7603_v51 }
 0x1e6   : > { %6292 = vmatmul.msk.f32.gmra.mxu1 %vm512_vm0, %v7615_v8 }
 0x1e7   : > { %6301 = vmatmul.msk.f32.gmra.mxu2 %vm512_vm0, %v7615_v8 }
 0x1ee   : > { %6293 = vmatmul.msk.f32.gmra.mxu1 %vm512_vm0, %v7533_v60 }
 0x1ef   : > { %6302 = vmatmul.msk.f32.gmra.mxu2 %vm512_vm0, %v7533_v60 }
 0x223   : > { %v836_v19 = vpop.f32.mrf.mxu1  ;;  %v785_v10 = vpop.f32.mrf.mxu0 }
 0x224   : > { %v837_v29 = vadd.f32 %v6807_v21, %v836_v19  ;;  %v786_v14 = vadd.f32 %v6806_v46, %v785_v10 }
 0x22a   : > { %v887_v23 = vpop.f32.mrf.mxu2 }
 0x22b   : > { %v839_v24 = vpop.f32.mrf.mxu1  ;;  %v888_v55 = vadd.f32 %v6808_v42, %v887_v23 }
 0x22c   : > { %v840_v25 = vadd.f32 %v6807_v21, %v839_v24 }
 0x22e   : > { %6261 = vmatpush.xpose.msk.msrb.mxu0 %vm901_vm11, %v840_v25  ;;  %6764 = vmatpush.xpose.msk.msra.mxu3 %vm901_vm11, %v840_v25  ;;  %v893_v25 = vld [vmem:[#allocation2] sm:$0xff] }
 0x232   : > { %v890_v30 = vpop.f32.mrf.mxu2  ;;  %6262 = vmatpush.xpose.msk.msrb.mxu0 %vm901_vm11, %v837_v29  ;;  %6765 = vmatpush.xpose.msk.msra.mxu3 %vm901_vm11, %v837_v29 }
 0x233   : > { %v891_v40 = vadd.f32 %v6808_v42, %v890_v30 }
 0x236   : > { %6263 = vmatpush.xpose.msk.msrb.mxu0 %vm901_vm11, %v834_v31  ;;  %6766 = vmatpush.xpose.msk.msra.mxu3 %vm901_vm11, %v834_v31  ;;  %v895_v31 = vld [vmem:[#allocation2 + $0x10] sm:$0xff] }
 0x23a   : > { %v7674_v34 = vpop.f32.mrf.mxu2  ;;  %6264 = vmatpush.xpose.msk.msrb.mxu0 %vm901_vm11, %v831_v33  ;;  %6767 = vmatpush.xpose.msk.msra.mxu3 %vm901_vm11, %v831_v33  ;;  %v894_v33 = vld [vmem:[#allocation2 + $0x8] sm:$0xff] }
 0x23b   : > { %v1225_v24 = vadd.f32 %v6810_v50, %v7674_v34 }
 0x23e   : > { %6265 = vmatpush.xpose.msk.msrb.mxu0 %vm901_vm11, %v828_v35  ;;  %6768 = vmatpush.xpose.msk.msra.mxu3 %vm901_vm11, %v828_v35 }
 0x242   : > { %v7680_v38 = vpop.f32.mrf.mxu2  ;;  %6266 = vmatpush.xpose.msk.msrb.mxu0 %vm901_vm11, %v825_v36  ;;  %6769 = vmatpush.xpose.msk.msra.mxu3 %vm901_vm11, %v825_v36 }
 0x243   : > { %v1228_v23 = vadd.f32 %v6810_v50, %v7680_v38 }
 0x246   : > { %6267 = vmatpush.xpose.msk.msrb.mxu0 %vm901_vm11, %v822_v43  ;;  %6770 = vmatpush.xpose.msk.msra.mxu3 %vm901_vm11, %v822_v43  ;;  %v896_v43 = vld [vmem:[#allocation2 + $0x18] sm:$0xff] }
 0x24a   : > { %v7692_v49 = vpop.f32.mrf.mxu2  ;;  %6268 = vmatpush.xpose.msk.msrb.mxu0 %vm901_vm11, %v819_v44  ;;  %6771 = vmatpush.xpose.msk.msra.mxu3 %vm901_vm11, %v819_v44 }
 0x24b   : > { %v1231_v18 = vadd.f32 %v6810_v50, %v7692_v49 }
 0x24d   : > { %6269 = vmatmul.msk.f32.vlgmr.msrb.gmra.mxu0 %vm901_vm11, %v768_v53  ;;  %6271 = vmatmul.msk.f32.vlgmr.msra.gmra.mxu3 %vm901_vm11, %v774_v52 }
 0x24e   : > { %1112 = vmatpush.msra.mxu0 %v891_v40  ;;  %1270 = vmatpush.msrb.mxu3 %v1252_v63  ;;  %v897_v40 = vld [vmem:[#allocation2 + $0x20] sm:$0xff] }
 0x250   : > { %1113 = vmatpush.msra.mxu0 %v888_v55  ;;  %1271 = vmatpush.msrb.mxu3 %v1251_v0 }
 0x252   : > { %1114 = vmatpush.msra.mxu0 %v885_v56  ;;  %v1233_v59 = vpop.f32.mrf.mxu2  ;;  %1272 = vmatpush.msrb.mxu3 %v1250_v4 }
 0x253   : > { %v1234_v21 = vadd.f32 %v6810_v50, %v1233_v59 }
 0x254   : > { %1115 = vmatpush.msra.mxu0 %v882_v57  ;;  %1273 = vmatpush.msrb.mxu3 %v1249_v5 }
 0x255   : > { %6270 = vmatmul.msk.f32.gmra.mxu0 %vm901_vm11, %v771_v26  ;;  %6272 = vmatmul.msk.f32.gmra.mxu3 %vm901_vm11, %v777_v61 }
 0x256   : > { %1116 = vmatpush.msra.mxu0 %v879_v58  ;;  %v899_v58 = vld [vmem:[#allocation2 + $0x30] sm:$0xff] }
 0x258   : > { %1117 = vmatpush.msra.mxu0 %v876_v62  ;;  %v900_v62 = vld [vmem:[#allocation2 + $0x38] sm:$0xff] }
 0x25a   : > { %1118 = vmatpush.msra.mxu0 %v873_v1  ;;  %v1236_v6 = vpop.f32.mrf.mxu2 }
 0x25b   : > { %v1237_v19 = vadd.f32 %v6810_v50, %v1236_v6 }
 0x25c   : > { %1119 = vmatpush.msra.mxu0 %v870_v3 }
 0x25d   : > { %6273 = vmatmul.msk.f32.gmra.mxu3 %vm901_vm11, %v780_v7 }
 0x262   : > { %v1239_v9 = vpop.f32.mrf.mxu2 }
 0x263   : > { %v1240_v17 = vadd.f32 %v6810_v50, %v1239_v9  ;;  %v6811_v9 = vld [vmem:[%s9771_s3 + $0x9] ss:$0 sm:$0xff] }
 0x265   : > { %6274 = vmatmul.msk.f32.gmra.mxu3 %vm901_vm11, %v783_v11 }
 0x26a   : > { %v1242_v12 = vpop.f32.mrf.mxu2 }
 0x26b   : > { %v1243_v16 = vadd.f32 %v6810_v50, %v1242_v12 }
 0x26d   : > { %6275 = vmatmul.msk.f32.gmra.mxu3 %vm901_vm11, %v786_v14 }
 0x272   : > { %v1245_v41 = vpop.f32.mrf.mxu2 }
 0x273   : > { %v1246_v27 = vadd.f32 %v6810_v50, %v1245_v41 }
 0x275   : > { %6312 = vmatpush.xpose.msk.msrb.mxu0 %vm901_vm11, %v1246_v27  ;;  %6276 = vmatmul.msk.f32.gmra.mxu3 %vm901_vm11, %v789_v15 }
 0x279   : > { %6313 = vmatpush.xpose.msk.msrb.mxu0 %vm901_vm11, %v1243_v16 }
 0x27d   : > { %6314 = vmatpush.xpose.msk.msrb.mxu0 %vm901_vm11, %v1240_v17  ;;  %6304 = vmatmul.msk.f32.vlgmr.msrb.gmra.mxu3 %vm512_vm0, %v7546_v13 }
 0x281   : > { %6315 = vmatpush.xpose.msk.msrb.mxu0 %vm901_vm11, %v1237_v19 }
 0x285   : > { %6316 = vmatpush.xpose.msk.msrb.mxu0 %vm901_vm11, %v1234_v21  ;;  %6305 = vmatmul.msk.f32.gmra.mxu3 %vm512_vm0, %v7558_v22 }
 0x289   : > { %6317 = vmatpush.xpose.msk.msrb.mxu0 %vm901_vm11, %v1231_v18 }
 0x28d   : > { %6318 = vmatpush.xpose.msk.msrb.mxu0 %vm901_vm11, %v1228_v23  ;;  %6306 = vmatmul.msk.f32.gmra.mxu3 %vm512_vm0, %v7570_v45 }
 0x291   : > { %6319 = vmatpush.xpose.msk.msrb.mxu0 %vm901_vm11, %v1225_v24 }
 0x295   : > { %6307 = vmatmul.msk.f32.gmra.mxu3 %vm512_vm0, %v7582_v39 }
 0x29d   : > { %6308 = vmatmul.msk.f32.gmra.mxu3 %vm512_vm0, %v7592_v48 }
 0x2a5   : > { %6309 = vmatmul.msk.f32.gmra.mxu3 %vm512_vm0, %v7603_v51 }
 0x2ad   : > { %6310 = vmatmul.msk.f32.gmra.mxu3 %vm512_vm0, %v7615_v8 }
 0x2b5   : > { %6311 = vmatmul.msk.f32.gmra.mxu3 %vm512_vm0, %v7533_v60 }
 0x2ca   : > { %v967_v28 = vpop.f32.mrf.mxu0 }
 0x2cb   : > { %v968_v29 = vadd.f32 %v967_v28, %v893_v25 }
 0x2cd   : > { %v992_v30 = vsel %vm991_vm12, %v968_v29, -inf }
 0x2ce   : > { %993 = vmax.xlane.f32.xlu1 %v992_v30 }
 0x2d0   : > { %v973_v32 = vpop.f32.mrf.mxu3 }
 0x2d1   : > { %v7738_v34 = vadd.f32 %v973_v32, %v895_v31 }
 0x2d2   : > { %v970_v35 = vpop.f32.mrf.mxu0 }
 0x2d3   : > { %v7740_v36 = vadd.f32 %v970_v35, %v894_v33  ;;  %v998_v37 = vsel %vm991_vm12, %v7738_v34, -inf }
 0x2d4   : > { %999 = vmax.xlane.f32.xlu0 %v998_v37 }
 0x2d5   : > { %v995_v38 = vsel %vm991_vm12, %v7740_v36, -inf }
 0x2d6   : > { %996 = vmax.xlane.f32.xlu2 %v995_v38 }
 0x2d8   : > { %v976_v42 = vpop.f32.mrf.mxu3 }
 0x2d9   : > { %v7746_v44 = vadd.f32 %v976_v42, %v896_v43 }
 0x2db   : > { %v1001_v46 = vsel %vm991_vm12, %v7746_v44, -inf }
 0x2dc   : > { %1002 = vmax.xlane.f32.xlu1 %v1001_v46 }
 0x2e0   : > { %v979_v49 = vpop.f32.mrf.mxu3 }
 0x2e1   : > { %v7750_v53 = vadd.f32 %v979_v49, %v897_v40 }
 0x2e3   : > { %v1004_v52 = vsel %vm991_vm12, %v7750_v53, -inf }
 0x2e4   : > { %1005 = vmax.xlane.f32.xlu2 %v1004_v52 }
 0x2e8   : > { %v982_v55 = vpop.f32.mrf.mxu3 }
 0x2e9   : > { %v7754_v56 = vadd.f32 %v982_v55, %v898_v54 }
 0x2eb   : > { %v1007_v57 = vsel %vm991_vm12, %v7754_v56, -inf }
 0x2ec   : > { %1008 = vmax.xlane.f32.xlu0 %v1007_v57 }
 0x2f0   : > { %v985_v59 = vpop.f32.mrf.mxu3 }
 0x2f1   : > { %v7758_v26 = vadd.f32 %v985_v59, %v899_v58 }
 0x2f3   : > { %v1010_v61 = vsel %vm991_vm12, %v7758_v26, -inf }
 0x2f4   : > { %1011 = vmax.xlane.f32.xlu1 %v1010_v61 }
 0x2f8   : > { %v988_v63 = vpop.f32.mrf.mxu3 }
 0x2f9   : > { %v7762_v0 = vadd.f32 %v988_v63, %v900_v62 }
 0x2fb   : > { %v1013_v1 = vsel %vm991_vm12, %v7762_v0, -inf }
 0x2fc   : > { %1014 = vmax.xlane.f32.xlu0 %v1013_v1 }
 0x300   : > { %v1275_v2 = vpop.f32.mrf.mxu3 }
 0x301   : > { %v1276_v21 = vadd.f32 %v6811_v9, %v1275_v2 }
 0x308   : > { %v1278_v3 = vpop.f32.mrf.mxu3 }
 0x309   : > { %v1279_v19 = vadd.f32 %v6811_v9, %v1278_v3 }
 0x310   : > { %v1281_v4 = vpop.f32.mrf.mxu3 }
 0x311   : > { %v1282_v16 = vadd.f32 %v6811_v9, %v1281_v4 }
 0x318   : > { %v1284_v5 = vpop.f32.mrf.mxu3 }
 0x319   : > { %v1285_v41 = vadd.f32 %v6811_v9, %v1284_v5 }
 0x320   : > { %v1287_v6 = vpop.f32.mrf.mxu3 }
 0x321   : > { %v1288_v50 = vadd.f32 %v6811_v9, %v1287_v6 }
 0x328   : > { %v1290_v7 = vpop.f32.mrf.mxu3 }
 0x329   : > { %v1291_v14 = vadd.f32 %v6811_v9, %v1290_v7 }
 0x330   : > { %v1293_v47 = vpop.f32.mrf.mxu3 }
 0x331   : > { %v1294_v12 = vadd.f32 %v6811_v9, %v1293_v47 }
 0x338   : > { %v1296_v11 = vpop.f32.mrf.mxu3 }
 0x339   : > { %v1297_v10 = vadd.f32 %v6811_v9, %v1296_v11 }
 0x33b   : > { %1517 = vmatpush.msrb.mxu1 %v1297_v10 }
 0x33d   : > { %1518 = vmatpush.msrb.mxu1 %v1294_v12 }
 0x33f   : > { %1519 = vmatpush.msrb.mxu1 %v1291_v14 }
 0x341   : > { %v994_v15 = vpop.xlane.xlu1 %993  ;;  %1520 = vmatpush.msrb.mxu1 %v1288_v50 }
 0x342   : > { %v1016_v27 = vsub.f32 %v968_v29, %v994_v15 }
 0x343   : > { %1521 = vmatpush.msrb.mxu1 %v1285_v41 }
 0x344   : > { %v1024_v17 = vmul.f32 1.442695, %v1016_v27 }
 0x345   : > { %1522 = vmatpush.msrb.mxu1 %v1282_v16 }
 0x346   : > { %6860 = vpow2.f32 %v1024_v17 }
 0x347   : > { %v1000_v18 = vpop.xlane.xlu0 %999  ;;  %1523 = vmatpush.msrb.mxu1 %v1279_v19 }
 0x348   : > { %v1018_v23 = vsub.f32 %v7738_v34, %v1000_v18 }
 0x349   : > { %v997_v24 = vpop.xlane.xlu2 %996  ;;  %1524 = vmatpush.msrb.mxu1 %v1276_v21 }
 0x34a   : > { %v1028_v25 = vmul.f32 1.442695, %v1018_v23  ;;  %v1017_v28 = vsub.f32 %v7740_v36, %v997_v24 }
 0x34c   : > { %v6861_v30 = vpop.eup %6860  ;;  %6862 = vpow2.f32 %v1028_v25  ;;  %v1026_v31 = vmul.f32 1.442695, %v1017_v28  ;;  %v1173_v25 = vpop.f32.mrf.mxu1 }
 0x34d   : > { %v1040_v29 = vsel %vm991_vm12, %v6861_v30, 0.0 }
 0x34e   : > { %6864 = vpow2.f32 %v1026_v31  ;;  %1041 = vadd.xlane.f32.xlu2 %v1040_v29 }
 0x34f   : > { %v1003_v32 = vpop.xlane.xlu1 %1002 }
 0x350   : > { %v1019_v33 = vsub.f32 %v7746_v44, %v1003_v32  ;;  %v6809_v32 = vld [vmem:[%s9771_s3 + $0x1] ss:$0 sm:$0xff] }
 0x352   : > { %v6863_v35 = vpop.eup %6862  ;;  %v1030_v37 = vmul.f32 1.442695, %v1019_v33  ;;  %v1174_v33 = vadd.f32 %v6809_v32, %v1173_v25 }
 0x353   : > { %v1046_v34 = vsel %vm991_vm12, %v6863_v35, 0.0 }
 0x354   : > { %v6865_v38 = vpop.eup %6864  ;;  %6866 = vpow2.f32 %v1030_v37  ;;  %v1176_v29 = vpop.f32.mrf.mxu1 }
 0x355   : > { %v1043_v43 = vsel %vm991_vm12, %v6865_v38, 0.0  ;;  %v1177_v37 = vadd.f32 %v6809_v32, %v1176_v29 }
 0x356   : > { %1047 = vadd.xlane.f32.xlu2 %v1046_v34  ;;  %1044 = vadd.xlane.f32.xlu1 %v1043_v43 }
 0x357   : > { %v1006_v36 = vpop.xlane.xlu2 %1005 }
 0x358   : > { %v1020_v42 = vsub.f32 %v7750_v53, %v1006_v36 }
 0x35a   : > { %v6867_v46 = vpop.eup %6866  ;;  %v1032_v40 = vmul.f32 1.442695, %v1020_v42  ;;  %v1686_v42 = vld [vmem:[#allocation4 + $0x58] sm:$0xff] }
 0x35b   : > { %v1049_v49 = vsel %vm991_vm12, %v6867_v46, 0.0 }
 0x35c   : > { %6868 = vpow2.f32 %v1032_v40  ;;  %1050 = vadd.xlane.f32.xlu0 %v1049_v49  ;;  %v1145_v40 = vld [vmem:[%s9772_s4] sm:$0xff]  ;;  %v1684_v49 = vld [vmem:[#allocation4 + $0x48] sm:$0xff] }
 0x35d   : > { %1656 = vmatpush.msra.mxu3 %v1145_v40 }
 0x35f   : > { %v1009_v44 = vpop.xlane.xlu0 %1008 }
 0x360   : > { %v1021_v52 = vsub.f32 %v7754_v56, %v1009_v44  ;;  %v1683_v44 = vld [vmem:[#allocation4 + $0x40] sm:$0xff] }
 0x362   : > { %v6869_v54 = vpop.eup %6868  ;;  %v1034_v55 = vmul.f32 1.442695, %v1021_v52 }
 0x363   : > { %v1052_v57 = vsel %vm991_vm12, %v6869_v54, 0.0 }
 0x364   : > { %6870 = vpow2.f32 %v1034_v55  ;;  %1053 = vadd.xlane.f32.xlu1 %v1052_v57 }
 0x367   : > { %v1012_v58 = vpop.xlane.xlu1 %1011 }
 0x368   : > { %v1022_v59 = vsub.f32 %v7758_v26, %v1012_v58 }
 0x36a   : > { %v6871_v61 = vpop.eup %6870  ;;  %v1036_v53 = vmul.f32 1.442695, %v1022_v59 }
 0x36b   : > { %v1055_v62 = vsel %vm991_vm12, %v6871_v61, 0.0 }
 0x36c   : > { %6872 = vpow2.f32 %v1036_v53  ;;  %1056 = vadd.xlane.f32.xlu2 %v1055_v62 }
 0x36f   : > { %v1015_v63 = vpop.xlane.xlu0 %1014 }
 0x370   : > { %v1023_v1 = vsub.f32 %v7762_v0, %v1015_v63 }
 0x372   : > { %v6873_v2 = vpop.eup %6872  ;;  %v1038_v56 = vmul.f32 1.442695, %v1023_v1 }
 0x373   : > { %v1058_v3 = vsel %vm991_vm12, %v6873_v2, 0.0 }
 0x374   : > { %6874 = vpow2.f32 %v1038_v56  ;;  %1059 = vadd.xlane.f32.xlu0 %v1058_v3 }
 0x37a   : > { %v6875_v4 = vpop.eup %6874 }
 0x37b   : > { %v1061_v5 = vsel %vm991_vm12, %v6875_v4, 0.0 }
 0x37c   : > { %1062 = vadd.xlane.f32.xlu1 %v1061_v5  ;;  %v1300_v5 = vld [vmem:[#allocation2 + $0x40] sm:$0xff] }
 0x3c1   : > { %v1042_v26 = vpop.xlane.xlu2 %1041 }
 0x3c2   : > { %6876 = vrcp.f32 %v1042_v26 }
 0x3c8   : > { %v6877_v6 = vpop.eup %6876 }
 0x3c9   : > { %v1072_v7 = vmul.f32 %v6877_v6, %v6861_v30  ;;  %v1045_v47 = vpop.xlane.xlu1 %1044  ;;  %v1048_v9 = vpop.xlane.xlu2 %1047 }
 0x3ca   : > { %6878 = vrcp.f32 %v1045_v47  ;;  %v1301_v47 = vld [vmem:[#allocation2 + $0x48] sm:$0xff] }
 0x3cb   : > { %6277 = vmatmul.msk.f32.vlgmr.msra.gmra.mxu0 %vm991_vm12, %v1072_v7  ;;  %6880 = vrcp.f32 %v1048_v9 }
 0x3cc   : > { %1704 = vmatpush.msra.mxu0 %v1686_v42 }
 0x3cf   : > { %v1051_v10 = vpop.xlane.xlu0 %1050 }
 0x3d0   : > { %v6879_v0 = vpop.eup %6878  ;;  %6882 = vrcp.f32 %v1051_v10  ;;  %v1302_v10 = vld [vmem:[#allocation2 + $0x50] sm:$0xff] }
 0x3d1   : > { %v1073_v11 = vmul.f32 %v6879_v0, %v6865_v38  ;;  %v6881_v12 = vpop.eup %6880 }
 0x3d2   : > { %v1074_v14 = vmul.f32 %v6881_v12, %v6863_v35  ;;  %v1179_v35 = vpop.f32.mrf.mxu1 }
 0x3d3   : > { %6278 = vmatmul.msk.f32.gmra.mxu0 %vm991_vm12, %v1073_v11  ;;  %v1180_v34 = vadd.f32 %v6809_v32, %v1179_v35 }
 0x3d6   : > { %v6883_v41 = vpop.eup %6882 }
 0x3d7   : > { %v1054_v50 = vpop.xlane.xlu1 %1053  ;;  %v1075_v15 = vmul.f32 %v6883_v41, %v6867_v46  ;;  %v1685_v46 = vld [vmem:[#allocation4 + $0x50] sm:$0xff]  ;;  %v1303_v41 = vld [vmem:[#allocation2 + $0x58] sm:$0xff] }
 0x3d8   : > { %6884 = vrcp.f32 %v1054_v50  ;;  %1705 = vmatpush.msra.mxu0 %v1685_v46 }
 0x3da   : > { %v1182_v38 = vpop.f32.mrf.mxu1  ;;  %1706 = vmatpush.msra.mxu0 %v1684_v49 }
 0x3db   : > { %6279 = vmatmul.msk.f32.gmra.mxu0 %vm991_vm12, %v1074_v14  ;;  %v1183_v36 = vadd.f32 %v6809_v32, %v1182_v38 }
 0x3dc   : > { %1707 = vmatpush.msra.mxu0 %v1683_v44 }
 0x3de   : > { %v6885_v16 = vpop.eup %6884 }
 0x3df   : > { %v1057_v27 = vpop.xlane.xlu2 %1056  ;;  %v1076_v17 = vmul.f32 %v6885_v16, %v6869_v54 }
 0x3e0   : > { %6886 = vrcp.f32 %v1057_v27 }
 0x3e2   : > { %v1185_v43 = vpop.f32.mrf.mxu1 }
 0x3e3   : > { %6280 = vmatmul.msk.f32.gmra.mxu0 %vm991_vm12, %v1075_v15  ;;  %v1186_v52 = vadd.f32 %v6809_v32, %v1185_v43 }
 0x3e6   : > { %v6887_v21 = vpop.eup %6886 }
 0x3e7   : > { %v1060_v19 = vpop.xlane.xlu0 %1059  ;;  %v1077_v18 = vmul.f32 %v6887_v21, %v6871_v61 }
 0x3e8   : > { %6888 = vrcp.f32 %v1060_v19 }
 0x3ea   : > { %v1188_v54 = vpop.f32.mrf.mxu1 }
 0x3eb   : > { %6281 = vmatmul.msk.f32.gmra.mxu0 %vm991_vm12, %v1076_v17  ;;  %v1189_v55 = vadd.f32 %v6809_v32, %v1188_v54  ;;  %v1304_v17 = vld [vmem:[#allocation2 + $0x60] sm:$0xff] }
 0x3ee   : > { %v6889_v24 = vpop.eup %6888 }
 0x3ef   : > { %v1063_v23 = vpop.xlane.xlu1 %1062  ;;  %v1078_v28 = vmul.f32 %v6889_v24, %v6873_v2 }
 0x3f0   : > { %6890 = vrcp.f32 %v1063_v23  ;;  %v1305_v23 = vld [vmem:[#allocation2 + $0x68] sm:$0xff] }
 0x3f2   : > { %v1191_v57 = vpop.f32.mrf.mxu1 }
 0x3f3   : > { %6282 = vmatmul.msk.f32.gmra.mxu0 %vm991_vm12, %v1077_v18  ;;  %v1192_v58 = vadd.f32 %v6809_v32, %v1191_v57 }
 0x3f6   : > { %v6891_v30 = vpop.eup %6890 }
 0x3f7   : > { %v1079_v31 = vmul.f32 %v6891_v30, %v6875_v4  ;;  %v1306_v30 = vld [vmem:[#allocation2 + $0x70] sm:$0xff] }
 0x3fa   : > { %v1194_v59 = vpop.f32.mrf.mxu1 }
 0x3fb   : > { %6283 = vmatmul.msk.f32.gmra.mxu0 %vm991_vm12, %v1078_v28  ;;  %v1195_v61 = vadd.f32 %v6809_v32, %v1194_v59 }
 0x403   : > { %6284 = vmatmul.msk.f32.gmra.mxu0 %vm991_vm12, %v1079_v31 }
 0x40b   : > { %6320 = vmatmul.msk.f32.vlgmr.msrb.gmra.mxu0 %vm901_vm11, %v1174_v33  ;;  %v1307_v33 = vld [vmem:[#allocation2 + $0x78] sm:$0xff] }
 0x413   : > { %6321 = vmatmul.msk.f32.gmra.mxu0 %vm901_vm11, %v1177_v37 }
 0x41b   : > { %6322 = vmatmul.msk.f32.gmra.mxu0 %vm901_vm11, %v1180_v34 }
 0x423   : > { %6323 = vmatmul.msk.f32.gmra.mxu0 %vm901_vm11, %v1183_v36 }
 0x42b   : > { %6324 = vmatmul.msk.f32.gmra.mxu0 %vm901_vm11, %v1186_v52 }
 0x433   : > { %6325 = vmatmul.msk.f32.gmra.mxu0 %vm901_vm11, %v1189_v55 }
 0x43b   : > { %6326 = vmatmul.msk.f32.gmra.mxu0 %vm901_vm11, %v1192_v58 }
 0x443   : > { %6327 = vmatmul.msk.f32.gmra.mxu0 %vm901_vm11, %v1195_v61 }
 0x448   : > { %v1121_v53 = vpop.f32.mrf.mxu0 }
 0x449   : > { %6345 = vmatmul.msk.f32.vlgmr.msra.gmra.mxu3 %vm901_vm11, %v1121_v53 }
 0x44b   : > { %6354 = vmatmul.msk.f32.vlgmr.msra.gmra.mxu0 %vm512_vm0, %v7546_v13 }
 0x450   : > { %v1124_v62 = vpop.f32.mrf.mxu0 }
 0x451   : > { %6346 = vmatmul.msk.f32.gmra.mxu3 %vm901_vm11, %v1124_v62 }
 0x453   : > { %6355 = vmatmul.msk.f32.gmra.mxu0 %vm512_vm0, %v7558_v22 }
 0x458   : > { %v1127_v63 = vpop.f32.mrf.mxu0 }
 0x459   : > { %6347 = vmatmul.msk.f32.gmra.mxu3 %vm901_vm11, %v1127_v63 }
 0x45b   : > { %6356 = vmatmul.msk.f32.gmra.mxu0 %vm512_vm0, %v7570_v45 }
 0x460   : > { %v1130_v1 = vpop.f32.mrf.mxu0 }
 0x461   : > { %6348 = vmatmul.msk.f32.gmra.mxu3 %vm901_vm11, %v1130_v1 }
 0x463   : > { %6357 = vmatmul.msk.f32.gmra.mxu0 %vm512_vm0, %v7582_v39 }
 0x468   : > { %v1133_v2 = vpop.f32.mrf.mxu0 }
 0x469   : > { %6349 = vmatmul.msk.f32.gmra.mxu3 %vm901_vm11, %v1133_v2 }
 0x46b   : > { %6358 = vmatmul.msk.f32.gmra.mxu0 %vm512_vm0, %v7592_v48 }
 0x470   : > { %v1136_v56 = vpop.f32.mrf.mxu0 }
 0x471   : > { %6350 = vmatmul.msk.f32.gmra.mxu3 %vm901_vm11, %v1136_v56 }
 0x473   : > { %6359 = vmatmul.msk.f32.gmra.mxu0 %vm512_vm0, %v7603_v51 }
 0x478   : > { %v1139_v3 = vpop.f32.mrf.mxu0 }
 0x479   : > { %6351 = vmatmul.msk.f32.gmra.mxu3 %vm901_vm11, %v1139_v3 }
 0x47b   : > { %6360 = vmatmul.msk.f32.gmra.mxu0 %vm512_vm0, %v7615_v8 }
 0x480   : > { %v1142_v4 = vpop.f32.mrf.mxu0 }
 0x481   : > { %6352 = vmatmul.msk.f32.gmra.mxu3 %vm901_vm11, %v1142_v4 }
 0x483   : > { %6361 = vmatmul.msk.f32.gmra.mxu0 %vm512_vm0, %v7533_v60 }
 0x488   : > { %v1373_v26 = vpop.f32.mrf.mxu0 }
 0x489   : > { %v1374_v6 = vadd.f32 %v1373_v26, %v1300_v5 }
 0x48b   : > { %v1397_v7 = vsel %vm991_vm12, %v1374_v6, -inf }
 0x48c   : > { %1398 = vmax.xlane.f32.xlu2 %v1397_v7 }
 0x490   : > { %v1376_v9 = vpop.f32.mrf.mxu0 }
 0x491   : > { %v1377_v0 = vadd.f32 %v1376_v9, %v1301_v47 }
 0x493   : > { %v1400_v11 = vsel %vm991_vm12, %v1377_v0, -inf }
 0x494   : > { %1401 = vmax.xlane.f32.xlu0 %v1400_v11 }
 0x498   : > { %v1379_v12 = vpop.f32.mrf.mxu0 }
 0x499   : > { %v1380_v14 = vadd.f32 %v1379_v12, %v1302_v10 }
 0x49b   : > { %v1403_v50 = vsel %vm991_vm12, %v1380_v14, -inf }
 0x49c   : > { %1404 = vmax.xlane.f32.xlu1 %v1403_v50 }
 0x4a0   : > { %v1382_v15 = vpop.f32.mrf.mxu0 }
 0x4a1   : > { %v1383_v27 = vadd.f32 %v1382_v15, %v1303_v41 }
 0x4a3   : > { %v1406_v16 = vsel %vm991_vm12, %v1383_v27, -inf }
 0x4a4   : > { %1407 = vmax.xlane.f32.xlu2 %v1406_v16 }
 0x4a8   : > { %v1385_v19 = vpop.f32.mrf.mxu0 }
 0x4a9   : > { %v1386_v21 = vadd.f32 %v1385_v19, %v1304_v17 }
 0x4ab   : > { %v1409_v18 = vsel %vm991_vm12, %v1386_v21, -inf }
 0x4ac   : > { %1410 = vmax.xlane.f32.xlu0 %v1409_v18 }
 0x4b0   : > { %v1388_v24 = vpop.f32.mrf.mxu0 }
 0x4b1   : > { %v1389_v25 = vadd.f32 %v1388_v24, %v1305_v23  ;;  %v1737_v24 = vld [vmem:[#allocation4 + $0xd8] sm:$0xff] }
 0x4b2   : > { %1755 = vmatpush.msra.mxu1 %v1737_v24 }
 0x4b3   : > { %v1412_v28 = vsel %vm991_vm12, %v1389_v25, -inf }
 0x4b4   : > { %1413 = vmax.xlane.f32.xlu1 %v1412_v28 }
 0x4b8   : > { %v1391_v31 = vpop.f32.mrf.mxu0 }
 0x4b9   : > { %v1392_v29 = vadd.f32 %v1391_v31, %v1306_v30 }
 0x4bb   : > { %v1415_v32 = vsel %vm991_vm12, %v1392_v29, -inf }
 0x4bc   : > { %1416 = vmax.xlane.f32.xlu2 %v1415_v32 }
 0x4c0   : > { %v1394_v35 = vpop.f32.mrf.mxu0 }
 0x4c1   : > { %v1395_v37 = vadd.f32 %v1394_v35, %v1307_v33  ;;  %v1736_v33 = vld [vmem:[#allocation4 + $0xd0] sm:$0xff] }
 0x4c2   : > { %1756 = vmatpush.msra.mxu1 %v1736_v33 }
 0x4c3   : > { %v1418_v38 = vsel %vm991_vm12, %v1395_v37, -inf }
 0x4c4   : > { %1419 = vmax.xlane.f32.xlu1 %v1418_v38 }
 0x4c8   : > { %v1709_v24 = vpop.f32.mrf.mxu0 }
 0x4ff   : > { %v1399_v34 = vpop.xlane.xlu2 %1398 }
 0x500   : > { %v1421_v43 = vsub.f32 %v1374_v6, %v1399_v34  ;;  %v1735_v34 = vld [vmem:[#allocation4 + $0xc8] sm:$0xff] }
 0x501   : > { %1757 = vmatpush.msra.mxu1 %v1735_v34 }
 0x502   : > { %v1429_v36 = vmul.f32 1.442695, %v1421_v43  ;;  %v1734_v43 = vld [vmem:[#allocation4 + $0xc0] sm:$0xff] }
 0x503   : > { %1758 = vmatpush.msra.mxu1 %v1734_v43 }
 0x504   : > { %6892 = vpow2.f32 %v1429_v36 }
 0x507   : > { %v1402_v42 = vpop.xlane.xlu0 %1401 }
 0x508   : > { %v1422_v46 = vsub.f32 %v1377_v0, %v1402_v42 }
 0x50a   : > { %v6893_v40 = vpop.eup %6892  ;;  %v1431_v49 = vmul.f32 1.442695, %v1422_v46 }
 0x50b   : > { %v1445_v44 = vsel %vm991_vm12, %v6893_v40, 0.0 }
 0x50c   : > { %6894 = vpow2.f32 %v1431_v49  ;;  %1446 = vadd.xlane.f32.xlu0 %v1445_v44 }
 0x50f   : > { %v1405_v52 = vpop.xlane.xlu1 %1404 }
 0x510   : > { %v1423_v54 = vsub.f32 %v1380_v14, %v1405_v52 }
 0x512   : > { %v6895_v55 = vpop.eup %6894  ;;  %v1433_v57 = vmul.f32 1.442695, %v1423_v54 }
 0x513   : > { %v1448_v58 = vsel %vm991_vm12, %v6895_v55, 0.0 }
 0x514   : > { %6896 = vpow2.f32 %v1433_v57  ;;  %1449 = vadd.xlane.f32.xlu2 %v1448_v58 }
 0x517   : > { %v1408_v59 = vpop.xlane.xlu2 %1407 }
 0x518   : > { %v1424_v61 = vsub.f32 %v1383_v27, %v1408_v59  ;;  %v6336_v59 = vld [vmem:[%s9772_s4 + $0x8] sm:$0xff] }
 0x519   : > { %1591 = vmatpush.msra.mxu2 %v6336_v59 }
 0x51a   : > { %v6897_v53 = vpop.eup %6896  ;;  %v1435_v62 = vmul.f32 1.442695, %v1424_v61 }
 0x51b   : > { %v1451_v63 = vsel %vm991_vm12, %v6897_v53, 0.0 }
 0x51c   : > { %6898 = vpow2.f32 %v1435_v62  ;;  %1452 = vadd.xlane.f32.xlu0 %v1451_v63 }
 0x51f   : > { %v1411_v1 = vpop.xlane.xlu0 %1410 }
 0x520   : > { %v1425_v2 = vsub.f32 %v1386_v21, %v1411_v1  ;;  %v1788_v1 = vld [vmem:[#allocation4 + $0x158] sm:$0xff] }
 0x521   : > { %1806 = vmatpush.msrb.mxu2 %v1788_v1 }
 0x522   : > { %v6899_v56 = vpop.eup %6898  ;;  %v1437_v3 = vmul.f32 1.442695, %v1425_v2  ;;  %v1787_v2 = vld [vmem:[#allocation4 + $0x150] sm:$0xff] }
 0x523   : > { %v1454_v4 = vsel %vm991_vm12, %v6899_v56, 0.0  ;;  %1807 = vmatpush.msrb.mxu2 %v1787_v2 }
 0x524   : > { %6900 = vpow2.f32 %v1437_v3  ;;  %1455 = vadd.xlane.f32.xlu1 %v1454_v4  ;;  %v1785_v3 = vld [vmem:[#allocation4 + $0x140] sm:$0xff] }
 0x527   : > { %v1414_v5 = vpop.xlane.xlu1 %1413 }
 0x528   : > { %v1426_v26 = vsub.f32 %v1389_v25, %v1414_v5 }
 0x52a   : > { %v6901_v6 = vpop.eup %6900  ;;  %v1439_v7 = vmul.f32 1.442695, %v1426_v26 }
 0x52b   : > { %v1457_v47 = vsel %vm991_vm12, %v6901_v6, 0.0 }
 0x52c   : > { %6902 = vpow2.f32 %v1439_v7  ;;  %1458 = vadd.xlane.f32.xlu2 %v1457_v47 }
 0x52f   : > { %v1417_v9 = vpop.xlane.xlu2 %1416 }
 0x530   : > { %v1427_v0 = vsub.f32 %v1392_v29, %v1417_v9 }
 0x532   : > { %v6903_v11 = vpop.eup %6902  ;;  %v1441_v10 = vmul.f32 1.442695, %v1427_v0 }
 0x533   : > { %v1460_v12 = vsel %vm991_vm12, %v6903_v11, 0.0 }
 0x534   : > { %6904 = vpow2.f32 %v1441_v10  ;;  %1461 = vadd.xlane.f32.xlu0 %v1460_v12  ;;  %v2164_v10 = vld [vmem:[#allocation4 + $0x70] sm:$0xff]  ;;  %v2163_v12 = vld [vmem:[#allocation4 + $0x68] sm:$0xff] }
 0x537   : > { %v1420_v14 = vpop.xlane.xlu1 %1419 }
 0x538   : > { %v1428_v50 = vsub.f32 %v1395_v37, %v1420_v14  ;;  %v2162_v14 = vld [vmem:[#allocation4 + $0x60] sm:$0xff] }
 0x53a   : > { %v6905_v41 = vpop.eup %6904  ;;  %v1443_v15 = vmul.f32 1.442695, %v1428_v50 }
 0x53b   : > { %v1463_v27 = vsel %vm991_vm12, %v6905_v41, 0.0 }
 0x53c   : > { %6906 = vpow2.f32 %v1443_v15  ;;  %1464 = vadd.xlane.f32.xlu1 %v1463_v27  ;;  %v6813_v27 = vld [vmem:[%s9771_s3 + $0x6] ss:$0 sm:$0xff] }
 0x542   : > { %v6907_v16 = vpop.eup %6906 }
 0x543   : > { %v1466_v17 = vsel %vm991_vm12, %v6907_v16, 0.0 }
 0x544   : > { %1467 = vadd.xlane.f32.xlu2 %v1466_v17 }
 0x57f   : > { %v1447_v19 = vpop.xlane.xlu0 %1446 }
 0x580   : > { %6908 = vrcp.f32 %v1447_v19 }
 0x586   : > { %v6909_v21 = vpop.eup %6908 }
 0x587   : > { %v1477_v18 = vmul.f32 %v6909_v21, %v6893_v40  ;;  %v1450_v23 = vpop.xlane.xlu2 %1449 }
 0x588   : > { %6910 = vrcp.f32 %v1450_v23 }
 0x589   : > { %6328 = vmatmul.msk.f32.vlgmr.msrb.gmra.mxu1 %vm991_vm12, %v1477_v18 }
 0x58e   : > { %v6911_v25 = vpop.eup %6910 }
 0x58f   : > { %v1453_v28 = vpop.xlane.xlu0 %1452  ;;  %v1478_v30 = vmul.f32 %v6911_v25, %v6895_v55 }
 0x590   : > { %6912 = vrcp.f32 %v1453_v28 }
 0x591   : > { %6329 = vmatmul.msk.f32.gmra.mxu1 %vm991_vm12, %v1478_v30 }
 0x596   : > { %v6913_v31 = vpop.eup %6912 }
 0x597   : > { %v1456_v29 = vpop.xlane.xlu1 %1455  ;;  %v1479_v32 = vmul.f32 %v6913_v31, %v6897_v53  ;;  %v1712_v31 = vpop.f32.mrf.mxu0 }
 0x598   : > { %6914 = vrcp.f32 %v1456_v29 }
 0x599   : > { %6330 = vmatmul.msk.f32.gmra.mxu1 %vm991_vm12, %v1479_v32  ;;  %v6812_v32 = vld [vmem:[%s9771_s3 + $0x2] ss:$0 sm:$0xff] }
 0x59a   : > { %v1713_v43 = vadd.f32 %v6812_v32, %v1712_v31  ;;  %v1836_v31 = vld [vmem:[#allocation2 + $0x80] sm:$0xff] }
 0x59e   : > { %v6915_v35 = vpop.eup %6914 }
 0x59f   : > { %v1459_v37 = vpop.xlane.xlu2 %1458  ;;  %v1480_v38 = vmul.f32 %v6915_v35, %v6899_v56  ;;  %v1786_v56 = vld [vmem:[#allocation4 + $0x148] sm:$0xff] }
 0x5a0   : > { %6916 = vrcp.f32 %v1459_v37  ;;  %1808 = vmatpush.msrb.mxu2 %v1786_v56  ;;  %v1710_v37 = vadd.f32 %v6812_v32, %v1709_v24 }
 0x5a1   : > { %6331 = vmatmul.msk.f32.gmra.mxu1 %vm991_vm12, %v1480_v38  ;;  %v1715_v38 = vpop.f32.mrf.mxu0 }
 0x5a2   : > { %1809 = vmatpush.msrb.mxu2 %v1785_v3 }
 0x5a6   : > { %v6917_v36 = vpop.eup %6916 }
 0x5a7   : > { %v1462_v42 = vpop.xlane.xlu0 %1461  ;;  %v1481_v46 = vmul.f32 %v6917_v36, %v6901_v6 }
 0x5a8   : > { %6918 = vrcp.f32 %v1462_v42 }
 0x5a9   : > { %6332 = vmatmul.msk.f32.gmra.mxu1 %vm991_vm12, %v1481_v46  ;;  %v1718_v42 = vpop.f32.mrf.mxu0  ;;  %v1716_v46 = vadd.f32 %v6812_v32, %v1715_v38 }
 0x5ae   : > { %v6919_v40 = vpop.eup %6918 }
 0x5af   : > { %v1465_v49 = vpop.xlane.xlu1 %1464  ;;  %v1482_v44 = vmul.f32 %v6919_v40, %v6903_v11  ;;  %v2165_v11 = vld [vmem:[#allocation4 + $0x78] sm:$0xff] }
 0x5b0   : > { %6920 = vrcp.f32 %v1465_v49 }
 0x5b1   : > { %6333 = vmatmul.msk.f32.gmra.mxu1 %vm991_vm12, %v1482_v44  ;;  %v1721_v49 = vpop.f32.mrf.mxu0  ;;  %v1719_v44 = vadd.f32 %v6812_v32, %v1718_v42 }
 0x5b2   : > { %v1722_v59 = vadd.f32 %v6812_v32, %v1721_v49 }
 0x5b6   : > { %v6921_v52 = vpop.eup %6920 }
 0x5b7   : > { %v1468_v54 = vpop.xlane.xlu2 %1467  ;;  %v1483_v55 = vmul.f32 %v6921_v52, %v6905_v41  ;;  %v2216_v52 = vld [vmem:[#allocation4 + $0xf8] sm:$0xff] }
 0x5b8   : > { %6922 = vrcp.f32 %v1468_v54 }
 0x5b9   : > { %6334 = vmatmul.msk.f32.gmra.mxu1 %vm991_vm12, %v1483_v55  ;;  %v2215_v55 = vld [vmem:[#allocation4 + $0xf0] sm:$0xff] }
 0x5be   : > { %v6923_v57 = vpop.eup %6922 }
 0x5bf   : > { %v1484_v58 = vmul.f32 %v6923_v57, %v6907_v16  ;;  %v2214_v57 = vld [vmem:[#allocation4 + $0xe8] sm:$0xff] }
 0x5c1   : > { %6335 = vmatmul.msk.f32.gmra.mxu1 %vm991_vm12, %v1484_v58  ;;  %v2213_v58 = vld [vmem:[#allocation4 + $0xe0] sm:$0xff] }
 0x5c9   : > { %6363 = vmatmul.msk.f32.vlgmr.msra.gmra.mxu1 %vm512_vm0, %v7546_v13 }
 0x5d1   : > { %6364 = vmatmul.msk.f32.gmra.mxu1 %vm512_vm0, %v7558_v22 }
 0x5d9   : > { %6365 = vmatmul.msk.f32.gmra.mxu1 %vm512_vm0, %v7570_v45 }
 0x5e1   : > { %6366 = vmatmul.msk.f32.gmra.mxu1 %vm512_vm0, %v7582_v39 }
 0x5e9   : > { %6367 = vmatmul.msk.f32.gmra.mxu1 %vm512_vm0, %v7592_v48 }
 0x5f1   : > { %6368 = vmatmul.msk.f32.gmra.mxu1 %vm512_vm0, %v7603_v51 }
 0x5f9   : > { %6369 = vmatmul.msk.f32.gmra.mxu1 %vm512_vm0, %v7615_v8 }
 0x601   : > { %6370 = vmatmul.msk.f32.gmra.mxu1 %vm512_vm0, %v7533_v60 }
 0x606   : > { %v1526_v61 = vpop.f32.mrf.mxu1 }
 0x607   : > { %6337 = vmatmul.msk.f32.vlgmr.msra.gmra.mxu2 %vm901_vm11, %v1526_v61  ;;  %v1724_v61 = vpop.f32.mrf.mxu0 }
 0x608   : > { %2183 = vmatpush.msra.mxu2 %v2165_v11 }
 0x60a   : > { %2184 = vmatpush.msra.mxu2 %v2164_v10 }
 0x60c   : > { %2185 = vmatpush.msra.mxu2 %v2163_v12 }
 0x60e   : > { %v1529_v53 = vpop.f32.mrf.mxu1  ;;  %2186 = vmatpush.msra.mxu2 %v2162_v14  ;;  %v6814_v14 = vld [vmem:[%s9771_s3 + $0xa] ss:$0 sm:$0xff] }
 0x60f   : > { %6338 = vmatmul.msk.f32.gmra.mxu2 %vm901_vm11, %v1529_v53 }
 0x616   : > { %v1532_v62 = vpop.f32.mrf.mxu1 }
 0x617   : > { %6339 = vmatmul.msk.f32.gmra.mxu2 %vm901_vm11, %v1532_v62  ;;  %v1725_v62 = vadd.f32 %v6812_v32, %v1724_v61  ;;  %v1840_v61 = vld [vmem:[#allocation2 + $0xa0] sm:$0xff] }
 0x61e   : > { %v1535_v63 = vpop.f32.mrf.mxu1 }
 0x61f   : > { %6340 = vmatmul.msk.f32.gmra.mxu2 %vm901_vm11, %v1535_v63  ;;  %v1727_v63 = vpop.f32.mrf.mxu0 }
 0x620   : > { %v1728_v2 = vadd.f32 %v6812_v32, %v1727_v63 }
 0x626   : > { %v1538_v4 = vpop.f32.mrf.mxu1 }
 0x627   : > { %6341 = vmatmul.msk.f32.gmra.mxu2 %vm901_vm11, %v1538_v4  ;;  %v1730_v3 = vpop.f32.mrf.mxu0  ;;  %v7950_v4 = vpop.f32.mrf.mxu3 }
 0x62e   : > { %v1541_v5 = vpop.f32.mrf.mxu1 }
 0x62f   : > { %6342 = vmatmul.msk.f32.gmra.mxu2 %vm901_vm11, %v1541_v5  ;;  %v1731_v5 = vadd.f32 %v6812_v32, %v1730_v3 }
 0x636   : > { %v1544_v26 = vpop.f32.mrf.mxu1 }
 0x637   : > { %6343 = vmatmul.msk.f32.gmra.mxu2 %vm901_vm11, %v1544_v26 }
 0x63e   : > { %v1547_v6 = vpop.f32.mrf.mxu1 }
 0x63f   : > { %6344 = vmatmul.msk.f32.gmra.mxu2 %vm901_vm11, %v1547_v6  ;;  %v7953_v6 = vpop.f32.mrf.mxu3 }
 0x646   : > { %v1760_v7 = vpop.f32.mrf.mxu1 }
 0x647   : > { %6372 = vmatmul.msk.f32.vlgmr.msrb.gmra.mxu2 %vm512_vm0, %v7546_v13  ;;  %v1761_v35 = vadd.f32 %v6813_v27, %v1760_v7 }
 0x64e   : > { %v1763_v47 = vpop.f32.mrf.mxu1 }
 0x64f   : > { %6373 = vmatmul.msk.f32.gmra.mxu2 %vm512_vm0, %v7558_v22  ;;  %v1764_v29 = vadd.f32 %v6813_v27, %v1763_v47  ;;  %v7959_v47 = vpop.f32.mrf.mxu3 }
 0x656   : > { %v1766_v9 = vpop.f32.mrf.mxu1 }
 0x657   : > { %6374 = vmatmul.msk.f32.gmra.mxu2 %vm512_vm0, %v7570_v45  ;;  %v1767_v30 = vadd.f32 %v6813_v27, %v1766_v9  ;;  %v7963_v11 = vpop.f32.mrf.mxu3 }
 0x65e   : > { %v1769_v0 = vpop.f32.mrf.mxu1 }
 0x65f   : > { %6375 = vmatmul.msk.f32.gmra.mxu2 %vm512_vm0, %v7582_v39  ;;  %v1770_v25 = vadd.f32 %v6813_v27, %v1769_v0  ;;  %v7967_v12 = vpop.f32.mrf.mxu3 }
 0x666   : > { %v1772_v50 = vpop.f32.mrf.mxu1 }
 0x667   : > { %6376 = vmatmul.msk.f32.gmra.mxu2 %vm512_vm0, %v7592_v48  ;;  %v1773_v23 = vadd.f32 %v6813_v27, %v1772_v50 }
 0x66e   : > { %v1775_v41 = vpop.f32.mrf.mxu1 }
 0x66f   : > { %6377 = vmatmul.msk.f32.gmra.mxu2 %vm512_vm0, %v7603_v51  ;;  %v1776_v21 = vadd.f32 %v6813_v27, %v1775_v41 }
 0x676   : > { %v1778_v15 = vpop.f32.mrf.mxu1 }
 0x677   : > { %6378 = vmatmul.msk.f32.gmra.mxu2 %vm512_vm0, %v7615_v8  ;;  %v1779_v19 = vadd.f32 %v6813_v27, %v1778_v15 }
 0x67e   : > { %v1781_v16 = vpop.f32.mrf.mxu1 }
 0x67f   : > { %v1782_v17 = vadd.f32 %v6813_v27, %v1781_v16  ;;  %6379 = vmatmul.msk.f32.gmra.mxu2 %vm512_vm0, %v7533_v60  ;;  %v7974_v27 = vpop.f32.mrf.mxu3 }
 0x681   : > { %6380 = vmatpush.xpose.msk.msrb.mxu3 %vm901_vm11, %v1782_v17 }
 0x685   : > { %6381 = vmatpush.xpose.msk.msrb.mxu3 %vm901_vm11, %v1779_v19 }
 0x687   : > { %6414 = vmatmul.msk.f32.vlgmr.msra.gmra.mxu2 %vm512_vm0, %v7546_v13  ;;  %v7980_v24 = vpop.f32.mrf.mxu3 }
 0x689   : > { %6382 = vmatpush.xpose.msk.msrb.mxu3 %vm901_vm11, %v1776_v21 }
 0x68a   : > { %v7905_v18 = vpop.f32.mrf.mxu2 }
 0x68d   : > { %6383 = vmatpush.xpose.msk.msrb.mxu3 %vm901_vm11, %v1773_v23 }
 0x68f   : > { %6415 = vmatmul.msk.f32.gmra.mxu2 %vm512_vm0, %v7558_v22 }
 0x691   : > { %6384 = vmatpush.xpose.msk.msrb.mxu3 %vm901_vm11, %v1770_v25 }
 0x692   : > { %v7911_v28 = vpop.f32.mrf.mxu2 }
 0x695   : > { %6385 = vmatpush.xpose.msk.msrb.mxu3 %vm901_vm11, %v1767_v30  ;;  %v7984_v30 = vpop.f32.mrf.mxu3 }
 0x697   : > { %6416 = vmatmul.msk.f32.gmra.mxu2 %vm512_vm0, %v7570_v45 }
 0x699   : > { %6386 = vmatpush.xpose.msk.msrb.mxu3 %vm901_vm11, %v1764_v29 }
 0x69a   : > { %v7920_v33 = vpop.f32.mrf.mxu2 }
 0x69d   : > { %6387 = vmatpush.xpose.msk.msrb.mxu3 %vm901_vm11, %v1761_v35 }
 0x69f   : > { %6417 = vmatmul.msk.f32.gmra.mxu2 %vm512_vm0, %v7582_v39 }
 0x6a0   : > { %6388 = vmatmul.msk.f32.vlgmr.msrb.gmra.mxu3 %vm901_vm11, %v1710_v37  ;;  %v1837_v37 = vld [vmem:[#allocation2 + $0x88] sm:$0xff] }
 0x6a1   : > { %2234 = vmatpush.msra.mxu3 %v2216_v52 }
 0x6a2   : > { %v7926_v34 = vpop.f32.mrf.mxu2 }
 0x6a3   : > { %2235 = vmatpush.msra.mxu3 %v2215_v55  ;;  %v1839_v55 = vld [vmem:[#allocation2 + $0x98] sm:$0xff] }
 0x6a5   : > { %2236 = vmatpush.msra.mxu3 %v2214_v57 }
 0x6a7   : > { %6418 = vmatmul.msk.f32.gmra.mxu2 %vm512_vm0, %v7592_v48  ;;  %2237 = vmatpush.msra.mxu3 %v2213_v58 }
 0x6a8   : > { %6389 = vmatmul.msk.f32.gmra.mxu3 %vm901_vm11, %v1713_v43 }
 0x6aa   : > { %v7931_v36 = vpop.f32.mrf.mxu2 }
 0x6af   : > { %6419 = vmatmul.msk.f32.gmra.mxu2 %vm512_vm0, %v7603_v51 }
 0x6b0   : > { %6390 = vmatmul.msk.f32.gmra.mxu3 %vm901_vm11, %v1716_v46  ;;  %v1838_v46 = vld [vmem:[#allocation2 + $0x90] sm:$0xff] }
 0x6b2   : > { %v7936_v40 = vpop.f32.mrf.mxu2 }
 0x6b7   : > { %6420 = vmatmul.msk.f32.gmra.mxu2 %vm512_vm0, %v7615_v8 }
 0x6b8   : > { %6391 = vmatmul.msk.f32.gmra.mxu3 %vm901_vm11, %v1719_v44 }
 0x6ba   : > { %v7941_v54 = vpop.f32.mrf.mxu2 }
 0x6bf   : > { %6421 = vmatmul.msk.f32.gmra.mxu2 %vm512_vm0, %v7533_v60 }
 0x6c0   : > { %6392 = vmatmul.msk.f32.gmra.mxu3 %vm901_vm11, %v1722_v59 }
 0x6c2   : > { %v7946_v53 = vpop.f32.mrf.mxu2 }
 0x6c8   : > { %6393 = vmatmul.msk.f32.gmra.mxu3 %vm901_vm11, %v1725_v62 }
 0x6ca   : > { %v1811_v1 = vpop.f32.mrf.mxu2 }
 0x6cb   : > { %v1812_v25 = vadd.f32 %v6814_v14, %v1811_v1 }
 0x6d0   : > { %6394 = vmatmul.msk.f32.gmra.mxu3 %vm901_vm11, %v1728_v2  ;;  %v1841_v2 = vld [vmem:[#allocation2 + $0xa8] sm:$0xff] }
 0x6d2   : > { %v1814_v56 = vpop.f32.mrf.mxu2 }
 0x6d3   : > { %v1815_v23 = vadd.f32 %v6814_v14, %v1814_v56 }
 0x6d8   : > { %6395 = vmatmul.msk.f32.gmra.mxu3 %vm901_vm11, %v1731_v5 }
 0x6da   : > { %v1817_v26 = vpop.f32.mrf.mxu2 }
 0x6db   : > { %v1818_v21 = vadd.f32 %v6814_v14, %v1817_v26  ;;  %v1842_v26 = vld [vmem:[#allocation2 + $0xb0] sm:$0xff] }
 0x6e0   : > { %6423 = vmatmul.msk.f32.vlgmr.msra.gmra.mxu3 %vm512_vm0, %v7546_v13 }
 0x6e2   : > { %v1820_v7 = vpop.f32.mrf.mxu2 }
 0x6e3   : > { %v1821_v19 = vadd.f32 %v6814_v14, %v1820_v7 }
 0x6e8   : > { %6424 = vmatmul.msk.f32.gmra.mxu3 %vm512_vm0, %v7558_v22 }
 0x6ea   : > { %v1823_v9 = vpop.f32.mrf.mxu2 }
 0x6eb   : > { %v1824_v17 = vadd.f32 %v6814_v14, %v1823_v9 }
 0x6f0   : > { %6425 = vmatmul.msk.f32.gmra.mxu3 %vm512_vm0, %v7570_v45 }
 0x6f2   : > { %v1826_v0 = vpop.f32.mrf.mxu2 }
 0x6f3   : > { %v1827_v16 = vadd.f32 %v6814_v14, %v1826_v0 }
 0x6f8   : > { %6426 = vmatmul.msk.f32.gmra.mxu3 %vm512_vm0, %v7582_v39 }
 0x6fa   : > { %v1829_v10 = vpop.f32.mrf.mxu2 }
 0x6fb   : > { %v1830_v15 = vadd.f32 %v6814_v14, %v1829_v10  ;;  %v1843_v10 = vld [vmem:[#allocation2 + $0xb8] sm:$0xff] }
 0x700   : > { %6427 = vmatmul.msk.f32.gmra.mxu3 %vm512_vm0, %v7592_v48 }
 0x702   : > { %v1832_v50 = vpop.f32.mrf.mxu2 }
 0x703   : > { %v1833_v41 = vadd.f32 %v6814_v14, %v1832_v50 }
 0x705   : > { %2053 = vmatpush.msrb.mxu0 %v1833_v41 }
 0x707   : > { %2054 = vmatpush.msrb.mxu0 %v1830_v15 }
 0x708   : > { %6428 = vmatmul.msk.f32.gmra.mxu3 %vm512_vm0, %v7603_v51 }
 0x709   : > { %2055 = vmatpush.msrb.mxu0 %v1827_v16 }
 0x70b   : > { %2056 = vmatpush.msrb.mxu0 %v1824_v17 }
 0x70d   : > { %2057 = vmatpush.msrb.mxu0 %v1821_v19 }
 0x70f   : > { %2058 = vmatpush.msrb.mxu0 %v1818_v21  ;;  %v6404_v21 = vld [vmem:[%s9772_s4 + $0x10] sm:$0xff] }
 0x710   : > { %6429 = vmatmul.msk.f32.gmra.mxu3 %vm512_vm0, %v7615_v8  ;;  %2127 = vmatpush.msrb.mxu1 %v6404_v21 }
 0x711   : > { %2059 = vmatpush.msrb.mxu0 %v1815_v23 }
 0x713   : > { %2060 = vmatpush.msrb.mxu0 %v1812_v25 }
 0x718   : > { %6430 = vmatmul.msk.f32.gmra.mxu3 %vm512_vm0, %v7533_v60 }
 0x723   : > { %v1909_v29 = vpop.f32.mrf.mxu3 }
 0x724   : > { %v1910_v32 = vadd.f32 %v1909_v29, %v1836_v31  ;;  %v6816_v29 = vld [vmem:[%s9771_s3 + $0x7] ss:$0 sm:$0xff] }
 0x726   : > { %v1933_v35 = vsel %vm991_vm12, %v1910_v32, -inf }
 0x727   : > { %1934 = vmax.xlane.f32.xlu0 %v1933_v35 }
 0x72b   : > { %v1912_v38 = vpop.f32.mrf.mxu3 }
 0x72c   : > { %v1913_v43 = vadd.f32 %v1912_v38, %v1837_v37 }
 0x72e   : > { %v1936_v42 = vsel %vm991_vm12, %v1913_v43, -inf }
 0x72f   : > { %1937 = vmax.xlane.f32.xlu1 %v1936_v42 }
 0x733   : > { %v1915_v49 = vpop.f32.mrf.mxu3 }
 0x734   : > { %v1916_v44 = vadd.f32 %v1915_v49, %v1838_v46 }
 0x736   : > { %v1939_v52 = vsel %vm991_vm12, %v1916_v44, -inf }
 0x737   : > { %1940 = vmax.xlane.f32.xlu2 %v1939_v52 }
 0x73b   : > { %v1918_v57 = vpop.f32.mrf.mxu3 }
 0x73c   : > { %v7989_v58 = vadd.f32 %v1918_v57, %v1839_v55 }
 0x73e   : > { %v1942_v59 = vsel %vm991_vm12, %v7989_v58, -inf }
 0x73f   : > { %1943 = vmax.xlane.f32.xlu0 %v1942_v59 }
 0x743   : > { %v1921_v62 = vpop.f32.mrf.mxu3 }
 0x744   : > { %v7993_v63 = vadd.f32 %v1921_v62, %v1840_v61 }
 0x746   : > { %v1945_v1 = vsel %vm991_vm12, %v7993_v63, -inf }
 0x747   : > { %1946 = vmax.xlane.f32.xlu1 %v1945_v1 }
 0x74b   : > { %v1924_v56 = vpop.f32.mrf.mxu3 }
 0x74c   : > { %v7997_v3 = vadd.f32 %v1924_v56, %v1841_v2 }
 0x74e   : > { %v1948_v5 = vsel %vm991_vm12, %v7997_v3, -inf }
 0x74f   : > { %1949 = vmax.xlane.f32.xlu2 %v1948_v5 }
 0x753   : > { %v1927_v7 = vpop.f32.mrf.mxu3 }
 0x754   : > { %v8001_v9 = vadd.f32 %v1927_v7, %v1842_v26 }
 0x756   : > { %v1951_v0 = vsel %vm991_vm12, %v8001_v9, -inf }
 0x757   : > { %1952 = vmax.xlane.f32.xlu0 %v1951_v0 }
 0x75b   : > { %v1930_v14 = vpop.f32.mrf.mxu3 }
 0x75c   : > { %v8005_v50 = vadd.f32 %v1930_v14, %v1843_v10 }
 0x75e   : > { %v1954_v41 = vsel %vm991_vm12, %v8005_v50, -inf }
 0x75f   : > { %1955 = vmax.xlane.f32.xlu2 %v1954_v41 }
 0x763   : > { %v2239_v15 = vpop.f32.mrf.mxu3 }
 0x76b   : > { %v2242_v16 = vpop.f32.mrf.mxu3 }
 0x76c   : > { %v2243_v14 = vadd.f32 %v6816_v29, %v2242_v16 }
 0x773   : > { %v2245_v17 = vpop.f32.mrf.mxu3 }
 0x774   : > { %v2246_v7 = vadd.f32 %v6816_v29, %v2245_v17 }
 0x77b   : > { %v2248_v19 = vpop.f32.mrf.mxu3 }
 0x77c   : > { %v2249_v56 = vadd.f32 %v6816_v29, %v2248_v19  ;;  %v2240_v19 = vadd.f32 %v6816_v29, %v2239_v15 }
 0x783   : > { %v2251_v23 = vpop.f32.mrf.mxu3 }
 0x784   : > { %v2252_v62 = vadd.f32 %v6816_v29, %v2251_v23 }
 0x78b   : > { %v2254_v25 = vpop.f32.mrf.mxu3 }
 0x78c   : > { %v2255_v57 = vadd.f32 %v6816_v29, %v2254_v25 }
 0x793   : > { %v2257_v31 = vpop.f32.mrf.mxu3 }
 0x794   : > { %v2258_v49 = vadd.f32 %v6816_v29, %v2257_v31 }
 0x79a   : > { %v1935_v35 = vpop.xlane.xlu0 %1934 }
 0x79b   : > { %v1957_v37 = vsub.f32 %v1910_v32, %v1935_v35  ;;  %v2260_v38 = vpop.f32.mrf.mxu3 }
 0x79c   : > { %v2261_v42 = vadd.f32 %v6816_v29, %v2260_v38 }
 0x79d   : > { %v1965_v46 = vmul.f32 1.442695, %v1957_v37 }
 0x79e   : > { %6440 = vmatpush.xpose.msk.msra.mxu1 %vm901_vm11, %v2261_v42 }
 0x79f   : > { %6924 = vpow2.f32 %v1965_v46 }
 0x7a2   : > { %6441 = vmatpush.xpose.msk.msra.mxu1 %vm901_vm11, %v2258_v49  ;;  %v1938_v52 = vpop.xlane.xlu1 %1937 }
 0x7a3   : > { %v1958_v55 = vsub.f32 %v1913_v43, %v1938_v52 }
 0x7a5   : > { %v8017_v59 = vpop.eup %6924  ;;  %v1967_v61 = vmul.f32 1.442695, %v1958_v55 }
 0x7a6   : > { %6442 = vmatpush.xpose.msk.msra.mxu1 %vm901_vm11, %v2255_v57  ;;  %v1981_v32 = vsel %vm991_vm12, %v8017_v59, 0.0 }
 0x7a7   : > { %6926 = vpow2.f32 %v1967_v61  ;;  %1982 = vadd.xlane.f32.xlu1 %v1981_v32 }
 0x7aa   : > { %6443 = vmatpush.xpose.msk.msra.mxu1 %vm901_vm11, %v2252_v62  ;;  %v1941_v1 = vpop.xlane.xlu2 %1940 }
 0x7ab   : > { %v1959_v2 = vsub.f32 %v1916_v44, %v1941_v1 }
 0x7ad   : > { %v6927_v5 = vpop.eup %6926  ;;  %v1969_v26 = vmul.f32 1.442695, %v1959_v2 }
 0x7ae   : > { %6444 = vmatpush.xpose.msk.msra.mxu1 %vm901_vm11, %v2249_v56  ;;  %v1984_v43 = vsel %vm991_vm12, %v6927_v5, 0.0 }
 0x7af   : > { %6928 = vpow2.f32 %v1969_v26  ;;  %1985 = vadd.xlane.f32.xlu0 %v1984_v43 }
 0x7b2   : > { %6445 = vmatpush.xpose.msk.msra.mxu1 %vm901_vm11, %v2246_v7  ;;  %v1944_v0 = vpop.xlane.xlu0 %1943 }
 0x7b3   : > { %v1960_v10 = vsub.f32 %v7989_v58, %v1944_v0 }
 0x7b5   : > { %v6929_v41 = vpop.eup %6928  ;;  %v1971_v21 = vmul.f32 1.442695, %v1960_v10 }
 0x7b6   : > { %6446 = vmatpush.xpose.msk.msra.mxu1 %vm901_vm11, %v2243_v14  ;;  %v1987_v44 = vsel %vm991_vm12, %v6929_v41, 0.0 }
 0x7b7   : > { %6930 = vpow2.f32 %v1971_v21  ;;  %1988 = vadd.xlane.f32.xlu1 %v1987_v44 }
 0x7ba   : > { %6447 = vmatpush.xpose.msk.msra.mxu1 %vm901_vm11, %v2240_v19  ;;  %v1947_v23 = vpop.xlane.xlu1 %1946  ;;  %v2266_v19 = vld [vmem:[#allocation4 + $0x170] sm:$0xff] }
 0x7bb   : > { %v1961_v17 = vsub.f32 %v7993_v63, %v1947_v23  ;;  %v2265_v23 = vld [vmem:[#allocation4 + $0x168] sm:$0xff] }
 0x7bd   : > { %v6931_v25 = vpop.eup %6930  ;;  %v1973_v31 = vmul.f32 1.442695, %v1961_v17 }
 0x7be   : > { %v1990_v35 = vsel %vm991_vm12, %v6931_v25, 0.0 }
 0x7bf   : > { %6932 = vpow2.f32 %v1973_v31  ;;  %1991 = vadd.xlane.f32.xlu2 %v1990_v35 }
 0x7c2   : > { %v1950_v58 = vpop.xlane.xlu2 %1949 }
 0x7c3   : > { %v1962_v16 = vsub.f32 %v7997_v3, %v1950_v58 }
 0x7c5   : > { %v6933_v37 = vpop.eup %6932  ;;  %v1975_v38 = vmul.f32 1.442695, %v1962_v16 }
 0x7c6   : > { %v1993_v42 = vsel %vm991_vm12, %v6933_v37, 0.0 }
 0x7c7   : > { %6934 = vpow2.f32 %v1975_v38  ;;  %1994 = vadd.xlane.f32.xlu0 %v1993_v42 }
 0x7ca   : > { %v1953_v15 = vpop.xlane.xlu0 %1952 }
 0x7cb   : > { %v1963_v29 = vsub.f32 %v8001_v9, %v1953_v15 }
 0x7cd   : > { %v6935_v46 = vpop.eup %6934  ;;  %v1977_v63 = vmul.f32 1.442695, %v1963_v29 }
 0x7ce   : > { %v1996_v49 = vsel %vm991_vm12, %v6935_v46, 0.0 }
 0x7cf   : > { %6936 = vpow2.f32 %v1977_v63  ;;  %1997 = vadd.xlane.f32.xlu1 %v1996_v49  ;;  %v6815_v63 = vld [vmem:[%s9771_s3 + $0x3] ss:$0 sm:$0xff] }
 0x7d2   : > { %v1956_v52 = vpop.xlane.xlu2 %1955 }
 0x7d3   : > { %v1964_v55 = vsub.f32 %v8005_v50, %v1956_v52 }
 0x7d5   : > { %v6937_v57 = vpop.eup %6936  ;;  %v1979_v3 = vmul.f32 1.442695, %v1964_v55 }
 0x7d6   : > { %v1999_v61 = vsel %vm991_vm12, %v6937_v57, 0.0 }
 0x7d7   : > { %6938 = vpow2.f32 %v1979_v3  ;;  %2000 = vadd.xlane.f32.xlu2 %v1999_v61 }
 0x7dd   : > { %v6939_v32 = vpop.eup %6938 }
 0x7de   : > { %v2002_v62 = vsel %vm991_vm12, %v6939_v32, 0.0 }
 0x7df   : > { %2003 = vadd.xlane.f32.xlu0 %v2002_v62 }
 0x81a   : > { %v1983_v9 = vpop.xlane.xlu1 %1982 }
 0x81b   : > { %6940 = vrcp.f32 %v1983_v9 }
 0x821   : > { %v6941_v1 = vpop.eup %6940 }
 0x822   : > { %v2013_v2 = vmul.f32 %v6941_v1, %v8017_v59  ;;  %v1986_v56 = vpop.xlane.xlu0 %1985  ;;  %v2267_v59 = vld [vmem:[#allocation4 + $0x178] sm:$0xff] }
 0x823   : > { %6942 = vrcp.f32 %v1986_v56  ;;  %2285 = vmatpush.msra.mxu0 %v2267_v59  ;;  %v6817_v59 = vld [vmem:[%s9771_s3 + $0xb] ss:$0 sm:$0xff] }
 0x824   : > { %6396 = vmatmul.msk.f32.vlgmr.msrb.gmra.mxu0 %vm991_vm12, %v2013_v2 }
 0x825   : > { %2286 = vmatpush.msra.mxu0 %v2266_v19 }
 0x827   : > { %2287 = vmatpush.msra.mxu0 %v2265_v23 }
 0x829   : > { %v6943_v50 = vpop.eup %6942 }
 0x82a   : > { %v1989_v26 = vpop.xlane.xlu1 %1988  ;;  %v2014_v43 = vmul.f32 %v6943_v50, %v6927_v5  ;;  %v2264_v5 = vld [vmem:[#allocation4 + $0x160] sm:$0xff] }
 0x82b   : > { %6944 = vrcp.f32 %v1989_v26  ;;  %2288 = vmatpush.msra.mxu0 %v2264_v5 }
 0x82c   : > { %6397 = vmatmul.msk.f32.gmra.mxu0 %vm991_vm12, %v2014_v43 }
 0x831   : > { %v6945_v7 = vpop.eup %6944 }
 0x832   : > { %v1992_v0 = vpop.xlane.xlu2 %1991  ;;  %v2015_v10 = vmul.f32 %v6945_v7, %v6929_v41 }
 0x833   : > { %6946 = vrcp.f32 %v1992_v0 }
 0x834   : > { %6398 = vmatmul.msk.f32.gmra.mxu0 %vm991_vm12, %v2015_v10 }
 0x839   : > { %v6947_v14 = vpop.eup %6946 }
 0x83a   : > { %v1995_v21 = vpop.xlane.xlu0 %1994  ;;  %v2016_v44 = vmul.f32 %v6947_v14, %v6931_v25 }
 0x83b   : > { %6948 = vrcp.f32 %v1995_v21 }
 0x83c   : > { %6399 = vmatmul.msk.f32.gmra.mxu0 %vm991_vm12, %v2016_v44 }
 0x841   : > { %v6949_v17 = vpop.eup %6948 }
 0x842   : > { %v1998_v31 = vpop.xlane.xlu1 %1997  ;;  %v2017_v35 = vmul.f32 %v6949_v17, %v6933_v37 }
 0x843   : > { %6950 = vrcp.f32 %v1998_v31 }
 0x844   : > { %6400 = vmatmul.msk.f32.gmra.mxu0 %vm991_vm12, %v2017_v35 }
 0x849   : > { %v6951_v41 = vpop.eup %6950 }
 0x84a   : > { %v2001_v58 = vpop.xlane.xlu2 %2000  ;;  %v2018_v25 = vmul.f32 %v6951_v41, %v6935_v46 }
 0x84b   : > { %6952 = vrcp.f32 %v2001_v58 }
 0x84c   : > { %6401 = vmatmul.msk.f32.gmra.mxu0 %vm991_vm12, %v2018_v25 }
 0x851   : > { %v6953_v16 = vpop.eup %6952 }
 0x852   : > { %v2004_v38 = vpop.xlane.xlu0 %2003  ;;  %v2019_v42 = vmul.f32 %v6953_v16, %v6937_v57 }
 0x853   : > { %6954 = vrcp.f32 %v2004_v38 }
 0x854   : > { %6402 = vmatmul.msk.f32.gmra.mxu0 %vm991_vm12, %v2019_v42 }
 0x859   : > { %v6955_v15 = vpop.eup %6954 }
 0x85a   : > { %v2020_v29 = vmul.f32 %v6955_v15, %v6939_v32 }
 0x85c   : > { %6403 = vmatmul.msk.f32.gmra.mxu0 %vm991_vm12, %v2020_v29 }
 0x864   : > { %6432 = vmatmul.msk.f32.vlgmr.msra.gmra.mxu0 %vm512_vm0, %v7546_v13 }
 0x86c   : > { %6433 = vmatmul.msk.f32.gmra.mxu0 %vm512_vm0, %v7558_v22 }
 0x874   : > { %6434 = vmatmul.msk.f32.gmra.mxu0 %vm512_vm0, %v7570_v45 }
 0x87c   : > { %6435 = vmatmul.msk.f32.gmra.mxu0 %vm512_vm0, %v7582_v39 }
 0x884   : > { %6436 = vmatmul.msk.f32.gmra.mxu0 %vm512_vm0, %v7592_v48 }
 0x88c   : > { %6437 = vmatmul.msk.f32.gmra.mxu0 %vm512_vm0, %v7603_v51 }
 0x894   : > { %6438 = vmatmul.msk.f32.gmra.mxu0 %vm512_vm0, %v7615_v8  ;;  %v2188_v8 = vpop.f32.mrf.mxu2 }
 0x895   : > { %v2189_v49 = vadd.f32 %v6815_v63, %v2188_v8 }
 0x89c   : > { %6439 = vmatmul.msk.f32.gmra.mxu0 %vm512_vm0, %v7533_v60  ;;  %v2191_v37 = vpop.f32.mrf.mxu2 }
 0x89d   : > { %v2192_v57 = vadd.f32 %v6815_v63, %v2191_v37 }
 0x8a1   : > { %v2062_v13 = vpop.f32.mrf.mxu0 }
 0x8a2   : > { %6405 = vmatmul.msk.f32.vlgmr.msrb.gmra.mxu1 %vm901_vm11, %v2062_v13 }
 0x8a4   : > { %v2194_v55 = vpop.f32.mrf.mxu2 }
 0x8a5   : > { %v2195_v32 = vadd.f32 %v6815_v63, %v2194_v55 }
 0x8a9   : > { %v2065_v22 = vpop.f32.mrf.mxu0 }
 0x8aa   : > { %6406 = vmatmul.msk.f32.gmra.mxu1 %vm901_vm11, %v2065_v22 }
 0x8ac   : > { %v2197_v61 = vpop.f32.mrf.mxu2 }
 0x8ad   : > { %v2198_v1 = vadd.f32 %v6815_v63, %v2197_v61 }
 0x8b1   : > { %v2068_v45 = vpop.f32.mrf.mxu0 }
 0x8b2   : > { %6407 = vmatmul.msk.f32.gmra.mxu1 %vm901_vm11, %v2068_v45 }
 0x8b4   : > { %v2200_v9 = vpop.f32.mrf.mxu2 }
 0x8b5   : > { %v2201_v56 = vadd.f32 %v6815_v63, %v2200_v9  ;;  %v2319_v9 = vld [vmem:[#allocation2 + $0xe0] sm:$0xff] }
 0x8b9   : > { %v2071_v39 = vpop.f32.mrf.mxu0 }
 0x8ba   : > { %6408 = vmatmul.msk.f32.gmra.mxu1 %vm901_vm11, %v2071_v39  ;;  %v2315_v39 = vld [vmem:[#allocation2 + $0xc0] sm:$0xff] }
 0x8bc   : > { %v2203_v50 = vpop.f32.mrf.mxu2 }
 0x8bd   : > { %v2204_v43 = vadd.f32 %v6815_v63, %v2203_v50  ;;  %v2320_v50 = vld [vmem:[#allocation2 + $0xe8] sm:$0xff] }
 0x8c1   : > { %v2074_v48 = vpop.f32.mrf.mxu0 }
 0x8c2   : > { %6409 = vmatmul.msk.f32.gmra.mxu1 %vm901_vm11, %v2074_v48 }
 0x8c4   : > { %v2206_v0 = vpop.f32.mrf.mxu2 }
 0x8c5   : > { %v2207_v10 = vadd.f32 %v6815_v63, %v2206_v0  ;;  %v2321_v0 = vld [vmem:[#allocation2 + $0xf0] sm:$0xff] }
 0x8c9   : > { %v2077_v51 = vpop.f32.mrf.mxu0 }
 0x8ca   : > { %6410 = vmatmul.msk.f32.gmra.mxu1 %vm901_vm11, %v2077_v51 }
 0x8cc   : > { %v2209_v21 = vpop.f32.mrf.mxu2 }
 0x8cd   : > { %v2210_v44 = vadd.f32 %v6815_v63, %v2209_v21 }
 0x8d1   : > { %v2080_v60 = vpop.f32.mrf.mxu0 }
 0x8d2   : > { %6411 = vmatmul.msk.f32.gmra.mxu1 %vm901_vm11, %v2080_v60  ;;  %v2316_v60 = vld [vmem:[#allocation2 + $0xc8] sm:$0xff] }
 0x8d9   : > { %v2083_v46 = vpop.f32.mrf.mxu0 }
 0x8da   : > { %6412 = vmatmul.msk.f32.gmra.mxu1 %vm901_vm11, %v2083_v46 }
 0x8e1   : > { %v2290_v52 = vpop.f32.mrf.mxu0 }
 0x8e2   : > { %6448 = vmatmul.msk.f32.vlgmr.msra.gmra.mxu1 %vm901_vm11, %v2189_v49  ;;  %v2291_v38 = vadd.f32 %v6817_v59, %v2290_v52  ;;  %v2317_v49 = vld [vmem:[#allocation2 + $0xd0] sm:$0xff] }
 0x8e9   : > { %v2293_v3 = vpop.f32.mrf.mxu0 }
 0x8ea   : > { %6449 = vmatmul.msk.f32.gmra.mxu1 %vm901_vm11, %v2192_v57  ;;  %v2294_v25 = vadd.f32 %v6817_v59, %v2293_v3  ;;  %v2318_v3 = vld [vmem:[#allocation2 + $0xd8] sm:$0xff] }
 0x8f1   : > { %v2296_v62 = vpop.f32.mrf.mxu0 }
 0x8f2   : > { %6450 = vmatmul.msk.f32.gmra.mxu1 %vm901_vm11, %v2195_v32  ;;  %v2297_v58 = vadd.f32 %v6817_v59, %v2296_v62 }
 0x8f9   : > { %v2299_v2 = vpop.f32.mrf.mxu0 }
 0x8fa   : > { %6451 = vmatmul.msk.f32.gmra.mxu1 %vm901_vm11, %v2198_v1  ;;  %v2300_v41 = vadd.f32 %v6817_v59, %v2299_v2 }
 0x901   : > { %v2302_v26 = vpop.f32.mrf.mxu0 }
 0x902   : > { %6452 = vmatmul.msk.f32.gmra.mxu1 %vm901_vm11, %v2201_v56  ;;  %v2303_v35 = vadd.f32 %v6817_v59, %v2302_v26 }
 0x909   : > { %v2305_v7 = vpop.f32.mrf.mxu0 }
 0x90a   : > { %6453 = vmatmul.msk.f32.gmra.mxu1 %vm901_vm11, %v2204_v43  ;;  %v2306_v17 = vadd.f32 %v6817_v59, %v2305_v7 }
 0x911   : > { %v2308_v14 = vpop.f32.mrf.mxu0 }
 0x912   : > { %6454 = vmatmul.msk.f32.gmra.mxu1 %vm901_vm11, %v2207_v10  ;;  %v2309_v5 = vadd.f32 %v6817_v59, %v2308_v14 }
 0x919   : > { %v2311_v19 = vpop.f32.mrf.mxu0 }
 0x91a   : > { %v2312_v23 = vadd.f32 %v6817_v59, %v2311_v19  ;;  %6455 = vmatmul.msk.f32.gmra.mxu1 %vm901_vm11, %v2210_v44  ;;  %v2322_v44 = vld [vmem:[#allocation2 + $0xf8] sm:$0xff] }
 0x91c   : > { %2532 = vmatpush.msrb.mxu2 %v2312_v23 }
 0x91e   : > { %2533 = vmatpush.msrb.mxu2 %v2309_v5 }
 0x91f   : > { %v8086_v31 = vpop.f32.mrf.mxu1 }
 0x920   : > { %2534 = vmatpush.msrb.mxu2 %v2306_v17 }
 0x922   : > { %2535 = vmatpush.msrb.mxu2 %v2303_v35 }
 0x924   : > { %2536 = vmatpush.msrb.mxu2 %v2300_v41 }
 0x926   : > { %2537 = vmatpush.msrb.mxu2 %v2297_v58 }
 0x927   : > { %v8088_v16 = vpop.f32.mrf.mxu1 }
 0x928   : > { %2538 = vmatpush.msrb.mxu2 %v2294_v25 }
 0x92a   : > { %2539 = vmatpush.msrb.mxu2 %v2291_v38 }
 0x92f   : > { %v8090_v42 = vpop.f32.mrf.mxu1 }
 0x937   : > { %v8092_v15 = vpop.f32.mrf.mxu1 }
 0x93f   : > { %v8094_v29 = vpop.f32.mrf.mxu1 }
 0x947   : > { %v8096_v13 = vpop.f32.mrf.mxu1 }
 0x94f   : > { %v8098_v22 = vpop.f32.mrf.mxu1 }
 0x957   : > { %v8100_v45 = vpop.f32.mrf.mxu1 }
 0x95f   : > { %v2388_v48 = vpop.f32.mrf.mxu1 }
 0x960   : > { %v2389_v51 = vadd.f32 %v2388_v48, %v2315_v39 }
 0x962   : > { %v2412_v8 = vsel %vm991_vm12, %v2389_v51, -inf }
 0x963   : > { %2413 = vmax.xlane.f32.xlu1 %v2412_v8 }
 0x967   : > { %v2391_v37 = vpop.f32.mrf.mxu1 }
 0x968   : > { %v2392_v46 = vadd.f32 %v2391_v37, %v2316_v60 }
 0x96a   : > { %v2415_v63 = vsel %vm991_vm12, %v2392_v46, -inf }
 0x96b   : > { %2416 = vmax.xlane.f32.xlu2 %v2415_v63 }
 0x96f   : > { %v2394_v52 = vpop.f32.mrf.mxu1 }
 0x970   : > { %v2395_v55 = vadd.f32 %v2394_v52, %v2317_v49 }
 0x972   : > { %v2418_v57 = vsel %vm991_vm12, %v2395_v55, -inf }
 0x973   : > { %2419 = vmax.xlane.f32.xlu0 %v2418_v57 }
 0x977   : > { %v2397_v61 = vpop.f32.mrf.mxu1 }
 0x978   : > { %v2398_v32 = vadd.f32 %v2397_v61, %v2318_v3 }
 0x97a   : > { %v2421_v62 = vsel %vm991_vm12, %v2398_v32, -inf }
 0x97b   : > { %2422 = vmax.xlane.f32.xlu1 %v2421_v62 }
 0x97f   : > { %v2400_v1 = vpop.f32.mrf.mxu1 }
 0x980   : > { %v2401_v2 = vadd.f32 %v2400_v1, %v2319_v9 }
 0x982   : > { %v2424_v56 = vsel %vm991_vm12, %v2401_v2, -inf }
 0x983   : > { %2425 = vmax.xlane.f32.xlu2 %v2424_v56 }
 0x987   : > { %v2403_v26 = vpop.f32.mrf.mxu1 }
 0x988   : > { %v2404_v43 = vadd.f32 %v2403_v26, %v2320_v50 }
 0x98a   : > { %v2427_v7 = vsel %vm991_vm12, %v2404_v43, -inf }
 0x98b   : > { %2428 = vmax.xlane.f32.xlu0 %v2427_v7 }
 0x98f   : > { %v2406_v10 = vpop.f32.mrf.mxu1 }
 0x990   : > { %v2407_v14 = vadd.f32 %v2406_v10, %v2321_v0 }
 0x992   : > { %v2430_v21 = vsel %vm991_vm12, %v2407_v14, -inf }
 0x993   : > { %2431 = vmax.xlane.f32.xlu1 %v2430_v21 }
 0x997   : > { %v2409_v59 = vpop.f32.mrf.mxu1 }
 0x998   : > { %v2410_v19 = vadd.f32 %v2409_v59, %v2322_v44 }
 0x99a   : > { %v2433_v23 = vsel %vm991_vm12, %v2410_v19, -inf }
 0x99b   : > { %2434 = vmax.xlane.f32.xlu0 %v2433_v23 }
 0x9d6   : > { %v2414_v5 = vpop.xlane.xlu1 %2413 }
 0x9d7   : > { %v2436_v17 = vsub.f32 %v2389_v51, %v2414_v5 }
 0x9d9   : > { %v2444_v35 = vmul.f32 1.442695, %v2436_v17 }
 0x9db   : > { %6956 = vpow2.f32 %v2444_v35 }
 0x9de   : > { %v2417_v41 = vpop.xlane.xlu2 %2416 }
 0x9df   : > { %v2437_v58 = vsub.f32 %v2392_v46, %v2417_v41 }
 0x9e1   : > { %v6957_v25 = vpop.eup %6956  ;;  %v2446_v38 = vmul.f32 1.442695, %v2437_v58 }
 0x9e2   : > { %v2460_v39 = vsel %vm991_vm12, %v6957_v25, 0.0 }
 0x9e3   : > { %6958 = vpow2.f32 %v2446_v38  ;;  %2461 = vadd.xlane.f32.xlu2 %v2460_v39 }
 0x9e6   : > { %v2420_v48 = vpop.xlane.xlu0 %2419 }
 0x9e7   : > { %v2438_v8 = vsub.f32 %v2395_v55, %v2420_v48 }
 0x9e9   : > { %v6959_v60 = vpop.eup %6958  ;;  %v2448_v37 = vmul.f32 1.442695, %v2438_v8 }
 0x9ea   : > { %v2463_v63 = vsel %vm991_vm12, %v6959_v60, 0.0 }
 0x9eb   : > { %6960 = vpow2.f32 %v2448_v37  ;;  %2464 = vadd.xlane.f32.xlu1 %v2463_v63 }
 0x9ee   : > { %v2423_v49 = vpop.xlane.xlu1 %2422 }
 0x9ef   : > { %v2439_v51 = vsub.f32 %v2398_v32, %v2423_v49 }
 0x9f1   : > { %v6961_v52 = vpop.eup %6960  ;;  %v2450_v57 = vmul.f32 1.442695, %v2439_v51 }
 0x9f2   : > { %v2466_v46 = vsel %vm991_vm12, %v6961_v52, 0.0 }
 0x9f3   : > { %6962 = vpow2.f32 %v2450_v57  ;;  %2467 = vadd.xlane.f32.xlu2 %v2466_v46 }
 0x9f6   : > { %v2426_v3 = vpop.xlane.xlu2 %2425 }
 0x9f7   : > { %v2440_v61 = vsub.f32 %v2401_v2, %v2426_v3 }
 0x9f9   : > { %v6963_v62 = vpop.eup %6962  ;;  %v2452_v9 = vmul.f32 1.442695, %v2440_v61 }
 0x9fa   : > { %v2469_v55 = vsel %vm991_vm12, %v6963_v62, 0.0 }
 0x9fb   : > { %6964 = vpow2.f32 %v2452_v9  ;;  %2470 = vadd.xlane.f32.xlu0 %v2469_v55 }
 0x9fe   : > { %v2429_v1 = vpop.xlane.xlu0 %2428 }
 0x9ff   : > { %v2441_v56 = vsub.f32 %v2404_v43, %v2429_v1 }
 0xa01   : > { %v6965_v50 = vpop.eup %6964  ;;  %v2454_v26 = vmul.f32 1.442695, %v2441_v56 }
 0xa02   : > { %v2472_v32 = vsel %vm991_vm12, %v6965_v50, 0.0 }
 0xa03   : > { %6966 = vpow2.f32 %v2454_v26  ;;  %2473 = vadd.xlane.f32.xlu1 %v2472_v32 }
 0xa06   : > { %v2432_v7 = vpop.xlane.xlu1 %2431 }
 0xa07   : > { %v2442_v0 = vsub.f32 %v2407_v14, %v2432_v7 }
 0xa09   : > { %v6967_v10 = vpop.eup %6966  ;;  %v2456_v21 = vmul.f32 1.442695, %v2442_v0 }
 0xa0a   : > { %v2475_v2 = vsel %vm991_vm12, %v6967_v10, 0.0 }
 0xa0b   : > { %6968 = vpow2.f32 %v2456_v21  ;;  %2476 = vadd.xlane.f32.xlu2 %v2475_v2 }
 0xa0e   : > { %v2435_v44 = vpop.xlane.xlu0 %2434 }
 0xa0f   : > { %v2443_v59 = vsub.f32 %v2410_v19, %v2435_v44 }
 0xa11   : > { %v6969_v23 = vpop.eup %6968  ;;  %v2458_v5 = vmul.f32 1.442695, %v2443_v59  ;;  %v1659_v59 = vadd.f32 %v7950_v4, %v7905_v18 }
 0xa12   : > { %v2478_v43 = vsel %vm991_vm12, %v6969_v23, 0.0 }
 0xa13   : > { %6970 = vpow2.f32 %v2458_v5  ;;  %2479 = vadd.xlane.f32.xlu0 %v2478_v43 }
 0xa19   : > { %v6971_v17 = vpop.eup %6970 }
 0xa1a   : > { %v2481_v35 = vsel %vm991_vm12, %v6971_v17, 0.0 }
 0xa1b   : > { %2482 = vadd.xlane.f32.xlu1 %v2481_v35  ;;  %v7228_v35 = vld [vmem:[%s7427_s16] sm:$0xff] }
 0xa56   : > { %v2462_v41 = vpop.xlane.xlu2 %2461 }
 0xa57   : > { %6972 = vrcp.f32 %v2462_v41 }
 0xa5d   : > { %v6973_v14 = vpop.eup %6972 }
 0xa5e   : > { %v2492_v58 = vmul.f32 %v6973_v14, %v6957_v25  ;;  %v2465_v38 = vpop.xlane.xlu1 %2464  ;;  %v6464_v25 = vld [vmem:[%s9772_s4 + $0x18] sm:$0xff]  ;;  %v1662_v14 = vadd.f32 %v7953_v6, %v7911_v28 }
 0xa5f   : > { %6974 = vrcp.f32 %v2465_v38  ;;  %2606 = vmatpush.msrb.mxu3 %v6464_v25 }
 0xa60   : > { %6456 = vmatmul.msk.f32.vlgmr.msrb.gmra.mxu2 %vm991_vm12, %v2492_v58  ;;  %v2154_v18 = vadd.f32 %v8088_v16, %v1662_v14 }
 0xa65   : > { %v6975_v39 = vpop.eup %6974 }
 0xa66   : > { %v2468_v19 = vpop.xlane.xlu2 %2467  ;;  %v2493_v48 = vmul.f32 %v6975_v39, %v6959_v60  ;;  %v7229_v39 = vld [vmem:[%s7427_s16 + $0x8] sm:$0xff] }
 0xa67   : > { %6976 = vrcp.f32 %v2468_v19 }
 0xa68   : > { %6457 = vmatmul.msk.f32.gmra.mxu2 %vm991_vm12, %v2493_v48  ;;  %v1665_v48 = vadd.f32 %v7959_v47, %v7920_v33 }
 0xa6a   : > { %v2155_v6 = vadd.f32 %v8090_v42, %v1665_v48 }
 0xa6d   : > { %v6977_v8 = vpop.eup %6976 }
 0xa6e   : > { %v2471_v37 = vpop.xlane.xlu0 %2470  ;;  %v2494_v63 = vmul.f32 %v6977_v8, %v6961_v52 }
 0xa6f   : > { %6978 = vrcp.f32 %v2471_v37 }
 0xa70   : > { %6458 = vmatmul.msk.f32.gmra.mxu2 %vm991_vm12, %v2494_v63  ;;  %v7230_v63 = vld [vmem:[%s7427_s16 + $0x10] sm:$0xff] }
 0xa75   : > { %v6979_v49 = vpop.eup %6978 }
 0xa76   : > { %v2474_v51 = vpop.xlane.xlu1 %2473  ;;  %v2495_v57 = vmul.f32 %v6979_v49, %v6963_v62 }
 0xa77   : > { %6980 = vrcp.f32 %v2474_v51  ;;  %v1668_v51 = vadd.f32 %v7963_v11, %v7926_v34 }
 0xa78   : > { %6459 = vmatmul.msk.f32.gmra.mxu2 %vm991_vm12, %v2495_v57 }
 0xa79   : > { %v2156_v47 = vadd.f32 %v8092_v15, %v1668_v51 }
 0xa7d   : > { %v6981_v60 = vpop.eup %6980 }
 0xa7e   : > { %v2477_v46 = vpop.xlane.xlu2 %2476  ;;  %v2496_v3 = vmul.f32 %v6981_v60, %v6965_v50  ;;  %v7231_v60 = vld [vmem:[%s7427_s16 + $0x18] sm:$0xff] }
 0xa7f   : > { %6982 = vrcp.f32 %v2477_v46 }
 0xa80   : > { %6460 = vmatmul.msk.f32.gmra.mxu2 %vm991_vm12, %v2496_v3  ;;  %v1671_v3 = vadd.f32 %v7967_v12, %v7931_v36 }
 0xa82   : > { %v2157_v11 = vadd.f32 %v8094_v29, %v1671_v3 }
 0xa85   : > { %v6983_v52 = vpop.eup %6982 }
 0xa86   : > { %v2480_v61 = vpop.xlane.xlu0 %2479  ;;  %v2497_v9 = vmul.f32 %v6983_v52, %v6967_v10 }
 0xa87   : > { %6984 = vrcp.f32 %v2480_v61 }
 0xa88   : > { %6461 = vmatmul.msk.f32.gmra.mxu2 %vm991_vm12, %v2497_v9  ;;  %v7232_v9 = vld [vmem:[%s7427_s16 + $0x20] sm:$0xff] }
 0xa8d   : > { %v6985_v62 = vpop.eup %6984 }
 0xa8e   : > { %v2483_v55 = vpop.xlane.xlu1 %2482  ;;  %v2498_v1 = vmul.f32 %v6985_v62, %v6969_v23  ;;  %v2153_v23 = vadd.f32 %v8086_v31, %v1659_v59 }
 0xa8f   : > { %6986 = vrcp.f32 %v2483_v55  ;;  %v1674_v55 = vadd.f32 %v7974_v27, %v7936_v40 }
 0xa90   : > { %6462 = vmatmul.msk.f32.gmra.mxu2 %vm991_vm12, %v2498_v1 }
 0xa91   : > { %v2158_v12 = vadd.f32 %v8096_v13, %v1674_v55 }
 0xa95   : > { %v6987_v56 = vpop.eup %6986 }
 0xa96   : > { %v2499_v26 = vmul.f32 %v6987_v56, %v6971_v17  ;;  %v8143_v17 = vld [vmem:[%s9773_s5] ss:$0 sm:$0xff] }
 0xa98   : > { %6463 = vmatmul.msk.f32.gmra.mxu2 %vm991_vm12, %v2499_v26  ;;  %v7233_v26 = vld [vmem:[%s7427_s16 + $0x28] sm:$0xff] }
 0xae3   : > { %v2541_v50 = vpop.f32.mrf.mxu2 }
 0xae4   : > { %6465 = vmatmul.msk.f32.vlgmr.msrb.gmra.mxu3 %vm901_vm11, %v2541_v50 }
 0xaeb   : > { %v2544_v32 = vpop.f32.mrf.mxu2 }
 0xaec   : > { %6466 = vmatmul.msk.f32.gmra.mxu3 %vm901_vm11, %v2544_v32  ;;  %v1677_v32 = vadd.f32 %v7980_v24, %v7941_v54  ;;  %v1680_v24 = vadd.f32 %v7984_v30, %v7946_v53 }
 0xaee   : > { %v2159_v40 = vadd.f32 %v8098_v22, %v1677_v32  ;;  %v2160_v59 = vadd.f32 %v8100_v45, %v1680_v24 }
 0xaf3   : > { %v2547_v7 = vpop.f32.mrf.mxu2 }
 0xaf4   : > { %6467 = vmatmul.msk.f32.gmra.mxu3 %vm901_vm11, %v2547_v7 }
 0xafb   : > { %v2550_v0 = vpop.f32.mrf.mxu2 }
 0xafc   : > { %6468 = vmatmul.msk.f32.gmra.mxu3 %vm901_vm11, %v2550_v0 }
 0xb03   : > { %v2553_v10 = vpop.f32.mrf.mxu2 }
 0xb04   : > { %6469 = vmatmul.msk.f32.gmra.mxu3 %vm901_vm11, %v2553_v10  ;;  %v7234_v10 = vld [vmem:[%s7427_s16 + $0x30] sm:$0xff] }
 0xb0b   : > { %v2556_v21 = vpop.f32.mrf.mxu2 }
 0xb0c   : > { %6470 = vmatmul.msk.f32.gmra.mxu3 %vm901_vm11, %v2556_v21 }
 0xb13   : > { %v2559_v2 = vpop.f32.mrf.mxu2 }
 0xb14   : > { %6471 = vmatmul.msk.f32.gmra.mxu3 %vm901_vm11, %v2559_v2 }
 0xb1b   : > { %v2562_v44 = vpop.f32.mrf.mxu2 }
 0xb1c   : > { %6472 = vmatmul.msk.f32.gmra.mxu3 %vm901_vm11, %v2562_v44 }
 0xb67   : > { %v2608_v5 = vpop.f32.mrf.mxu3 }
 0xb68   : > { %v2632_v43 = vadd.f32 %v2608_v5, %v2153_v23 }
 0xb6a   : > { %v2640_v41 = vadd.f32 %v7228_v35, %v2632_v43 }
 0xb6c   : > { %v8149_v58 = vadd.f32 %v8143_v17, %v2640_v41  ;;  %v7235_v41 = vld [vmem:[%s7427_s16 + $0x38] sm:$0xff] }
 0xb6e   : > { %v2662_v4 = vsel %vm512_vm0, %v8149_v58, 0.0 }
 0xb6f   : > { %2663 = vadd.xlane.f32.xlu2 %v2662_v4  ;;  %v2611_v31 = vpop.f32.mrf.mxu3 }
 0xb70   : > { %v2633_v38 = vadd.f32 %v2611_v31, %v2154_v18 }
 0xb72   : > { %v2641_v19 = vadd.f32 %v7229_v39, %v2633_v38 }
 0xb74   : > { %v8158_v28 = vadd.f32 %v8143_v17, %v2641_v19 }
 0xb76   : > { %v2665_v16 = vsel %vm512_vm0, %v8158_v28, 0.0 }
 0xb77   : > { %2666 = vadd.xlane.f32.xlu0 %v2665_v16  ;;  %v2614_v8 = vpop.f32.mrf.mxu3 }
 0xb78   : > { %v2634_v37 = vadd.f32 %v2614_v8, %v2155_v6 }
 0xb7a   : > { %v2642_v49 = vadd.f32 %v7230_v63, %v2634_v37  ;;  %v2863_v37 = vld [vmem:[%s9778_s10 + $0x18] sm:$0xff] }
 0xb7b   : > { %2904 = vmatpush.msrb.mxu0 %v2863_v37 }
 0xb7c   : > { %v8167_v33 = vadd.f32 %v8143_v17, %v2642_v49 }
 0xb7e   : > { %v2668_v42 = vsel %vm512_vm0, %v8167_v33, 0.0 }
 0xb7f   : > { %2669 = vadd.xlane.f32.xlu1 %v2668_v42  ;;  %v2617_v57 = vpop.f32.mrf.mxu3 }
 0xb80   : > { %v2635_v25 = vadd.f32 %v2617_v57, %v2156_v47 }
 0xb82   : > { %v2643_v46 = vadd.f32 %v7231_v60, %v2635_v25 }
 0xb84   : > { %v8176_v34 = vadd.f32 %v8143_v17, %v2643_v46 }
 0xb86   : > { %v2671_v15 = vsel %vm512_vm0, %v8176_v34, 0.0 }
 0xb87   : > { %2672 = vadd.xlane.f32.xlu2 %v2671_v15  ;;  %v2620_v52 = vpop.f32.mrf.mxu3 }
 0xb88   : > { %v2636_v61 = vadd.f32 %v2620_v52, %v2157_v11 }
 0xb8a   : > { %v2644_v62 = vadd.f32 %v7232_v9, %v2636_v61 }
 0xb8c   : > { %v8185_v36 = vadd.f32 %v8143_v17, %v2644_v62 }
 0xb8e   : > { %v2674_v29 = vsel %vm512_vm0, %v8185_v36, 0.0 }
 0xb8f   : > { %2675 = vadd.xlane.f32.xlu0 %v2674_v29  ;;  %v2623_v1 = vpop.f32.mrf.mxu3 }
 0xb90   : > { %v2637_v56 = vadd.f32 %v2623_v1, %v2158_v12  ;;  %v2862_v1 = vld [vmem:[%s9778_s10 + $0x10] sm:$0xff] }
 0xb91   : > { %2905 = vmatpush.msrb.mxu0 %v2862_v1 }
 0xb92   : > { %v2645_v50 = vadd.f32 %v7233_v26, %v2637_v56  ;;  %v2861_v56 = vld [vmem:[%s9778_s10 + $0x8] sm:$0xff]  ;;  %v2860_v26 = vld [vmem:[%s9778_s10] sm:$0xff] }
 0xb93   : > { %2906 = vmatpush.msrb.mxu0 %v2861_v56 }
 0xb94   : > { %v8194_v7 = vadd.f32 %v8143_v17, %v2645_v50 }
 0xb95   : > { %2907 = vmatpush.msrb.mxu0 %v2860_v26 }
 0xb96   : > { %v2677_v27 = vsel %vm512_vm0, %v8194_v7, 0.0 }
 0xb97   : > { %2678 = vadd.xlane.f32.xlu1 %v2677_v27  ;;  %v2626_v13 = vpop.f32.mrf.mxu3 }
 0xb98   : > { %v2638_v0 = vadd.f32 %v2626_v13, %v2159_v40 }
 0xb9a   : > { %v2646_v21 = vadd.f32 %v7234_v10, %v2638_v0 }
 0xb9c   : > { %v8201_v2 = vadd.f32 %v8143_v17, %v2646_v21 }
 0xb9e   : > { %v2680_v54 = vsel %vm512_vm0, %v8201_v2, 0.0 }
 0xb9f   : > { %2681 = vadd.xlane.f32.xlu0 %v2680_v54  ;;  %v2629_v22 = vpop.f32.mrf.mxu3 }
 0xba0   : > { %v2639_v5 = vadd.f32 %v2629_v22, %v2160_v59 }
 0xba2   : > { %v2647_v14 = vadd.f32 %v7235_v41, %v2639_v5 }
 0xba4   : > { %v8221_v45 = vadd.f32 %v8143_v17, %v2647_v14 }
 0xba6   : > { %v2683_v39 = vsel %vm512_vm0, %v8221_v45, 0.0 }
 0xbe2   : > { %v2664_v44 = vpop.xlane.xlu2 %2663 }
 0xbe3   : > { %v2686_v23 = vmul.f32 %v2664_v44, %v7443_v20 }
 0xbe5   : > { %v8210_v43 = vsub.f32 %v8149_v58, %v2686_v23 }
 0xbe7   : > { %v2702_v35 = vmul.f32 %v8210_v43, %v8210_v43 }
 0xbe9   : > { %v2710_v18 = vsel %vm512_vm0, %v2702_v35, 0.0 }
 0xbea   : > { %v2667_v4 = vpop.xlane.xlu0 %2666  ;;  %2711 = vadd.xlane.f32.xlu2 %v2710_v18 }
 0xbeb   : > { %v2687_v53 = vmul.f32 %v2667_v4, %v7443_v20 }
 0xbed   : > { %v8218_v30 = vsub.f32 %v8158_v28, %v2687_v53 }
 0xbef   : > { %v2703_v31 = vmul.f32 %v8218_v30, %v8218_v30 }
 0xbf1   : > { %v2713_v38 = vsel %vm512_vm0, %v2703_v31, 0.0 }
 0xbf2   : > { %2714 = vadd.xlane.f32.xlu1 %v2713_v38  ;;  %v2670_v19 = vpop.xlane.xlu1 %2669  ;;  %2684 = vadd.xlane.f32.xlu2 %v2683_v39  ;;  %v8288_v38 = vld [vmem:[%s9776_s8] ss:$0 sm:$0xff] }
 0xbf3   : > { %v2688_v48 = vmul.f32 %v2670_v19, %v7443_v20 }
 0xbf5   : > { %v8230_v6 = vsub.f32 %v8167_v33, %v2688_v48  ;;  %v8293_v48 = vld [vmem:[%s9777_s9] ss:$0 sm:$0xff] }
 0xbf7   : > { %v2704_v17 = vmul.f32 %v8230_v6, %v8230_v6 }
 0xbf9   : > { %v2716_v16 = vsel %vm512_vm0, %v2704_v17, 0.0 }
 0xbfa   : > { %v2673_v8 = vpop.xlane.xlu2 %2672  ;;  %2717 = vadd.xlane.f32.xlu0 %v2716_v16 }
 0xbfb   : > { %v2689_v63 = vmul.f32 %v2673_v8, %v7443_v20 }
 0xbfd   : > { %v8240_v49 = vsub.f32 %v8176_v34, %v2689_v63 }
 0xbff   : > { %v2705_v51 = vmul.f32 %v8240_v49, %v8240_v49 }
 0xc01   : > { %v2719_v47 = vsel %vm512_vm0, %v2705_v51, 0.0 }
 0xc02   : > { %v2676_v42 = vpop.xlane.xlu0 %2675  ;;  %2720 = vadd.xlane.f32.xlu1 %v2719_v47 }
 0xc03   : > { %v2690_v57 = vmul.f32 %v2676_v42, %v7443_v20 }
 0xc05   : > { %v8247_v25 = vsub.f32 %v8185_v36, %v2690_v57 }
 0xc07   : > { %v2706_v60 = vmul.f32 %v8247_v25, %v8247_v25 }
 0xc09   : > { %v2722_v46 = vsel %vm512_vm0, %v2706_v60, 0.0 }
 0xc0a   : > { %v2679_v3 = vpop.xlane.xlu1 %2678  ;;  %2723 = vadd.xlane.f32.xlu2 %v2722_v46 }
 0xc0b   : > { %v2691_v11 = vmul.f32 %v2679_v3, %v7443_v20 }
 0xc0d   : > { %v8254_v15 = vsub.f32 %v8194_v7, %v2691_v11 }
 0xc0f   : > { %v2707_v52 = vmul.f32 %v8254_v15, %v8254_v15 }
 0xc11   : > { %v2725_v61 = vsel %vm512_vm0, %v2707_v52, 0.0 }
 0xc12   : > { %v2682_v9 = vpop.xlane.xlu0 %2681  ;;  %2726 = vadd.xlane.f32.xlu0 %v2725_v61 }
 0xc13   : > { %v2692_v62 = vmul.f32 %v2682_v9, %v7443_v20 }
 0xc15   : > { %v8261_v55 = vsub.f32 %v8201_v2, %v2692_v62 }
 0xc17   : > { %v2708_v12 = vmul.f32 %v8261_v55, %v8261_v55 }
 0xc19   : > { %v2728_v29 = vsel %vm512_vm0, %v2708_v12, 0.0 }
 0xc1a   : > { %2729 = vadd.xlane.f32.xlu1 %v2728_v29 }
 0xc5d   : > { %v2712_v50 = vpop.xlane.xlu2 %2711 }
 0xc5e   : > { %v2734_v32 = vmul.f32 %v2712_v50, %v7443_v20 }
 0xc60   : > { %v2742_v40 = vadd.f32 1e-05, %v2734_v32 }
 0xc62   : > { %6988 = vrsqrt.f32 %v2742_v40  ;;  %vm2756_vm14 = vweird.f32 %v2742_v40 }
 0xc65   : > { %v2715_v27 = vpop.xlane.xlu1 %2714  ;;  %v2685_v13 = vpop.xlane.xlu2 %2684 }
 0xc66   : > { %v2735_v0 = vmul.f32 %v2715_v27, %v7443_v20  ;;  %v2693_v10 = vmul.f32 %v2685_v13, %v7443_v20 }
 0xc68   : > { %v6989_v21 = vpop.eup %6988  ;;  %v2743_v54 = vadd.f32 1e-05, %v2735_v0  ;;  %v8279_v24 = vsub.f32 %v8221_v45, %v2693_v10 }
 0xc69   : > { %v2751_v22 = vmul.f32 %v6989_v21, %v2742_v40  ;;  %vm2757_vm13 = vweird.f32 %v6989_v21 }
 0xc6a   : > { %6990 = vrsqrt.f32 %v2743_v54  ;;  %v2709_v44 = vmul.f32 %v8279_v24, %v8279_v24  ;;  %vm2758_vm15 = vmor %vm2756_vm14, %vm2757_vm13  ;;  %vm2766_vm2 = vweird.f32 %v2743_v54 }
 0xc6b   : > { %v2752_v59 = vmul.f32 %v6989_v21, %v2751_v22 }
 0xc6c   : > { %v2731_v23 = vsel %vm512_vm0, %v2709_v44, 0.0 }
 0xc6d   : > { %v2753_v5 = vmul.f32 0.5, %v2752_v59  ;;  %v2718_v35 = vpop.xlane.xlu0 %2717  ;;  %2732 = vadd.xlane.f32.xlu2 %v2731_v23 }
 0xc6e   : > { %v2736_v41 = vmul.f32 %v2718_v35, %v7443_v20 }
 0xc6f   : > { %v2754_v14 = vsub.f32 1.5, %v2753_v5 }
 0xc70   : > { %v6991_v18 = vpop.eup %6990  ;;  %v2744_v4 = vadd.f32 1e-05, %v2736_v41 }
 0xc71   : > { %v2755_v53 = vmul.f32 %v6989_v21, %v2754_v14  ;;  %v2761_v31 = vmul.f32 %v6991_v18, %v2743_v54  ;;  %vm2767_vm1 = vweird.f32 %v6991_v18 }
 0xc72   : > { %6992 = vrsqrt.f32 %v2744_v4  ;;  %vm2768_vm3 = vmor %vm2766_vm2, %vm2767_vm1  ;;  %vm2776_vm5 = vweird.f32 %v2744_v4 }
 0xc73   : > { %v2759_v39 = vsel %vm2758_vm15, %v6989_v21, %v2755_v53  ;;  %v2762_v19 = vmul.f32 %v6991_v18, %v2761_v31 }
 0xc74   : > { %v2830_v17 = vmul.f32 %v2759_v39, %v8210_v43 }
 0xc75   : > { %v2763_v16 = vmul.f32 0.5, %v2762_v19  ;;  %v2721_v8 = vpop.xlane.xlu1 %2720 }
 0xc76   : > { %v2841_v37 = vmul.f32 %v8288_v38, %v2830_v17  ;;  %v2737_v63 = vmul.f32 %v2721_v8, %v7443_v20 }
 0xc77   : > { %v2764_v51 = vsub.f32 1.5, %v2763_v16 }
 0xc78   : > { %v6993_v47 = vpop.eup %6992  ;;  %v2852_v42 = vadd.f32 %v8293_v48, %v2841_v37  ;;  %v2745_v57 = vadd.f32 1e-05, %v2737_v63 }
 0xc79   : > { %v2765_v60 = vmul.f32 %v6991_v18, %v2764_v51  ;;  %v2771_v46 = vmul.f32 %v6993_v47, %v2744_v4  ;;  %vm2777_vm4 = vweird.f32 %v6993_v47 }
 0xc7a   : > { %6994 = vrsqrt.f32 %v2745_v57  ;;  %6473 = vmatmul.msk.f32.vlgmr.msrb.gmra.mxu0 %vm512_vm0, %v2852_v42  ;;  %vm2778_vm6 = vmor %vm2776_vm5, %vm2777_vm4  ;;  %vm2786_vm8 = vweird.f32 %v2745_v57 }
 0xc7b   : > { %v2769_v43 = vsel %vm2768_vm3, %v6991_v18, %v2765_v60  ;;  %v2772_v3 = vmul.f32 %v6993_v47, %v2771_v46 }
 0xc7c   : > { %v2831_v11 = vmul.f32 %v2769_v43, %v8218_v30 }
 0xc7d   : > { %v2773_v52 = vmul.f32 0.5, %v2772_v3  ;;  %v2724_v61 = vpop.xlane.xlu2 %2723 }
 0xc7e   : > { %v2738_v9 = vmul.f32 %v2724_v61, %v7443_v20  ;;  %v2842_v62 = vmul.f32 %v8288_v38, %v2831_v11 }
 0xc7f   : > { %v2774_v12 = vsub.f32 1.5, %v2773_v52 }
 0xc80   : > { %v6995_v29 = vpop.eup %6994  ;;  %v2746_v1 = vadd.f32 1e-05, %v2738_v9  ;;  %v2853_v56 = vadd.f32 %v8293_v48, %v2842_v62 }
 0xc81   : > { %v2775_v26 = vmul.f32 %v6993_v47, %v2774_v12  ;;  %v2781_v50 = vmul.f32 %v6995_v29, %v2745_v57  ;;  %vm2787_vm7 = vweird.f32 %v6995_v29 }
 0xc82   : > { %6996 = vrsqrt.f32 %v2746_v1  ;;  %6474 = vmatmul.msk.f32.gmra.mxu0 %vm512_vm0, %v2853_v56  ;;  %vm2788_vm9 = vmor %vm2786_vm8, %vm2787_vm7  ;;  %vm2796_vm13 = vweird.f32 %v2746_v1 }
 0xc83   : > { %v2779_v30 = vsel %vm2778_vm6, %v6993_v47, %v2775_v26  ;;  %v2782_v32 = vmul.f32 %v6995_v29, %v2781_v50 }
 0xc84   : > { %v2832_v40 = vmul.f32 %v2779_v30, %v8230_v6 }
 0xc85   : > { %v2783_v27 = vmul.f32 0.5, %v2782_v32  ;;  %v2727_v13 = vpop.xlane.xlu0 %2726 }
 0xc86   : > { %v2739_v0 = vmul.f32 %v2727_v13, %v7443_v20  ;;  %v2843_v10 = vmul.f32 %v8288_v38, %v2832_v40 }
 0xc87   : > { %v2784_v21 = vsub.f32 1.5, %v2783_v27 }
 0xc88   : > { %v6997_v54 = vpop.eup %6996  ;;  %v2747_v22 = vadd.f32 1e-05, %v2739_v0  ;;  %v2854_v44 = vadd.f32 %v8293_v48, %v2843_v10  ;;  %v8334_v10 = vld [vmem:[%s9779_s11] ss:$0 sm:$0xff] }
 0xc89   : > { %v2785_v59 = vmul.f32 %v6995_v29, %v2784_v21  ;;  %v2791_v23 = vmul.f32 %v6997_v54, %v2746_v1  ;;  %vm2797_vm10 = vweird.f32 %v6997_v54  ;;  %v3267_v21 = vld [vmem:[%s9780_s12 + $0x70] sm:$0xff] }
 0xc8a   : > { %6998 = vrsqrt.f32 %v2747_v22  ;;  %6475 = vmatmul.msk.f32.gmra.mxu0 %vm512_vm0, %v2854_v44  ;;  %vm2798_vm14 = vmor %vm2796_vm13, %vm2797_vm10  ;;  %vm2806_vm1 = vweird.f32 %v2747_v22 }
 0xc8b   : > { %v2789_v6 = vsel %vm2788_vm9, %v6995_v29, %v2785_v59  ;;  %v2792_v5 = vmul.f32 %v6997_v54, %v2791_v23 }
 0xc8c   : > { %v2833_v35 = vmul.f32 %v2789_v6, %v8240_v49  ;;  %v3265_v6 = vld [vmem:[%s9780_s12 + $0x60] sm:$0xff] }
 0xc8d   : > { %v2793_v41 = vmul.f32 0.5, %v2792_v5  ;;  %v2730_v14 = vpop.xlane.xlu1 %2729 }
 0xc8e   : > { %v2740_v18 = vmul.f32 %v2730_v14, %v7443_v20  ;;  %v2844_v4 = vmul.f32 %v8288_v38, %v2833_v35 }
 0xc8f   : > { %v2794_v53 = vsub.f32 1.5, %v2793_v41  ;;  %v3264_v41 = vld [vmem:[%s9780_s12 + $0x58] sm:$0xff] }
 0xc90   : > { %v6999_v31 = vpop.eup %6998  ;;  %v2748_v39 = vadd.f32 1e-05, %v2740_v18  ;;  %v2855_v19 = vadd.f32 %v8293_v48, %v2844_v4  ;;  %v3263_v18 = vld [vmem:[%s9780_s12 + $0x50] sm:$0xff]  ;;  %v3262_v4 = vld [vmem:[%s9780_s12 + $0x48] sm:$0xff] }
 0xc91   : > { %v2795_v17 = vmul.f32 %v6997_v54, %v2794_v53  ;;  %v2801_v16 = vmul.f32 %v6999_v31, %v2747_v22  ;;  %vm2807_vm15 = vweird.f32 %v6999_v31  ;;  %v3266_v22 = vld [vmem:[%s9780_s12 + $0x68] sm:$0xff] }
 0xc92   : > { %7000 = vrsqrt.f32 %v2748_v39  ;;  %6476 = vmatmul.msk.f32.gmra.mxu0 %vm512_vm0, %v2855_v19  ;;  %vm2808_vm2 = vmor %vm2806_vm1, %vm2807_vm15  ;;  %vm2816_vm4 = vweird.f32 %v2748_v39  ;;  %v3260_v19 = vld [vmem:[%s9780_s12 + $0x38] sm:$0xff] }
 0xc93   : > { %v2799_v49 = vsel %vm2798_vm14, %v6997_v54, %v2795_v17  ;;  %v2802_v8 = vmul.f32 %v6999_v31, %v2801_v16  ;;  %v3259_v16 = vld [vmem:[%s9780_s12 + $0x30] sm:$0xff] }
 0xc94   : > { %v2834_v37 = vmul.f32 %v2799_v49, %v8247_v25 }
 0xc95   : > { %v2803_v63 = vmul.f32 0.5, %v2802_v8  ;;  %v3258_v8 = vld [vmem:[%s9780_s12 + $0x28] sm:$0xff] }
 0xc96   : > { %v2845_v51 = vmul.f32 %v8288_v38, %v2834_v37 }
 0xc97   : > { %v2804_v47 = vsub.f32 1.5, %v2803_v63 }
 0xc98   : > { %v7001_v42 = vpop.eup %7000  ;;  %v2856_v57 = vadd.f32 %v8293_v48, %v2845_v51 }
 0xc99   : > { %v2805_v60 = vmul.f32 %v6999_v31, %v2804_v47  ;;  %v2811_v46 = vmul.f32 %v7001_v42, %v2748_v39  ;;  %vm2817_vm3 = vweird.f32 %v7001_v42  ;;  %v3261_v39 = vld [vmem:[%s9780_s12 + $0x40] sm:$0xff] }
 0xc9a   : > { %6477 = vmatmul.msk.f32.gmra.mxu0 %vm512_vm0, %v2856_v57  ;;  %vm2818_vm5 = vmor %vm2816_vm4, %vm2817_vm3 }
 0xc9b   : > { %v2809_v43 = vsel %vm2808_vm2, %v6999_v31, %v2805_v60  ;;  %v2812_v3 = vmul.f32 %v7001_v42, %v2811_v46 }
 0xc9c   : > { %v2835_v11 = vmul.f32 %v2809_v43, %v8254_v15  ;;  %v3256_v43 = vld [vmem:[%s9780_s12 + $0x18] sm:$0xff] }
 0xc9d   : > { %v2813_v52 = vmul.f32 0.5, %v2812_v3 }
 0xc9e   : > { %v2846_v25 = vmul.f32 %v8288_v38, %v2835_v11 }
 0xc9f   : > { %v2814_v61 = vsub.f32 1.5, %v2813_v52 }
 0xca0   : > { %v2857_v9 = vadd.f32 %v8293_v48, %v2846_v25  ;;  %v3255_v25 = vld [vmem:[%s9780_s12 + $0x10] sm:$0xff] }
 0xca1   : > { %v2815_v62 = vmul.f32 %v7001_v42, %v2814_v61 }
 0xca2   : > { %6478 = vmatmul.msk.f32.gmra.mxu0 %vm512_vm0, %v2857_v9 }
 0xca3   : > { %v2819_v12 = vsel %vm2818_vm5, %v7001_v42, %v2815_v62  ;;  %v3257_v42 = vld [vmem:[%s9780_s12 + $0x20] sm:$0xff] }
 0xca4   : > { %v2836_v29 = vmul.f32 %v2819_v12, %v8261_v55  ;;  %v3268_v55 = vld [vmem:[%s9780_s12 + $0x78] sm:$0xff]  ;;  %v3254_v12 = vld [vmem:[%s9780_s12 + $0x8] sm:$0xff] }
 0xca5   : > { %3273 = vmatpush.msrb.mxu1 %v3268_v55 }
 0xca6   : > { %v2847_v1 = vmul.f32 %v8288_v38, %v2836_v29 }
 0xca7   : > { %3274 = vmatpush.msrb.mxu1 %v3267_v21 }
 0xca8   : > { %v2858_v56 = vadd.f32 %v8293_v48, %v2847_v1 }
 0xca9   : > { %3275 = vmatpush.msrb.mxu1 %v3266_v22 }
 0xcaa   : > { %6479 = vmatmul.msk.f32.gmra.mxu0 %vm512_vm0, %v2858_v56 }
 0xcab   : > { %3276 = vmatpush.msrb.mxu1 %v3265_v6 }
 0xcad   : > { %3277 = vmatpush.msrb.mxu1 %v3264_v41 }
 0xcaf   : > { %3278 = vmatpush.msrb.mxu1 %v3263_v18 }
 0xcb1   : > { %3279 = vmatpush.msrb.mxu1 %v3262_v4 }
 0xcb3   : > { %3280 = vmatpush.msrb.mxu1 %v3261_v39 }
 0xcb5   : > { %3281 = vmatpush.msrb.mxu1 %v3260_v19 }
 0xcb7   : > { %3282 = vmatpush.msrb.mxu1 %v3259_v16 }
 0xcb9   : > { %3283 = vmatpush.msrb.mxu1 %v3258_v8 }
 0xcbb   : > { %3284 = vmatpush.msrb.mxu1 %v3257_v42 }
 0xcbd   : > { %3285 = vmatpush.msrb.mxu1 %v3256_v43 }
 0xcbf   : > { %3286 = vmatpush.msrb.mxu1 %v3255_v25 }
 0xcc1   : > { %3287 = vmatpush.msrb.mxu1 %v3254_v12 }
 0xce0   : > { %v2733_v15 = vpop.xlane.xlu2 %2732 }
 0xce1   : > { %v2741_v26 = vmul.f32 %v2733_v15, %v7443_v20 }
 0xce3   : > { %v2749_v50 = vadd.f32 1e-05, %v2741_v26 }
 0xce5   : > { %7002 = vrsqrt.f32 %v2749_v50  ;;  %vm2826_vm7 = vweird.f32 %v2749_v50 }
 0xceb   : > { %v7003_v30 = vpop.eup %7002 }
 0xcec   : > { %v2821_v32 = vmul.f32 %v7003_v30, %v2749_v50  ;;  %vm2827_vm6 = vweird.f32 %v7003_v30 }
 0xced   : > { %vm2828_vm8 = vmor %vm2826_vm7, %vm2827_vm6 }
 0xcee   : > { %v2822_v40 = vmul.f32 %v7003_v30, %v2821_v32 }
 0xcf0   : > { %v2823_v27 = vmul.f32 0.5, %v2822_v40 }
 0xcf2   : > { %v2824_v13 = vsub.f32 1.5, %v2823_v27 }
 0xcf4   : > { %v2825_v0 = vmul.f32 %v7003_v30, %v2824_v13 }
 0xcf6   : > { %v2829_v54 = vsel %vm2828_vm8, %v7003_v30, %v2825_v0  ;;  %v3253_v30 = vld [vmem:[%s9780_s12] sm:$0xff] }
 0xcf7   : > { %v2837_v44 = vmul.f32 %v2829_v54, %v8279_v24  ;;  %v2909_v59 = vpop.f32.mrf.mxu0  ;;  %3288 = vmatpush.msrb.mxu1 %v3253_v30 }
 0xcf8   : > { %v8344_v23 = vadd.f32 %v8334_v10, %v2909_v59 }
 0xcf9   : > { %v2848_v5 = vmul.f32 %v8288_v38, %v2837_v44 }
 0xcfa   : > { %v8351_v35 = vmul.f32 0.70710677, %v8344_v23  ;;  %v2933_v30 = vmul.f32 0.5, %v8344_v23 }
 0xcfb   : > { %v2859_v24 = vadd.f32 %v8293_v48, %v2848_v5 }
 0xcfc   : > { %v2949_v14 = vand.u32 2147483647, %v8351_v35  ;;  %vm3213_vm7 = vcmp.ge.f32.partialorder %v8351_v35, 0.0 }
 0xcfd   : > { %6480 = vmatmul.msk.f32.gmra.mxu0 %vm512_vm0, %v2859_v24 }
 0xcfe   : > { %v2957_v38 = vmul.f32 0.3275911, %v2949_v14  ;;  %v3165_v1 = vsub.f32 0.0, %v2949_v14 }
 0xcff   : > { %v2912_v53 = vpop.f32.mrf.mxu0 }
 0xd00   : > { %v2965_v31 = vadd.f32 1.0, %v2957_v38  ;;  %v8366_v48 = vadd.f32 %v8334_v10, %v2912_v53  ;;  %v3173_v0 = vmul.f32 %v3165_v1, %v2949_v14 }
 0xd02   : > { %7004 = vrcp.f32 %v2965_v31  ;;  %v8375_v17 = vmul.f32 0.70710677, %v8366_v48  ;;  %v2984_v11 = vand.u32 2147483648, %v2965_v31  ;;  %v2982_v9 = vand.u32 2147483647, %v2965_v31 }
 0xd03   : > { %vm2978_vm10 = vweird.f32 %v2965_v31  ;;  %v3181_v5 = vmul.f32 1.442695, %v3173_v0 }
 0xd04   : > { %v8381_v49 = vand.u32 2147483647, %v8375_v17  ;;  %v2985_v15 = vor.u32 1.1754944e-38, %v2984_v11  ;;  %vm2983_vm14 = vcmp.eq.f32.partialorder %v2982_v9, 8.507059e+37 }
 0xd06   : > { %v2958_v37 = vmul.f32 0.3275911, %v8381_v49  ;;  %v3166_v19 = vsub.f32 0.0, %v8381_v49 }
 0xd07   : > { %v2915_v63 = vpop.f32.mrf.mxu0 }
 0xd08   : > { %v7005_v51 = vpop.eup %7004  ;;  %v8388_v47 = vadd.f32 %v8334_v10, %v2915_v63  ;;  %v8393_v60 = vadd.f32 1.0, %v2958_v37  ;;  %v3174_v11 = vmul.f32 %v3166_v19, %v8381_v49 }
 0xd09   : > { %v2974_v57 = vmul.f32 %v7005_v51, %v2965_v31  ;;  %vm2979_vm9 = vweird.f32 %v7005_v51 }
 0xd0a   : > { %v8396_v46 = vmul.f32 0.70710677, %v8388_v47  ;;  %7006 = vrcp.f32 %v8393_v60  ;;  %vm2980_vm13 = vmor %vm2978_vm10, %vm2979_vm9  ;;  %v2999_v18 = vand.u32 2147483648, %v8393_v60  ;;  %vm2993_vm1 = vweird.f32 %v8393_v60 }
 0xd0b   : > { %v2975_v3 = vsub.f32 1.0, %v2974_v57  ;;  %v2997_v39 = vand.u32 2147483647, %v8393_v60 }
 0xd0c   : > { %v2951_v52 = vand.u32 2147483647, %v8396_v46  ;;  %v3000_v57 = vor.u32 1.1754944e-38, %v2999_v18 }
 0xd0d   : > { %v2976_v61 = vmul.f32 %v7005_v51, %v2975_v3  ;;  %vm2998_vm3 = vcmp.eq.f32.partialorder %v2997_v39, 8.507059e+37 }
 0xd0e   : > { %v2959_v62 = vmul.f32 0.3275911, %v2951_v52  ;;  %v3167_v16 = vsub.f32 0.0, %v2951_v52 }
 0xd0f   : > { %v2977_v29 = vadd.f32 %v7005_v51, %v2976_v61  ;;  %v2918_v56 = vpop.f32.mrf.mxu0 }
 0xd10   : > { %v8409_v26 = vadd.f32 1.0, %v2959_v62  ;;  %v8412_v50 = vadd.f32 %v8334_v10, %v2918_v56  ;;  %v7007_v32 = vpop.eup %7006  ;;  %v3175_v25 = vmul.f32 %v3167_v16, %v2951_v52 }
 0xd11   : > { %v2981_v40 = vsel %vm2980_vm13, %v7005_v51, %v2977_v29  ;;  %v2989_v13 = vmul.f32 %v7007_v32, %v8393_v60  ;;  %vm2994_vm15 = vweird.f32 %v7007_v32 }
 0xd12   : > { %v8417_v27 = vsel %vm2983_vm14, %v2985_v15, %v2981_v40  ;;  %7008 = vrcp.f32 %v8409_v26  ;;  %v8423_v54 = vmul.f32 0.70710677, %v8412_v50  ;;  %vm2995_vm2 = vmor %vm2993_vm1, %vm2994_vm15  ;;  %v3014_v62 = vand.u32 2147483648, %v8409_v26 }
 0xd13   : > { %v3093_v55 = vmul.f32 1.0614054, %v8417_v27  ;;  %v2990_v21 = vsub.f32 1.0, %v2989_v13  ;;  %7010 = vpow2.f32 %v3181_v5  ;;  %vm3008_vm5 = vweird.f32 %v8409_v26 }
 0xd14   : > { %v8426_v59 = vand.u32 2147483647, %v8423_v54  ;;  %v3012_v49 = vand.u32 2147483647, %v8409_v26  ;;  %v3185_v18 = vmul.f32 1.442695, %v3175_v25 }
 0xd15   : > { %v3101_v22 = vadd.f32 -1.4531521, %v3093_v55  ;;  %v2991_v44 = vmul.f32 %v7007_v32, %v2990_v21  ;;  %v3183_v21 = vmul.f32 1.442695, %v3174_v11  ;;  %vm3214_vm1 = vcmp.ge.f32.partialorder %v8375_v17, 0.0 }
 0xd16   : > { %v2960_v38 = vmul.f32 0.3275911, %v8426_v59  ;;  %vm3013_vm8 = vcmp.eq.f32.partialorder %v3012_v49, 8.507059e+37 }
 0xd17   : > { %v3109_v6 = vmul.f32 %v3101_v22, %v8417_v27  ;;  %v2921_v41 = vpop.f32.mrf.mxu0  ;;  %v2992_v4 = vadd.f32 %v7007_v32, %v2991_v44  ;;  %v3168_v22 = vsub.f32 0.0, %v8426_v59 }
 0xd18   : > { %v7009_v24 = vpop.eup %7008  ;;  %v8432_v14 = vadd.f32 %v8334_v10, %v2921_v41  ;;  %v8438_v8 = vadd.f32 1.0, %v2960_v38  ;;  %v8482_v41 = vmul.f32 0.5, %v8366_v48 }
 0xd19   : > { %v3117_v53 = vadd.f32 1.4214138, %v3109_v6  ;;  %v3004_v31 = vmul.f32 %v7009_v24, %v8409_v26  ;;  %v2996_v42 = vsel %vm2995_vm2, %v7007_v32, %v2992_v4  ;;  %vm3009_vm4 = vweird.f32 %v7009_v24  ;;  %v7011_v52 = vpop.eup %7010 }
 0xd1a   : > { %v8441_v37 = vmul.f32 0.70710677, %v8432_v14  ;;  %7012 = vrcp.f32 %v8438_v8  ;;  %v8449_v61 = vsel %vm2998_vm3, %v3000_v57, %v2996_v42  ;;  %vm8464_vm6 = vmor %vm3008_vm5, %vm3009_vm4  ;;  %v3015_v6 = vor.u32 1.1754944e-38, %v3014_v62 }
 0xd1b   : > { %v3125_v63 = vmul.f32 %v3117_v53, %v8417_v27  ;;  %v3005_v51 = vsub.f32 1.0, %v3004_v31  ;;  %v3094_v1 = vmul.f32 1.0614054, %v8449_v61  ;;  %v3176_v39 = vmul.f32 %v3168_v22, %v8426_v59 }
 0xd1c   : > { %v8446_v60 = vand.u32 2147483647, %v8441_v37  ;;  %v3029_v57 = vand.u32 2147483648, %v8438_v8  ;;  %vm3023_vm10 = vweird.f32 %v8438_v8 }
 0xd1d   : > { %v3133_v43 = vadd.f32 -0.28449672, %v3125_v63  ;;  %v3006_v3 = vmul.f32 %v7009_v24, %v3005_v51  ;;  %v3102_v13 = vadd.f32 -1.4531521, %v3094_v1  ;;  %v3187_v1 = vmul.f32 1.442695, %v3176_v39 }
 0xd1e   : > { %v2961_v12 = vmul.f32 0.3275911, %v8446_v60 }
 0xd1f   : > { %v3141_v9 = vmul.f32 %v3133_v43, %v8417_v27  ;;  %v2924_v29 = vpop.f32.mrf.mxu0  ;;  %v3007_v15 = vadd.f32 %v7009_v24, %v3006_v3 }
 0xd20   : > { %v8457_v56 = vadd.f32 %v8334_v10, %v2924_v29  ;;  %v8461_v40 = vadd.f32 1.0, %v2961_v12  ;;  %v8468_v0 = vpop.eup %7012 }
 0xd21   : > { %v3149_v32 = vadd.f32 0.2548296, %v3141_v9  ;;  %v3011_v23 = vsel %vm8464_vm6, %v7009_v24, %v3007_v15  ;;  %v3019_v5 = vmul.f32 %v8468_v0, %v8438_v8  ;;  %v3110_v24 = vmul.f32 %v3102_v13, %v8449_v61 }
 0xd22   : > { %v8473_v26 = vmul.f32 0.70710677, %v8457_v56  ;;  %7014 = vrcp.f32 %v8461_v40  ;;  %v8488_v31 = vsel %vm3013_vm8, %v3015_v6, %v3011_v23  ;;  %v3027_v9 = vand.u32 2147483647, %v8438_v8 }
 0xd23   : > { %v3157_v44 = vmul.f32 %v3149_v32, %v8417_v27  ;;  %v3020_v53 = vsub.f32 1.0, %v3019_v5  ;;  %7016 = vpow2.f32 %v3183_v21  ;;  %v8491_v27 = vmul.f32 0.5, %v8388_v47 }
 0xd24   : > { %v8485_v38 = vand.u32 2147483647, %v8473_v26  ;;  %v3118_v51 = vadd.f32 1.4214138, %v3110_v24  ;;  %v3095_v42 = vmul.f32 1.0614054, %v8488_v31  ;;  %7018 = vpow2.f32 %v3185_v18 }
 0xd25   : > { %v3197_v4 = vmul.f32 %v7011_v52, %v3157_v44  ;;  %v3021_v16 = vmul.f32 %v8468_v0, %v3020_v53  ;;  %vm3024_vm9 = vweird.f32 %v8468_v0  ;;  %v3030_v32 = vor.u32 1.1754944e-38, %v3029_v57 }
 0xd26   : > { %v2962_v48 = vmul.f32 0.3275911, %v8485_v38  ;;  %v3126_v11 = vmul.f32 %v3118_v51, %v8449_v61  ;;  %v3103_v25 = vadd.f32 -1.4531521, %v3095_v42  ;;  %v3169_v21 = vsub.f32 0.0, %v8446_v60  ;;  %vm3025_vm13 = vmor %vm3023_vm10, %vm3024_vm9 }
 0xd27   : > { %v3205_v19 = vsub.f32 1.0, %v3197_v4  ;;  %v2927_v63 = vpop.f32.mrf.mxu0  ;;  %v3022_v12 = vadd.f32 %v8468_v0, %v3021_v16  ;;  %vm3028_vm14 = vcmp.eq.f32.partialorder %v3027_v9, 8.507059e+37  ;;  %v3044_v18 = vand.u32 2147483648, %v8461_v40 }
 0xd28   : > { %v8498_v43 = vadd.f32 1.0, %v2962_v48  ;;  %v8501_v3 = vadd.f32 %v8334_v10, %v2927_v63  ;;  %v8503_v47 = vpop.eup %7014  ;;  %v3134_v55 = vadd.f32 -0.28449672, %v3126_v11  ;;  %v3111_v23 = vmul.f32 %v3103_v25, %v8488_v31 }
 0xd29   : > { %v3221_v59 = vsub.f32 0.0, %v3205_v19  ;;  %v3034_v62 = vmul.f32 %v8503_v47, %v8461_v40  ;;  %v7017_v49 = vpop.eup %7016  ;;  %v3026_v5 = vsel %vm3025_vm13, %v8468_v0, %v3022_v12  ;;  %vm3039_vm15 = vweird.f32 %v8503_v47 }
 0xd2a   : > { %7020 = vrcp.f32 %v8498_v43  ;;  %v8516_v15 = vmul.f32 0.70710677, %v8501_v3  ;;  %v8523_v35 = vpop.eup %7018  ;;  %v3142_v6 = vmul.f32 %v3134_v55, %v8449_v61  ;;  %v3119_v53 = vadd.f32 1.4214138, %v3111_v23 }
 0xd2b   : > { %v3229_v29 = vsel %vm3213_vm7, %v3205_v19, %v3221_v59  ;;  %v3035_v13 = vsub.f32 1.0, %v3034_v62  ;;  %v8530_v24 = vsel %vm3028_vm14, %v3030_v32, %v3026_v5  ;;  %7022 = vpow2.f32 %v3187_v1 }
 0xd2c   : > { %v3237_v52 = vadd.f32 1.0, %v3229_v29  ;;  %v8520_v22 = vand.u32 2147483647, %v8516_v15  ;;  %v3150_v48 = vadd.f32 0.2548296, %v3142_v6  ;;  %v3127_v63 = vmul.f32 %v3119_v53, %v8488_v31 }
 0xd2d   : > { %v3036_v44 = vmul.f32 %v8503_v47, %v3035_v13  ;;  %v3096_v19 = vmul.f32 1.0614054, %v8530_v24  ;;  %vm3038_vm2 = vweird.f32 %v8461_v40  ;;  %v3042_v57 = vand.u32 2147483647, %v8461_v40 }
 0xd2e   : > { %v3245_v8 = vmul.f32 %v3237_v52, %v2933_v30  ;;  %v2963_v4 = vmul.f32 0.3275911, %v8520_v22  ;;  %v3158_v51 = vmul.f32 %v3150_v48, %v8449_v61  ;;  %v3045_v59 = vor.u32 1.1754944e-38, %v3044_v18  ;;  %vm8545_vm3 = vmor %vm3038_vm2, %vm3039_vm15 }
 0xd2f   : > { %v3037_v30 = vadd.f32 %v8503_v47, %v3036_v44  ;;  %v3104_v42 = vadd.f32 -1.4531521, %v3096_v19  ;;  %v3177_v11 = vmul.f32 %v3169_v21, %v8446_v60  ;;  %v3135_v12 = vadd.f32 -0.28449672, %v3127_v63 }
 0xd30   : > { %v7021_v39 = vpop.eup %7020  ;;  %3289 = vmatmul.f32.vlgmr.msrb.gmra.mxu1 %v3245_v8  ;;  %v8537_v16 = vadd.f32 1.0, %v2963_v4  ;;  %v3198_v62 = vmul.f32 %v7017_v49, %v3158_v51  ;;  %v3059_v40 = vand.u32 2147483648, %v8498_v43  ;;  %v3170_v60 = vsub.f32 0.0, %v8485_v38 }
 0xd31   : > { %v3049_v0 = vmul.f32 %v7021_v39, %v8498_v43  ;;  %v3112_v29 = vmul.f32 %v3104_v42, %v8530_v24  ;;  %v3041_v61 = vsel %vm8545_vm3, %v8503_v47, %v3037_v30  ;;  %vm3054_vm4 = vweird.f32 %v7021_v39  ;;  %v7023_v55 = vpop.eup %7022 }
 0xd32   : > { %7024 = vrcp.f32 %v8537_v16  ;;  %v3206_v52 = vsub.f32 1.0, %v3198_v62  ;;  %v3143_v32 = vmul.f32 %v3135_v12, %v8488_v31  ;;  %vm3043_vm5 = vcmp.eq.f32.partialorder %v3042_v57, 8.507059e+37 }
 0xd33   : > { %v3050_v25 = vsub.f32 1.0, %v3049_v0  ;;  %v3120_v13 = vadd.f32 1.4214138, %v3112_v29  ;;  %vm3053_vm6 = vweird.f32 %v8498_v43  ;;  %v8557_v49 = vsel %vm3043_vm5, %v3045_v59, %v3041_v61 }
 0xd34   : > { %v3057_v23 = vand.u32 2147483647, %v8498_v43  ;;  %v3222_v47 = vsub.f32 0.0, %v3206_v52  ;;  %v3151_v8 = vadd.f32 0.2548296, %v3143_v32  ;;  %vm3055_vm7 = vmor %vm3053_vm6, %vm3054_vm4  ;;  %v3060_v18 = vor.u32 1.1754944e-38, %v3059_v40 }
 0xd35   : > { %v3051_v1 = vmul.f32 %v7021_v39, %v3050_v25  ;;  %v3128_v44 = vmul.f32 %v3120_v13, %v8530_v24  ;;  %v3097_v6 = vmul.f32 1.0614054, %v8557_v49  ;;  %v3178_v4 = vmul.f32 %v3170_v60, %v8485_v38 }
 0xd36   : > { %vm3058_vm8 = vcmp.eq.f32.partialorder %v3057_v23, 8.507059e+37  ;;  %v3230_v19 = vsel %vm3214_vm1, %v3206_v52, %v3222_v47  ;;  %v3159_v43 = vmul.f32 %v3151_v8, %v8488_v31  ;;  %v3074_v0 = vand.u32 2147483648, %v8537_v16 }
 0xd37   : > { %v3052_v21 = vadd.f32 %v7021_v39, %v3051_v1  ;;  %v3136_v30 = vadd.f32 -0.28449672, %v3128_v44  ;;  %v3238_v63 = vadd.f32 1.0, %v3230_v19  ;;  %v3105_v51 = vadd.f32 -1.4531521, %v3097_v6 }
 0xd38   : > { %v7025_v5 = vpop.eup %7024  ;;  %v3199_v59 = vmul.f32 %v8523_v35, %v3159_v43  ;;  %v3072_v17 = vand.u32 2147483647, %v8537_v16  ;;  %vm3215_vm10 = vcmp.ge.f32.partialorder %v8396_v46, 0.0  ;;  %v3189_v61 = vmul.f32 1.442695, %v3177_v11 }
 0xd39   : > { %v3056_v53 = vsel %vm3055_vm7, %v7021_v39, %v3052_v21  ;;  %v3064_v48 = vmul.f32 %v7025_v5, %v8537_v16  ;;  %v3144_v38 = vmul.f32 %v3136_v30, %v8530_v24  ;;  %v3246_v25 = vmul.f32 %v3238_v63, %v8482_v41 }
 0xd3a   : > { %v3061_v42 = vsel %vm3058_vm8, %v3060_v18, %v3056_v53  ;;  %v3113_v9 = vmul.f32 %v3105_v51, %v8557_v49  ;;  %vm3069_vm9 = vweird.f32 %v7025_v5  ;;  %v3207_v62 = vsub.f32 1.0, %v3199_v59 }
 0xd3b   : > { %v3065_v57 = vsub.f32 1.0, %v3064_v48  ;;  %v3098_v39 = vmul.f32 1.0614054, %v3061_v42  ;;  %v3152_v12 = vadd.f32 0.2548296, %v3144_v38  ;;  %vm3068_vm13 = vweird.f32 %v8537_v16  ;;  %3292 = vmatmul.f32.gmra.mxu1 %v3246_v25 }
 0xd3c   : > { %v3121_v35 = vadd.f32 1.4214138, %v3113_v9  ;;  %v3223_v1 = vsub.f32 0.0, %v3207_v62  ;;  %v3191_v52 = vmul.f32 1.442695, %v3178_v4  ;;  %v3075_v32 = vor.u32 1.1754944e-38, %v3074_v0  ;;  %vm3070_vm14 = vmor %vm3068_vm13, %vm3069_vm9 }
 0xd3d   : > { %v3066_v31 = vmul.f32 %v7025_v5, %v3065_v57  ;;  %v3106_v29 = vadd.f32 -1.4531521, %v3098_v39  ;;  %v3160_v40 = vmul.f32 %v3152_v12, %v8530_v24  ;;  %vm3073_vm15 = vcmp.eq.f32.partialorder %v3072_v17, 8.507059e+37 }
 0xd3e   : > { %v3129_v13 = vmul.f32 %v3121_v35, %v8557_v49  ;;  %v3231_v21 = vsel %vm3215_vm10, %v3207_v62, %v3223_v1  ;;  %v3171_v16 = vsub.f32 0.0, %v8520_v22  ;;  %7026 = vpow2.f32 %v3189_v61 }
 0xd3f   : > { %v3114_v41 = vmul.f32 %v3106_v29, %v3061_v42  ;;  %v3067_v60 = vadd.f32 %v7025_v5, %v3066_v31  ;;  %v3200_v23 = vmul.f32 %v7023_v55, %v3160_v40  ;;  %v3239_v47 = vadd.f32 1.0, %v3231_v21 }
 0xd40   : > { %v3137_v8 = vadd.f32 -0.28449672, %v3129_v13  ;;  %vm3216_vm1 = vcmp.ge.f32.partialorder %v8423_v54, 0.0  ;;  %7028 = vpow2.f32 %v3191_v52  ;;  %v3179_v55 = vmul.f32 %v3171_v16, %v8520_v22 }
 0xd41   : > { %v3122_v46 = vadd.f32 1.4214138, %v3114_v41  ;;  %v3071_v11 = vsel %vm3070_vm14, %v7025_v5, %v3067_v60  ;;  %v3208_v24 = vsub.f32 1.0, %v3200_v23  ;;  %v3247_v4 = vmul.f32 %v3239_v47, %v8491_v27 }
 0xd42   : > { %v3076_v44 = vsel %vm3073_vm15, %v3075_v32, %v3071_v11  ;;  %v3145_v53 = vmul.f32 %v3137_v8, %v8557_v49  ;;  %v2936_v51 = vmul.f32 0.5, %v8412_v50  ;;  %v3193_v25 = vmul.f32 1.442695, %v3179_v55 }
 0xd43   : > { %v3130_v6 = vmul.f32 %v3122_v46, %v3061_v42  ;;  %v3099_v18 = vmul.f32 1.0614054, %v3076_v44  ;;  %v3224_v48 = vsub.f32 0.0, %v3208_v24  ;;  %3295 = vmatmul.f32.gmra.mxu1 %v3247_v4  ;;  %vm3217_vm2 = vcmp.ge.f32.partialorder %v8441_v37, 0.0 }
 0xd44   : > { %v3153_v5 = vadd.f32 0.2548296, %v3145_v53  ;;  %v7027_v59 = vpop.eup %7026  ;;  %7030 = vpow2.f32 %v3193_v25  ;;  %v2937_v1 = vmul.f32 0.5, %v8432_v14  ;;  %vm3218_vm3 = vcmp.ge.f32.partialorder %v8473_v26, 0.0 }
 0xd45   : > { %v3138_v19 = vadd.f32 -0.28449672, %v3130_v6  ;;  %v3107_v43 = vadd.f32 -1.4531521, %v3099_v18  ;;  %v3232_v30 = vsel %vm3216_vm1, %v3208_v24, %v3224_v48  ;;  %v2938_v37 = vmul.f32 0.5, %v8457_v56 }
 0xd46   : > { %v3240_v57 = vadd.f32 1.0, %v3232_v30  ;;  %v3161_v27 = vmul.f32 %v3153_v5, %v8557_v49  ;;  %v7029_v62 = vpop.eup %7028  ;;  %vm3219_vm4 = vcmp.ge.f32.partialorder %v8516_v15, 0.0  ;;  %v2939_v8 = vmul.f32 0.5, %v8501_v3 }
 0xd47   : > { %v3146_v0 = vmul.f32 %v3138_v19, %v3061_v42  ;;  %v3115_v63 = vmul.f32 %v3107_v43, %v3076_v44 }
 0xd48   : > { %v3248_v9 = vmul.f32 %v3240_v57, %v2936_v51  ;;  %v3201_v17 = vmul.f32 %v7027_v59, %v3161_v27 }
 0xd49   : > { %v3154_v38 = vadd.f32 0.2548296, %v3146_v0  ;;  %v3123_v39 = vadd.f32 1.4214138, %v3115_v63 }
 0xd4a   : > { %v3209_v22 = vsub.f32 1.0, %v3201_v17  ;;  %v7031_v13 = vpop.eup %7030 }
 0xd4b   : > { %v3162_v54 = vmul.f32 %v3154_v38, %v3061_v42  ;;  %v3131_v31 = vmul.f32 %v3123_v39, %v3076_v44  ;;  %3298 = vmatmul.f32.gmra.mxu1 %v3248_v9 }
 0xd4c   : > { %v3225_v61 = vsub.f32 0.0, %v3209_v22 }
 0xd4d   : > { %v3202_v12 = vmul.f32 %v7029_v62, %v3162_v54  ;;  %v3139_v29 = vadd.f32 -0.28449672, %v3131_v31 }
 0xd4e   : > { %v3233_v49 = vsel %vm3217_vm2, %v3209_v22, %v3225_v61  ;;  %v6822_v22 = vld [vmem:[%s9781_s13] ss:$0 sm:$0xff] }
 0xd4f   : > { %v3210_v50 = vsub.f32 1.0, %v3202_v12  ;;  %v3147_v35 = vmul.f32 %v3139_v29, %v3076_v44  ;;  %v3241_v40 = vadd.f32 1.0, %v3233_v49 }
 0xd51   : > { %v3226_v41 = vsub.f32 0.0, %v3210_v50  ;;  %v3155_v60 = vadd.f32 0.2548296, %v3147_v35  ;;  %v3249_v42 = vmul.f32 %v3241_v40, %v2937_v1 }
 0xd53   : > { %v3234_v52 = vsel %vm3218_vm3, %v3210_v50, %v3226_v41  ;;  %v3163_v32 = vmul.f32 %v3155_v60, %v3076_v44  ;;  %3301 = vmatmul.f32.gmra.mxu1 %v3249_v42 }
 0xd54   : > { %v3242_v23 = vadd.f32 1.0, %v3234_v52 }
 0xd55   : > { %v3203_v21 = vmul.f32 %v7031_v13, %v3163_v32 }
 0xd56   : > { %v3250_v16 = vmul.f32 %v3242_v23, %v2938_v37 }
 0xd57   : > { %v3211_v46 = vsub.f32 1.0, %v3203_v21 }
 0xd59   : > { %v3227_v11 = vsub.f32 0.0, %v3211_v46 }
 0xd5b   : > { %v3235_v14 = vsel %vm3219_vm4, %v3211_v46, %v3227_v11  ;;  %3304 = vmatmul.f32.gmra.mxu1 %v3250_v16 }
 0xd5c   : > { %v3243_v47 = vadd.f32 1.0, %v3235_v14 }
 0xd5e   : > { %v3251_v26 = vmul.f32 %v3243_v47, %v2939_v8 }
 0xd63   : > { %3307 = vmatmul.f32.gmra.mxu1 %v3251_v26 }
 0xd7a   : > { %v2930_v24 = vpop.f32.mrf.mxu0 }
 0xd7b   : > { %v2931_v44 = vadd.f32 %v8334_v10, %v2930_v24 }
 0xd7d   : > { %v2948_v6 = vmul.f32 0.70710677, %v2931_v44  ;;  %v2940_v49 = vmul.f32 0.5, %v2931_v44 }
 0xd7f   : > { %v2956_v18 = vand.u32 2147483647, %v2948_v6  ;;  %vm3220_vm9 = vcmp.ge.f32.partialorder %v2948_v6, 0.0 }
 0xd81   : > { %v2964_v4 = vmul.f32 0.3275911, %v2956_v18  ;;  %v3172_v0 = vsub.f32 0.0, %v2956_v18 }
 0xd83   : > { %v2972_v53 = vadd.f32 1.0, %v2964_v4  ;;  %v3180_v57 = vmul.f32 %v3172_v0, %v2956_v18 }
 0xd85   : > { %7032 = vrcp.f32 %v2972_v53  ;;  %v3089_v15 = vand.u32 2147483648, %v2972_v53  ;;  %v3087_v55 = vand.u32 2147483647, %v2972_v53  ;;  %vm3083_vm6 = vweird.f32 %v2972_v53 }
 0xd86   : > { %v3195_v38 = vmul.f32 1.442695, %v3180_v57 }
 0xd87   : > { %v3090_v3 = vor.u32 1.1754944e-38, %v3089_v15  ;;  %vm3088_vm8 = vcmp.eq.f32.partialorder %v3087_v55, 8.507059e+37 }
 0xd88   : > { %7034 = vpow2.f32 %v3195_v38 }
 0xd8b   : > { %v7033_v56 = vpop.eup %7032 }
 0xd8c   : > { %v3079_v48 = vmul.f32 %v7033_v56, %v2972_v53  ;;  %vm3084_vm5 = vweird.f32 %v7033_v56 }
 0xd8d   : > { %vm3085_vm7 = vmor %vm3083_vm6, %vm3084_vm5 }
 0xd8e   : > { %v3080_v19 = vsub.f32 1.0, %v3079_v48  ;;  %v7035_v31 = vpop.eup %7034 }
 0xd90   : > { %v3081_v43 = vmul.f32 %v7033_v56, %v3080_v19 }
 0xd92   : > { %v3082_v5 = vadd.f32 %v7033_v56, %v3081_v43 }
 0xd94   : > { %v3086_v30 = vsel %vm3085_vm7, %v7033_v56, %v3082_v5 }
 0xd95   : > { %v3091_v10 = vsel %vm3088_vm8, %v3090_v3, %v3086_v30 }
 0xd96   : > { %v3100_v63 = vmul.f32 1.0614054, %v3091_v10 }
 0xd98   : > { %v3108_v51 = vadd.f32 -1.4531521, %v3100_v63 }
 0xd9a   : > { %v3116_v27 = vmul.f32 %v3108_v51, %v3091_v10 }
 0xd9c   : > { %v3124_v59 = vadd.f32 1.4214138, %v3116_v27 }
 0xd9e   : > { %v3132_v39 = vmul.f32 %v3124_v59, %v3091_v10 }
 0xda0   : > { %v3140_v25 = vadd.f32 -0.28449672, %v3132_v39 }
 0xda2   : > { %v3148_v9 = vmul.f32 %v3140_v25, %v3091_v10 }
 0xda4   : > { %v3156_v17 = vadd.f32 0.2548296, %v3148_v9 }
 0xda6   : > { %v3164_v54 = vmul.f32 %v3156_v17, %v3091_v10 }
 0xda8   : > { %v3204_v62 = vmul.f32 %v7035_v31, %v3164_v54 }
 0xdaa   : > { %v3212_v12 = vsub.f32 1.0, %v3204_v62 }
 0xdac   : > { %v3228_v29 = vsub.f32 0.0, %v3212_v12 }
 0xdad   : > { %v3290_v61 = vpop.f32.mrf.mxu1 }
 0xdae   : > { %v3291_v50 = vadd.f32 %v6822_v22, %v3290_v61  ;;  %v3236_v35 = vsel %vm3220_vm9, %v3212_v12, %v3228_v29 }
 0xdaf   : > { %v3244_v1 = vadd.f32 1.0, %v3236_v35 }
 0xdb0   : > { %v8596_v40 = vadd.f32 %v3291_v50, %v8149_v58 }
 0xdb1   : > { %v3252_v41 = vmul.f32 %v3244_v1, %v2940_v49 }
 0xdb2   : > { %v3326_v60 = vsel %vm512_vm0, %v8596_v40, 0.0 }
 0xdb3   : > { %3327 = vadd.xlane.f32.xlu0 %v3326_v60  ;;  %3310 = vmatmul.f32.gmra.mxu1 %v3252_v41 }
 0xdb8   : > { %v3293_v42 = vpop.f32.mrf.mxu1 }
 0xdb9   : > { %v3294_v52 = vadd.f32 %v6822_v22, %v3293_v42 }
 0xdbb   : > { %v8601_v32 = vadd.f32 %v3294_v52, %v8158_v28 }
 0xdbd   : > { %v3329_v13 = vsel %vm512_vm0, %v8601_v32, 0.0 }
 0xdbe   : > { %3330 = vadd.xlane.f32.xlu1 %v3329_v13 }
 0xdc0   : > { %v3296_v21 = vpop.f32.mrf.mxu1 }
 0xdc1   : > { %v3297_v23 = vadd.f32 %v6822_v22, %v3296_v21 }
 0xdc3   : > { %v8606_v58 = vadd.f32 %v3297_v23, %v8167_v33  ;;  %v3528_v23 = vld [vmem:[#allocation4 + $0x198] sm:$0xff] }
 0xdc4   : > { %3570 = vmatpush.msra.mxu2 %v3528_v23 }
 0xdc5   : > { %v3332_v46 = vsel %vm512_vm0, %v8606_v58, 0.0 }
 0xdc6   : > { %3333 = vadd.xlane.f32.xlu2 %v3332_v46  ;;  %v3603_v46 = vld [vmem:[#allocation4 + $0x218] sm:$0xff] }
 0xdc7   : > { %3621 = vmatpush.msra.mxu3 %v3603_v46 }
 0xdc8   : > { %v3299_v37 = vpop.f32.mrf.mxu1 }
 0xdc9   : > { %v3300_v11 = vadd.f32 %v6822_v22, %v3299_v37  ;;  %v3654_v37 = vld [vmem:[#allocation4 + $0x298] sm:$0xff] }
 0xdca   : > { %3672 = vmatpush.msra.mxu0 %v3654_v37 }
 0xdcb   : > { %v8611_v16 = vadd.f32 %v3300_v11, %v8176_v34 }
 0xdcd   : > { %v3335_v28 = vsel %vm512_vm0, %v8611_v16, 0.0 }
 0xdce   : > { %3336 = vadd.xlane.f32.xlu0 %v3335_v28  ;;  %v3527_v28 = vld [vmem:[#allocation4 + $0x190] sm:$0xff] }
 0xdcf   : > { %3571 = vmatpush.msra.mxu2 %v3527_v28 }
 0xdd0   : > { %v3302_v14 = vpop.f32.mrf.mxu1 }
 0xdd1   : > { %v3303_v47 = vadd.f32 %v6822_v22, %v3302_v14  ;;  %v3602_v14 = vld [vmem:[#allocation4 + $0x210] sm:$0xff] }
 0xdd2   : > { %3622 = vmatpush.msra.mxu3 %v3602_v14 }
 0xdd3   : > { %v8616_v8 = vadd.f32 %v3303_v47, %v8185_v36  ;;  %v3653_v47 = vld [vmem:[#allocation4 + $0x290] sm:$0xff] }
 0xdd4   : > { %3673 = vmatpush.msra.mxu0 %v3653_v47 }
 0xdd5   : > { %v3338_v33 = vsel %vm512_vm0, %v8616_v8, 0.0 }
 0xdd6   : > { %3339 = vadd.xlane.f32.xlu1 %v3338_v33 }
 0xdd8   : > { %v3305_v26 = vpop.f32.mrf.mxu1 }
 0xdd9   : > { %v3306_v24 = vadd.f32 %v6822_v22, %v3305_v26  ;;  %v3526_v26 = vld [vmem:[#allocation4 + $0x188] sm:$0xff] }
 0xdda   : > { %3572 = vmatpush.msra.mxu2 %v3526_v26 }
 0xddb   : > { %v8621_v44 = vadd.f32 %v3306_v24, %v8194_v7  ;;  %v3601_v24 = vld [vmem:[#allocation4 + $0x208] sm:$0xff] }
 0xddc   : > { %3623 = vmatpush.msra.mxu3 %v3601_v24 }
 0xddd   : > { %v3341_v34 = vsel %vm512_vm0, %v8621_v44, 0.0 }
 0xdde   : > { %3342 = vadd.xlane.f32.xlu2 %v3341_v34  ;;  %v3652_v34 = vld [vmem:[#allocation4 + $0x288] sm:$0xff] }
 0xddf   : > { %3674 = vmatpush.msra.mxu0 %v3652_v34 }
 0xde0   : > { %v3308_v6 = vpop.f32.mrf.mxu1 }
 0xde1   : > { %v3309_v18 = vadd.f32 %v6822_v22, %v3308_v6 }
 0xde3   : > { %v8626_v4 = vadd.f32 %v3309_v18, %v8201_v2 }
 0xde5   : > { %v3344_v36 = vsel %vm512_vm0, %v8626_v4, 0.0 }
 0xde6   : > { %3345 = vadd.xlane.f32.xlu1 %v3344_v36 }
 0xe26   : > { %v3328_v53 = vpop.xlane.xlu0 %3327 }
 0xe27   : > { %v3350_v56 = vmul.f32 %v3328_v53, %v7443_v20  ;;  %v3525_v53 = vld [vmem:[#allocation4 + $0x180] sm:$0xff] }
 0xe28   : > { %3573 = vmatpush.msra.mxu2 %v3525_v53 }
 0xe29   : > { %v8632_v48 = vsub.f32 %v8596_v40, %v3350_v56  ;;  %v3600_v56 = vld [vmem:[#allocation4 + $0x200] sm:$0xff] }
 0xe2a   : > { %3624 = vmatpush.msra.mxu3 %v3600_v56 }
 0xe2b   : > { %v3366_v7 = vmul.f32 %v8632_v48, %v8632_v48 }
 0xe2d   : > { %v3374_v19 = vsel %vm512_vm0, %v3366_v7, 0.0  ;;  %v3651_v7 = vld [vmem:[#allocation4 + $0x280] sm:$0xff] }
 0xe2e   : > { %3375 = vadd.xlane.f32.xlu0 %v3374_v19  ;;  %3675 = vmatpush.msra.mxu0 %v3651_v7 }
 0xe30   : > { %v3311_v15 = vpop.f32.mrf.mxu1 }
 0xe31   : > { %v3312_v43 = vadd.f32 %v6822_v22, %v3311_v15  ;;  %v3331_v55 = vpop.xlane.xlu1 %3330 }
 0xe32   : > { %v3351_v3 = vmul.f32 %v3331_v55, %v7443_v20 }
 0xe33   : > { %v8638_v2 = vadd.f32 %v3312_v43, %v8221_v45 }
 0xe34   : > { %v8644_v30 = vsub.f32 %v8601_v32, %v3351_v3 }
 0xe35   : > { %v3347_v5 = vsel %vm512_vm0, %v8638_v2, 0.0 }
 0xe36   : > { %3348 = vadd.xlane.f32.xlu0 %v3347_v5  ;;  %v3367_v0 = vmul.f32 %v8644_v30, %v8644_v30 }
 0xe38   : > { %v3377_v10 = vsel %vm512_vm0, %v3367_v0, 0.0 }
 0xe39   : > { %3378 = vadd.xlane.f32.xlu2 %v3377_v10  ;;  %v3334_v63 = vpop.xlane.xlu2 %3333 }
 0xe3a   : > { %v3352_v45 = vmul.f32 %v3334_v63, %v7443_v20 }
 0xe3c   : > { %v8651_v51 = vsub.f32 %v8606_v58, %v3352_v45  ;;  %v8696_v45 = vld [vmem:[%s9774_s6 + $0x1] ss:$0 sm:$0xff] }
 0xe3e   : > { %v3368_v57 = vmul.f32 %v8651_v51, %v8651_v51 }
 0xe40   : > { %v3380_v27 = vsel %vm512_vm0, %v3368_v57, 0.0 }
 0xe41   : > { %v3337_v59 = vpop.xlane.xlu0 %3336  ;;  %3381 = vadd.xlane.f32.xlu1 %v3380_v27  ;;  %v8701_v27 = vld [vmem:[%s9775_s7 + $0x1] ss:$0 sm:$0xff] }
 0xe42   : > { %v3353_v38 = vmul.f32 %v3337_v59, %v7443_v20 }
 0xe44   : > { %v8658_v39 = vsub.f32 %v8611_v16, %v3353_v38 }
 0xe46   : > { %v3369_v25 = vmul.f32 %v8658_v39, %v8658_v39 }
 0xe48   : > { %v3383_v9 = vsel %vm512_vm0, %v3369_v25, 0.0 }
 0xe49   : > { %3384 = vadd.xlane.f32.xlu2 %v3383_v9  ;;  %v3340_v17 = vpop.xlane.xlu1 %3339 }
 0xe4a   : > { %v3354_v54 = vmul.f32 %v3340_v17, %v7443_v20 }
 0xe4c   : > { %v8665_v31 = vsub.f32 %v8616_v8, %v3354_v54 }
 0xe4e   : > { %v3370_v62 = vmul.f32 %v8665_v31, %v8665_v31 }
 0xe50   : > { %v3386_v22 = vsel %vm512_vm0, %v3370_v62, 0.0 }
 0xe51   : > { %3387 = vadd.xlane.f32.xlu0 %v3386_v22  ;;  %v3343_v12 = vpop.xlane.xlu2 %3342 }
 0xe52   : > { %v3355_v29 = vmul.f32 %v3343_v12, %v7443_v20 }
 0xe54   : > { %v8672_v61 = vsub.f32 %v8621_v44, %v3355_v29 }
 0xe56   : > { %v3371_v50 = vmul.f32 %v8672_v61, %v8672_v61 }
 0xe58   : > { %v3389_v35 = vsel %vm512_vm0, %v3371_v50, 0.0 }
 0xe59   : > { %v3346_v49 = vpop.xlane.xlu1 %3345  ;;  %3390 = vadd.xlane.f32.xlu1 %v3389_v35 }
 0xe5a   : > { %v3356_v1 = vmul.f32 %v3346_v49, %v7443_v20 }
 0xe5c   : > { %v8679_v41 = vsub.f32 %v8626_v4, %v3356_v1 }
 0xe5e   : > { %v3372_v60 = vmul.f32 %v8679_v41, %v8679_v41 }
 0xe60   : > { %v3392_v42 = vsel %vm512_vm0, %v3372_v60, 0.0 }
 0xe61   : > { %3393 = vadd.xlane.f32.xlu2 %v3392_v42 }
 0xea1   : > { %v3376_v52 = vpop.xlane.xlu0 %3375 }
 0xea2   : > { %v3398_v13 = vmul.f32 %v3376_v52, %v7443_v20 }
 0xea4   : > { %v3406_v21 = vadd.f32 1e-05, %v3398_v13 }
 0xea6   : > { %7036 = vrsqrt.f32 %v3406_v21  ;;  %vm3420_vm13 = vweird.f32 %v3406_v21 }
 0xea9   : > { %v3349_v11 = vpop.xlane.xlu0 %3348 }
 0xeaa   : > { %v3357_v33 = vmul.f32 %v3349_v11, %v7443_v20 }
 0xeac   : > { %v7037_v6 = vpop.eup %7036  ;;  %v8687_v18 = vsub.f32 %v8638_v2, %v3357_v33  ;;  %v3379_v43 = vpop.xlane.xlu2 %3378 }
 0xead   : > { %v3415_v36 = vmul.f32 %v7037_v6, %v3406_v21  ;;  %v3399_v3 = vmul.f32 %v3379_v43, %v7443_v20  ;;  %vm3421_vm10 = vweird.f32 %v7037_v6 }
 0xeae   : > { %v3373_v19 = vmul.f32 %v8687_v18, %v8687_v18  ;;  %vm3422_vm14 = vmor %vm3420_vm13, %vm3421_vm10 }
 0xeaf   : > { %v3416_v15 = vmul.f32 %v7037_v6, %v3415_v36  ;;  %v3407_v10 = vadd.f32 1e-05, %v3399_v3 }
 0xeb0   : > { %v3395_v55 = vsel %vm512_vm0, %v3373_v19, 0.0 }
 0xeb1   : > { %v3417_v5 = vmul.f32 0.5, %v3416_v15  ;;  %3396 = vadd.xlane.f32.xlu0 %v3395_v55  ;;  %7038 = vrsqrt.f32 %v3407_v10  ;;  %vm3430_vm1 = vweird.f32 %v3407_v10 }
 0xeb3   : > { %v3418_v0 = vsub.f32 1.5, %v3417_v5 }
 0xeb4   : > { %v3382_v38 = vpop.xlane.xlu1 %3381 }
 0xeb5   : > { %v3419_v63 = vmul.f32 %v7037_v6, %v3418_v0  ;;  %v3400_v25 = vmul.f32 %v3382_v38, %v7443_v20 }
 0xeb7   : > { %v3423_v57 = vsel %vm3422_vm14, %v7037_v6, %v3419_v63  ;;  %v7039_v17 = vpop.eup %7038  ;;  %v3408_v54 = vadd.f32 1e-05, %v3400_v25 }
 0xeb8   : > { %v3494_v59 = vmul.f32 %v3423_v57, %v8632_v48  ;;  %v3425_v22 = vmul.f32 %v7039_v17, %v3407_v10  ;;  %vm3431_vm15 = vweird.f32 %v7039_v17 }
 0xeb9   : > { %7040 = vrsqrt.f32 %v3408_v54  ;;  %vm3432_vm2 = vmor %vm3430_vm1, %vm3431_vm15  ;;  %vm3440_vm4 = vweird.f32 %v3408_v54 }
 0xeba   : > { %v3505_v9 = vmul.f32 %v8696_v45, %v3494_v59  ;;  %v3426_v12 = vmul.f32 %v7039_v17, %v3425_v22 }
 0xebc   : > { %v8707_v62 = vadd.f32 %v8701_v27, %v3505_v9  ;;  %v3427_v48 = vmul.f32 0.5, %v3426_v12  ;;  %v3385_v29 = vpop.xlane.xlu2 %3384 }
 0xebd   : > { %v3401_v50 = vmul.f32 %v3385_v29, %v7443_v20 }
 0xebe   : > { %6484 = vmatmul.msk.f32.vlgmr.msra.gmra.mxu2 %vm512_vm0, %v8707_v62  ;;  %6493 = vmatmul.msk.f32.vlgmr.msra.gmra.mxu3 %vm512_vm0, %v8707_v62  ;;  %v3428_v35 = vsub.f32 1.5, %v3427_v48 }
 0xebf   : > { %6502 = vmatmul.msk.f32.vlgmr.msra.gmra.mxu0 %vm512_vm0, %v8707_v62  ;;  %v7041_v49 = vpop.eup %7040  ;;  %v3409_v1 = vadd.f32 1e-05, %v3401_v50 }
 0xec0   : > { %v3429_v60 = vmul.f32 %v7039_v17, %v3428_v35  ;;  %v3435_v42 = vmul.f32 %v7041_v49, %v3408_v54  ;;  %vm3441_vm3 = vweird.f32 %v7041_v49 }
 0xec1   : > { %7042 = vrsqrt.f32 %v3409_v1  ;;  %vm3442_vm5 = vmor %vm3440_vm4, %vm3441_vm3  ;;  %vm3450_vm7 = vweird.f32 %v3409_v1 }
 0xec2   : > { %v3433_v52 = vsel %vm3432_vm2, %v7039_v17, %v3429_v60  ;;  %v3436_v13 = vmul.f32 %v7041_v49, %v3435_v42 }
 0xec3   : > { %v3495_v21 = vmul.f32 %v3433_v52, %v8644_v30 }
 0xec4   : > { %v3437_v23 = vmul.f32 0.5, %v3436_v13  ;;  %v3388_v46 = vpop.xlane.xlu0 %3387 }
 0xec5   : > { %v3506_v37 = vmul.f32 %v8696_v45, %v3495_v21  ;;  %v3402_v11 = vmul.f32 %v3388_v46, %v7443_v20 }
 0xec6   : > { %v3438_v28 = vsub.f32 1.5, %v3437_v23 }
 0xec7   : > { %v7043_v14 = vpop.eup %7042  ;;  %v8720_v47 = vadd.f32 %v8701_v27, %v3506_v37  ;;  %v3410_v33 = vadd.f32 1e-05, %v3402_v11 }
 0xec8   : > { %v3439_v26 = vmul.f32 %v7041_v49, %v3438_v28  ;;  %v3445_v24 = vmul.f32 %v7043_v14, %v3409_v1  ;;  %vm3451_vm6 = vweird.f32 %v7043_v14 }
 0xec9   : > { %7044 = vrsqrt.f32 %v3410_v33  ;;  %6485 = vmatmul.msk.f32.gmra.mxu2 %vm512_vm0, %v8720_v47  ;;  %6494 = vmatmul.msk.f32.gmra.mxu3 %vm512_vm0, %v8720_v47  ;;  %vm3452_vm8 = vmor %vm3450_vm7, %vm3451_vm6  ;;  %vm3460_vm10 = vweird.f32 %v3410_v33 }
 0xeca   : > { %v3443_v30 = vsel %vm3442_vm5, %v7041_v49, %v3439_v26  ;;  %v3446_v34 = vmul.f32 %v7043_v14, %v3445_v24  ;;  %6503 = vmatmul.msk.f32.gmra.mxu0 %vm512_vm0, %v8720_v47  ;;  %v3958_v24 = vld [vmem:[#allocation4 + $0x1b8] sm:$0xff] }
 0xecb   : > { %v3496_v6 = vmul.f32 %v3443_v30, %v8651_v51  ;;  %v4009_v30 = vld [vmem:[#allocation4 + $0x238] sm:$0xff]  ;;  %3976 = vmatpush.msrb.mxu3 %v3958_v24 }
 0xecc   : > { %v3447_v36 = vmul.f32 0.5, %v3446_v34  ;;  %v3391_v53 = vpop.xlane.xlu1 %3390  ;;  %4027 = vmatpush.msrb.mxu0 %v4009_v30 }
 0xecd   : > { %v3507_v56 = vmul.f32 %v8696_v45, %v3496_v6  ;;  %v3403_v7 = vmul.f32 %v3391_v53, %v7443_v20  ;;  %v4008_v53 = vld [vmem:[#allocation4 + $0x230] sm:$0xff] }
 0xece   : > { %v3448_v19 = vsub.f32 1.5, %v3447_v36  ;;  %v3957_v36 = vld [vmem:[#allocation4 + $0x1b0] sm:$0xff]  ;;  %4028 = vmatpush.msrb.mxu0 %v4008_v53 }
 0xecf   : > { %v7045_v15 = vpop.eup %7044  ;;  %v8732_v43 = vadd.f32 %v8701_v27, %v3507_v56  ;;  %v3411_v55 = vadd.f32 1e-05, %v3403_v7  ;;  %v3956_v56 = vld [vmem:[#allocation4 + $0x1a8] sm:$0xff]  ;;  %3977 = vmatpush.msrb.mxu3 %v3957_v36 }
 0xed0   : > { %v3449_v5 = vmul.f32 %v7043_v14, %v3448_v19  ;;  %v3455_v3 = vmul.f32 %v7045_v15, %v3410_v33  ;;  %vm3461_vm9 = vweird.f32 %v7045_v15  ;;  %v4007_v7 = vld [vmem:[#allocation4 + $0x228] sm:$0xff]  ;;  %v3955_v19 = vld [vmem:[#allocation4 + $0x1a0] sm:$0xff] }
 0xed1   : > { %7046 = vrsqrt.f32 %v3411_v55  ;;  %6486 = vmatmul.msk.f32.gmra.mxu2 %vm512_vm0, %v8732_v43  ;;  %6495 = vmatmul.msk.f32.gmra.mxu3 %vm512_vm0, %v8732_v43  ;;  %vm3462_vm13 = vmor %vm3460_vm10, %vm3461_vm9  ;;  %vm3470_vm15 = vweird.f32 %v3411_v55 }
 0xed2   : > { %v3453_v51 = vsel %vm3452_vm8, %v7043_v14, %v3449_v5  ;;  %v3456_v0 = vmul.f32 %v7045_v15, %v3455_v3  ;;  %6504 = vmatmul.msk.f32.gmra.mxu0 %vm512_vm0, %v8732_v43  ;;  %3978 = vmatpush.msrb.mxu3 %v3956_v56 }
 0xed3   : > { %v3497_v10 = vmul.f32 %v3453_v51, %v8658_v39  ;;  %4029 = vmatpush.msrb.mxu0 %v4007_v7 }
 0xed4   : > { %v3457_v63 = vmul.f32 0.5, %v3456_v0  ;;  %v3394_v57 = vpop.xlane.xlu2 %3393  ;;  %3979 = vmatpush.msrb.mxu3 %v3955_v19 }
 0xed5   : > { %v3508_v59 = vmul.f32 %v8696_v45, %v3497_v10  ;;  %v3404_v38 = vmul.f32 %v3394_v57, %v7443_v20 }
 0xed6   : > { %v3458_v25 = vsub.f32 1.5, %v3457_v63 }
 0xed7   : > { %v7047_v9 = vpop.eup %7046  ;;  %v8744_v17 = vadd.f32 %v8701_v27, %v3508_v59  ;;  %v3412_v54 = vadd.f32 1e-05, %v3404_v38 }
 0xed8   : > { %v3459_v22 = vmul.f32 %v7045_v15, %v3458_v25  ;;  %v3465_v12 = vmul.f32 %v7047_v9, %v3411_v55  ;;  %vm3471_vm14 = vweird.f32 %v7047_v9 }
 0xed9   : > { %7048 = vrsqrt.f32 %v3412_v54  ;;  %6487 = vmatmul.msk.f32.gmra.mxu2 %vm512_vm0, %v8744_v17  ;;  %6496 = vmatmul.msk.f32.gmra.mxu3 %vm512_vm0, %v8744_v17  ;;  %vm3472_vm1 = vmor %vm3470_vm15, %vm3471_vm14  ;;  %vm3480_vm3 = vweird.f32 %v3412_v54 }
 0xeda   : > { %v3463_v39 = vsel %vm3462_vm13, %v7045_v15, %v3459_v22  ;;  %v3466_v48 = vmul.f32 %v7047_v9, %v3465_v12  ;;  %6505 = vmatmul.msk.f32.gmra.mxu0 %vm512_vm0, %v8744_v17  ;;  %v4006_v15 = vld [vmem:[#allocation4 + $0x220] sm:$0xff] }
 0xedb   : > { %v3498_v29 = vmul.f32 %v3463_v39, %v8665_v31  ;;  %4030 = vmatpush.msrb.mxu0 %v4006_v15 }
 0xedc   : > { %v3467_v50 = vmul.f32 0.5, %v3466_v48 }
 0xedd   : > { %v3509_v35 = vmul.f32 %v8696_v45, %v3498_v29 }
 0xede   : > { %v3468_v49 = vsub.f32 1.5, %v3467_v50 }
 0xedf   : > { %v7049_v1 = vpop.eup %7048  ;;  %v8755_v60 = vadd.f32 %v8701_v27, %v3509_v35 }
 0xee0   : > { %v3469_v42 = vmul.f32 %v7047_v9, %v3468_v49  ;;  %v3475_v52 = vmul.f32 %v7049_v1, %v3412_v54  ;;  %vm3481_vm2 = vweird.f32 %v7049_v1 }
 0xee1   : > { %6488 = vmatmul.msk.f32.gmra.mxu2 %vm512_vm0, %v8755_v60  ;;  %6497 = vmatmul.msk.f32.gmra.mxu3 %vm512_vm0, %v8755_v60  ;;  %vm3482_vm4 = vmor %vm3480_vm3, %vm3481_vm2 }
 0xee2   : > { %v3473_v31 = vsel %vm3472_vm1, %v7047_v9, %v3469_v42  ;;  %v3476_v13 = vmul.f32 %v7049_v1, %v3475_v52  ;;  %6506 = vmatmul.msk.f32.gmra.mxu0 %vm512_vm0, %v8755_v60 }
 0xee3   : > { %v3499_v21 = vmul.f32 %v3473_v31, %v8672_v61 }
 0xee4   : > { %v3477_v23 = vmul.f32 0.5, %v3476_v13  ;;  %v6827_v13 = vld [vmem:[%s9771_s3 + $0x10] ss:$0 sm:$0xff] }
 0xee5   : > { %v3510_v46 = vmul.f32 %v8696_v45, %v3499_v21 }
 0xee6   : > { %v3478_v37 = vsub.f32 1.5, %v3477_v23 }
 0xee7   : > { %v8766_v11 = vadd.f32 %v8701_v27, %v3510_v46 }
 0xee8   : > { %v3479_v28 = vmul.f32 %v7049_v1, %v3478_v37 }
 0xee9   : > { %6489 = vmatmul.msk.f32.gmra.mxu2 %vm512_vm0, %v8766_v11  ;;  %6498 = vmatmul.msk.f32.gmra.mxu3 %vm512_vm0, %v8766_v11 }
 0xeea   : > { %v3483_v14 = vsel %vm3482_vm4, %v7049_v1, %v3479_v28  ;;  %6507 = vmatmul.msk.f32.gmra.mxu0 %vm512_vm0, %v8766_v11  ;;  %v6825_v1 = vld [vmem:[%s9771_s3 + $0x14] ss:$0 sm:$0xff] }
 0xeeb   : > { %v3500_v61 = vmul.f32 %v3483_v14, %v8679_v41 }
 0xeed   : > { %v3511_v33 = vmul.f32 %v8696_v45, %v3500_v61 }
 0xeef   : > { %v8777_v26 = vadd.f32 %v8701_v27, %v3511_v33 }
 0xef1   : > { %6490 = vmatmul.msk.f32.gmra.mxu2 %vm512_vm0, %v8777_v26  ;;  %6499 = vmatmul.msk.f32.gmra.mxu3 %vm512_vm0, %v8777_v26 }
 0xef2   : > { %6508 = vmatmul.msk.f32.gmra.mxu0 %vm512_vm0, %v8777_v26 }
 0xf24   : > { %v3397_v34 = vpop.xlane.xlu0 %3396 }
 0xf25   : > { %v3405_v41 = vmul.f32 %v3397_v34, %v7443_v20 }
 0xf27   : > { %v3413_v6 = vadd.f32 1e-05, %v3405_v41 }
 0xf29   : > { %7050 = vrsqrt.f32 %v3413_v6  ;;  %vm3490_vm6 = vweird.f32 %v3413_v6 }
 0xf2f   : > { %v7051_v55 = vpop.eup %7050 }
 0xf30   : > { %v3485_v5 = vmul.f32 %v7051_v55, %v3413_v6  ;;  %vm3491_vm5 = vweird.f32 %v7051_v55 }
 0xf31   : > { %vm3492_vm7 = vmor %vm3490_vm6, %vm3491_vm5 }
 0xf32   : > { %v3486_v3 = vmul.f32 %v7051_v55, %v3485_v5  ;;  %v6826_v5 = vld [vmem:[%s9771_s3 + $0xc] ss:$0 sm:$0xff] }
 0xf34   : > { %v3487_v51 = vmul.f32 0.5, %v3486_v3 }
 0xf36   : > { %v3488_v0 = vsub.f32 1.5, %v3487_v51 }
 0xf38   : > { %v3489_v10 = vmul.f32 %v7051_v55, %v3488_v0 }
 0xf3a   : > { %v3493_v63 = vsel %vm3492_vm7, %v7051_v55, %v3489_v10 }
 0xf3b   : > { %v3501_v57 = vmul.f32 %v3493_v63, %v8687_v18 }
 0xf3c   : > { %v3677_v18 = vpop.f32.mrf.mxu0 }
 0xf3d   : > { %v3512_v59 = vmul.f32 %v8696_v45, %v3501_v57  ;;  %v3678_v34 = vadd.f32 %v6825_v1, %v3677_v18 }
 0xf3f   : > { %v8789_v38 = vadd.f32 %v8701_v27, %v3512_v59 }
 0xf41   : > { %6491 = vmatmul.msk.f32.gmra.mxu2 %vm512_vm0, %v8789_v38  ;;  %6500 = vmatmul.msk.f32.gmra.mxu3 %vm512_vm0, %v8789_v38  ;;  %v3626_v45 = vpop.f32.mrf.mxu3  ;;  %v3575_v36 = vpop.f32.mrf.mxu2 }
 0xf42   : > { %6509 = vmatmul.msk.f32.gmra.mxu0 %vm512_vm0, %v8789_v38  ;;  %v3627_v3 = vadd.f32 %v6827_v13, %v3626_v45  ;;  %v3576_v51 = vadd.f32 %v6826_v5, %v3575_v36  ;;  %v6828_v45 = vld [vmem:[%s9771_s3 + $0x11] ss:$0 sm:$0xff] }
 0xf47   : > { %v3680_v27 = vpop.f32.mrf.mxu0 }
 0xf48   : > { %v3681_v24 = vadd.f32 %v6825_v1, %v3680_v27 }
 0xf49   : > { %6536 = vmatmul.msk.f32.vlgmr.msrb.gmra.mxu3 %vm512_vm0, %v8707_v62 }
 0xf4a   : > { %6545 = vmatmul.msk.f32.vlgmr.msrb.gmra.mxu0 %vm512_vm0, %v8707_v62 }
 0xf4c   : > { %v3629_v25 = vpop.f32.mrf.mxu3  ;;  %v3578_v15 = vpop.f32.mrf.mxu2 }
 0xf4d   : > { %v3630_v19 = vadd.f32 %v6827_v13, %v3629_v25  ;;  %v3579_v63 = vadd.f32 %v6826_v5, %v3578_v15  ;;  %v3705_v15 = vld [vmem:[#allocation2 + $0x118] sm:$0xff] }
 0xf4f   : > { %v3683_v9 = vpop.f32.mrf.mxu0 }
 0xf50   : > { %v3684_v33 = vadd.f32 %v6825_v1, %v3683_v9 }
 0xf51   : > { %6537 = vmatmul.msk.f32.gmra.mxu3 %vm512_vm0, %v8720_v47 }
 0xf52   : > { %6546 = vmatmul.msk.f32.gmra.mxu0 %vm512_vm0, %v8720_v47 }
 0xf54   : > { %v3632_v54 = vpop.f32.mrf.mxu3  ;;  %v3581_v10 = vpop.f32.mrf.mxu2 }
 0xf55   : > { %v3633_v7 = vadd.f32 %v6827_v13, %v3632_v54  ;;  %v3582_v18 = vadd.f32 %v6826_v5, %v3581_v10  ;;  %v4060_v54 = vld [vmem:[#allocation4 + $0x2b8] sm:$0xff] }
 0xf57   : > { %v3686_v22 = vpop.f32.mrf.mxu0 }
 0xf58   : > { %v3687_v14 = vadd.f32 %v6825_v1, %v3686_v22  ;;  %v4059_v22 = vld [vmem:[#allocation4 + $0x2b0] sm:$0xff] }
 0xf59   : > { %6538 = vmatmul.msk.f32.gmra.mxu3 %vm512_vm0, %v8732_v43 }
 0xf5a   : > { %6547 = vmatmul.msk.f32.gmra.mxu0 %vm512_vm0, %v8732_v43 }
 0xf5c   : > { %v3635_v12 = vpop.f32.mrf.mxu3  ;;  %v3584_v59 = vpop.f32.mrf.mxu2 }
 0xf5d   : > { %v3636_v53 = vadd.f32 %v6827_v13, %v3635_v12  ;;  %v3585_v25 = vadd.f32 %v6826_v5, %v3584_v59 }
 0xf5f   : > { %v3689_v39 = vpop.f32.mrf.mxu0 }
 0xf60   : > { %v3690_v37 = vadd.f32 %v6825_v1, %v3689_v39 }
 0xf61   : > { %6539 = vmatmul.msk.f32.gmra.mxu3 %vm512_vm0, %v8744_v17 }
 0xf62   : > { %6548 = vmatmul.msk.f32.gmra.mxu0 %vm512_vm0, %v8744_v17 }
 0xf64   : > { %v3638_v48 = vpop.f32.mrf.mxu3  ;;  %v3587_v9 = vpop.f32.mrf.mxu2 }
 0xf65   : > { %v3639_v6 = vadd.f32 %v6827_v13, %v3638_v48  ;;  %v4058_v48 = vld [vmem:[#allocation4 + $0x2a8] sm:$0xff] }
 0xf67   : > { %v3692_v29 = vpop.f32.mrf.mxu0 }
 0xf68   : > { %v3693_v21 = vadd.f32 %v6825_v1, %v3692_v29  ;;  %v4057_v29 = vld [vmem:[#allocation4 + $0x2a0] sm:$0xff] }
 0xf69   : > { %6540 = vmatmul.msk.f32.gmra.mxu3 %vm512_vm0, %v8755_v60 }
 0xf6a   : > { %6549 = vmatmul.msk.f32.gmra.mxu0 %vm512_vm0, %v8755_v60 }
 0xf6c   : > { %v3641_v50 = vpop.f32.mrf.mxu3 }
 0xf6d   : > { %v3642_v30 = vadd.f32 %v6827_v13, %v3641_v50  ;;  %v3588_v50 = vadd.f32 %v6826_v5, %v3587_v9 }
 0xf6f   : > { %v3695_v35 = vpop.f32.mrf.mxu0 }
 0xf70   : > { %v3696_v31 = vadd.f32 %v6825_v1, %v3695_v35 }
 0xf71   : > { %6541 = vmatmul.msk.f32.gmra.mxu3 %vm512_vm0, %v8766_v11 }
 0xf72   : > { %6550 = vmatmul.msk.f32.gmra.mxu0 %vm512_vm0, %v8766_v11 }
 0xf74   : > { %v3644_v49 = vpop.f32.mrf.mxu3 }
 0xf75   : > { %v3645_v61 = vadd.f32 %v6827_v13, %v3644_v49  ;;  %v3590_v49 = vpop.f32.mrf.mxu2 }
 0xf79   : > { %6542 = vmatmul.msk.f32.gmra.mxu3 %vm512_vm0, %v8777_v26 }
 0xf7a   : > { %6551 = vmatmul.msk.f32.gmra.mxu0 %vm512_vm0, %v8777_v26 }
 0xf81   : > { %6543 = vmatmul.msk.f32.gmra.mxu3 %vm512_vm0, %v8789_v38 }
 0xf82   : > { %6552 = vmatmul.msk.f32.gmra.mxu0 %vm512_vm0, %v8789_v38 }
 0xfbf   : > { %v3698_v42 = vpop.f32.mrf.mxu0 }
 0xfc0   : > { %v3699_v52 = vadd.f32 %v6825_v1, %v3698_v42  ;;  %v3591_v42 = vadd.f32 %v6826_v5, %v3590_v49 }
 0xfc2   : > { %3919 = vmatpush.msrb.mxu2 %v3699_v52 }
 0xfc4   : > { %3920 = vmatpush.msrb.mxu2 %v3696_v31  ;;  %v3647_v23 = vpop.f32.mrf.mxu3 }
 0xfc5   : > { %v3648_v46 = vadd.f32 %v6827_v13, %v3647_v23  ;;  %v3593_v13 = vpop.f32.mrf.mxu2 }
 0xfc6   : > { %3921 = vmatpush.msrb.mxu2 %v3693_v21  ;;  %v3594_v21 = vadd.f32 %v6826_v5, %v3593_v13 }
 0xfc7   : > { %v8835_v28 = vpop.f32.mrf.mxu0  ;;  %6510 = vmatpush.xpose.msk.msra.mxu1 %vm901_vm11, %v3648_v46 }
 0xfc8   : > { %3922 = vmatpush.msrb.mxu2 %v3690_v37 }
 0xfca   : > { %3923 = vmatpush.msrb.mxu2 %v3687_v14 }
 0xfcb   : > { %6511 = vmatpush.xpose.msk.msra.mxu1 %vm901_vm11, %v3645_v61  ;;  %v4033_v61 = vadd.f32 %v6828_v45, %v8835_v28  ;;  %v3702_v28 = vld [vmem:[#allocation2 + $0x100] sm:$0xff] }
 0xfcc   : > { %3924 = vmatpush.msrb.mxu2 %v3684_v33 }
 0xfcd   : > { %v3596_v37 = vpop.f32.mrf.mxu2 }
 0xfce   : > { %3925 = vmatpush.msrb.mxu2 %v3681_v24  ;;  %v3597_v14 = vadd.f32 %v6826_v5, %v3596_v37 }
 0xfcf   : > { %v4035_v41 = vpop.f32.mrf.mxu0  ;;  %6512 = vmatpush.xpose.msk.msra.mxu1 %vm901_vm11, %v3642_v30 }
 0xfd0   : > { %3926 = vmatpush.msrb.mxu2 %v3678_v34  ;;  %v4036_v46 = vadd.f32 %v6828_v45, %v4035_v41  ;;  %v3703_v34 = vld [vmem:[#allocation2 + $0x108] sm:$0xff] }
 0xfd3   : > { %6513 = vmatpush.xpose.msk.msra.mxu1 %vm901_vm11, %v3639_v6 }
 0xfd7   : > { %v4038_v56 = vpop.f32.mrf.mxu0  ;;  %6514 = vmatpush.xpose.msk.msra.mxu1 %vm901_vm11, %v3636_v53  ;;  %v3704_v53 = vld [vmem:[#allocation2 + $0x110] sm:$0xff] }
 0xfd8   : > { %v4039_v23 = vadd.f32 %v6828_v45, %v4038_v56 }
 0xfdb   : > { %6515 = vmatpush.xpose.msk.msra.mxu1 %vm901_vm11, %v3633_v7 }
 0xfdf   : > { %v4041_v55 = vpop.f32.mrf.mxu0  ;;  %6516 = vmatpush.xpose.msk.msra.mxu1 %vm901_vm11, %v3630_v19 }
 0xfe0   : > { %v4042_v31 = vadd.f32 %v6828_v45, %v4041_v55 }
 0xfe3   : > { %6517 = vmatpush.xpose.msk.msra.mxu1 %vm901_vm11, %v3627_v3 }
 0xfe6   : > { %6518 = vmatmul.msk.f32.vlgmr.msra.gmra.mxu1 %vm901_vm11, %v3576_v51  ;;  %v3706_v51 = vld [vmem:[#allocation2 + $0x120] sm:$0xff] }
 0xfe7   : > { %v4044_v0 = vpop.f32.mrf.mxu0  ;;  %4078 = vmatpush.msrb.mxu1 %v4060_v54 }
 0xfe8   : > { %v4045_v52 = vadd.f32 %v6828_v45, %v4044_v0 }
 0xfe9   : > { %4079 = vmatpush.msrb.mxu1 %v4059_v22  ;;  %v3709_v22 = vld [vmem:[#allocation2 + $0x138] sm:$0xff] }
 0xfeb   : > { %4080 = vmatpush.msrb.mxu1 %v4058_v48 }
 0xfed   : > { %4081 = vmatpush.msrb.mxu1 %v4057_v29 }
 0xfee   : > { %6519 = vmatmul.msk.f32.gmra.mxu1 %vm901_vm11, %v3579_v63 }
 0xfef   : > { %v4047_v57 = vpop.f32.mrf.mxu0 }
 0xff0   : > { %v4048_v1 = vadd.f32 %v6828_v45, %v4047_v57  ;;  %v3707_v57 = vld [vmem:[#allocation2 + $0x128] sm:$0xff] }
 0xff6   : > { %6520 = vmatmul.msk.f32.gmra.mxu1 %vm901_vm11, %v3582_v18 }
 0xff7   : > { %v4050_v27 = vpop.f32.mrf.mxu0 }
 0xff8   : > { %v4051_v35 = vadd.f32 %v6828_v45, %v4050_v27 }
 0xffe   : > { %6521 = vmatmul.msk.f32.gmra.mxu1 %vm901_vm11, %v3585_v25  ;;  %v3708_v25 = vld [vmem:[#allocation2 + $0x130] sm:$0xff] }
 0xfff   : > { %v4053_v12 = vpop.f32.mrf.mxu0 }
0x1000   : > { %v4054_v39 = vadd.f32 %v6828_v45, %v4053_v12 }
0x1002   : > { %6562 = vmatpush.xpose.msk.msra.mxu2 %vm901_vm11, %v4054_v39 }
0x1006   : > { %6563 = vmatpush.xpose.msk.msra.mxu2 %vm901_vm11, %v4051_v35  ;;  %6522 = vmatmul.msk.f32.gmra.mxu1 %vm901_vm11, %v3588_v50 }
0x100a   : > { %6564 = vmatpush.xpose.msk.msra.mxu2 %vm901_vm11, %v4048_v1 }
0x100e   : > { %6565 = vmatpush.xpose.msk.msra.mxu2 %vm901_vm11, %v4045_v52  ;;  %6523 = vmatmul.msk.f32.gmra.mxu1 %vm901_vm11, %v3591_v42 }
0x1012   : > { %6566 = vmatpush.xpose.msk.msra.mxu2 %vm901_vm11, %v4042_v31  ;;  %v6830_v31 = vld [vmem:[%s9771_s3 + $0x15] ss:$0 sm:$0xff] }
0x1016   : > { %6567 = vmatpush.xpose.msk.msra.mxu2 %vm901_vm11, %v4039_v23  ;;  %6524 = vmatmul.msk.f32.gmra.mxu1 %vm901_vm11, %v3594_v21 }
0x101a   : > { %6568 = vmatpush.xpose.msk.msra.mxu2 %vm901_vm11, %v4036_v46 }
0x101e   : > { %6569 = vmatpush.xpose.msk.msra.mxu2 %vm901_vm11, %v4033_v61  ;;  %6525 = vmatmul.msk.f32.gmra.mxu1 %vm901_vm11, %v3597_v14 }
0x1026   : > { %6554 = vmatmul.msk.f32.vlgmr.msrb.gmra.mxu1 %vm512_vm0, %v8707_v62 }
0x102e   : > { %6555 = vmatmul.msk.f32.gmra.mxu1 %vm512_vm0, %v8720_v47 }
0x1036   : > { %6556 = vmatmul.msk.f32.gmra.mxu1 %vm512_vm0, %v8732_v43 }
0x103e   : > { %6557 = vmatmul.msk.f32.gmra.mxu1 %vm512_vm0, %v8744_v17 }
0x1046   : > { %6558 = vmatmul.msk.f32.gmra.mxu1 %vm512_vm0, %v8755_v60 }
0x104e   : > { %6559 = vmatmul.msk.f32.gmra.mxu1 %vm512_vm0, %v8766_v11 }
0x1056   : > { %6560 = vmatmul.msk.f32.gmra.mxu1 %vm512_vm0, %v8777_v26 }
0x105e   : > { %6561 = vmatmul.msk.f32.gmra.mxu1 %vm512_vm0, %v8789_v38 }
0x1063   : > { %v3775_v33 = vpop.f32.mrf.mxu1 }
0x1064   : > { %v3776_v24 = vadd.f32 %v3775_v33, %v3702_v28 }
0x1066   : > { %v3799_v30 = vsel %vm991_vm12, %v3776_v24, -inf }
0x1067   : > { %3800 = vmax.xlane.f32.xlu1 %v3799_v30 }
0x106b   : > { %v3778_v41 = vpop.f32.mrf.mxu1 }
0x106c   : > { %v3779_v6 = vadd.f32 %v3778_v41, %v3703_v34 }
0x106e   : > { %v3802_v36 = vsel %vm991_vm12, %v3779_v6, -inf }
0x106f   : > { %3803 = vmax.xlane.f32.xlu2 %v3802_v36 }
0x1073   : > { %v3781_v56 = vpop.f32.mrf.mxu1 }
0x1074   : > { %v8886_v7 = vadd.f32 %v3781_v56, %v3704_v53 }
0x1076   : > { %v3805_v19 = vsel %vm991_vm12, %v8886_v7, -inf }
0x1077   : > { %3806 = vmax.xlane.f32.xlu0 %v3805_v19 }
0x107b   : > { %v3784_v55 = vpop.f32.mrf.mxu1 }
0x107c   : > { %v8890_v5 = vadd.f32 %v3784_v55, %v3705_v15 }
0x107e   : > { %v3808_v3 = vsel %vm991_vm12, %v8890_v5, -inf }
0x107f   : > { %3809 = vmax.xlane.f32.xlu1 %v3808_v3 }
0x1083   : > { %v3787_v0 = vpop.f32.mrf.mxu1 }
0x1084   : > { %v8894_v10 = vadd.f32 %v3787_v0, %v3706_v51 }
0x1086   : > { %v3811_v63 = vsel %vm991_vm12, %v8894_v10, -inf }
0x1087   : > { %3812 = vmax.xlane.f32.xlu2 %v3811_v63 }
0x108b   : > { %v3790_v59 = vpop.f32.mrf.mxu1 }
0x108c   : > { %v8898_v18 = vadd.f32 %v3790_v59, %v3707_v57 }
0x108e   : > { %v3814_v27 = vsel %vm991_vm12, %v8898_v18, -inf }
0x108f   : > { %3815 = vmax.xlane.f32.xlu0 %v3814_v27 }
0x1093   : > { %v3793_v9 = vpop.f32.mrf.mxu1 }
0x1094   : > { %v8902_v45 = vadd.f32 %v3793_v9, %v3708_v25 }
0x1096   : > { %v3817_v54 = vsel %vm991_vm12, %v8902_v45, -inf }
0x1097   : > { %3818 = vmax.xlane.f32.xlu1 %v3817_v54 }
0x109b   : > { %v3796_v12 = vpop.f32.mrf.mxu1 }
0x109c   : > { %v8906_v39 = vadd.f32 %v3796_v12, %v3709_v22 }
0x109e   : > { %v3820_v48 = vsel %vm991_vm12, %v8906_v39, -inf }
0x109f   : > { %3821 = vmax.xlane.f32.xlu0 %v3820_v48 }
0x10a3   : > { %v4083_v29 = vpop.f32.mrf.mxu1 }
0x10a4   : > { %v4084_v19 = vadd.f32 %v6830_v31, %v4083_v29 }
0x10ab   : > { %v4086_v50 = vpop.f32.mrf.mxu1 }
0x10ac   : > { %v4087_v56 = vadd.f32 %v6830_v31, %v4086_v50 }
0x10b3   : > { %v4089_v35 = vpop.f32.mrf.mxu1 }
0x10b4   : > { %v4090_v53 = vadd.f32 %v6830_v31, %v4089_v35 }
0x10bb   : > { %v4092_v49 = vpop.f32.mrf.mxu1 }
0x10bc   : > { %v4093_v34 = vadd.f32 %v6830_v31, %v4092_v49 }
0x10c3   : > { %v4095_v1 = vpop.f32.mrf.mxu1 }
0x10c4   : > { %v4096_v28 = vadd.f32 %v6830_v31, %v4095_v1 }
0x10cb   : > { %v4098_v42 = vpop.f32.mrf.mxu1 }
0x10cc   : > { %v4099_v61 = vadd.f32 %v6830_v31, %v4098_v42 }
0x10d3   : > { %v4101_v52 = vpop.f32.mrf.mxu1 }
0x10d4   : > { %v4102_v14 = vadd.f32 %v6830_v31, %v4101_v52 }
0x10da   : > { %v3801_v13 = vpop.xlane.xlu1 %3800 }
0x10db   : > { %v3823_v21 = vsub.f32 %v3776_v24, %v3801_v13  ;;  %v4104_v23 = vpop.f32.mrf.mxu1 }
0x10dc   : > { %v4105_v46 = vadd.f32 %v6830_v31, %v4104_v23 }
0x10dd   : > { %v3831_v37 = vmul.f32 1.442695, %v3823_v21 }
0x10de   : > { %4325 = vmatpush.msra.mxu3 %v4105_v46 }
0x10df   : > { %7052 = vpow2.f32 %v3831_v37 }
0x10e0   : > { %4326 = vmatpush.msra.mxu3 %v4102_v14 }
0x10e2   : > { %v3804_v33 = vpop.xlane.xlu2 %3803  ;;  %4327 = vmatpush.msra.mxu3 %v4099_v61 }
0x10e3   : > { %v3824_v30 = vsub.f32 %v3779_v6, %v3804_v33 }
0x10e4   : > { %4328 = vmatpush.msra.mxu3 %v4096_v28 }
0x10e5   : > { %v7053_v41 = vpop.eup %7052  ;;  %v3833_v36 = vmul.f32 1.442695, %v3824_v30 }
0x10e6   : > { %4329 = vmatpush.msra.mxu3 %v4093_v34  ;;  %v3847_v24 = vsel %vm991_vm12, %v7053_v41, 0.0 }
0x10e7   : > { %7054 = vpow2.f32 %v3833_v36  ;;  %3848 = vadd.xlane.f32.xlu2 %v3847_v24 }
0x10e8   : > { %4330 = vmatpush.msra.mxu3 %v4090_v53 }
0x10ea   : > { %v3807_v15 = vpop.xlane.xlu0 %3806  ;;  %4331 = vmatpush.msra.mxu3 %v4087_v56 }
0x10eb   : > { %v3825_v55 = vsub.f32 %v8886_v7, %v3807_v15 }
0x10ec   : > { %4332 = vmatpush.msra.mxu3 %v4084_v19 }
0x10ed   : > { %v7055_v3 = vpop.eup %7054  ;;  %v3835_v6 = vmul.f32 1.442695, %v3825_v55 }
0x10ee   : > { %v3850_v51 = vsel %vm991_vm12, %v7055_v3, 0.0 }
0x10ef   : > { %7056 = vpow2.f32 %v3835_v6  ;;  %3851 = vadd.xlane.f32.xlu1 %v3850_v51 }
0x10f2   : > { %v3810_v0 = vpop.xlane.xlu1 %3809 }
0x10f3   : > { %v3826_v63 = vsub.f32 %v8890_v5, %v3810_v0  ;;  %v3981_v0 = vpop.f32.mrf.mxu3 }
0x10f5   : > { %v7057_v57 = vpop.eup %7056  ;;  %v3837_v59 = vmul.f32 1.442695, %v3826_v63 }
0x10f6   : > { %v3853_v27 = vsel %vm991_vm12, %v7057_v57, 0.0 }
0x10f7   : > { %7058 = vpow2.f32 %v3837_v59  ;;  %3854 = vadd.xlane.f32.xlu2 %v3853_v27 }
0x10fa   : > { %v3813_v25 = vpop.xlane.xlu2 %3812 }
0x10fb   : > { %v3827_v9 = vsub.f32 %v8894_v10, %v3813_v25  ;;  %v3984_v25 = vpop.f32.mrf.mxu3 }
0x10fd   : > { %v7059_v7 = vpop.eup %7058  ;;  %v3839_v54 = vmul.f32 1.442695, %v3827_v9  ;;  %v6829_v9 = vld [vmem:[%s9771_s3 + $0xd] ss:$0 sm:$0xff] }
0x10fe   : > { %v3856_v22 = vsel %vm991_vm12, %v7059_v7, 0.0 }
0x10ff   : > { %7060 = vpow2.f32 %v3839_v54  ;;  %3857 = vadd.xlane.f32.xlu0 %v3856_v22  ;;  %v3985_v22 = vadd.f32 %v6829_v9, %v3984_v25 }
0x1102   : > { %v3816_v12 = vpop.xlane.xlu0 %3815 }
0x1103   : > { %v3828_v48 = vsub.f32 %v8898_v18, %v3816_v12  ;;  %v3987_v54 = vpop.f32.mrf.mxu3 }
0x1105   : > { %v7061_v29 = vpop.eup %7060  ;;  %v3841_v5 = vmul.f32 1.442695, %v3828_v48  ;;  %v3988_v48 = vadd.f32 %v6829_v9, %v3987_v54 }
0x1106   : > { %v3859_v50 = vsel %vm991_vm12, %v7061_v29, 0.0 }
0x1107   : > { %7062 = vpow2.f32 %v3841_v5  ;;  %3860 = vadd.xlane.f32.xlu1 %v3859_v50  ;;  %v4494_v50 = vld [vmem:[#allocation4 + $0x1d8] sm:$0xff] }
0x110a   : > { %v3819_v35 = vpop.xlane.xlu1 %3818 }
0x110b   : > { %v3829_v49 = vsub.f32 %v8902_v45, %v3819_v35  ;;  %v3990_v12 = vpop.f32.mrf.mxu3  ;;  %v4493_v35 = vld [vmem:[#allocation4 + $0x1d0] sm:$0xff] }
0x110c   : > { %v3991_v5 = vadd.f32 %v6829_v9, %v3990_v12 }
0x110d   : > { %v7063_v1 = vpop.eup %7062  ;;  %v3843_v10 = vmul.f32 1.442695, %v3829_v49  ;;  %v4492_v49 = vld [vmem:[#allocation4 + $0x1c8] sm:$0xff] }
0x110e   : > { %v3862_v42 = vsel %vm991_vm12, %v7063_v1, 0.0 }
0x110f   : > { %7064 = vpow2.f32 %v3843_v10  ;;  %3863 = vadd.xlane.f32.xlu2 %v3862_v42 }
0x1112   : > { %v3822_v52 = vpop.xlane.xlu0 %3821 }
0x1113   : > { %v3830_v31 = vsub.f32 %v8906_v39, %v3822_v52  ;;  %v6534_v52 = vld [vmem:[%s9772_s4 + $0x20] sm:$0xff] }
0x1114   : > { %4464 = vmatpush.msra.mxu1 %v6534_v52 }
0x1115   : > { %v7065_v13 = vpop.eup %7064  ;;  %v3845_v18 = vmul.f32 1.442695, %v3830_v31 }
0x1116   : > { %v3865_v21 = vsel %vm991_vm12, %v7065_v13, 0.0 }
0x1117   : > { %7066 = vpow2.f32 %v3845_v18  ;;  %3866 = vadd.xlane.f32.xlu0 %v3865_v21 }
0x111d   : > { %v7067_v23 = vpop.eup %7066 }
0x111e   : > { %v3868_v46 = vsel %vm991_vm12, %v7067_v23, 0.0 }
0x111f   : > { %3869 = vadd.xlane.f32.xlu1 %v3868_v46 }
0x115a   : > { %v3849_v45 = vpop.xlane.xlu2 %3848 }
0x115b   : > { %7068 = vrcp.f32 %v3849_v45 }
0x1161   : > { %v7069_v37 = vpop.eup %7068 }
0x1162   : > { %v3879_v14 = vmul.f32 %v7069_v37, %v7053_v41  ;;  %v3852_v61 = vpop.xlane.xlu1 %3851 }
0x1163   : > { %7070 = vrcp.f32 %v3852_v61 }
0x1164   : > { %6526 = vmatmul.msk.f32.vlgmr.msrb.gmra.mxu2 %vm991_vm12, %v3879_v14 }
0x1165   : > { %4512 = vmatpush.msrb.mxu2 %v4494_v50 }
0x1167   : > { %4513 = vmatpush.msrb.mxu2 %v4493_v35  ;;  %v4115_v35 = vld [vmem:[#allocation2 + $0x178] sm:$0xff] }
0x1169   : > { %v7071_v28 = vpop.eup %7070  ;;  %4514 = vmatpush.msrb.mxu2 %v4492_v49 }
0x116a   : > { %v3855_v39 = vpop.xlane.xlu2 %3854  ;;  %v3880_v33 = vmul.f32 %v7071_v28, %v7055_v3 }
0x116b   : > { %7072 = vrcp.f32 %v3855_v39 }
0x116c   : > { %6527 = vmatmul.msk.f32.gmra.mxu2 %vm991_vm12, %v3880_v33 }
0x1171   : > { %v7073_v30 = vpop.eup %7072 }
0x1172   : > { %v3858_v34 = vpop.xlane.xlu0 %3857  ;;  %v3881_v36 = vmul.f32 %v7073_v30, %v7057_v57  ;;  %v4108_v30 = vld [vmem:[#allocation2 + $0x140] sm:$0xff] }
0x1173   : > { %7074 = vrcp.f32 %v3858_v34 }
0x1174   : > { %6528 = vmatmul.msk.f32.gmra.mxu2 %vm991_vm12, %v3881_v36 }
0x1179   : > { %v7075_v53 = vpop.eup %7074 }
0x117a   : > { %v3861_v24 = vpop.xlane.xlu1 %3860  ;;  %v3882_v56 = vmul.f32 %v7075_v53, %v7059_v7  ;;  %v3982_v7 = vadd.f32 %v6829_v9, %v3981_v0 }
0x117b   : > { %7076 = vrcp.f32 %v3861_v24  ;;  %v4109_v24 = vld [vmem:[#allocation2 + $0x148] sm:$0xff] }
0x117c   : > { %6529 = vmatmul.msk.f32.gmra.mxu2 %vm991_vm12, %v3882_v56 }
0x1181   : > { %v7077_v41 = vpop.eup %7076 }
0x1182   : > { %v3864_v19 = vpop.xlane.xlu2 %3863  ;;  %v3883_v15 = vmul.f32 %v7077_v41, %v7061_v29  ;;  %v3993_v29 = vpop.f32.mrf.mxu3 }
0x1183   : > { %7078 = vrcp.f32 %v3864_v19  ;;  %v3994_v10 = vadd.f32 %v6829_v9, %v3993_v29 }
0x1184   : > { %6530 = vmatmul.msk.f32.gmra.mxu2 %vm991_vm12, %v3883_v15  ;;  %v4110_v15 = vld [vmem:[#allocation2 + $0x150] sm:$0xff] }
0x1189   : > { %v7079_v55 = vpop.eup %7078 }
0x118a   : > { %v3867_v3 = vpop.xlane.xlu0 %3866  ;;  %v3884_v6 = vmul.f32 %v7079_v55, %v7063_v1  ;;  %v4491_v1 = vld [vmem:[#allocation4 + $0x1c0] sm:$0xff]  ;;  %v3996_v42 = vpop.f32.mrf.mxu3 }
0x118b   : > { %7080 = vrcp.f32 %v3867_v3  ;;  %4515 = vmatpush.msrb.mxu2 %v4491_v1  ;;  %v3997_v31 = vadd.f32 %v6829_v9, %v3996_v42 }
0x118c   : > { %6531 = vmatmul.msk.f32.gmra.mxu2 %vm991_vm12, %v3884_v6 }
0x1191   : > { %v7081_v51 = vpop.eup %7080 }
0x1192   : > { %v3870_v63 = vpop.xlane.xlu1 %3869  ;;  %v3885_v57 = vmul.f32 %v7081_v51, %v7065_v13  ;;  %v3999_v13 = vpop.f32.mrf.mxu3  ;;  %v4111_v51 = vld [vmem:[#allocation2 + $0x158] sm:$0xff] }
0x1193   : > { %7082 = vrcp.f32 %v3870_v63  ;;  %v4000_v18 = vadd.f32 %v6829_v9, %v3999_v13 }
0x1194   : > { %6532 = vmatmul.msk.f32.gmra.mxu2 %vm991_vm12, %v3885_v57 }
0x1199   : > { %v7083_v59 = vpop.eup %7082 }
0x119a   : > { %v3886_v27 = vmul.f32 %v7083_v59, %v7067_v23  ;;  %v4002_v21 = vpop.f32.mrf.mxu3  ;;  %v4112_v59 = vld [vmem:[#allocation2 + $0x160] sm:$0xff] }
0x119b   : > { %v4003_v23 = vadd.f32 %v6829_v9, %v4002_v21 }
0x119c   : > { %6533 = vmatmul.msk.f32.gmra.mxu2 %vm991_vm12, %v3886_v27 }
0x11a4   : > { %6570 = vmatmul.msk.f32.vlgmr.msra.gmra.mxu2 %vm901_vm11, %v3982_v7  ;;  %v4113_v7 = vld [vmem:[#allocation2 + $0x168] sm:$0xff] }
0x11ac   : > { %6571 = vmatmul.msk.f32.gmra.mxu2 %vm901_vm11, %v3985_v22 }
0x11b4   : > { %6572 = vmatmul.msk.f32.gmra.mxu2 %vm901_vm11, %v3988_v48  ;;  %v4114_v48 = vld [vmem:[#allocation2 + $0x170] sm:$0xff] }
0x11bc   : > { %6573 = vmatmul.msk.f32.gmra.mxu2 %vm901_vm11, %v3991_v5 }
0x11c4   : > { %6574 = vmatmul.msk.f32.gmra.mxu2 %vm901_vm11, %v3994_v10 }
0x11cc   : > { %6575 = vmatmul.msk.f32.gmra.mxu2 %vm901_vm11, %v3997_v31 }
0x11d4   : > { %6576 = vmatmul.msk.f32.gmra.mxu2 %vm901_vm11, %v4000_v18 }
0x11dc   : > { %6577 = vmatmul.msk.f32.gmra.mxu2 %vm901_vm11, %v4003_v23 }
0x11e4   : > { %6604 = vmatmul.msk.f32.vlgmr.msrb.gmra.mxu2 %vm512_vm0, %v8707_v62 }
0x11e7   : > { %v3928_v46 = vpop.f32.mrf.mxu2 }
0x11e8   : > { %6595 = vmatmul.msk.f32.vlgmr.msra.gmra.mxu1 %vm901_vm11, %v3928_v46 }
0x11ec   : > { %6605 = vmatmul.msk.f32.gmra.mxu2 %vm512_vm0, %v8720_v47 }
0x11ef   : > { %v3931_v45 = vpop.f32.mrf.mxu2 }
0x11f0   : > { %6596 = vmatmul.msk.f32.gmra.mxu1 %vm901_vm11, %v3931_v45 }
0x11f4   : > { %6606 = vmatmul.msk.f32.gmra.mxu2 %vm512_vm0, %v8732_v43 }
0x11f7   : > { %v3934_v37 = vpop.f32.mrf.mxu2 }
0x11f8   : > { %6597 = vmatmul.msk.f32.gmra.mxu1 %vm901_vm11, %v3934_v37 }
0x11fc   : > { %6607 = vmatmul.msk.f32.gmra.mxu2 %vm512_vm0, %v8744_v17 }
0x11ff   : > { %v3937_v14 = vpop.f32.mrf.mxu2 }
0x1200   : > { %6598 = vmatmul.msk.f32.gmra.mxu1 %vm901_vm11, %v3937_v14 }
0x1204   : > { %6608 = vmatmul.msk.f32.gmra.mxu2 %vm512_vm0, %v8755_v60 }
0x1207   : > { %v3940_v61 = vpop.f32.mrf.mxu2 }
0x1208   : > { %6599 = vmatmul.msk.f32.gmra.mxu1 %vm901_vm11, %v3940_v61 }
0x120c   : > { %6609 = vmatmul.msk.f32.gmra.mxu2 %vm512_vm0, %v8766_v11 }
0x120f   : > { %v3943_v28 = vpop.f32.mrf.mxu2 }
0x1210   : > { %6600 = vmatmul.msk.f32.gmra.mxu1 %vm901_vm11, %v3943_v28 }
0x1214   : > { %6610 = vmatmul.msk.f32.gmra.mxu2 %vm512_vm0, %v8777_v26 }
0x1217   : > { %v3946_v39 = vpop.f32.mrf.mxu2 }
0x1218   : > { %6601 = vmatmul.msk.f32.gmra.mxu1 %vm901_vm11, %v3946_v39 }
0x121c   : > { %6611 = vmatmul.msk.f32.gmra.mxu2 %vm512_vm0, %v8789_v38 }
0x121f   : > { %v3949_v33 = vpop.f32.mrf.mxu2 }
0x1220   : > { %6602 = vmatmul.msk.f32.gmra.mxu1 %vm901_vm11, %v3949_v33 }
0x1227   : > { %v4181_v34 = vpop.f32.mrf.mxu2 }
0x1228   : > { %v4182_v36 = vadd.f32 %v4181_v34, %v4108_v30 }
0x122a   : > { %v4205_v53 = vsel %vm991_vm12, %v4182_v36, -inf }
0x122b   : > { %4206 = vmax.xlane.f32.xlu2 %v4205_v53 }
0x122f   : > { %v4184_v56 = vpop.f32.mrf.mxu2 }
0x1230   : > { %v4185_v41 = vadd.f32 %v4184_v56, %v4109_v24 }
0x1232   : > { %v4208_v19 = vsel %vm991_vm12, %v4185_v41, -inf }
0x1233   : > { %4209 = vmax.xlane.f32.xlu0 %v4208_v19 }
0x1237   : > { %v4187_v55 = vpop.f32.mrf.mxu2 }
0x1238   : > { %v4188_v3 = vadd.f32 %v4187_v55, %v4110_v15 }
0x123a   : > { %v4211_v6 = vsel %vm991_vm12, %v4188_v3, -inf }
0x123b   : > { %4212 = vmax.xlane.f32.xlu1 %v4211_v6 }
0x123f   : > { %v4190_v0 = vpop.f32.mrf.mxu2 }
0x1240   : > { %v4191_v63 = vadd.f32 %v4190_v0, %v4111_v51 }
0x1242   : > { %v4214_v57 = vsel %vm991_vm12, %v4191_v63, -inf }
0x1243   : > { %4215 = vmax.xlane.f32.xlu2 %v4214_v57 }
0x1247   : > { %v4193_v27 = vpop.f32.mrf.mxu2 }
0x1248   : > { %v4194_v25 = vadd.f32 %v4193_v27, %v4112_v59 }
0x124a   : > { %v4217_v9 = vsel %vm991_vm12, %v4194_v25, -inf }
0x124b   : > { %4218 = vmax.xlane.f32.xlu0 %v4217_v9 }
0x124f   : > { %v4196_v54 = vpop.f32.mrf.mxu2 }
0x1250   : > { %v4197_v22 = vadd.f32 %v4196_v54, %v4113_v7 }
0x1252   : > { %v4220_v12 = vsel %vm991_vm12, %v4197_v22, -inf }
0x1253   : > { %4221 = vmax.xlane.f32.xlu1 %v4220_v12 }
0x1257   : > { %v4199_v29 = vpop.f32.mrf.mxu2 }
0x1258   : > { %v4200_v5 = vadd.f32 %v4199_v29, %v4114_v48 }
0x125a   : > { %v4223_v50 = vsel %vm991_vm12, %v4200_v5, -inf }
0x125b   : > { %4224 = vmax.xlane.f32.xlu2 %v4223_v50 }
0x125f   : > { %v4202_v49 = vpop.f32.mrf.mxu2 }
0x1260   : > { %v4203_v1 = vadd.f32 %v4202_v49, %v4115_v35  ;;  %v4545_v49 = vld [vmem:[#allocation4 + $0x258] sm:$0xff] }
0x1261   : > { %4563 = vmatpush.msrb.mxu3 %v4545_v49 }
0x1262   : > { %v4226_v10 = vsel %vm991_vm12, %v4203_v1, -inf }
0x1263   : > { %4227 = vmax.xlane.f32.xlu1 %v4226_v10 }
0x129e   : > { %v4207_v42 = vpop.xlane.xlu2 %4206 }
0x129f   : > { %v4229_v52 = vsub.f32 %v4182_v36, %v4207_v42 }
0x12a1   : > { %v4237_v31 = vmul.f32 1.442695, %v4229_v52 }
0x12a3   : > { %7084 = vpow2.f32 %v4237_v31 }
0x12a6   : > { %v4210_v13 = vpop.xlane.xlu0 %4209 }
0x12a7   : > { %v4230_v18 = vsub.f32 %v4185_v41, %v4210_v13 }
0x12a9   : > { %v7085_v21 = vpop.eup %7084  ;;  %v4239_v23 = vmul.f32 1.442695, %v4230_v18  ;;  %v4544_v18 = vld [vmem:[#allocation4 + $0x250] sm:$0xff] }
0x12aa   : > { %v4253_v46 = vsel %vm991_vm12, %v7085_v21, 0.0  ;;  %4564 = vmatpush.msrb.mxu3 %v4544_v18 }
0x12ab   : > { %7086 = vpow2.f32 %v4239_v23  ;;  %4254 = vadd.xlane.f32.xlu0 %v4253_v46 }
0x12ae   : > { %v4213_v45 = vpop.xlane.xlu1 %4212 }
0x12af   : > { %v4231_v37 = vsub.f32 %v4188_v3, %v4213_v45  ;;  %v4543_v45 = vld [vmem:[#allocation4 + $0x248] sm:$0xff] }
0x12b0   : > { %4565 = vmatpush.msrb.mxu3 %v4543_v45 }
0x12b1   : > { %v7087_v14 = vpop.eup %7086  ;;  %v4241_v61 = vmul.f32 1.442695, %v4231_v37  ;;  %v4542_v37 = vld [vmem:[#allocation4 + $0x240] sm:$0xff] }
0x12b2   : > { %v4256_v28 = vsel %vm991_vm12, %v7087_v14, 0.0  ;;  %4566 = vmatpush.msrb.mxu3 %v4542_v37 }
0x12b3   : > { %7088 = vpow2.f32 %v4241_v61  ;;  %4257 = vadd.xlane.f32.xlu2 %v4256_v28 }
0x12b6   : > { %v4216_v39 = vpop.xlane.xlu2 %4215 }
0x12b7   : > { %v4232_v33 = vsub.f32 %v4191_v63, %v4216_v39 }
0x12b9   : > { %v7089_v30 = vpop.eup %7088  ;;  %v4243_v34 = vmul.f32 1.442695, %v4232_v33 }
0x12ba   : > { %v4259_v36 = vsel %vm991_vm12, %v7089_v30, 0.0 }
0x12bb   : > { %7090 = vpow2.f32 %v4243_v34  ;;  %4260 = vadd.xlane.f32.xlu0 %v4259_v36 }
0x12be   : > { %v4219_v53 = vpop.xlane.xlu0 %4218 }
0x12bf   : > { %v4233_v24 = vsub.f32 %v4194_v25, %v4219_v53 }
0x12c1   : > { %v7091_v56 = vpop.eup %7090  ;;  %v4245_v41 = vmul.f32 1.442695, %v4233_v24 }
0x12c2   : > { %v4262_v19 = vsel %vm991_vm12, %v7091_v56, 0.0 }
0x12c3   : > { %7092 = vpow2.f32 %v4245_v41  ;;  %4263 = vadd.xlane.f32.xlu1 %v4262_v19  ;;  %v6586_v41 = vld [vmem:[%s9772_s4 + $0x28] sm:$0xff] }
0x12c4   : > { %4399 = vmatpush.msra.mxu0 %v6586_v41 }
0x12c6   : > { %v4222_v15 = vpop.xlane.xlu1 %4221 }
0x12c7   : > { %v4234_v55 = vsub.f32 %v4197_v22, %v4222_v15 }
0x12c9   : > { %v7093_v3 = vpop.eup %7092  ;;  %v4247_v6 = vmul.f32 1.442695, %v4234_v55 }
0x12ca   : > { %v4265_v51 = vsel %vm991_vm12, %v7093_v3, 0.0 }
0x12cb   : > { %7094 = vpow2.f32 %v4247_v6  ;;  %4266 = vadd.xlane.f32.xlu2 %v4265_v51  ;;  %v4596_v6 = vld [vmem:[#allocation4 + $0x2d8] sm:$0xff]  ;;  %v4595_v51 = vld [vmem:[#allocation4 + $0x2d0] sm:$0xff] }
0x12cc   : > { %4614 = vmatpush.msrb.mxu0 %v4596_v6  ;;  %v5023_v6 = vld [vmem:[#allocation4 + $0x270] sm:$0xff] }
0x12ce   : > { %v4225_v0 = vpop.xlane.xlu2 %4224  ;;  %4615 = vmatpush.msrb.mxu0 %v4595_v51 }
0x12cf   : > { %v4235_v63 = vsub.f32 %v4200_v5, %v4225_v0  ;;  %v4594_v0 = vld [vmem:[#allocation4 + $0x2c8] sm:$0xff] }
0x12d0   : > { %4616 = vmatpush.msrb.mxu0 %v4594_v0  ;;  %v5022_v0 = vld [vmem:[#allocation4 + $0x268] sm:$0xff] }
0x12d1   : > { %v7095_v57 = vpop.eup %7094  ;;  %v4249_v59 = vmul.f32 1.442695, %v4235_v63 }
0x12d2   : > { %v4268_v27 = vsel %vm991_vm12, %v7095_v57, 0.0 }
0x12d3   : > { %7096 = vpow2.f32 %v4249_v59  ;;  %4269 = vadd.xlane.f32.xlu0 %v4268_v27 }
0x12d6   : > { %v4228_v25 = vpop.xlane.xlu1 %4227 }
0x12d7   : > { %v4236_v9 = vsub.f32 %v4203_v1, %v4228_v25 }
0x12d9   : > { %v7097_v7 = vpop.eup %7096  ;;  %v4251_v54 = vmul.f32 1.442695, %v4236_v9 }
0x12da   : > { %v4271_v22 = vsel %vm991_vm12, %v7097_v7, 0.0 }
0x12db   : > { %7098 = vpow2.f32 %v4251_v54  ;;  %4272 = vadd.xlane.f32.xlu1 %v4271_v22 }
0x12e1   : > { %v7099_v12 = vpop.eup %7098 }
0x12e2   : > { %v4274_v48 = vsel %vm991_vm12, %v7099_v12, 0.0 }
0x12e3   : > { %4275 = vadd.xlane.f32.xlu2 %v4274_v48  ;;  %v4972_v48 = vld [vmem:[#allocation4 + $0x1f0] sm:$0xff] }
0x131e   : > { %v4255_v29 = vpop.xlane.xlu0 %4254 }
0x131f   : > { %7100 = vrcp.f32 %v4255_v29  ;;  %v4971_v29 = vld [vmem:[#allocation4 + $0x1e8] sm:$0xff] }
0x1325   : > { %v7101_v5 = vpop.eup %7100 }
0x1326   : > { %v4285_v50 = vmul.f32 %v7101_v5, %v7085_v21  ;;  %v4258_v35 = vpop.xlane.xlu2 %4257  ;;  %v4970_v5 = vld [vmem:[#allocation4 + $0x1e0] sm:$0xff] }
0x1327   : > { %7102 = vrcp.f32 %v4258_v35 }
0x1328   : > { %6578 = vmatmul.msk.f32.vlgmr.msra.gmra.mxu3 %vm991_vm12, %v4285_v50 }
0x132d   : > { %v7103_v1 = vpop.eup %7102 }
0x132e   : > { %v4261_v10 = vpop.xlane.xlu0 %4260  ;;  %v4286_v42 = vmul.f32 %v7103_v1, %v7087_v14  ;;  %v6832_v1 = vld [vmem:[%s9771_s3 + $0x12] ss:$0 sm:$0xff] }
0x132f   : > { %7104 = vrcp.f32 %v4261_v10 }
0x1330   : > { %6579 = vmatmul.msk.f32.gmra.mxu3 %vm991_vm12, %v4286_v42 }
0x1335   : > { %v7105_v52 = vpop.eup %7104 }
0x1336   : > { %v4264_v31 = vpop.xlane.xlu1 %4263  ;;  %v4287_v13 = vmul.f32 %v7105_v52, %v7089_v30 }
0x1337   : > { %7106 = vrcp.f32 %v4264_v31 }
0x1338   : > { %6580 = vmatmul.msk.f32.gmra.mxu3 %vm991_vm12, %v4287_v13 }
0x133d   : > { %v7107_v21 = vpop.eup %7106 }
0x133e   : > { %v4267_v23 = vpop.xlane.xlu2 %4266  ;;  %v4288_v46 = vmul.f32 %v7107_v21, %v7091_v56 }
0x133f   : > { %7108 = vrcp.f32 %v4267_v23  ;;  %v4517_v23 = vpop.f32.mrf.mxu2 }
0x1340   : > { %6581 = vmatmul.msk.f32.gmra.mxu3 %vm991_vm12, %v4288_v46 }
0x1345   : > { %v7109_v14 = vpop.eup %7108 }
0x1346   : > { %v4270_v61 = vpop.xlane.xlu0 %4269  ;;  %v4289_v28 = vmul.f32 %v7109_v14, %v7093_v3 }
0x1347   : > { %7110 = vrcp.f32 %v4270_v61  ;;  %v4520_v14 = vpop.f32.mrf.mxu2 }
0x1348   : > { %6582 = vmatmul.msk.f32.gmra.mxu3 %vm991_vm12, %v4289_v28  ;;  %v6831_v28 = vld [vmem:[%s9771_s3 + $0xe] ss:$0 sm:$0xff] }
0x134d   : > { %v7111_v39 = vpop.eup %7110 }
0x134e   : > { %v4273_v33 = vpop.xlane.xlu1 %4272  ;;  %v4290_v30 = vmul.f32 %v7111_v39, %v7095_v57  ;;  %v4593_v57 = vld [vmem:[#allocation4 + $0x2c0] sm:$0xff] }
0x134f   : > { %7112 = vrcp.f32 %v4273_v33  ;;  %4617 = vmatpush.msrb.mxu0 %v4593_v57  ;;  %v5021_v57 = vld [vmem:[#allocation4 + $0x260] sm:$0xff] }
0x1350   : > { %6583 = vmatmul.msk.f32.gmra.mxu3 %vm991_vm12, %v4290_v30  ;;  %v4518_v30 = vadd.f32 %v6831_v28, %v4517_v23 }
0x1355   : > { %v7113_v34 = vpop.eup %7112 }
0x1356   : > { %v4276_v36 = vpop.xlane.xlu2 %4275  ;;  %v4291_v53 = vmul.f32 %v7113_v34, %v7097_v7  ;;  %v4523_v34 = vpop.f32.mrf.mxu2 }
0x1357   : > { %7114 = vrcp.f32 %v4276_v36  ;;  %v4524_v41 = vadd.f32 %v6831_v28, %v4523_v34 }
0x1358   : > { %6584 = vmatmul.msk.f32.gmra.mxu3 %vm991_vm12, %v4291_v53  ;;  %v4521_v53 = vadd.f32 %v6831_v28, %v4520_v14 }
0x135d   : > { %v7115_v24 = vpop.eup %7114 }
0x135e   : > { %v4292_v56 = vmul.f32 %v7115_v24, %v7099_v12  ;;  %v4973_v12 = vld [vmem:[#allocation4 + $0x1f8] sm:$0xff]  ;;  %v4526_v24 = vpop.f32.mrf.mxu2 }
0x1360   : > { %6585 = vmatmul.msk.f32.gmra.mxu3 %vm991_vm12, %v4292_v56 }
0x1368   : > { %6613 = vmatmul.msk.f32.vlgmr.msrb.gmra.mxu3 %vm512_vm0, %v8707_v62 }
0x1370   : > { %6614 = vmatmul.msk.f32.gmra.mxu3 %vm512_vm0, %v8720_v47 }
0x1378   : > { %6615 = vmatmul.msk.f32.gmra.mxu3 %vm512_vm0, %v8732_v43 }
0x1380   : > { %6616 = vmatmul.msk.f32.gmra.mxu3 %vm512_vm0, %v8744_v17 }
0x1388   : > { %6617 = vmatmul.msk.f32.gmra.mxu3 %vm512_vm0, %v8755_v60 }
0x1390   : > { %6618 = vmatmul.msk.f32.gmra.mxu3 %vm512_vm0, %v8766_v11 }
0x1398   : > { %6619 = vmatmul.msk.f32.gmra.mxu3 %vm512_vm0, %v8777_v26 }
0x13a0   : > { %6620 = vmatmul.msk.f32.gmra.mxu3 %vm512_vm0, %v8789_v38 }
0x13ab   : > { %v4334_v19 = vpop.f32.mrf.mxu3 }
0x13ac   : > { %6587 = vmatmul.msk.f32.vlgmr.msra.gmra.mxu0 %vm901_vm11, %v4334_v19 }
0x13ad   : > { %4991 = vmatpush.msra.mxu0 %v4973_v12 }
0x13af   : > { %4992 = vmatpush.msra.mxu0 %v4972_v48 }
0x13b1   : > { %4993 = vmatpush.msra.mxu0 %v4971_v29 }
0x13b3   : > { %v4337_v15 = vpop.f32.mrf.mxu3  ;;  %4994 = vmatpush.msra.mxu0 %v4970_v5 }
0x13b4   : > { %6588 = vmatmul.msk.f32.gmra.mxu0 %vm901_vm11, %v4337_v15  ;;  %v4529_v15 = vpop.f32.mrf.mxu2 }
0x13bb   : > { %v4340_v55 = vpop.f32.mrf.mxu3 }
0x13bc   : > { %6589 = vmatmul.msk.f32.gmra.mxu0 %vm901_vm11, %v4340_v55  ;;  %v4527_v55 = vadd.f32 %v6831_v28, %v4526_v24 }
0x13c3   : > { %v4343_v3 = vpop.f32.mrf.mxu3 }
0x13c4   : > { %6590 = vmatmul.msk.f32.gmra.mxu0 %vm901_vm11, %v4343_v3  ;;  %v5024_v3 = vld [vmem:[#allocation4 + $0x278] sm:$0xff] }
0x13cb   : > { %v4346_v63 = vpop.f32.mrf.mxu3 }
0x13cc   : > { %6591 = vmatmul.msk.f32.gmra.mxu0 %vm901_vm11, %v4346_v63  ;;  %v4530_v63 = vadd.f32 %v6831_v28, %v4529_v15 }
0x13d3   : > { %v4349_v59 = vpop.f32.mrf.mxu3 }
0x13d4   : > { %6592 = vmatmul.msk.f32.gmra.mxu0 %vm901_vm11, %v4349_v59  ;;  %v4532_v59 = vpop.f32.mrf.mxu2 }
0x13db   : > { %v4352_v27 = vpop.f32.mrf.mxu3 }
0x13dc   : > { %6593 = vmatmul.msk.f32.gmra.mxu0 %vm901_vm11, %v4352_v27 }
0x13e3   : > { %v4355_v25 = vpop.f32.mrf.mxu3 }
0x13e4   : > { %6594 = vmatmul.msk.f32.gmra.mxu0 %vm901_vm11, %v4355_v25  ;;  %v4533_v25 = vadd.f32 %v6831_v28, %v4532_v59  ;;  %v4646_v59 = vld [vmem:[#allocation2 + $0x190] sm:$0xff] }
0x13eb   : > { %v4568_v9 = vpop.f32.mrf.mxu3 }
0x13ec   : > { %6622 = vmatmul.msk.f32.vlgmr.msrb.gmra.mxu0 %vm512_vm0, %v8707_v62  ;;  %v4569_v39 = vadd.f32 %v6832_v1, %v4568_v9  ;;  %v4535_v9 = vpop.f32.mrf.mxu2 }
0x13f3   : > { %v4571_v7 = vpop.f32.mrf.mxu3 }
0x13f4   : > { %6623 = vmatmul.msk.f32.gmra.mxu0 %vm512_vm0, %v8720_v47  ;;  %v4572_v61 = vadd.f32 %v6832_v1, %v4571_v7  ;;  %v4538_v12 = vpop.f32.mrf.mxu2 }
0x13f5   : > { %v4539_v29 = vadd.f32 %v6831_v28, %v4538_v12 }
0x13fb   : > { %v4574_v54 = vpop.f32.mrf.mxu3 }
0x13fc   : > { %6624 = vmatmul.msk.f32.gmra.mxu0 %vm512_vm0, %v8732_v43  ;;  %v4575_v45 = vadd.f32 %v6832_v1, %v4574_v54  ;;  %v4536_v54 = vadd.f32 %v6831_v28, %v4535_v9 }
0x1403   : > { %v4577_v22 = vpop.f32.mrf.mxu3 }
0x1404   : > { %6625 = vmatmul.msk.f32.gmra.mxu0 %vm512_vm0, %v8744_v17  ;;  %v4578_v46 = vadd.f32 %v6832_v1, %v4577_v22  ;;  %v9092_v22 = vpop.f32.mrf.mxu1 }
0x140b   : > { %v4580_v50 = vpop.f32.mrf.mxu3 }
0x140c   : > { %6626 = vmatmul.msk.f32.gmra.mxu0 %vm512_vm0, %v8755_v60  ;;  %v4581_v18 = vadd.f32 %v6832_v1, %v4580_v50  ;;  %v9096_v5 = vpop.f32.mrf.mxu1 }
0x1413   : > { %v4583_v35 = vpop.f32.mrf.mxu3 }
0x1414   : > { %6627 = vmatmul.msk.f32.gmra.mxu0 %vm512_vm0, %v8766_v11  ;;  %v4584_v13 = vadd.f32 %v6832_v1, %v4583_v35  ;;  %v9100_v35 = vpop.f32.mrf.mxu1 }
0x141b   : > { %v4586_v49 = vpop.f32.mrf.mxu3 }
0x141c   : > { %6628 = vmatmul.msk.f32.gmra.mxu0 %vm512_vm0, %v8777_v26  ;;  %v4587_v52 = vadd.f32 %v6832_v1, %v4586_v49 }
0x1423   : > { %v4589_v10 = vpop.f32.mrf.mxu3 }
0x1424   : > { %v4590_v42 = vadd.f32 %v6832_v1, %v4589_v10  ;;  %6629 = vmatmul.msk.f32.gmra.mxu0 %vm512_vm0, %v8789_v38  ;;  %v9104_v10 = vpop.f32.mrf.mxu1 }
0x1426   : > { %6630 = vmatpush.xpose.msk.msrb.mxu1 %vm901_vm11, %v4590_v42 }
0x1429   : > { %v9044_v31 = vpop.f32.mrf.mxu0 }
0x142a   : > { %6631 = vmatpush.xpose.msk.msrb.mxu1 %vm901_vm11, %v4587_v52 }
0x142c   : > { %6664 = vmatmul.msk.f32.vlgmr.msra.gmra.mxu0 %vm512_vm0, %v8707_v62  ;;  %v9108_v52 = vpop.f32.mrf.mxu1 }
0x142e   : > { %6632 = vmatpush.xpose.msk.msrb.mxu1 %vm901_vm11, %v4584_v13  ;;  %v6833_v13 = vld [vmem:[%s9771_s3 + $0x16] ss:$0 sm:$0xff] }
0x1431   : > { %v9050_v21 = vpop.f32.mrf.mxu0 }
0x1432   : > { %6633 = vmatpush.xpose.msk.msrb.mxu1 %vm901_vm11, %v4581_v18 }
0x1434   : > { %6665 = vmatmul.msk.f32.gmra.mxu0 %vm512_vm0, %v8720_v47 }
0x1436   : > { %6634 = vmatpush.xpose.msk.msrb.mxu1 %vm901_vm11, %v4578_v46 }
0x1439   : > { %v9056_v37 = vpop.f32.mrf.mxu0 }
0x143a   : > { %6635 = vmatpush.xpose.msk.msrb.mxu1 %vm901_vm11, %v4575_v45  ;;  %v9117_v45 = vpop.f32.mrf.mxu1 }
0x143c   : > { %6666 = vmatmul.msk.f32.gmra.mxu0 %vm512_vm0, %v8732_v43 }
0x143e   : > { %6636 = vmatpush.xpose.msk.msrb.mxu1 %vm901_vm11, %v4572_v61 }
0x1441   : > { %v9065_v33 = vpop.f32.mrf.mxu0 }
0x1442   : > { %6637 = vmatpush.xpose.msk.msrb.mxu1 %vm901_vm11, %v4569_v39  ;;  %v9121_v34 = vpop.f32.mrf.mxu1 }
0x1444   : > { %6667 = vmatmul.msk.f32.gmra.mxu0 %vm512_vm0, %v8744_v17 }
0x1445   : > { %6638 = vmatmul.msk.f32.vlgmr.msrb.gmra.mxu1 %vm901_vm11, %v4518_v30 }
0x1446   : > { %5042 = vmatpush.msra.mxu1 %v5024_v3 }
0x1448   : > { %5043 = vmatpush.msra.mxu1 %v5023_v6  ;;  %v4645_v6 = vld [vmem:[#allocation2 + $0x188] sm:$0xff] }
0x1449   : > { %v9071_v36 = vpop.f32.mrf.mxu0 }
0x144a   : > { %5044 = vmatpush.msra.mxu1 %v5022_v0  ;;  %v9125_v24 = vpop.f32.mrf.mxu1 }
0x144c   : > { %6668 = vmatmul.msk.f32.gmra.mxu0 %vm512_vm0, %v8755_v60  ;;  %5045 = vmatpush.msra.mxu1 %v5021_v57 }
0x144d   : > { %6639 = vmatmul.msk.f32.gmra.mxu1 %vm901_vm11, %v4521_v53 }
0x1451   : > { %v9076_v56 = vpop.f32.mrf.mxu0 }
0x1454   : > { %6669 = vmatmul.msk.f32.gmra.mxu0 %vm512_vm0, %v8766_v11 }
0x1455   : > { %6640 = vmatmul.msk.f32.gmra.mxu1 %vm901_vm11, %v4524_v41  ;;  %v4644_v41 = vld [vmem:[#allocation2 + $0x180] sm:$0xff] }
0x1459   : > { %v9081_v19 = vpop.f32.mrf.mxu0 }
0x145c   : > { %6670 = vmatmul.msk.f32.gmra.mxu0 %vm512_vm0, %v8777_v26 }
0x145d   : > { %6641 = vmatmul.msk.f32.gmra.mxu1 %vm901_vm11, %v4527_v55 }
0x1461   : > { %v9086_v51 = vpop.f32.mrf.mxu0 }
0x1464   : > { %6671 = vmatmul.msk.f32.gmra.mxu0 %vm512_vm0, %v8789_v38 }
0x1465   : > { %6642 = vmatmul.msk.f32.gmra.mxu1 %vm901_vm11, %v4530_v63 }
0x1469   : > { %v4619_v27 = vpop.f32.mrf.mxu0 }
0x146a   : > { %v4620_v53 = vadd.f32 %v6833_v13, %v4619_v27 }
0x146d   : > { %6643 = vmatmul.msk.f32.gmra.mxu1 %vm901_vm11, %v4533_v25 }
0x1471   : > { %v4622_v7 = vpop.f32.mrf.mxu0 }
0x1472   : > { %v4623_v30 = vadd.f32 %v6833_v13, %v4622_v7  ;;  %v4647_v7 = vld [vmem:[#allocation2 + $0x198] sm:$0xff] }
0x1475   : > { %6644 = vmatmul.msk.f32.gmra.mxu1 %vm901_vm11, %v4536_v54 }
0x1479   : > { %v4625_v48 = vpop.f32.mrf.mxu0 }
0x147a   : > { %v4626_v39 = vadd.f32 %v6833_v13, %v4625_v48 }
0x147d   : > { %6645 = vmatmul.msk.f32.gmra.mxu1 %vm901_vm11, %v4539_v29  ;;  %v4648_v29 = vld [vmem:[#allocation2 + $0x1a0] sm:$0xff] }
0x1481   : > { %v4628_v50 = vpop.f32.mrf.mxu0 }
0x1482   : > { %v4629_v28 = vadd.f32 %v6833_v13, %v4628_v50 }
0x1485   : > { %6673 = vmatmul.msk.f32.vlgmr.msra.gmra.mxu1 %vm512_vm0, %v8707_v62 }
0x1489   : > { %v4631_v49 = vpop.f32.mrf.mxu0 }
0x148a   : > { %v4632_v61 = vadd.f32 %v6833_v13, %v4631_v49 }
0x148d   : > { %6674 = vmatmul.msk.f32.gmra.mxu1 %vm512_vm0, %v8720_v47 }
0x1491   : > { %v4634_v1 = vpop.f32.mrf.mxu0 }
0x1492   : > { %v4635_v14 = vadd.f32 %v6833_v13, %v4634_v1 }
0x1495   : > { %6675 = vmatmul.msk.f32.gmra.mxu1 %vm512_vm0, %v8732_v43 }
0x1499   : > { %v4637_v42 = vpop.f32.mrf.mxu0 }
0x149a   : > { %v4638_v46 = vadd.f32 %v6833_v13, %v4637_v42  ;;  %v4649_v42 = vld [vmem:[#allocation2 + $0x1a8] sm:$0xff] }
0x149d   : > { %6676 = vmatmul.msk.f32.gmra.mxu1 %vm512_vm0, %v8744_v17 }
0x14a1   : > { %v4640_v18 = vpop.f32.mrf.mxu0 }
0x14a2   : > { %v4641_v23 = vadd.f32 %v6833_v13, %v4640_v18 }
0x14a4   : > { %4861 = vmatpush.msra.mxu2 %v4641_v23 }
0x14a5   : > { %6677 = vmatmul.msk.f32.gmra.mxu1 %vm512_vm0, %v8755_v60 }
0x14a6   : > { %4862 = vmatpush.msra.mxu2 %v4638_v46  ;;  %v4650_v46 = vld [vmem:[#allocation2 + $0x1b0] sm:$0xff] }
0x14a8   : > { %4863 = vmatpush.msra.mxu2 %v4635_v14 }
0x14aa   : > { %4864 = vmatpush.msra.mxu2 %v4632_v61 }
0x14ac   : > { %4865 = vmatpush.msra.mxu2 %v4629_v28 }
0x14ad   : > { %6678 = vmatmul.msk.f32.gmra.mxu1 %vm512_vm0, %v8766_v11 }
0x14ae   : > { %4866 = vmatpush.msra.mxu2 %v4626_v39  ;;  %v4651_v39 = vld [vmem:[#allocation2 + $0x1b8] sm:$0xff] }
0x14b0   : > { %4867 = vmatpush.msra.mxu2 %v4623_v30 }
0x14b2   : > { %4868 = vmatpush.msra.mxu2 %v4620_v53 }
0x14b5   : > { %6679 = vmatmul.msk.f32.gmra.mxu1 %vm512_vm0, %v8777_v26 }
0x14bd   : > { %6680 = vmatmul.msk.f32.gmra.mxu1 %vm512_vm0, %v8789_v38 }
0x14c2   : > { %v4717_v15 = vpop.f32.mrf.mxu1 }
0x14c3   : > { %v4718_v55 = vadd.f32 %v4717_v15, %v4644_v41 }
0x14c5   : > { %v4741_v3 = vsel %vm991_vm12, %v4718_v55, -inf }
0x14c6   : > { %4742 = vmax.xlane.f32.xlu0 %v4741_v3 }
0x14ca   : > { %v4720_v0 = vpop.f32.mrf.mxu1 }
0x14cb   : > { %v4721_v63 = vadd.f32 %v4720_v0, %v4645_v6 }
0x14cd   : > { %v4744_v57 = vsel %vm991_vm12, %v4721_v63, -inf }
0x14ce   : > { %4745 = vmax.xlane.f32.xlu1 %v4744_v57  ;;  %v6654_v57 = vld [vmem:[%s9772_s4 + $0x30] sm:$0xff] }
0x14cf   : > { %4935 = vmatpush.msra.mxu3 %v6654_v57 }
0x14d2   : > { %v4723_v27 = vpop.f32.mrf.mxu1 }
0x14d3   : > { %v4724_v25 = vadd.f32 %v4723_v27, %v4646_v59 }
0x14d5   : > { %v4747_v9 = vsel %vm991_vm12, %v4724_v25, -inf }
0x14d6   : > { %4748 = vmax.xlane.f32.xlu2 %v4747_v9 }
0x14da   : > { %v4726_v54 = vpop.f32.mrf.mxu1 }
0x14db   : > { %v9132_v12 = vadd.f32 %v4726_v54, %v4647_v7  ;;  %v6835_v7 = vld [vmem:[%s9771_s3 + $0x13] ss:$0 sm:$0xff] }
0x14dd   : > { %v4750_v48 = vsel %vm991_vm12, %v9132_v12, -inf }
0x14de   : > { %4751 = vmax.xlane.f32.xlu0 %v4750_v48 }
0x14e2   : > { %v4729_v50 = vpop.f32.mrf.mxu1 }
0x14e3   : > { %v9136_v49 = vadd.f32 %v4729_v50, %v4648_v29 }
0x14e5   : > { %v4753_v1 = vsel %vm991_vm12, %v9136_v49, -inf }
0x14e6   : > { %4754 = vmax.xlane.f32.xlu1 %v4753_v1 }
0x14ea   : > { %v4732_v13 = vpop.f32.mrf.mxu1 }
0x14eb   : > { %v9140_v18 = vadd.f32 %v4732_v13, %v4649_v42 }
0x14ed   : > { %v4756_v23 = vsel %vm991_vm12, %v9140_v18, -inf }
0x14ee   : > { %4757 = vmax.xlane.f32.xlu2 %v4756_v23 }
0x14f2   : > { %v4735_v14 = vpop.f32.mrf.mxu1 }
0x14f3   : > { %v9144_v61 = vadd.f32 %v4735_v14, %v4650_v46 }
0x14f5   : > { %v4759_v28 = vsel %vm991_vm12, %v9144_v61, -inf }
0x14f6   : > { %4760 = vmax.xlane.f32.xlu0 %v4759_v28 }
0x14fa   : > { %v4738_v30 = vpop.f32.mrf.mxu1 }
0x14fb   : > { %v9148_v53 = vadd.f32 %v4738_v30, %v4651_v39 }
0x14fd   : > { %v4762_v41 = vsel %vm991_vm12, %v9148_v53, -inf }
0x14fe   : > { %4763 = vmax.xlane.f32.xlu2 %v4762_v41 }
0x1502   : > { %v5047_v15 = vpop.f32.mrf.mxu1 }
0x150a   : > { %v5050_v3 = vpop.f32.mrf.mxu1 }
0x1512   : > { %v5053_v6 = vpop.f32.mrf.mxu1 }
0x151a   : > { %v5056_v0 = vpop.f32.mrf.mxu1 }
0x151b   : > { %v5057_v57 = vadd.f32 %v6835_v7, %v5056_v0  ;;  %v5048_v0 = vadd.f32 %v6835_v7, %v5047_v15 }
0x1522   : > { %v5059_v59 = vpop.f32.mrf.mxu1 }
0x1523   : > { %v5060_v39 = vadd.f32 %v6835_v7, %v5059_v59  ;;  %v5051_v59 = vadd.f32 %v6835_v7, %v5050_v3 }
0x152a   : > { %v5062_v27 = vpop.f32.mrf.mxu1 }
0x152b   : > { %v5063_v46 = vadd.f32 %v6835_v7, %v5062_v27  ;;  %v5054_v27 = vadd.f32 %v6835_v7, %v5053_v6 }
0x1532   : > { %v5065_v9 = vpop.f32.mrf.mxu1 }
0x1533   : > { %v5066_v42 = vadd.f32 %v6835_v7, %v5065_v9 }
0x1539   : > { %v4743_v54 = vpop.xlane.xlu0 %4742 }
0x153a   : > { %v4765_v48 = vsub.f32 %v4718_v55, %v4743_v54  ;;  %v5068_v29 = vpop.f32.mrf.mxu1 }
0x153b   : > { %v5069_v50 = vadd.f32 %v6835_v7, %v5068_v29 }
0x153c   : > { %v4773_v1 = vmul.f32 1.442695, %v4765_v48 }
0x153d   : > { %6690 = vmatpush.xpose.msk.msrb.mxu3 %vm901_vm11, %v5069_v50 }
0x153e   : > { %7116 = vpow2.f32 %v4773_v1 }
0x1541   : > { %6691 = vmatpush.xpose.msk.msrb.mxu3 %vm901_vm11, %v5066_v42  ;;  %v4746_v13 = vpop.xlane.xlu1 %4745 }
0x1542   : > { %v4766_v23 = vsub.f32 %v4721_v63, %v4746_v13 }
0x1544   : > { %v9160_v14 = vpop.eup %7116  ;;  %v4775_v28 = vmul.f32 1.442695, %v4766_v23 }
0x1545   : > { %6692 = vmatpush.xpose.msk.msrb.mxu3 %vm901_vm11, %v5063_v46  ;;  %v4789_v55 = vsel %vm991_vm12, %v9160_v14, 0.0 }
0x1546   : > { %7118 = vpow2.f32 %v4775_v28  ;;  %4790 = vadd.xlane.f32.xlu1 %v4789_v55 }
0x1549   : > { %6693 = vmatpush.xpose.msk.msrb.mxu3 %vm901_vm11, %v5060_v39  ;;  %v4749_v30 = vpop.xlane.xlu2 %4748 }
0x154a   : > { %v4767_v41 = vsub.f32 %v4724_v25, %v4749_v30 }
0x154c   : > { %v7119_v9 = vpop.eup %7118  ;;  %v4777_v54 = vmul.f32 1.442695, %v4767_v41 }
0x154d   : > { %6694 = vmatpush.xpose.msk.msrb.mxu3 %vm901_vm11, %v5057_v57  ;;  %v4792_v63 = vsel %vm991_vm12, %v7119_v9, 0.0 }
0x154e   : > { %7120 = vpow2.f32 %v4777_v54  ;;  %4793 = vadd.xlane.f32.xlu0 %v4792_v63 }
0x1551   : > { %6695 = vmatpush.xpose.msk.msrb.mxu3 %vm901_vm11, %v5054_v27  ;;  %v4752_v48 = vpop.xlane.xlu0 %4751 }
0x1552   : > { %v4768_v29 = vsub.f32 %v9132_v12, %v4752_v48 }
0x1554   : > { %v7121_v50 = vpop.eup %7120  ;;  %v4779_v1 = vmul.f32 1.442695, %v4768_v29 }
0x1555   : > { %6696 = vmatpush.xpose.msk.msrb.mxu3 %vm901_vm11, %v5051_v59  ;;  %v4795_v25 = vsel %vm991_vm12, %v7121_v50, 0.0 }
0x1556   : > { %7122 = vpow2.f32 %v4779_v1  ;;  %4796 = vadd.xlane.f32.xlu1 %v4795_v25 }
0x1559   : > { %6697 = vmatpush.xpose.msk.msrb.mxu3 %vm901_vm11, %v5048_v0  ;;  %v4755_v42 = vpop.xlane.xlu1 %4754 }
0x155a   : > { %v4769_v6 = vsub.f32 %v9136_v49, %v4755_v42 }
0x155c   : > { %v7123_v13 = vpop.eup %7122  ;;  %v4781_v23 = vmul.f32 1.442695, %v4769_v6 }
0x155d   : > { %v4798_v46 = vsel %vm991_vm12, %v7123_v13, 0.0 }
0x155e   : > { %7124 = vpow2.f32 %v4781_v23  ;;  %4799 = vadd.xlane.f32.xlu2 %v4798_v46 }
0x1561   : > { %v4758_v12 = vpop.xlane.xlu2 %4757 }
0x1562   : > { %v4770_v3 = vsub.f32 %v9140_v18, %v4758_v12 }
0x1564   : > { %v7125_v28 = vpop.eup %7124  ;;  %v4783_v55 = vmul.f32 1.442695, %v4770_v3 }
0x1565   : > { %v4801_v39 = vsel %vm991_vm12, %v7125_v28, 0.0 }
0x1566   : > { %7126 = vpow2.f32 %v4783_v55  ;;  %4802 = vadd.xlane.f32.xlu0 %v4801_v39  ;;  %v5074_v39 = vld [vmem:[#allocation4 + $0x2f0] sm:$0xff] }
0x1569   : > { %v4761_v15 = vpop.xlane.xlu0 %4760 }
0x156a   : > { %v4771_v7 = vsub.f32 %v9144_v61, %v4761_v15  ;;  %v5073_v15 = vld [vmem:[#allocation4 + $0x2e8] sm:$0xff] }
0x156c   : > { %v7127_v30 = vpop.eup %7126  ;;  %v4785_v49 = vmul.f32 1.442695, %v4771_v7 }
0x156d   : > { %v4804_v41 = vsel %vm991_vm12, %v7127_v30, 0.0 }
0x156e   : > { %7128 = vpow2.f32 %v4785_v49  ;;  %4805 = vadd.xlane.f32.xlu1 %v4804_v41 }
0x1571   : > { %v4764_v57 = vpop.xlane.xlu2 %4763 }
0x1572   : > { %v4772_v54 = vsub.f32 %v9148_v53, %v4764_v57 }
0x1574   : > { %v7129_v63 = vpop.eup %7128  ;;  %v4787_v18 = vmul.f32 1.442695, %v4772_v54 }
0x1575   : > { %v4807_v27 = vsel %vm991_vm12, %v7129_v63, 0.0 }
0x1576   : > { %7130 = vpow2.f32 %v4787_v18  ;;  %4808 = vadd.xlane.f32.xlu2 %v4807_v27 }
0x157c   : > { %v7131_v48 = vpop.eup %7130 }
0x157d   : > { %v4810_v29 = vsel %vm991_vm12, %v7131_v48, 0.0 }
0x157e   : > { %4811 = vadd.xlane.f32.xlu0 %v4810_v29 }
0x15b9   : > { %v4791_v61 = vpop.xlane.xlu1 %4790 }
0x15ba   : > { %7132 = vrcp.f32 %v4791_v61 }
0x15c0   : > { %v7133_v59 = vpop.eup %7132 }
0x15c1   : > { %v4821_v1 = vmul.f32 %v7133_v59, %v9160_v14  ;;  %v4794_v25 = vpop.xlane.xlu0 %4793  ;;  %v5075_v14 = vld [vmem:[#allocation4 + $0x2f8] sm:$0xff] }
0x15c2   : > { %7134 = vrcp.f32 %v4794_v25  ;;  %5093 = vmatpush.msrb.mxu2 %v5075_v14 }
0x15c3   : > { %6646 = vmatmul.msk.f32.vlgmr.msra.gmra.mxu2 %vm991_vm12, %v4821_v1 }
0x15c4   : > { %5094 = vmatpush.msrb.mxu2 %v5074_v39 }
0x15c6   : > { %5095 = vmatpush.msrb.mxu2 %v5073_v15 }
0x15c8   : > { %v7135_v53 = vpop.eup %7134 }
0x15c9   : > { %v4797_v0 = vpop.xlane.xlu1 %4796  ;;  %v4822_v42 = vmul.f32 %v7135_v53, %v7119_v9  ;;  %v5072_v9 = vld [vmem:[#allocation4 + $0x2e0] sm:$0xff] }
0x15ca   : > { %7136 = vrcp.f32 %v4797_v0  ;;  %5096 = vmatpush.msrb.mxu2 %v5072_v9 }
0x15cb   : > { %6647 = vmatmul.msk.f32.gmra.mxu2 %vm991_vm12, %v4822_v42 }
0x15d0   : > { %v7137_v6 = vpop.eup %7136 }
0x15d1   : > { %v4800_v23 = vpop.xlane.xlu2 %4799  ;;  %v4823_v46 = vmul.f32 %v7137_v6, %v7121_v50 }
0x15d2   : > { %7138 = vrcp.f32 %v4800_v23 }
0x15d3   : > { %6648 = vmatmul.msk.f32.gmra.mxu2 %vm991_vm12, %v4823_v46 }
0x15d8   : > { %v7139_v12 = vpop.eup %7138 }
0x15d9   : > { %v4803_v3 = vpop.xlane.xlu0 %4802  ;;  %v4824_v55 = vmul.f32 %v7139_v12, %v7123_v13 }
0x15da   : > { %7140 = vrcp.f32 %v4803_v3 }
0x15db   : > { %6649 = vmatmul.msk.f32.gmra.mxu2 %vm991_vm12, %v4824_v55 }
0x15e0   : > { %v7141_v7 = vpop.eup %7140 }
0x15e1   : > { %v4806_v49 = vpop.xlane.xlu1 %4805  ;;  %v4825_v41 = vmul.f32 %v7141_v7, %v7125_v28 }
0x15e2   : > { %7142 = vrcp.f32 %v4806_v49 }
0x15e3   : > { %6650 = vmatmul.msk.f32.gmra.mxu2 %vm991_vm12, %v4825_v41 }
0x15e8   : > { %v7143_v50 = vpop.eup %7142 }
0x15e9   : > { %v4809_v57 = vpop.xlane.xlu2 %4808  ;;  %v4826_v13 = vmul.f32 %v7143_v50, %v7127_v30 }
0x15ea   : > { %7144 = vrcp.f32 %v4809_v57  ;;  %v6836_v57 = vld [vmem:[%s9771_s3 + $0x17] ss:$0 sm:$0xff] }
0x15eb   : > { %6651 = vmatmul.msk.f32.gmra.mxu2 %vm991_vm12, %v4826_v13 }
0x15f0   : > { %v7145_v54 = vpop.eup %7144 }
0x15f1   : > { %v4812_v18 = vpop.xlane.xlu0 %4811  ;;  %v4827_v27 = vmul.f32 %v7145_v54, %v7129_v63  ;;  %v6834_v63 = vld [vmem:[%s9771_s3 + $0xf] ss:$0 sm:$0xff] }
0x15f2   : > { %7146 = vrcp.f32 %v4812_v18 }
0x15f3   : > { %6652 = vmatmul.msk.f32.gmra.mxu2 %vm991_vm12, %v4827_v27 }
0x15f8   : > { %v7147_v29 = vpop.eup %7146 }
0x15f9   : > { %v4828_v61 = vmul.f32 %v7147_v29, %v7131_v48 }
0x15fb   : > { %6653 = vmatmul.msk.f32.gmra.mxu2 %vm991_vm12, %v4828_v61 }
0x1603   : > { %6682 = vmatmul.msk.f32.vlgmr.msrb.gmra.mxu2 %vm512_vm0, %v8707_v62 }
0x160b   : > { %6683 = vmatmul.msk.f32.gmra.mxu2 %vm512_vm0, %v8720_v47 }
0x1613   : > { %6684 = vmatmul.msk.f32.gmra.mxu2 %vm512_vm0, %v8732_v43 }
0x161b   : > { %6685 = vmatmul.msk.f32.gmra.mxu2 %vm512_vm0, %v8744_v17 }
0x1623   : > { %6686 = vmatmul.msk.f32.gmra.mxu2 %vm512_vm0, %v8755_v60 }
0x162b   : > { %6687 = vmatmul.msk.f32.gmra.mxu2 %vm512_vm0, %v8766_v11 }
0x1633   : > { %6688 = vmatmul.msk.f32.gmra.mxu2 %vm512_vm0, %v8777_v26  ;;  %v4996_v26 = vpop.f32.mrf.mxu0 }
0x1634   : > { %v4997_v48 = vadd.f32 %v6834_v63, %v4996_v26 }
0x163b   : > { %6689 = vmatmul.msk.f32.gmra.mxu2 %vm512_vm0, %v8789_v38  ;;  %v4999_v28 = vpop.f32.mrf.mxu0 }
0x163c   : > { %v5000_v25 = vadd.f32 %v6834_v63, %v4999_v28 }
0x1643   : > { %v5002_v1 = vpop.f32.mrf.mxu0 }
0x1644   : > { %v5003_v42 = vadd.f32 %v6834_v63, %v5002_v1 }
0x1646   : > { %v4870_v62 = vpop.f32.mrf.mxu2 }
0x1647   : > { %6655 = vmatmul.msk.f32.vlgmr.msra.gmra.mxu3 %vm901_vm11, %v4870_v62 }
0x164b   : > { %v5005_v0 = vpop.f32.mrf.mxu0 }
0x164c   : > { %v5006_v46 = vadd.f32 %v6834_v63, %v5005_v0 }
0x164e   : > { %v4873_v47 = vpop.f32.mrf.mxu2 }
0x164f   : > { %6656 = vmatmul.msk.f32.gmra.mxu3 %vm901_vm11, %v4873_v47 }
0x1653   : > { %v5008_v23 = vpop.f32.mrf.mxu0 }
0x1654   : > { %v5009_v3 = vadd.f32 %v6834_v63, %v5008_v23  ;;  %v5125_v23 = vld [vmem:[#allocation2 + $0x1d0] sm:$0xff] }
0x1656   : > { %v4876_v43 = vpop.f32.mrf.mxu2 }
0x1657   : > { %6657 = vmatmul.msk.f32.gmra.mxu3 %vm901_vm11, %v4876_v43 }
0x165b   : > { %v5011_v55 = vpop.f32.mrf.mxu0 }
0x165c   : > { %v5012_v39 = vadd.f32 %v6834_v63, %v5011_v55  ;;  %v5126_v55 = vld [vmem:[#allocation2 + $0x1d8] sm:$0xff] }
0x165e   : > { %v4879_v17 = vpop.f32.mrf.mxu2 }
0x165f   : > { %6658 = vmatmul.msk.f32.gmra.mxu3 %vm901_vm11, %v4879_v17 }
0x1663   : > { %v5014_v9 = vpop.f32.mrf.mxu0 }
0x1664   : > { %v5015_v7 = vadd.f32 %v6834_v63, %v5014_v9  ;;  %v5127_v9 = vld [vmem:[#allocation2 + $0x1e0] sm:$0xff] }
0x1666   : > { %v4882_v60 = vpop.f32.mrf.mxu2 }
0x1667   : > { %6659 = vmatmul.msk.f32.gmra.mxu3 %vm901_vm11, %v4882_v60 }
0x166b   : > { %v5017_v41 = vpop.f32.mrf.mxu0 }
0x166c   : > { %v5018_v50 = vadd.f32 %v6834_v63, %v5017_v41 }
0x166e   : > { %v4885_v11 = vpop.f32.mrf.mxu2 }
0x166f   : > { %6660 = vmatmul.msk.f32.gmra.mxu3 %vm901_vm11, %v4885_v11 }
0x1676   : > { %v4888_v38 = vpop.f32.mrf.mxu2 }
0x1677   : > { %6661 = vmatmul.msk.f32.gmra.mxu3 %vm901_vm11, %v4888_v38 }
0x167e   : > { %v4891_v30 = vpop.f32.mrf.mxu2 }
0x167f   : > { %6662 = vmatmul.msk.f32.gmra.mxu3 %vm901_vm11, %v4891_v30 }
0x1686   : > { %v5098_v59 = vpop.f32.mrf.mxu2 }
0x1687   : > { %6698 = vmatmul.msk.f32.vlgmr.msrb.gmra.mxu3 %vm901_vm11, %v4997_v48  ;;  %v5099_v17 = vadd.f32 %v6836_v57, %v5098_v59  ;;  %v5123_v48 = vld [vmem:[#allocation2 + $0x1c0] sm:$0xff] }
0x168e   : > { %v5101_v53 = vpop.f32.mrf.mxu2 }
0x168f   : > { %6699 = vmatmul.msk.f32.gmra.mxu3 %vm901_vm11, %v5000_v25  ;;  %v5102_v43 = vadd.f32 %v6836_v57, %v5101_v53  ;;  %v5124_v53 = vld [vmem:[#allocation2 + $0x1c8] sm:$0xff] }
0x1696   : > { %v5104_v6 = vpop.f32.mrf.mxu2 }
0x1697   : > { %6700 = vmatmul.msk.f32.gmra.mxu3 %vm901_vm11, %v5003_v42  ;;  %v5105_v62 = vadd.f32 %v6836_v57, %v5104_v6 }
0x169e   : > { %v5107_v12 = vpop.f32.mrf.mxu2 }
0x169f   : > { %6701 = vmatmul.msk.f32.gmra.mxu3 %vm901_vm11, %v5006_v46  ;;  %v5108_v61 = vadd.f32 %v6836_v57, %v5107_v12 }
0x16a6   : > { %v5110_v14 = vpop.f32.mrf.mxu2 }
0x16a7   : > { %6702 = vmatmul.msk.f32.gmra.mxu3 %vm901_vm11, %v5009_v3  ;;  %v5111_v29 = vadd.f32 %v6836_v57, %v5110_v14 }
0x16ae   : > { %v5113_v15 = vpop.f32.mrf.mxu2 }
0x16af   : > { %6703 = vmatmul.msk.f32.gmra.mxu3 %vm901_vm11, %v5012_v39  ;;  %v5114_v27 = vadd.f32 %v6836_v57, %v5113_v15 }
0x16b6   : > { %v5116_v49 = vpop.f32.mrf.mxu2 }
0x16b7   : > { %6704 = vmatmul.msk.f32.gmra.mxu3 %vm901_vm11, %v5015_v7  ;;  %v5117_v18 = vadd.f32 %v6836_v57, %v5116_v49 }
0x16be   : > { %v5119_v13 = vpop.f32.mrf.mxu2 }
0x16bf   : > { %v5120_v54 = vadd.f32 %v6836_v57, %v5119_v13  ;;  %6705 = vmatmul.msk.f32.gmra.mxu3 %vm901_vm11, %v5018_v50  ;;  %v5128_v50 = vld [vmem:[#allocation2 + $0x1e8] sm:$0xff] }
0x16c1   : > { %5340 = vmatpush.msrb.mxu0 %v5120_v54 }
0x16c3   : > { %5341 = vmatpush.msrb.mxu0 %v5117_v18  ;;  %v5129_v18 = vld [vmem:[#allocation2 + $0x1f0] sm:$0xff] }
0x16c5   : > { %5342 = vmatpush.msrb.mxu0 %v5114_v27 }
0x16c7   : > { %5343 = vmatpush.msrb.mxu0 %v5111_v29 }
0x16c9   : > { %5344 = vmatpush.msrb.mxu0 %v5108_v61 }
0x16ca   : > { %v9229_v47 = vpop.f32.mrf.mxu3 }
0x16cb   : > { %5345 = vmatpush.msrb.mxu0 %v5105_v62  ;;  %v5130_v62 = vld [vmem:[#allocation2 + $0x1f8] sm:$0xff] }
0x16cd   : > { %5346 = vmatpush.msrb.mxu0 %v5102_v43 }
0x16cf   : > { %5347 = vmatpush.msrb.mxu0 %v5099_v17 }
0x16d2   : > { %v9231_v60 = vpop.f32.mrf.mxu3 }
0x16da   : > { %v9233_v11 = vpop.f32.mrf.mxu3 }
0x16e2   : > { %v9235_v26 = vpop.f32.mrf.mxu3 }
0x16ea   : > { %v9237_v38 = vpop.f32.mrf.mxu3 }
0x16f2   : > { %v9239_v28 = vpop.f32.mrf.mxu3 }
0x16fa   : > { %v9241_v30 = vpop.f32.mrf.mxu3 }
0x1702   : > { %v9243_v63 = vpop.f32.mrf.mxu3 }
0x170a   : > { %v5196_v1 = vpop.f32.mrf.mxu3 }
0x170b   : > { %v5197_v25 = vadd.f32 %v5196_v1, %v5123_v48 }
0x170d   : > { %v5220_v59 = vsel %vm991_vm12, %v5197_v25, -inf }
0x170e   : > { %5221 = vmax.xlane.f32.xlu1 %v5220_v59 }
0x1712   : > { %v5199_v0 = vpop.f32.mrf.mxu3 }
0x1713   : > { %v5200_v42 = vadd.f32 %v5199_v0, %v5124_v53 }
0x1715   : > { %v5223_v6 = vsel %vm991_vm12, %v5200_v42, -inf }
0x1716   : > { %5224 = vmax.xlane.f32.xlu2 %v5223_v6 }
0x171a   : > { %v5202_v46 = vpop.f32.mrf.mxu3 }
0x171b   : > { %v5203_v12 = vadd.f32 %v5202_v46, %v5125_v23 }
0x171d   : > { %v5226_v3 = vsel %vm991_vm12, %v5203_v12, -inf }
0x171e   : > { %5227 = vmax.xlane.f32.xlu0 %v5226_v3 }
0x1722   : > { %v5205_v14 = vpop.f32.mrf.mxu3 }
0x1723   : > { %v5206_v39 = vadd.f32 %v5205_v14, %v5126_v55 }
0x1725   : > { %v5229_v15 = vsel %vm991_vm12, %v5206_v39, -inf }
0x1726   : > { %5230 = vmax.xlane.f32.xlu1 %v5229_v15 }
0x172a   : > { %v5208_v7 = vpop.f32.mrf.mxu3 }
0x172b   : > { %v5209_v49 = vadd.f32 %v5208_v7, %v5127_v9 }
0x172d   : > { %v5232_v41 = vsel %vm991_vm12, %v5209_v49, -inf }
0x172e   : > { %5233 = vmax.xlane.f32.xlu2 %v5232_v41 }
0x1732   : > { %v5211_v57 = vpop.f32.mrf.mxu3 }
0x1733   : > { %v5212_v13 = vadd.f32 %v5211_v57, %v5128_v50 }
0x1735   : > { %v5235_v54 = vsel %vm991_vm12, %v5212_v13, -inf }
0x1736   : > { %5236 = vmax.xlane.f32.xlu0 %v5235_v54 }
0x173a   : > { %v5214_v27 = vpop.f32.mrf.mxu3 }
0x173b   : > { %v5215_v29 = vadd.f32 %v5214_v27, %v5129_v18 }
0x173d   : > { %v5238_v61 = vsel %vm991_vm12, %v5215_v29, -inf }
0x173e   : > { %5239 = vmax.xlane.f32.xlu1 %v5238_v61 }
0x1742   : > { %v5217_v43 = vpop.f32.mrf.mxu3 }
0x1743   : > { %v5218_v17 = vadd.f32 %v5217_v43, %v5130_v62 }
0x1745   : > { %v5241_v48 = vsel %vm991_vm12, %v5218_v17, -inf }
0x1746   : > { %5242 = vmax.xlane.f32.xlu0 %v5241_v48 }
0x1781   : > { %v5222_v1 = vpop.xlane.xlu1 %5221 }
0x1782   : > { %v5244_v59 = vsub.f32 %v5197_v25, %v5222_v1 }
0x1784   : > { %v5252_v53 = vmul.f32 1.442695, %v5244_v59 }
0x1786   : > { %7148 = vpow2.f32 %v5252_v53 }
0x1789   : > { %v5225_v0 = vpop.xlane.xlu2 %5224 }
0x178a   : > { %v5245_v6 = vsub.f32 %v5200_v42, %v5225_v0 }
0x178c   : > { %v7149_v23 = vpop.eup %7148  ;;  %v5254_v46 = vmul.f32 1.442695, %v5245_v6 }
0x178d   : > { %v5268_v3 = vsel %vm991_vm12, %v7149_v23, 0.0 }
0x178e   : > { %7150 = vpow2.f32 %v5254_v46  ;;  %5269 = vadd.xlane.f32.xlu2 %v5268_v3 }
0x1791   : > { %v5228_v55 = vpop.xlane.xlu0 %5227 }
0x1792   : > { %v5246_v14 = vsub.f32 %v5203_v12, %v5228_v55 }
0x1794   : > { %v7151_v15 = vpop.eup %7150  ;;  %v5256_v9 = vmul.f32 1.442695, %v5246_v14 }
0x1795   : > { %v5271_v7 = vsel %vm991_vm12, %v7151_v15, 0.0 }
0x1796   : > { %7152 = vpow2.f32 %v5256_v9  ;;  %5272 = vadd.xlane.f32.xlu1 %v5271_v7 }
0x1799   : > { %v5231_v41 = vpop.xlane.xlu1 %5230 }
0x179a   : > { %v5247_v25 = vsub.f32 %v5206_v39, %v5231_v41 }
0x179c   : > { %v7153_v50 = vpop.eup %7152  ;;  %v5258_v57 = vmul.f32 1.442695, %v5247_v25 }
0x179d   : > { %v5274_v42 = vsel %vm991_vm12, %v7153_v50, 0.0 }
0x179e   : > { %7154 = vpow2.f32 %v5258_v57  ;;  %5275 = vadd.xlane.f32.xlu2 %v5274_v42 }
0x17a1   : > { %v5234_v54 = vpop.xlane.xlu2 %5233 }
0x17a2   : > { %v5248_v18 = vsub.f32 %v5209_v49, %v5234_v54 }
0x17a4   : > { %v7155_v27 = vpop.eup %7154  ;;  %v5260_v61 = vmul.f32 1.442695, %v5248_v18 }
0x17a5   : > { %v5277_v12 = vsel %vm991_vm12, %v7155_v27, 0.0 }
0x17a6   : > { %7156 = vpow2.f32 %v5260_v61  ;;  %5278 = vadd.xlane.f32.xlu0 %v5277_v12 }
0x17a9   : > { %v5237_v62 = vpop.xlane.xlu0 %5236 }
0x17aa   : > { %v5249_v43 = vsub.f32 %v5212_v13, %v5237_v62 }
0x17ac   : > { %v7157_v48 = vpop.eup %7156  ;;  %v5262_v1 = vmul.f32 1.442695, %v5249_v43 }
0x17ad   : > { %v5280_v39 = vsel %vm991_vm12, %v7157_v48, 0.0 }
0x17ae   : > { %7158 = vpow2.f32 %v5262_v1  ;;  %5281 = vadd.xlane.f32.xlu1 %v5280_v39 }
0x17b1   : > { %v5240_v59 = vpop.xlane.xlu1 %5239 }
0x17b2   : > { %v5250_v53 = vsub.f32 %v5215_v29, %v5240_v59 }
0x17b4   : > { %v7159_v0 = vpop.eup %7158  ;;  %v5264_v6 = vmul.f32 1.442695, %v5250_v53 }
0x17b5   : > { %v5283_v49 = vsel %vm991_vm12, %v7159_v0, 0.0 }
0x17b6   : > { %7160 = vpow2.f32 %v5264_v6  ;;  %5284 = vadd.xlane.f32.xlu2 %v5283_v49 }
0x17b9   : > { %v5243_v46 = vpop.xlane.xlu0 %5242 }
0x17ba   : > { %v5251_v3 = vsub.f32 %v5218_v17, %v5243_v46 }
0x17bc   : > { %v7161_v55 = vpop.eup %7160  ;;  %v5266_v14 = vmul.f32 1.442695, %v5251_v3 }
0x17bd   : > { %v5286_v13 = vsel %vm991_vm12, %v7161_v55, 0.0 }
0x17be   : > { %7162 = vpow2.f32 %v5266_v14  ;;  %5287 = vadd.xlane.f32.xlu0 %v5286_v13 }
0x17c4   : > { %v7163_v9 = vpop.eup %7162 }
0x17c5   : > { %v5289_v7 = vsel %vm991_vm12, %v7163_v9, 0.0 }
0x17c6   : > { %5290 = vadd.xlane.f32.xlu1 %v5289_v7 }
0x1801   : > { %v5270_v41 = vpop.xlane.xlu2 %5269 }
0x1802   : > { %7164 = vrcp.f32 %v5270_v41 }
0x1808   : > { %v7165_v29 = vpop.eup %7164 }
0x1809   : > { %v5300_v25 = vmul.f32 %v7165_v29, %v7149_v23  ;;  %v5273_v57 = vpop.xlane.xlu1 %5272  ;;  %v6714_v23 = vld [vmem:[%s9772_s4 + $0x38] sm:$0xff] }
0x180a   : > { %7166 = vrcp.f32 %v5273_v57  ;;  %5414 = vmatpush.msrb.mxu1 %v6714_v23 }
0x180b   : > { %6706 = vmatmul.msk.f32.vlgmr.msrb.gmra.mxu0 %vm991_vm12, %v5300_v25  ;;  %v4467_v25 = vadd.f32 %v9092_v22, %v9044_v31 }
0x180d   : > { %v4961_v57 = vadd.f32 %v9229_v47, %v4467_v25 }
0x1810   : > { %v7167_v42 = vpop.eup %7166 }
0x1811   : > { %v5276_v17 = vpop.xlane.xlu2 %5275  ;;  %v5301_v54 = vmul.f32 %v7167_v42, %v7151_v15 }
0x1812   : > { %7168 = vrcp.f32 %v5276_v17 }
0x1813   : > { %6707 = vmatmul.msk.f32.gmra.mxu0 %vm991_vm12, %v5301_v54  ;;  %v6837_v54 = vld [vmem:[%s9773_s5 + $0x1] ss:$0 sm:$0xff] }
0x1818   : > { %v7169_v18 = vpop.eup %7168 }
0x1819   : > { %v5279_v61 = vpop.xlane.xlu0 %5278  ;;  %v5302_v12 = vmul.f32 %v7169_v18, %v7153_v50 }
0x181a   : > { %7170 = vrcp.f32 %v5279_v61  ;;  %v4470_v61 = vadd.f32 %v9096_v5, %v9050_v21 }
0x181b   : > { %6708 = vmatmul.msk.f32.gmra.mxu0 %vm991_vm12, %v5302_v12 }
0x1820   : > { %v7171_v62 = vpop.eup %7170 }
0x1821   : > { %v5282_v43 = vpop.xlane.xlu1 %5281  ;;  %v5303_v1 = vmul.f32 %v7171_v62, %v7155_v27  ;;  %v4962_v62 = vadd.f32 %v9231_v60, %v4470_v61 }
0x1822   : > { %7172 = vrcp.f32 %v5282_v43 }
0x1823   : > { %6709 = vmatmul.msk.f32.gmra.mxu0 %vm991_vm12, %v5303_v1  ;;  %v4473_v1 = vadd.f32 %v9100_v35, %v9056_v37 }
0x1828   : > { %v7173_v15 = vpop.eup %7172 }
0x1829   : > { %v5285_v39 = vpop.xlane.xlu2 %5284  ;;  %v5304_v59 = vmul.f32 %v7173_v15, %v7157_v48 }
0x182a   : > { %7174 = vrcp.f32 %v5285_v39  ;;  %v4476_v39 = vadd.f32 %v9104_v10, %v9065_v33 }
0x182b   : > { %6710 = vmatmul.msk.f32.gmra.mxu0 %vm991_vm12, %v5304_v59 }
0x1830   : > { %v7175_v50 = vpop.eup %7174 }
0x1831   : > { %v5288_v53 = vpop.xlane.xlu0 %5287  ;;  %v5305_v6 = vmul.f32 %v7175_v50, %v7159_v0 }
0x1832   : > { %7176 = vrcp.f32 %v5288_v53  ;;  %v4479_v53 = vadd.f32 %v9108_v52, %v9071_v36 }
0x1833   : > { %6711 = vmatmul.msk.f32.gmra.mxu0 %vm991_vm12, %v5305_v6 }
0x1838   : > { %v7177_v27 = vpop.eup %7176 }
0x1839   : > { %v5291_v49 = vpop.xlane.xlu1 %5290  ;;  %v5306_v46 = vmul.f32 %v7177_v27, %v7161_v55 }
0x183a   : > { %7178 = vrcp.f32 %v5291_v49  ;;  %v4482_v49 = vadd.f32 %v9117_v45, %v9076_v56 }
0x183b   : > { %6712 = vmatmul.msk.f32.gmra.mxu0 %vm991_vm12, %v5306_v46 }
0x1840   : > { %v7179_v3 = vpop.eup %7178 }
0x1841   : > { %v5307_v14 = vmul.f32 %v7179_v3, %v7163_v9 }
0x1843   : > { %6713 = vmatmul.msk.f32.gmra.mxu0 %vm991_vm12, %v5307_v14  ;;  %v4485_v14 = vadd.f32 %v9121_v34, %v9081_v19 }
0x1888   : > { %v5349_v48 = vpop.f32.mrf.mxu0 }
0x1889   : > { %6715 = vmatmul.msk.f32.vlgmr.msrb.gmra.mxu1 %vm901_vm11, %v5349_v48 }
0x1890   : > { %v5352_v13 = vpop.f32.mrf.mxu0 }
0x1891   : > { %6716 = vmatmul.msk.f32.gmra.mxu1 %vm901_vm11, %v5352_v13 }
0x1898   : > { %v5355_v0 = vpop.f32.mrf.mxu0 }
0x1899   : > { %6717 = vmatmul.msk.f32.gmra.mxu1 %vm901_vm11, %v5355_v0  ;;  %v4488_v0 = vadd.f32 %v9125_v24, %v9086_v51 }
0x18a0   : > { %v5358_v7 = vpop.f32.mrf.mxu0 }
0x18a1   : > { %6718 = vmatmul.msk.f32.gmra.mxu1 %vm901_vm11, %v5358_v7 }
0x18a8   : > { %v5361_v55 = vpop.f32.mrf.mxu0 }
0x18a9   : > { %6719 = vmatmul.msk.f32.gmra.mxu1 %vm901_vm11, %v5361_v55 }
0x18b0   : > { %v5364_v41 = vpop.f32.mrf.mxu0 }
0x18b1   : > { %6720 = vmatmul.msk.f32.gmra.mxu1 %vm901_vm11, %v5364_v41 }
0x18b8   : > { %v5367_v9 = vpop.f32.mrf.mxu0 }
0x18b9   : > { %6721 = vmatmul.msk.f32.gmra.mxu1 %vm901_vm11, %v5367_v9 }
0x18c0   : > { %v5370_v29 = vpop.f32.mrf.mxu0 }
0x18c1   : > { %6722 = vmatmul.msk.f32.gmra.mxu1 %vm901_vm11, %v5370_v29 }
0x1906   : > { %v5416_v42 = vpop.f32.mrf.mxu1 }
0x1907   : > { %v5440_v17 = vadd.f32 %v5416_v42, %v4961_v57 }
0x1909   : > { %v5448_v18 = vadd.f32 %v5440_v17, %v8596_v40  ;;  %v4963_v40 = vadd.f32 %v9233_v11, %v4473_v1 }
0x190b   : > { %v9289_v12 = vadd.f32 %v6837_v54, %v5448_v18 }
0x190d   : > { %v5473_v31 = vsel %vm512_vm0, %v9289_v12, 0.0 }
0x190e   : > { %5474 = vadd.xlane.f32.xlu2 %v5473_v31  ;;  %v5419_v22 = vpop.f32.mrf.mxu1 }
0x190f   : > { %v5441_v47 = vadd.f32 %v5419_v22, %v4962_v62 }
0x1911   : > { %v5449_v43 = vadd.f32 %v5441_v47, %v8601_v32  ;;  %v4964_v32 = vadd.f32 %v9235_v26, %v4476_v39 }
0x1913   : > { %v9297_v23 = vadd.f32 %v6837_v54, %v5449_v43 }
0x1915   : > { %v5476_v21 = vsel %vm512_vm0, %v9297_v23, 0.0 }
0x1916   : > { %5477 = vadd.xlane.f32.xlu0 %v5476_v21  ;;  %v5422_v5 = vpop.f32.mrf.mxu1 }
0x1917   : > { %v5442_v60 = vadd.f32 %v5422_v5, %v4963_v40 }
0x1919   : > { %v5450_v15 = vadd.f32 %v5442_v60, %v8606_v58  ;;  %v4965_v58 = vadd.f32 %v9237_v38, %v4479_v53 }
0x191b   : > { %v9305_v59 = vadd.f32 %v6837_v54, %v5450_v15 }
0x191d   : > { %v5479_v37 = vsel %vm512_vm0, %v9305_v59, 0.0 }
0x191e   : > { %5480 = vadd.xlane.f32.xlu1 %v5479_v37  ;;  %v5425_v35 = vpop.f32.mrf.mxu1 }
0x191f   : > { %v5443_v11 = vadd.f32 %v5425_v35, %v4964_v32 }
0x1921   : > { %v5451_v50 = vadd.f32 %v5443_v11, %v8611_v16  ;;  %v4966_v16 = vadd.f32 %v9239_v28, %v4482_v49 }
0x1923   : > { %v9313_v6 = vadd.f32 %v6837_v54, %v5451_v50 }
0x1925   : > { %v5482_v33 = vsel %vm512_vm0, %v9313_v6, 0.0 }
0x1926   : > { %5483 = vadd.xlane.f32.xlu2 %v5482_v33  ;;  %v5428_v10 = vpop.f32.mrf.mxu1 }
0x1927   : > { %v5444_v26 = vadd.f32 %v5428_v10, %v4965_v58 }
0x1929   : > { %v5452_v27 = vadd.f32 %v5444_v26, %v8616_v8  ;;  %v4967_v8 = vadd.f32 %v9241_v30, %v4485_v14 }
0x192b   : > { %v9321_v46 = vadd.f32 %v6837_v54, %v5452_v27 }
0x192d   : > { %v5485_v36 = vsel %vm512_vm0, %v9321_v46, 0.0 }
0x192e   : > { %5486 = vadd.xlane.f32.xlu0 %v5485_v36  ;;  %v5431_v52 = vpop.f32.mrf.mxu1  ;;  %v6729_v36 = vld [vmem:[%s9778_s10 + $0x38] sm:$0xff] }
0x192f   : > { %v5445_v38 = vadd.f32 %v5431_v52, %v4966_v16  ;;  %5717 = vmatpush.msra.mxu2 %v6729_v36  ;;  %v6728_v52 = vld [vmem:[%s9778_s10 + $0x30] sm:$0xff] }
0x1931   : > { %v5453_v3 = vadd.f32 %v5445_v38, %v8621_v44  ;;  %v4968_v44 = vadd.f32 %v9243_v63, %v4488_v0  ;;  %5718 = vmatpush.msra.mxu2 %v6728_v52 }
0x1933   : > { %v9329_v48 = vadd.f32 %v6837_v54, %v5453_v3 }
0x1935   : > { %v5488_v56 = vsel %vm512_vm0, %v9329_v48, 0.0 }
0x1936   : > { %5489 = vadd.xlane.f32.xlu1 %v5488_v56  ;;  %v5434_v45 = vpop.f32.mrf.mxu1  ;;  %v6727_v56 = vld [vmem:[%s9778_s10 + $0x28] sm:$0xff] }
0x1937   : > { %v5446_v28 = vadd.f32 %v5434_v45, %v4967_v8  ;;  %5719 = vmatpush.msra.mxu2 %v6727_v56 }
0x1939   : > { %v5454_v13 = vadd.f32 %v5446_v28, %v8626_v4 }
0x193b   : > { %v9337_v7 = vadd.f32 %v6837_v54, %v5454_v13 }
0x193d   : > { %v5491_v19 = vsel %vm512_vm0, %v9337_v7, 0.0 }
0x193e   : > { %5492 = vadd.xlane.f32.xlu0 %v5491_v19  ;;  %v5437_v34 = vpop.f32.mrf.mxu1 }
0x193f   : > { %v5447_v30 = vadd.f32 %v5437_v34, %v4968_v44  ;;  %v6726_v44 = vld [vmem:[%s9778_s10 + $0x20] sm:$0xff] }
0x1940   : > { %5720 = vmatpush.msra.mxu2 %v6726_v44 }
0x1941   : > { %v5455_v55 = vadd.f32 %v5447_v30, %v8638_v2 }
0x1943   : > { %v9343_v41 = vadd.f32 %v6837_v54, %v5455_v55 }
0x1945   : > { %v5494_v17 = vsel %vm512_vm0, %v9343_v41, 0.0 }
0x1981   : > { %v5475_v9 = vpop.xlane.xlu2 %5474 }
0x1982   : > { %v5497_v4 = vmul.f32 %v5475_v9, %v7443_v20 }
0x1984   : > { %v9347_v29 = vsub.f32 %v9289_v12, %v5497_v4 }
0x1986   : > { %v5513_v51 = vmul.f32 %v9347_v29, %v9347_v29 }
0x1988   : > { %v5521_v24 = vsel %vm512_vm0, %v5513_v51, 0.0 }
0x1989   : > { %v5478_v63 = vpop.xlane.xlu0 %5477  ;;  %5522 = vadd.xlane.f32.xlu2 %v5521_v24 }
0x198a   : > { %v5498_v25 = vmul.f32 %v5478_v63, %v7443_v20 }
0x198c   : > { %v9354_v57 = vsub.f32 %v9297_v23, %v5498_v25 }
0x198e   : > { %v5514_v2 = vmul.f32 %v9354_v57, %v9354_v57 }
0x1990   : > { %v5524_v42 = vsel %vm512_vm0, %v5514_v2, 0.0 }
0x1991   : > { %5525 = vadd.xlane.f32.xlu1 %v5524_v42  ;;  %v5481_v54 = vpop.xlane.xlu1 %5480  ;;  %5495 = vadd.xlane.f32.xlu2 %v5494_v17  ;;  %v9421_v42 = vld [vmem:[%s9776_s8 + $0x1] ss:$0 sm:$0xff] }
0x1992   : > { %v5499_v18 = vmul.f32 %v5481_v54, %v7443_v20 }
0x1994   : > { %v9363_v61 = vsub.f32 %v9305_v59, %v5499_v18  ;;  %v9426_v18 = vld [vmem:[%s9777_s9 + $0x1] ss:$0 sm:$0xff] }
0x1996   : > { %v5515_v62 = vmul.f32 %v9363_v61, %v9363_v61 }
0x1998   : > { %v5527_v31 = vsel %vm512_vm0, %v5515_v62, 0.0 }
0x1999   : > { %v5484_v22 = vpop.xlane.xlu2 %5483  ;;  %5528 = vadd.xlane.f32.xlu0 %v5527_v31 }
0x199a   : > { %v5500_v47 = vmul.f32 %v5484_v22, %v7443_v20 }
0x199c   : > { %v9370_v43 = vsub.f32 %v9313_v6, %v5500_v47 }
0x199e   : > { %v5516_v1 = vmul.f32 %v9370_v43, %v9370_v43 }
0x19a0   : > { %v5530_v40 = vsel %vm512_vm0, %v5516_v1, 0.0 }
0x19a1   : > { %v5487_v21 = vpop.xlane.xlu0 %5486  ;;  %5531 = vadd.xlane.f32.xlu1 %v5530_v40 }
0x19a2   : > { %v5501_v5 = vmul.f32 %v5487_v21, %v7443_v20 }
0x19a4   : > { %v9377_v60 = vsub.f32 %v9321_v46, %v5501_v5 }
0x19a6   : > { %v5517_v15 = vmul.f32 %v9377_v60, %v9377_v60 }
0x19a8   : > { %v5533_v39 = vsel %vm512_vm0, %v5517_v15, 0.0 }
0x19a9   : > { %v5490_v32 = vpop.xlane.xlu1 %5489  ;;  %5534 = vadd.xlane.f32.xlu2 %v5533_v39 }
0x19aa   : > { %v5502_v37 = vmul.f32 %v5490_v32, %v7443_v20 }
0x19ac   : > { %v9384_v35 = vsub.f32 %v9329_v48, %v5502_v37 }
0x19ae   : > { %v5518_v11 = vmul.f32 %v9384_v35, %v9384_v35 }
0x19b0   : > { %v5536_v50 = vsel %vm512_vm0, %v5518_v11, 0.0 }
0x19b1   : > { %v5493_v53 = vpop.xlane.xlu0 %5492  ;;  %5537 = vadd.xlane.f32.xlu0 %v5536_v50 }
0x19b2   : > { %v5503_v58 = vmul.f32 %v5493_v53, %v7443_v20 }
0x19b4   : > { %v9391_v33 = vsub.f32 %v9337_v7, %v5503_v58 }
0x19b6   : > { %v5519_v10 = vmul.f32 %v9391_v33, %v9391_v33 }
0x19b8   : > { %v5539_v26 = vsel %vm512_vm0, %v5519_v10, 0.0 }
0x19b9   : > { %5540 = vadd.xlane.f32.xlu1 %v5539_v26 }
0x19fc   : > { %v5523_v27 = vpop.xlane.xlu2 %5522 }
0x19fd   : > { %v5545_v49 = vmul.f32 %v5523_v27, %v7443_v20 }
0x19ff   : > { %v5553_v16 = vadd.f32 1e-05, %v5545_v49 }
0x1a01   : > { %7180 = vrsqrt.f32 %v5553_v16  ;;  %vm5567_vm12 = vweird.f32 %v5553_v16 }
0x1a04   : > { %v5526_v38 = vpop.xlane.xlu1 %5525  ;;  %v5496_v3 = vpop.xlane.xlu2 %5495 }
0x1a05   : > { %v5546_v14 = vmul.f32 %v5526_v38, %v7443_v20  ;;  %v5504_v8 = vmul.f32 %v5496_v3, %v7443_v20 }
0x1a07   : > { %v7181_v45 = vpop.eup %7180  ;;  %v5554_v28 = vadd.f32 1e-05, %v5546_v14  ;;  %v9409_v13 = vsub.f32 %v9343_v41, %v5504_v8 }
0x1a08   : > { %v5562_v0 = vmul.f32 %v7181_v45, %v5553_v16  ;;  %vm5568_vm11 = vweird.f32 %v7181_v45 }
0x1a09   : > { %7182 = vrsqrt.f32 %v5554_v28  ;;  %v5520_v19 = vmul.f32 %v9409_v13, %v9409_v13  ;;  %vm5569_vm8 = vmor %vm5567_vm12, %vm5568_vm11  ;;  %vm5577_vm10 = vweird.f32 %v5554_v28 }
0x1a0a   : > { %v5563_v34 = vmul.f32 %v7181_v45, %v5562_v0 }
0x1a0b   : > { %v5542_v30 = vsel %vm512_vm0, %v5520_v19, 0.0 }
0x1a0c   : > { %v5564_v55 = vmul.f32 0.5, %v5563_v34  ;;  %v5529_v9 = vpop.xlane.xlu0 %5528  ;;  %5543 = vadd.xlane.f32.xlu2 %v5542_v30 }
0x1a0d   : > { %v5547_v4 = vmul.f32 %v5529_v9, %v7443_v20 }
0x1a0e   : > { %v5565_v51 = vsub.f32 1.5, %v5564_v55 }
0x1a0f   : > { %v7183_v24 = vpop.eup %7182  ;;  %v5555_v63 = vadd.f32 1e-05, %v5547_v4 }
0x1a10   : > { %v5566_v25 = vmul.f32 %v7181_v45, %v5565_v51  ;;  %v5572_v2 = vmul.f32 %v7183_v24, %v5554_v28  ;;  %vm5578_vm9 = vweird.f32 %v7183_v24 }
0x1a11   : > { %7184 = vrsqrt.f32 %v5555_v63  ;;  %vm5579_vm13 = vmor %vm5577_vm10, %vm5578_vm9  ;;  %vm5587_vm15 = vweird.f32 %v5555_v63 }
0x1a12   : > { %v5570_v17 = vsel %vm5569_vm8, %v7181_v45, %v5566_v25  ;;  %v5573_v54 = vmul.f32 %v7183_v24, %v5572_v2 }
0x1a13   : > { %v5641_v62 = vmul.f32 %v5570_v17, %v9347_v29 }
0x1a14   : > { %v5574_v31 = vmul.f32 0.5, %v5573_v54  ;;  %v5532_v22 = vpop.xlane.xlu1 %5531 }
0x1a15   : > { %v5652_v47 = vmul.f32 %v9421_v42, %v5641_v62  ;;  %v5548_v1 = vmul.f32 %v5532_v22, %v7443_v20 }
0x1a16   : > { %v5575_v40 = vsub.f32 1.5, %v5574_v31 }
0x1a17   : > { %v7185_v21 = vpop.eup %7184  ;;  %v5663_v5 = vadd.f32 %v9426_v18, %v5652_v47  ;;  %v5556_v15 = vadd.f32 1e-05, %v5548_v1 }
0x1a18   : > { %v5576_v39 = vmul.f32 %v7183_v24, %v5575_v40  ;;  %v5582_v32 = vmul.f32 %v7185_v21, %v5555_v63  ;;  %vm5588_vm14 = vweird.f32 %v7185_v21 }
0x1a19   : > { %7186 = vrsqrt.f32 %v5556_v15  ;;  %6731 = vmatmul.msk.f32.vlgmr.msra.gmra.mxu2 %vm512_vm0, %v5663_v5  ;;  %vm5589_vm1 = vmor %vm5587_vm15, %vm5588_vm14  ;;  %vm5597_vm3 = vweird.f32 %v5556_v15 }
0x1a1a   : > { %v5580_v29 = vsel %vm5579_vm13, %v7183_v24, %v5576_v39  ;;  %v5583_v37 = vmul.f32 %v7185_v21, %v5582_v32 }
0x1a1b   : > { %v5642_v11 = vmul.f32 %v5580_v29, %v9354_v57 }
0x1a1c   : > { %v5584_v50 = vmul.f32 0.5, %v5583_v37  ;;  %v5535_v53 = vpop.xlane.xlu2 %5534 }
0x1a1d   : > { %v5549_v58 = vmul.f32 %v5535_v53, %v7443_v20  ;;  %v5653_v10 = vmul.f32 %v9421_v42, %v5642_v11 }
0x1a1e   : > { %v5585_v26 = vsub.f32 1.5, %v5584_v50 }
0x1a1f   : > { %v7187_v27 = vpop.eup %7186  ;;  %v5557_v49 = vadd.f32 1e-05, %v5549_v58  ;;  %v5664_v16 = vadd.f32 %v9426_v18, %v5653_v10 }
0x1a20   : > { %v5586_v36 = vmul.f32 %v7185_v21, %v5585_v26  ;;  %v5592_v52 = vmul.f32 %v7187_v27, %v5556_v15  ;;  %vm5598_vm2 = vweird.f32 %v7187_v27 }
0x1a21   : > { %7188 = vrsqrt.f32 %v5557_v49  ;;  %6732 = vmatmul.msk.f32.gmra.mxu2 %vm512_vm0, %v5664_v16  ;;  %vm5599_vm4 = vmor %vm5597_vm3, %vm5598_vm2  ;;  %vm5607_vm6 = vweird.f32 %v5557_v49 }
0x1a22   : > { %v5590_v57 = vsel %vm5589_vm1, %v7185_v21, %v5586_v36  ;;  %v5593_v38 = vmul.f32 %v7187_v27, %v5592_v52 }
0x1a23   : > { %v5643_v3 = vmul.f32 %v5590_v57, %v9363_v61 }
0x1a24   : > { %v5594_v14 = vmul.f32 0.5, %v5593_v38  ;;  %v5538_v8 = vpop.xlane.xlu0 %5537 }
0x1a25   : > { %v5550_v56 = vmul.f32 %v5538_v8, %v7443_v20  ;;  %v5654_v45 = vmul.f32 %v9421_v42, %v5643_v3 }
0x1a26   : > { %v5595_v28 = vsub.f32 1.5, %v5594_v14 }
0x1a27   : > { %v7189_v0 = vpop.eup %7188  ;;  %v5558_v44 = vadd.f32 1e-05, %v5550_v56  ;;  %v5665_v19 = vadd.f32 %v9426_v18, %v5654_v45 }
0x1a28   : > { %v5596_v34 = vmul.f32 %v7187_v27, %v5595_v28  ;;  %v5602_v30 = vmul.f32 %v7189_v0, %v5557_v49  ;;  %vm5608_vm5 = vweird.f32 %v7189_v0 }
0x1a29   : > { %7190 = vrsqrt.f32 %v5558_v44  ;;  %6733 = vmatmul.msk.f32.gmra.mxu2 %vm512_vm0, %v5665_v19  ;;  %vm5609_vm7 = vmor %vm5607_vm6, %vm5608_vm5  ;;  %vm5617_vm12 = vweird.f32 %v5558_v44 }
0x1a2a   : > { %v5600_v61 = vsel %vm5599_vm4, %v7187_v27, %v5596_v34  ;;  %v5603_v55 = vmul.f32 %v7189_v0, %v5602_v30 }
0x1a2b   : > { %v5644_v9 = vmul.f32 %v5600_v61, %v9370_v43 }
0x1a2c   : > { %v5604_v4 = vmul.f32 0.5, %v5603_v55  ;;  %v5541_v51 = vpop.xlane.xlu1 %5540 }
0x1a2d   : > { %v5551_v24 = vmul.f32 %v5541_v51, %v7443_v20  ;;  %v5655_v63 = vmul.f32 %v9421_v42, %v5644_v9 }
0x1a2e   : > { %v5605_v25 = vsub.f32 1.5, %v5604_v4  ;;  %v6753_v4 = vld [vmem:[%s9780_s12 + $0xf0] sm:$0xff] }
0x1a2f   : > { %v7191_v2 = vpop.eup %7190  ;;  %v5559_v17 = vadd.f32 1e-05, %v5551_v24  ;;  %v5666_v54 = vadd.f32 %v9426_v18, %v5655_v63  ;;  %v6752_v24 = vld [vmem:[%s9780_s12 + $0xe8] sm:$0xff] }
0x1a30   : > { %v5606_v62 = vmul.f32 %v7189_v0, %v5605_v25  ;;  %v5612_v31 = vmul.f32 %v7191_v2, %v5558_v44  ;;  %vm5618_vm11 = vweird.f32 %v7191_v2 }
0x1a31   : > { %7192 = vrsqrt.f32 %v5559_v17  ;;  %6734 = vmatmul.msk.f32.gmra.mxu2 %vm512_vm0, %v5666_v54  ;;  %vm5619_vm8 = vmor %vm5617_vm12, %vm5618_vm11  ;;  %vm5627_vm10 = vweird.f32 %v5559_v17 }
0x1a32   : > { %v5610_v43 = vsel %vm5609_vm7, %v7189_v0, %v5606_v62  ;;  %v5613_v22 = vmul.f32 %v7191_v2, %v5612_v31 }
0x1a33   : > { %v5645_v47 = vmul.f32 %v5610_v43, %v9377_v60  ;;  %v6750_v43 = vld [vmem:[%s9780_s12 + $0xd8] sm:$0xff] }
0x1a34   : > { %v5614_v1 = vmul.f32 0.5, %v5613_v22 }
0x1a35   : > { %v5656_v40 = vmul.f32 %v9421_v42, %v5645_v47 }
0x1a36   : > { %v5615_v21 = vsub.f32 1.5, %v5614_v1  ;;  %v6749_v1 = vld [vmem:[%s9780_s12 + $0xd0] sm:$0xff] }
0x1a37   : > { %v7193_v5 = vpop.eup %7192  ;;  %v5667_v15 = vadd.f32 %v9426_v18, %v5656_v40 }
0x1a38   : > { %v5616_v39 = vmul.f32 %v7191_v2, %v5615_v21  ;;  %v5622_v32 = vmul.f32 %v7193_v5, %v5559_v17  ;;  %vm5628_vm9 = vweird.f32 %v7193_v5 }
0x1a39   : > { %6735 = vmatmul.msk.f32.gmra.mxu2 %vm512_vm0, %v5667_v15  ;;  %vm5629_vm13 = vmor %vm5627_vm10, %vm5628_vm9 }
0x1a3a   : > { %v5620_v29 = vsel %vm5619_vm8, %v7191_v2, %v5616_v39  ;;  %v5623_v37 = vmul.f32 %v7193_v5, %v5622_v32  ;;  %v6751_v2 = vld [vmem:[%s9780_s12 + $0xe0] sm:$0xff]  ;;  %v6748_v39 = vld [vmem:[%s9780_s12 + $0xc8] sm:$0xff] }
0x1a3b   : > { %v5646_v11 = vmul.f32 %v5620_v29, %v9384_v35 }
0x1a3c   : > { %v5624_v50 = vmul.f32 0.5, %v5623_v37 }
0x1a3d   : > { %v5657_v60 = vmul.f32 %v9421_v42, %v5646_v11  ;;  %v6747_v11 = vld [vmem:[%s9780_s12 + $0xc0] sm:$0xff] }
0x1a3e   : > { %v5625_v53 = vsub.f32 1.5, %v5624_v50 }
0x1a3f   : > { %v5668_v58 = vadd.f32 %v9426_v18, %v5657_v60 }
0x1a40   : > { %v5626_v10 = vmul.f32 %v7193_v5, %v5625_v53 }
0x1a41   : > { %6736 = vmatmul.msk.f32.gmra.mxu2 %vm512_vm0, %v5668_v58 }
0x1a42   : > { %v5630_v26 = vsel %vm5629_vm13, %v7193_v5, %v5626_v10 }
0x1a43   : > { %v5647_v27 = vmul.f32 %v5630_v26, %v9391_v33  ;;  %v6746_v26 = vld [vmem:[%s9780_s12 + $0xb8] sm:$0xff] }
0x1a45   : > { %v5658_v49 = vmul.f32 %v9421_v42, %v5647_v27 }
0x1a47   : > { %v5669_v16 = vadd.f32 %v9426_v18, %v5658_v49 }
0x1a49   : > { %6737 = vmatmul.msk.f32.gmra.mxu2 %vm512_vm0, %v5669_v16 }
0x1a7f   : > { %v5544_v35 = vpop.xlane.xlu2 %5543 }
0x1a80   : > { %v5552_v36 = vmul.f32 %v5544_v35, %v7443_v20  ;;  %v9466_v20 = vld [vmem:[%s9779_s11 + $0x1] ss:$0 sm:$0xff] }
0x1a82   : > { %v5560_v52 = vadd.f32 1e-05, %v5552_v36  ;;  %v6745_v36 = vld [vmem:[%s9780_s12 + $0xb0] sm:$0xff] }
0x1a84   : > { %7194 = vrsqrt.f32 %v5560_v52  ;;  %vm5637_vm15 = vweird.f32 %v5560_v52 }
0x1a8a   : > { %v7195_v57 = vpop.eup %7194 }
0x1a8b   : > { %v5632_v38 = vmul.f32 %v7195_v57, %v5560_v52  ;;  %vm5638_vm14 = vweird.f32 %v7195_v57 }
0x1a8c   : > { %vm5639_vm1 = vmor %vm5637_vm15, %vm5638_vm14 }
0x1a8d   : > { %v5633_v3 = vmul.f32 %v7195_v57, %v5632_v38 }
0x1a8f   : > { %v5634_v14 = vmul.f32 0.5, %v5633_v3  ;;  %v6744_v3 = vld [vmem:[%s9780_s12 + $0xa8] sm:$0xff] }
0x1a91   : > { %v5635_v8 = vsub.f32 1.5, %v5634_v14 }
0x1a93   : > { %v5636_v56 = vmul.f32 %v7195_v57, %v5635_v8 }
0x1a95   : > { %v5640_v33 = vsel %vm5639_vm1, %v7195_v57, %v5636_v56 }
0x1a96   : > { %v5648_v45 = vmul.f32 %v5640_v33, %v9409_v13 }
0x1a98   : > { %v5659_v28 = vmul.f32 %v9421_v42, %v5648_v45 }
0x1a9a   : > { %v5670_v0 = vadd.f32 %v9426_v18, %v5659_v28  ;;  %v6754_v18 = vld [vmem:[%s9780_s12 + $0xf8] sm:$0xff] }
0x1a9b   : > { %6088 = vmatpush.msra.mxu3 %v6754_v18 }
0x1a9c   : > { %v5722_v44 = vpop.f32.mrf.mxu2  ;;  %6738 = vmatmul.msk.f32.gmra.mxu2 %vm512_vm0, %v5670_v0  ;;  %v6743_v0 = vld [vmem:[%s9780_s12 + $0xa0] sm:$0xff] }
0x1a9d   : > { %v9471_v19 = vadd.f32 %v9466_v20, %v5722_v44  ;;  %6089 = vmatpush.msra.mxu3 %v6753_v4 }
0x1a9f   : > { %v9474_v34 = vmul.f32 0.70710677, %v9471_v19  ;;  %6090 = vmatpush.msra.mxu3 %v6752_v24 }
0x1aa1   : > { %v5762_v13 = vand.u32 2147483647, %v9474_v34  ;;  %6091 = vmatpush.msra.mxu3 %v6751_v2  ;;  %vm6026_vm14 = vcmp.ge.f32.partialorder %v9474_v34, 0.0 }
0x1aa3   : > { %v5770_v30 = vmul.f32 0.3275911, %v5762_v13  ;;  %6092 = vmatpush.msra.mxu3 %v6750_v43  ;;  %v5978_v49 = vsub.f32 0.0, %v5762_v13 }
0x1aa4   : > { %v5725_v42 = vpop.f32.mrf.mxu2 }
0x1aa5   : > { %v5778_v61 = vadd.f32 1.0, %v5770_v30  ;;  %v9478_v55 = vadd.f32 %v9466_v20, %v5725_v42  ;;  %6093 = vmatpush.msra.mxu3 %v6749_v1  ;;  %v5986_v14 = vmul.f32 %v5978_v49, %v5762_v13  ;;  %v6741_v1 = vld [vmem:[%s9780_s12 + $0x90] sm:$0xff] }
0x1aa7   : > { %7196 = vrcp.f32 %v5778_v61  ;;  %v9484_v9 = vmul.f32 0.70710677, %v9478_v55  ;;  %v5797_v40 = vand.u32 2147483648, %v5778_v61  ;;  %v5795_v15 = vand.u32 2147483647, %v5778_v61  ;;  %6094 = vmatpush.msra.mxu3 %v6748_v39 }
0x1aa8   : > { %vm5791_vm3 = vweird.f32 %v5778_v61 }
0x1aa9   : > { %v9490_v51 = vand.u32 2147483647, %v9484_v9  ;;  %v5798_v50 = vor.u32 1.1754944e-38, %v5797_v40  ;;  %6095 = vmatpush.msra.mxu3 %v6747_v11  ;;  %vm5796_vm5 = vcmp.eq.f32.partialorder %v5795_v15, 8.507059e+37 }
0x1aab   : > { %v5771_v63 = vmul.f32 0.3275911, %v9490_v51  ;;  %6096 = vmatpush.msra.mxu3 %v6746_v26  ;;  %v5979_v56 = vsub.f32 0.0, %v9490_v51 }
0x1aac   : > { %v5728_v25 = vpop.f32.mrf.mxu2 }
0x1aad   : > { %v7197_v17 = vpop.eup %7196  ;;  %v9500_v54 = vadd.f32 %v9466_v20, %v5728_v25  ;;  %v9502_v31 = vadd.f32 1.0, %v5771_v63  ;;  %6097 = vmatpush.msra.mxu3 %v6745_v36  ;;  %v6742_v63 = vld [vmem:[%s9780_s12 + $0x98] sm:$0xff]  ;;  %v5994_v25 = vmul.f32 1.442695, %v5986_v14 }
0x1aae   : > { %v5787_v62 = vmul.f32 %v7197_v17, %v5778_v61  ;;  %vm5792_vm2 = vweird.f32 %v7197_v17 }
0x1aaf   : > { %v9508_v22 = vmul.f32 0.70710677, %v9500_v54  ;;  %7198 = vrcp.f32 %v9502_v31  ;;  %vm5793_vm4 = vmor %vm5791_vm3, %vm5792_vm2  ;;  %6098 = vmatpush.msra.mxu3 %v6744_v3  ;;  %v5812_v30 = vand.u32 2147483648, %v9502_v31  ;;  %vm5806_vm7 = vweird.f32 %v9502_v31 }
0x1ab0   : > { %v5788_v47 = vsub.f32 1.0, %v5787_v62  ;;  %v5810_v4 = vand.u32 2147483647, %v9502_v31 }
0x1ab1   : > { %v9515_v21 = vand.u32 2147483647, %v9508_v22  ;;  %6099 = vmatpush.msra.mxu3 %v6743_v0 }
0x1ab2   : > { %v5789_v5 = vmul.f32 %v7197_v17, %v5788_v47  ;;  %vm5811_vm12 = vcmp.eq.f32.partialorder %v5810_v4, 8.507059e+37 }
0x1ab3   : > { %v5772_v32 = vmul.f32 0.3275911, %v9515_v21  ;;  %6100 = vmatpush.msra.mxu3 %v6742_v63 }
0x1ab4   : > { %v5790_v29 = vadd.f32 %v7197_v17, %v5789_v5  ;;  %v5731_v37 = vpop.f32.mrf.mxu2  ;;  %v5813_v5 = vor.u32 1.1754944e-38, %v5812_v30 }
0x1ab5   : > { %v9524_v60 = vadd.f32 1.0, %v5772_v32  ;;  %v9527_v53 = vadd.f32 %v9466_v20, %v5731_v37  ;;  %v7199_v58 = vpop.eup %7198  ;;  %6101 = vmatpush.msra.mxu3 %v6741_v1  ;;  %v6739_v37 = vld [vmem:[%s9780_s12 + $0x80] sm:$0xff] }
0x1ab6   : > { %v5794_v10 = vsel %vm5793_vm4, %v7197_v17, %v5790_v29  ;;  %v5802_v16 = vmul.f32 %v7199_v58, %v9502_v31  ;;  %vm5807_vm6 = vweird.f32 %v7199_v58  ;;  %v5987_v17 = vmul.f32 %v5979_v56, %v9490_v51  ;;  %v6740_v29 = vld [vmem:[%s9780_s12 + $0x88] sm:$0xff] }
0x1ab7   : > { %v9532_v27 = vsel %vm5796_vm5, %v5798_v50, %v5794_v10  ;;  %7200 = vrcp.f32 %v9524_v60  ;;  %v9541_v57 = vmul.f32 0.70710677, %v9527_v53  ;;  %vm9569_vm11 = vmor %vm5806_vm7, %vm5807_vm6  ;;  %6102 = vmatpush.msra.mxu3 %v6740_v29  ;;  %v5827_v49 = vand.u32 2147483648, %v9524_v60 }
0x1ab8   : > { %v5906_v35 = vmul.f32 1.0614054, %v9532_v27  ;;  %v5803_v52 = vsub.f32 1.0, %v5802_v16  ;;  %v5996_v32 = vmul.f32 1.442695, %v5987_v17  ;;  %vm5821_vm9 = vweird.f32 %v9524_v60 }
0x1ab9   : > { %v9548_v33 = vand.u32 2147483647, %v9541_v57  ;;  %6103 = vmatpush.msra.mxu3 %v6739_v37 }
0x1aba   : > { %v5914_v38 = vadd.f32 -1.4531521, %v5906_v35  ;;  %v5804_v8 = vmul.f32 %v7199_v58, %v5803_v52 }
0x1abb   : > { %v5773_v13 = vmul.f32 0.3275911, %v9548_v33  ;;  %v5981_v56 = vsub.f32 0.0, %v9548_v33 }
0x1abc   : > { %v5922_v45 = vmul.f32 %v5914_v38, %v9532_v27  ;;  %v5734_v28 = vpop.f32.mrf.mxu2  ;;  %v5805_v61 = vadd.f32 %v7199_v58, %v5804_v8  ;;  %v5825_v38 = vand.u32 2147483647, %v9524_v60 }
0x1abd   : > { %v9554_v44 = vpop.eup %7200  ;;  %v9559_v42 = vadd.f32 %v9466_v20, %v5734_v28  ;;  %v9574_v62 = vadd.f32 1.0, %v5773_v13 }
0x1abe   : > { %v5930_v18 = vadd.f32 1.4214138, %v5922_v45  ;;  %v5817_v24 = vmul.f32 %v9554_v44, %v9524_v60  ;;  %v5809_v40 = vsel %vm9569_vm11, %v7199_v58, %v5805_v61  ;;  %vm5822_vm8 = vweird.f32 %v9554_v44 }
0x1abf   : > { %v9577_v43 = vmul.f32 0.70710677, %v9559_v42  ;;  %7202 = vrcp.f32 %v9574_v62  ;;  %v9596_v11 = vsel %vm5811_vm12, %v5813_v5, %v5809_v40  ;;  %v5980_v58 = vsub.f32 0.0, %v9515_v21  ;;  %vm9616_vm10 = vmor %vm5821_vm9, %vm5822_vm8 }
0x1ac0   : > { %v5938_v31 = vmul.f32 %v5930_v18, %v9532_v27  ;;  %v5818_v47 = vsub.f32 1.0, %v5817_v24  ;;  %7204 = vpow2.f32 %v5994_v25  ;;  %v5907_v35 = vmul.f32 1.0614054, %v9596_v11 }
0x1ac1   : > { %v9588_v39 = vand.u32 2147483647, %v9577_v43  ;;  %v5746_v61 = vmul.f32 0.5, %v9471_v19  ;;  %v5828_v18 = vor.u32 1.1754944e-38, %v5827_v49  ;;  %v5988_v4 = vmul.f32 %v5980_v58, %v9515_v21 }
0x1ac2   : > { %v5946_v51 = vadd.f32 -0.28449672, %v5938_v31  ;;  %v5819_v15 = vmul.f32 %v9554_v44, %v5818_v47  ;;  %v5915_v28 = vadd.f32 -1.4531521, %v5907_v35  ;;  %vm5826_vm13 = vcmp.eq.f32.partialorder %v5825_v38, 8.507059e+37 }
0x1ac3   : > { %v5774_v10 = vmul.f32 0.3275911, %v9588_v39  ;;  %v5989_v19 = vmul.f32 %v5981_v56, %v9548_v33  ;;  %v5998_v47 = vmul.f32 1.442695, %v5988_v4  ;;  %v5842_v40 = vand.u32 2147483648, %v9574_v62 }
0x1ac4   : > { %v5954_v50 = vmul.f32 %v5946_v51, %v9532_v27  ;;  %v5737_v26 = vpop.f32.mrf.mxu2  ;;  %v5820_v36 = vadd.f32 %v9554_v44, %v5819_v15  ;;  %v5923_v2 = vmul.f32 %v5915_v28, %v9596_v11  ;;  %vm5836_vm15 = vweird.f32 %v9574_v62 }
0x1ac5   : > { %v9604_v16 = vadd.f32 %v9466_v20, %v5737_v26  ;;  %v9610_v3 = vadd.f32 1.0, %v5774_v10  ;;  %v9612_v14 = vpop.eup %7202  ;;  %v5982_v37 = vsub.f32 0.0, %v9588_v39  ;;  %v5840_v10 = vand.u32 2147483647, %v9574_v62 }
0x1ac6   : > { %v5962_v52 = vadd.f32 0.2548296, %v5954_v50  ;;  %v5832_v60 = vmul.f32 %v9612_v14, %v9574_v62  ;;  %v5824_v30 = vsel %vm9616_vm10, %v9554_v44, %v5820_v36  ;;  %v7205_v13 = vpop.eup %7204  ;;  %v5931_v29 = vadd.f32 1.4214138, %v5923_v2 }
0x1ac7   : > { %v9622_v45 = vmul.f32 0.70710677, %v9604_v16  ;;  %7206 = vrcp.f32 %v9610_v3  ;;  %v9641_v44 = vsel %vm5826_vm13, %v5828_v18, %v5824_v30  ;;  %v6000_v26 = vmul.f32 1.442695, %v5989_v19 }
0x1ac8   : > { %v5970_v0 = vmul.f32 %v5962_v52, %v9532_v27  ;;  %v5833_v63 = vsub.f32 1.0, %v5832_v60  ;;  %v9638_v27 = vmul.f32 0.5, %v9478_v55  ;;  %7208 = vpow2.f32 %v5996_v32 }
0x1ac9   : > { %v9634_v25 = vand.u32 2147483647, %v9622_v45  ;;  %v5908_v32 = vmul.f32 1.0614054, %v9641_v44  ;;  %vm5837_vm1 = vweird.f32 %v9612_v14  ;;  %v5843_v38 = vor.u32 1.1754944e-38, %v5842_v40 }
0x1aca   : > { %v6010_v24 = vmul.f32 %v7205_v13, %v5970_v0  ;;  %v5834_v1 = vmul.f32 %v9612_v14, %v5833_v63  ;;  %v5939_v56 = vmul.f32 %v5931_v29, %v9596_v11  ;;  %v5990_v60 = vmul.f32 %v5982_v37, %v9588_v39  ;;  %vm9672_vm3 = vmor %vm5836_vm15, %vm5837_vm1 }
0x1acb   : > { %v5775_v21 = vmul.f32 0.3275911, %v9634_v25  ;;  %v5916_v34 = vadd.f32 -1.4531521, %v5908_v32  ;;  %v5857_v13 = vand.u32 2147483648, %v9610_v3  ;;  %vm5851_vm4 = vweird.f32 %v9610_v3 }
0x1acc   : > { %v6018_v17 = vsub.f32 1.0, %v6010_v24  ;;  %v5740_v31 = vpop.f32.mrf.mxu2  ;;  %v5835_v36 = vadd.f32 %v9612_v14, %v5834_v1  ;;  %v5947_v4 = vadd.f32 -0.28449672, %v5939_v56  ;;  %vm5841_vm6 = vcmp.eq.f32.partialorder %v5840_v10, 8.507059e+37 }
0x1acd   : > { %v9648_v5 = vadd.f32 %v9466_v20, %v5740_v31  ;;  %v7207_v55 = vpop.eup %7206  ;;  %v9650_v15 = vadd.f32 1.0, %v5775_v21  ;;  %v5924_v24 = vmul.f32 %v5916_v34, %v9641_v44  ;;  %v5858_v1 = vor.u32 1.1754944e-38, %v5857_v13 }
0x1ace   : > { %v6034_v51 = vsub.f32 0.0, %v6018_v17  ;;  %v5847_v33 = vmul.f32 %v7207_v55, %v9610_v3  ;;  %v7209_v52 = vpop.eup %7208  ;;  %vm5852_vm2 = vweird.f32 %v7207_v55  ;;  %v5839_v62 = vsel %vm9672_vm3, %v9612_v14, %v5835_v36 }
0x1acf   : > { %v9657_v50 = vmul.f32 0.70710677, %v9648_v5  ;;  %7210 = vrcp.f32 %v9650_v15  ;;  %vm9684_vm5 = vmor %vm5851_vm4, %vm5852_vm2  ;;  %v5955_v19 = vmul.f32 %v5947_v4, %v9596_v11  ;;  %v5932_v21 = vadd.f32 1.4214138, %v5924_v24 }
0x1ad0   : > { %v6042_v58 = vsel %vm6026_vm14, %v6018_v17, %v6034_v51  ;;  %v5848_v35 = vsub.f32 1.0, %v5847_v33  ;;  %7212 = vpow2.f32 %v5998_v47  ;;  %v9692_v31 = vsel %vm5841_vm6, %v5843_v38, %v5839_v62 }
0x1ad1   : > { %v6050_v49 = vadd.f32 1.0, %v6042_v58  ;;  %v9666_v8 = vand.u32 2147483647, %v9657_v50  ;;  %v6002_v40 = vmul.f32 1.442695, %v5990_v60  ;;  %v5983_v51 = vsub.f32 0.0, %v9634_v25 }
0x1ad2   : > { %v5849_v0 = vmul.f32 %v7207_v55, %v5848_v35  ;;  %v5963_v32 = vadd.f32 0.2548296, %v5955_v19  ;;  %v5940_v33 = vmul.f32 %v5932_v21, %v9641_v44  ;;  %vm6027_vm11 = vcmp.ge.f32.partialorder %v9484_v9, 0.0 }
0x1ad3   : > { %v6058_v28 = vmul.f32 %v6050_v49, %v5746_v61  ;;  %v5776_v18 = vmul.f32 0.3275911, %v9666_v8  ;;  %v5855_v61 = vand.u32 2147483647, %v9610_v3  ;;  %v5872_v47 = vand.u32 2147483648, %v9650_v15 }
0x1ad4   : > { %v5850_v39 = vadd.f32 %v7207_v55, %v5849_v0  ;;  %v5909_v37 = vmul.f32 1.0614054, %v9692_v31  ;;  %v5870_v10 = vand.u32 2147483647, %v9650_v15  ;;  %v5971_v49 = vmul.f32 %v5963_v32, %v9596_v11 }
0x1ad5   : > { %6104 = vmatmul.f32.vlgmr.msra.gmra.mxu3 %v6058_v28  ;;  %v7211_v63 = vpop.eup %7210  ;;  %v9688_v17 = vadd.f32 1.0, %v5776_v18  ;;  %vm5856_vm7 = vcmp.eq.f32.partialorder %v5855_v61, 8.507059e+37  ;;  %v5948_v35 = vadd.f32 -0.28449672, %v5940_v33  ;;  %vm5866_vm8 = vweird.f32 %v9650_v15 }
0x1ad6   : > { %v5862_v3 = vmul.f32 %v7211_v63, %v9650_v15  ;;  %v5854_v14 = vsel %vm9684_vm5, %v7207_v55, %v5850_v39  ;;  %vm5867_vm12 = vweird.f32 %v7211_v63  ;;  %v5917_v36 = vadd.f32 -1.4531521, %v5909_v37  ;;  %v7213_v56 = vpop.eup %7212 }
0x1ad7   : > { %7214 = vrcp.f32 %v9688_v17  ;;  %v9702_v58 = vsel %vm5856_vm7, %v5858_v1, %v5854_v14  ;;  %v6011_v34 = vmul.f32 %v7209_v52, %v5971_v49  ;;  %v5956_v28 = vmul.f32 %v5948_v35, %v9641_v44  ;;  %vm5868_vm9 = vmor %vm5866_vm8, %vm5867_vm12 }
0x1ad8   : > { %v5863_v29 = vsub.f32 1.0, %v5862_v3  ;;  %7216 = vpow2.f32 %v6000_v26  ;;  %v5910_v38 = vmul.f32 1.0614054, %v9702_v58  ;;  %v5991_v26 = vmul.f32 %v5983_v51, %v9634_v25 }
0x1ad9   : > { %7218 = vpow2.f32 %v6002_v40  ;;  %v5873_v30 = vor.u32 1.1754944e-38, %v5872_v47  ;;  %v5925_v13 = vmul.f32 %v5917_v36, %v9692_v31  ;;  %v6019_v4 = vsub.f32 1.0, %v6011_v34 }
0x1ada   : > { %v5864_v55 = vmul.f32 %v7211_v63, %v5863_v29  ;;  %v5918_v11 = vadd.f32 -1.4531521, %v5910_v38  ;;  %v5964_v24 = vadd.f32 0.2548296, %v5956_v28  ;;  %vm5871_vm10 = vcmp.eq.f32.partialorder %v5870_v10, 8.507059e+37 }
0x1adb   : > { %vm6028_vm13 = vcmp.ge.f32.partialorder %v9508_v22, 0.0  ;;  %v5887_v25 = vand.u32 2147483648, %v9688_v17  ;;  %v5933_v52 = vadd.f32 1.4214138, %v5925_v13  ;;  %v6035_v2 = vsub.f32 0.0, %v6019_v4 }
0x1adc   : > { %v5865_v0 = vadd.f32 %v7211_v63, %v5864_v55  ;;  %v5926_v62 = vmul.f32 %v5918_v11, %v9702_v58  ;;  %v5972_v19 = vmul.f32 %v5964_v24, %v9641_v44  ;;  %v5885_v14 = vand.u32 2147483647, %v9688_v17 }
0x1add   : > { %v7215_v60 = vpop.eup %7214  ;;  %v5941_v1 = vmul.f32 %v5933_v52, %v9692_v31  ;;  %v6043_v32 = vsel %vm6027_vm11, %v6019_v4, %v6035_v2  ;;  %vm5881_vm15 = vweird.f32 %v9688_v17  ;;  %v5888_v44 = vor.u32 1.1754944e-38, %v5887_v25 }
0x1ade   : > { %v5877_v18 = vmul.f32 %v7215_v60, %v9688_v17  ;;  %v7217_v61 = vpop.eup %7216  ;;  %v5869_v39 = vsel %vm5868_vm9, %v7211_v63, %v5865_v0  ;;  %v5934_v40 = vadd.f32 1.4214138, %v5926_v62  ;;  %vm5882_vm14 = vweird.f32 %v7215_v60 }
0x1adf   : > { %v5874_v21 = vsel %vm5871_vm10, %v5873_v30, %v5869_v39  ;;  %v7219_v3 = vpop.eup %7218  ;;  %v6012_v33 = vmul.f32 %v7213_v56, %v5972_v19  ;;  %v6051_v47 = vadd.f32 1.0, %v6043_v32  ;;  %v5949_v63 = vadd.f32 -0.28449672, %v5941_v1  ;;  %vm5883_vm1 = vmor %vm5881_vm15, %vm5882_vm14 }
0x1ae0   : > { %v5878_v15 = vsub.f32 1.0, %v5877_v18  ;;  %v5911_v51 = vmul.f32 1.0614054, %v5874_v21  ;;  %v5942_v37 = vmul.f32 %v5934_v40, %v9702_v58  ;;  %v5984_v9 = vsub.f32 0.0, %v9666_v8 }
0x1ae1   : > { %v6020_v10 = vsub.f32 1.0, %v6012_v33  ;;  %v6059_v35 = vmul.f32 %v6051_v47, %v9638_v27  ;;  %v5957_v36 = vmul.f32 %v5949_v63, %v9692_v31  ;;  %vm5886_vm2 = vcmp.eq.f32.partialorder %v5885_v14, 8.507059e+37 }
0x1ae2   : > { %v5879_v29 = vmul.f32 %v7215_v60, %v5878_v15  ;;  %v5919_v55 = vadd.f32 -1.4531521, %v5911_v51  ;;  %v5950_v38 = vadd.f32 -0.28449672, %v5942_v37  ;;  %v5748_v11 = vmul.f32 0.5, %v9500_v54 }
0x1ae3   : > { %v6036_v56 = vsub.f32 0.0, %v6020_v10  ;;  %6107 = vmatmul.f32.gmra.mxu3 %v6059_v35  ;;  %v5965_v0 = vadd.f32 0.2548296, %v5957_v36  ;;  %v6004_v18 = vmul.f32 1.442695, %v5991_v26  ;;  %vm6029_vm3 = vcmp.ge.f32.partialorder %v9541_v57, 0.0 }
0x1ae4   : > { %v5880_v49 = vadd.f32 %v7215_v60, %v5879_v29  ;;  %v5927_v34 = vmul.f32 %v5919_v55, %v5874_v21  ;;  %v5958_v30 = vmul.f32 %v5950_v38, %v9702_v58  ;;  %vm6030_vm4 = vcmp.ge.f32.partialorder %v9577_v43, 0.0 }
0x1ae5   : > { %v6044_v27 = vsel %vm6028_vm13, %v6020_v10, %v6036_v56  ;;  %v5973_v25 = vmul.f32 %v5965_v0, %v9692_v31  ;;  %7220 = vpow2.f32 %v6004_v18  ;;  %vm6031_vm5 = vcmp.ge.f32.partialorder %v9622_v45, 0.0 }
0x1ae6   : > { %v5884_v28 = vsel %vm5883_vm1, %v7215_v60, %v5880_v49  ;;  %v5935_v17 = vadd.f32 1.4214138, %v5927_v34  ;;  %v6052_v24 = vadd.f32 1.0, %v6044_v27  ;;  %v5966_v52 = vadd.f32 0.2548296, %v5958_v30 }
0x1ae7   : > { %v5889_v13 = vsel %vm5886_vm2, %v5888_v44, %v5884_v28  ;;  %v5992_v60 = vmul.f32 %v5984_v9, %v9666_v8  ;;  %v6013_v2 = vmul.f32 %v7217_v61, %v5973_v25  ;;  %vm6032_vm6 = vcmp.ge.f32.partialorder %v9657_v50, 0.0 }
0x1ae8   : > { %v5912_v4 = vmul.f32 1.0614054, %v5889_v13  ;;  %v5943_v62 = vmul.f32 %v5935_v17, %v5874_v21  ;;  %v6060_v15 = vmul.f32 %v6052_v24, %v5748_v11  ;;  %v5974_v19 = vmul.f32 %v5966_v52, %v9702_v58 }
0x1ae9   : > { %v6021_v26 = vsub.f32 1.0, %v6013_v2  ;;  %v6006_v51 = vmul.f32 1.442695, %v5992_v60  ;;  %v5749_v58 = vmul.f32 0.5, %v9527_v53  ;;  %v5751_v17 = vmul.f32 0.5, %v9604_v16 }
0x1aea   : > { %v5920_v39 = vadd.f32 -1.4531521, %v5912_v4  ;;  %v5951_v14 = vadd.f32 -0.28449672, %v5943_v62  ;;  %v6014_v1 = vmul.f32 %v7219_v3, %v5974_v19  ;;  %v5752_v27 = vmul.f32 0.5, %v9648_v5 }
0x1aeb   : > { %6110 = vmatmul.f32.gmra.mxu3 %v6060_v15  ;;  %v6037_v29 = vsub.f32 0.0, %v6021_v26  ;;  %v7221_v63 = vpop.eup %7220  ;;  %7222 = vpow2.f32 %v6006_v51 }
0x1aec   : > { %v5928_v54 = vmul.f32 %v5920_v39, %v5889_v13  ;;  %v5959_v22 = vmul.f32 %v5951_v14, %v5874_v21  ;;  %v6022_v31 = vsub.f32 1.0, %v6014_v1 }
0x1aed   : > { %v6045_v33 = vsel %vm6029_vm3, %v6021_v26, %v6037_v29 }
0x1aee   : > { %v5936_v40 = vadd.f32 1.4214138, %v5928_v54  ;;  %v5967_v32 = vadd.f32 0.2548296, %v5959_v22  ;;  %v6038_v47 = vsub.f32 0.0, %v6022_v31  ;;  %v6053_v37 = vadd.f32 1.0, %v6045_v33 }
0x1af0   : > { %v5944_v8 = vmul.f32 %v5936_v40, %v5889_v13  ;;  %v5975_v61 = vmul.f32 %v5967_v32, %v5874_v21  ;;  %v6061_v44 = vmul.f32 %v6053_v37, %v5749_v58  ;;  %v6046_v10 = vsel %vm6030_vm4, %v6022_v31, %v6038_v47 }
0x1af1   : > { %v6054_v57 = vadd.f32 1.0, %v6046_v10  ;;  %v7223_v9 = vpop.eup %7222  ;;  %v5750_v21 = vmul.f32 0.5, %v9559_v42  ;;  %v6841_v10 = vld [vmem:[%s9781_s13 + $0x1] ss:$0 sm:$0xff] }
0x1af2   : > { %v5952_v55 = vadd.f32 -0.28449672, %v5944_v8  ;;  %v6015_v3 = vmul.f32 %v7221_v63, %v5975_v61 }
0x1af3   : > { %6113 = vmatmul.f32.gmra.mxu3 %v6061_v44  ;;  %v6062_v53 = vmul.f32 %v6054_v57, %v5750_v21 }
0x1af4   : > { %v5960_v49 = vmul.f32 %v5952_v55, %v5889_v13  ;;  %v6023_v35 = vsub.f32 1.0, %v6015_v3 }
0x1af6   : > { %v5968_v36 = vadd.f32 0.2548296, %v5960_v49  ;;  %v6039_v38 = vsub.f32 0.0, %v6023_v35 }
0x1af8   : > { %v5976_v34 = vmul.f32 %v5968_v36, %v5889_v13  ;;  %v6047_v28 = vsel %vm6031_vm5, %v6023_v35, %v6039_v38 }
0x1af9   : > { %v6055_v0 = vadd.f32 1.0, %v6047_v28 }
0x1afa   : > { %v6016_v56 = vmul.f32 %v7223_v9, %v5976_v34 }
0x1afb   : > { %6116 = vmatmul.f32.gmra.mxu3 %v6062_v53  ;;  %v6063_v11 = vmul.f32 %v6055_v0, %v5751_v17 }
0x1afc   : > { %v6024_v43 = vsub.f32 1.0, %v6016_v56 }
0x1afe   : > { %v6040_v30 = vsub.f32 0.0, %v6024_v43 }
0x1b00   : > { %v6048_v18 = vsel %vm6032_vm6, %v6024_v43, %v6040_v30 }
0x1b01   : > { %v6056_v13 = vadd.f32 1.0, %v6048_v18 }
0x1b03   : > { %6119 = vmatmul.f32.gmra.mxu3 %v6063_v11  ;;  %v6064_v42 = vmul.f32 %v6056_v13, %v5752_v27 }
0x1b0b   : > { %6122 = vmatmul.f32.gmra.mxu3 %v6064_v42 }
0x1b1f   : > { %v5743_v4 = vpop.f32.mrf.mxu2 }
0x1b20   : > { %v5744_v45 = vadd.f32 %v9466_v20, %v5743_v4 }
0x1b22   : > { %v5761_v24 = vmul.f32 0.70710677, %v5744_v45  ;;  %v5753_v3 = vmul.f32 0.5, %v5744_v45 }
0x1b24   : > { %v5769_v25 = vand.u32 2147483647, %v5761_v24  ;;  %vm6033_vm9 = vcmp.ge.f32.partialorder %v5761_v24, 0.0 }
0x1b26   : > { %v5777_v52 = vmul.f32 0.3275911, %v5769_v25  ;;  %v5985_v54 = vsub.f32 0.0, %v5769_v25 }
0x1b28   : > { %v5785_v62 = vadd.f32 1.0, %v5777_v52  ;;  %v5993_v22 = vmul.f32 %v5985_v54, %v5769_v25 }
0x1b2a   : > { %7224 = vrcp.f32 %v5785_v62  ;;  %v5902_v50 = vand.u32 2147483648, %v5785_v62  ;;  %v5900_v2 = vand.u32 2147483647, %v5785_v62  ;;  %vm5896_vm11 = vweird.f32 %v5785_v62 }
0x1b2b   : > { %v6008_v29 = vmul.f32 1.442695, %v5993_v22 }
0x1b2c   : > { %v5903_v5 = vor.u32 1.1754944e-38, %v5902_v50  ;;  %vm5901_vm8 = vcmp.eq.f32.partialorder %v5900_v2, 8.507059e+37 }
0x1b2d   : > { %7226 = vpow2.f32 %v6008_v29 }
0x1b30   : > { %v7225_v60 = vpop.eup %7224 }
0x1b31   : > { %v5892_v16 = vmul.f32 %v7225_v60, %v5785_v62  ;;  %vm5897_vm7 = vweird.f32 %v7225_v60 }
0x1b32   : > { %vm5898_vm12 = vmor %vm5896_vm11, %vm5897_vm7 }
0x1b33   : > { %v5893_v39 = vsub.f32 1.0, %v5892_v16  ;;  %v7227_v61 = vpop.eup %7226 }
0x1b35   : > { %v5894_v15 = vmul.f32 %v7225_v60, %v5893_v39 }
0x1b37   : > { %v5895_v19 = vadd.f32 %v7225_v60, %v5894_v15 }
0x1b39   : > { %v5899_v14 = vsel %vm5898_vm12, %v7225_v60, %v5895_v19 }
0x1b3a   : > { %v5904_v20 = vsel %vm5901_vm8, %v5903_v5, %v5899_v14 }
0x1b3b   : > { %v5913_v26 = vmul.f32 1.0614054, %v5904_v20 }
0x1b3d   : > { %v5921_v1 = vadd.f32 -1.4531521, %v5913_v26 }
0x1b3f   : > { %v5929_v40 = vmul.f32 %v5921_v1, %v5904_v20 }
0x1b41   : > { %v5937_v51 = vadd.f32 1.4214138, %v5929_v40 }
0x1b43   : > { %v5945_v31 = vmul.f32 %v5937_v51, %v5904_v20 }
0x1b45   : > { %v5953_v32 = vadd.f32 -0.28449672, %v5945_v31 }
0x1b47   : > { %v5961_v8 = vmul.f32 %v5953_v32, %v5904_v20 }
0x1b49   : > { %v5969_v33 = vadd.f32 0.2548296, %v5961_v8 }
0x1b4b   : > { %v5977_v47 = vmul.f32 %v5969_v33, %v5904_v20 }
0x1b4d   : > { %v6017_v63 = vmul.f32 %v7227_v61, %v5977_v47 }
0x1b4f   : > { %v6025_v58 = vsub.f32 1.0, %v6017_v63 }
0x1b51   : > { %v6041_v37 = vsub.f32 0.0, %v6025_v58 }
0x1b53   : > { %v6049_v55 = vsel %vm6033_vm9, %v6025_v58, %v6041_v37 }
0x1b54   : > { %v6057_v44 = vadd.f32 1.0, %v6049_v55 }
0x1b56   : > { %v6065_v49 = vmul.f32 %v6057_v44, %v5753_v3 }
0x1b58   : > { %v6105_v35 = vpop.f32.mrf.mxu3  ;;  %6125 = vmatmul.f32.gmra.mxu3 %v6065_v49 }
0x1b59   : > { %v6106_v36 = vadd.f32 %v6841_v10, %v6105_v35 }
0x1b5b   : > { %v6129_v57 = vadd.f32 %v6106_v36, %v9289_v12 }
0x1b5d   : > { %6137 = vst.msk [vmem:[%s501_s25] sm:$0xff] %vm512_vm0, %v6129_v57 }
0x1b66   : > { %v6108_v38 = vpop.f32.mrf.mxu3 }
0x1b67   : > { %v6109_v34 = vadd.f32 %v6841_v10, %v6108_v38 }
0x1b69   : > { %v6130_v9 = vadd.f32 %v6109_v34, %v9297_v23 }
0x1b6b   : > { %6138 = vst.msk [vmem:[%s501_s25 + $0x8] sm:$0xff] %vm512_vm0, %v6130_v9 }
0x1b6e   : > { %v6111_v21 = vpop.f32.mrf.mxu3 }
0x1b6f   : > { %v6112_v56 = vadd.f32 %v6841_v10, %v6111_v21 }
0x1b71   : > { %v6131_v53 = vadd.f32 %v6112_v56, %v9305_v59 }
0x1b73   : > { %6139 = vst.msk [vmem:[%s501_s25 + $0x10] sm:$0xff] %vm512_vm0, %v6131_v53 }
0x1b76   : > { %v6114_v28 = vpop.f32.mrf.mxu3 }
0x1b77   : > { %v6115_v43 = vadd.f32 %v6841_v10, %v6114_v28 }
0x1b79   : > { %v6132_v0 = vadd.f32 %v6115_v43, %v9313_v6 }
0x1b7b   : > { %6140 = vst.msk [vmem:[%s501_s25 + $0x18] sm:$0xff] %vm512_vm0, %v6132_v0 }
0x1b7e   : > { %v6117_v12 = vpop.f32.mrf.mxu3 }
0x1b7f   : > { %v6118_v30 = vadd.f32 %v6841_v10, %v6117_v12 }
0x1b81   : > { %v6133_v17 = vadd.f32 %v6118_v30, %v9321_v46 }
0x1b83   : > { %6141 = vst.msk [vmem:[%s501_s25 + $0x20] sm:$0xff] %vm512_vm0, %v6133_v17 }
0x1b86   : > { %v6120_v23 = vpop.f32.mrf.mxu3 }
0x1b87   : > { %v6121_v11 = vadd.f32 %v6841_v10, %v6120_v23 }
0x1b89   : > { %v6134_v18 = vadd.f32 %v6121_v11, %v9329_v48 }
0x1b8b   : > { %6142 = vst.msk [vmem:[%s501_s25 + $0x28] sm:$0xff] %vm512_vm0, %v6134_v18 }
0x1b8e   : > { %v6123_v59 = vpop.f32.mrf.mxu3 }
0x1b8f   : > { %v6124_v13 = vadd.f32 %v6841_v10, %v6123_v59 }
0x1b91   : > { %v6135_v27 = vadd.f32 %v6124_v13, %v9337_v7 }
0x1b93   : > { %6143 = vst.msk [vmem:[%s501_s25 + $0x30] sm:$0xff] %vm512_vm0, %v6135_v27 }
0x1bdb   : > { %v6126_v6 = vpop.f32.mrf.mxu3 }
0x1bdc   : > { %v6127_v42 = vadd.f32 %v6841_v10, %v6126_v6 }
0x1bde   : > { %v6136_v4 = vadd.f32 %v6127_v42, %v9343_v41 }
0x1be0   : > { %6144 = vst.msk [vmem:[%s501_s25 + $0x38] sm:$0xff] %vm512_vm0, %v6136_v4 }
0x1be1 PF: > { %s26_s29 = sadd.s32 1, %s7310_s29  }
0x1be2   : > { %p23_p7 = scmp.ge.s32.totalorder %s26_s29, 4  }
0x1be4   :  { %25 = sbr.rel (!%p23_p7) target bundleno = 2 (0x2), region = 184 }
0x1be9   :  { %6166 = vsyncpa [#allocation3], 1 }
0x1bea   :  { %6168 = vsyncpa [#allocation3 + $0x1], 1 }
0x1beb   :  { %6169 = vsyncpa [#allocation5], 1 }

</bundles_post_ra>
